<compile_context>
chip_gen: v7x
topology: tpu7x:2x2x1
jax: 0.10.0
libtpu: 0.0.40
codegen_flags: <defaults>
</compile_context>

<pallas_src>
import functools

import numpy as np
import jax
import jax.numpy as jnp
from jax import lax
from jax.experimental import pallas as pl
from jax.experimental.pallas import tpu as pltpu


def _column_masks(H, W, K, dilations):
    """(len(dilations)*K, H*W) f32 {0,1}: valid-column mask per (branch, tap col j)."""
    half = K // 2
    col = np.arange(H * W) % W
    m = np.zeros((len(dilations) * K, H * W), dtype=np.float32)
    for b, d in enumerate(dilations):
        for j in range(K):
            oj = (j - half) * d
            m[b * K + j] = ((col + oj >= 0) & (col + oj < W)).astype(np.float32)
    return jnp.asarray(m)


def _fused_kernel(w_ref, b_ref, mask_ref,
                  x1_ref, x2_ref, x3_ref, x4_ref, o_ref,
                  *, N, H, W, K, dilations):
    # w_ref:    VMEM f32[2N, 4*K*K]  weight table; rows 0..N-1 = avg-channel
    #                                 weights, rows N..2N-1 = max-channel weights
    # b_ref:    SMEM f32[4]          per-branch conv bias
    # mask_ref: VMEM f32[4*K, H*W]   precomputed column-validity masks (0/1)
    # x*_ref:   VMEM f32[N, C, H*W]  full batch, lane-dense spatial layout
    # o_ref:    VMEM f32[2, N, C, H*W]  branch-pair block of the stacked output
    HW = H * W
    half = K // 2
    R = 2 * N
    K2 = K * K
    x_refs = (x1_ref, x2_ref, x3_ref, x4_ref)

    def do_branch(b, p):
        d = dilations[b]
        xref = x_refs[b]

        # Pack channel-mean / channel-max of every batch element into one
        # (2N, HW) slab (rows match w_ref's row layout).
        rows = [jnp.mean(xref[n].astype(jnp.float32), axis=0, keepdims=True)
                for n in range(N)]
        rows += [jnp.max(xref[n].astype(jnp.float32), axis=0, keepdims=True)
                 for n in range(N)]
        maps = jnp.concatenate(rows, axis=0)                       # (2N, HW)

        # Zero-extend along lanes so every (row, col) tap offset becomes a
        # plain static lane-offset slice; row-out-of-range taps read zeros.
        S = half * d * (W + 1)                                     # max |row_off*W + col_off|
        zext = jnp.zeros((R, S), dtype=jnp.float32)
        ext = jnp.concatenate([zext, maps, zext], axis=1)          # (2N, HW + 2S)

        acc = jnp.zeros((R, HW), dtype=jnp.float32)
        for j in range(K):                                         # statically unrolled
            oj = (j - half) * d
            pj = jnp.zeros((R, HW), dtype=jnp.float32)
            for i in range(K):
                st = S + (i - half) * d * W + oj                   # static slice start
                t = b * K2 + i * K + j
                wcol = w_ref[:, t:t + 1]                           # (2N, 1) weight column
                pj = pj + wcol * ext[:, st:st + HW]                # packed broadcast MAC
            # Column-validity mask depends only on (b, j): one masked add per j.
            cmask = mask_ref[b * K + j:b * K + j + 1, :]           # (1, HW)
            acc = acc + cmask * pj

        bias = b_ref[b]
        for n in range(N):
            logit = acc[n:n + 1, :] + acc[N + n:N + n + 1, :] + bias   # (1, HW)
            att = jax.nn.sigmoid(logit)
            xn = xref[n].astype(jnp.float32)                       # (C, HW)
            o_ref[p, n] = (att * xn).astype(o_ref.dtype)

    g = pl.program_id(0)
    for pair in range(2):                                          # 2 branches / step
        @pl.when(g == pair)
        def _(pair=pair):
            do_branch(2 * pair + 0, 0)
            do_branch(2 * pair + 1, 1)


def gci_spatial_attention(xs, weights, biases, *, kernel_size=7):
    """xs / weights / biases: length-4 lists. Mirrors GCI_SpatialAttention.forward.

    Implements the module's "same" dilated padding, pad_b = (K//2) * dilation_b,
    which equals the hard-coded Conv2d paddings (3, 6, 9, 12) for kernel_size=7.
    """
    dilations = (1, 2, 3, 4)
    K = kernel_size
    half = K // 2
    nb = len(dilations)
    K2 = K * K
    N, C, H, W = xs[0].shape
    HW = H * W

    # Zero-extension trick guard: a row-out-of-range tap must land in the zero
    # region, which requires the per-tap column offset |oj| < W.
    assert half * max(dilations) < W, "W too small for flat zero-extension trick"

    dtype = xs[0].dtype
    # Lane-dense layout: fold (H, W) -> H*W on the minor axis (metadata-only
    # reshape of contiguous NCHW). HW = 256 here -> multiple of 128 lanes.
    xs_flat = [x.reshape(N, C, HW) for x in xs]

    # VMEM weight table (2N, nb*K*K): rows 0..N-1 repeat the avg-channel
    # weights, rows N..2N-1 repeat the max-channel weights (matches slab rows).
    w_flat = jnp.stack([w.astype(jnp.float32).reshape(2, K2) for w in weights],
                       axis=1).reshape(2, nb * K2)                 # [avg; max]
    w_tab = jnp.concatenate([w_flat[0:1]] * N + [w_flat[1:2]] * N, axis=0)
    b_all = jnp.concatenate([b.reshape(-1) for b in biases]).astype(jnp.float32)
    masks = _column_masks(H, W, K, dilations)                      # (nb*K, HW)

    kernel = functools.partial(_fused_kernel, N=N, H=H, W=W, K=K,
                               dilations=dilations)

    # Inputs are small enough to stay fully resident (constant block index ->
    # loaded once per core, no re-DMA across grid steps).
    x_spec = pl.BlockSpec((N, C, HW), lambda g: (0, 0, 0))
    # TODO(synk): for production C*H*W, tile H with a (K//2)*dilation halo (or
    # tile C with running sum/max scratch), sizing double-buffered blocks to
    # ~1-2 MiB and staying under ~32 MiB scoped VMEM on v7x (64 MiB physical).
    out = pl.pallas_call(
        kernel,
        out_shape=jax.ShapeDtypeStruct((nb, N, C, HW), dtype),
        grid_spec=pltpu.PrefetchScalarGridSpec(
            num_scalar_prefetch=0,
            grid=(2,),                                             # branch pairs
            in_specs=[
                pl.BlockSpec((2 * N, nb * K2), lambda g: (0, 0)),      # weights (VMEM)
                pl.BlockSpec(memory_space=pltpu.MemorySpace.SMEM),     # biases
                pl.BlockSpec((nb * K, HW), lambda g: (0, 0)),          # column masks
                x_spec, x_spec, x_spec, x_spec,
            ],
            out_specs=pl.BlockSpec((2, N, C, HW), lambda g: (g, 0, 0, 0)),
        ),
        compiler_params=pltpu.CompilerParams(
            dimension_semantics=("parallel",),
            vmem_limit_bytes=32 * 1024 * 1024,
        ),
    )(w_tab, b_all, masks, *xs_flat)
    return tuple(out[i].reshape(N, C, H, W) for i in range(nb))


def _reference_branch(x, weight, bias, dilation, padding):
    avg = jnp.mean(x, axis=1, keepdims=True)
    mx = jnp.max(x, axis=1, keepdims=True)
    xc = jnp.concatenate([avg, mx], axis=1)
    conv = lax.conv_general_dilated(
        xc, weight,
        window_strides=(1, 1),
        padding=((padding, padding), (padding, padding)),
        rhs_dilation=(dilation, dilation),
        dimension_numbers=("NCHW", "OIHW", "NCHW"),
        precision=lax.Precision.HIGHEST,
    ) + bias.reshape(1, 1, 1, 1)
    return jax.nn.sigmoid(conv) * x


if __name__ == "__main__":
    key = jax.random.PRNGKey(0)
    N, C, H, W = 2, 4, 16, 16
    K = 7
    fan_in = 2 * K * K
    bound = 1.0 / (fan_in ** 0.5)

    keys = jax.random.split(key, 12)
    xs = [jax.random.normal(keys[i], (N, C, H, W), dtype=jnp.float32)
          for i in range(4)]
    # Deterministic synthetic parameters (PyTorch-style uniform(-bound, bound)).
    weights = [jax.random.uniform(keys[4 + i], (1, 2, K, K), dtype=jnp.float32,
                                  minval=-bound, maxval=bound)
               for i in range(4)]
    biases = [jax.random.uniform(keys[8 + i], (1,), dtype=jnp.float32,
                                 minval=-bound, maxval=bound)
              for i in range(4)]

    outs = gci_spatial_attention(xs, weights, biases, kernel_size=K)
    outs = jax.block_until_ready(outs)

    # Correctness check against a pure-JAX reference of the PyTorch forward.
    dilations = (1, 2, 3, 4)
    paddings = (3, 6, 9, 12)
    for i in range(4):
        ref = _reference_branch(xs[i], weights[i], biases[i],
                                dilations[i], paddings[i])
        assert jnp.allclose(outs[i], ref, atol=1e-4, rtol=1e-4), f"branch {i} mismatch"

    print("KERNEL_OK")
</pallas_src>

<mosaic_0001>
module attributes {stable_mosaic.version = 11 : i64} {
  func.func @_fused_kernel(%arg0: i32, %arg1: memref<4x196xf32, #tpu.memory_space<vmem>>, %arg2: memref<4xf32, #tpu.memory_space<smem>>, %arg3: memref<28x256xf32, #tpu.memory_space<vmem>>, %arg4: memref<2x4x256xf32, #tpu.memory_space<vmem>>, %arg5: memref<2x4x256xf32, #tpu.memory_space<vmem>>, %arg6: memref<2x4x256xf32, #tpu.memory_space<vmem>>, %arg7: memref<2x4x256xf32, #tpu.memory_space<vmem>>, %arg8: memref<2x2x4x256xf32, #tpu.memory_space<vmem>>) attributes {dimension_semantics = [#tpu.dimension_semantics<parallel>], iteration_bounds = array<i64: 2>, scalar_prefetch = 0 : i64, scratch_operands = 0 : i64, tpu.core_type = #tpu.core_type<tc>, window_params = [{pipeline_mode = #tpu.pipeline_mode<synchronous>, transform_indices = @transform_0, window_bounds = array<i64: 4, 196>}, {transform_indices = @transform_1, window_bounds = array<i64: 4>}, {pipeline_mode = #tpu.pipeline_mode<synchronous>, transform_indices = @transform_2, window_bounds = array<i64: 28, 256>}, {pipeline_mode = #tpu.pipeline_mode<synchronous>, transform_indices = @transform_3, window_bounds = array<i64: 2, 4, 256>}, {pipeline_mode = #tpu.pipeline_mode<synchronous>, transform_indices = @transform_4, window_bounds = array<i64: 2, 4, 256>}, {pipeline_mode = #tpu.pipeline_mode<synchronous>, transform_indices = @transform_5, window_bounds = array<i64: 2, 4, 256>}, {pipeline_mode = #tpu.pipeline_mode<synchronous>, transform_indices = @transform_6, window_bounds = array<i64: 2, 4, 256>}, {transform_indices = @transform_7, window_bounds = array<i64: 2, 2, 4, 256>}]} {
    %c0_i32 = arith.constant 0 : i32
    %0 = arith.cmpi eq, %arg0, %c0_i32 : i32
    %1 = arith.extui %0 : i1 to i32
    %c0_i32_0 = arith.constant 0 : i32
    %2 = arith.cmpi ne, %1, %c0_i32_0 : i32
    scf.if %2 {
      %c0 = arith.constant 0 : index
      %c0_2 = arith.constant 0 : index
      %c0_3 = arith.constant 0 : index
      %6 = vector.load %arg4[%c0, %c0_2, %c0_3] : memref<2x4x256xf32, #tpu.memory_space<vmem>>, vector<1x4x256xf32>
      %7 = vector.shape_cast %6 : vector<1x4x256xf32> to vector<4x256xf32>
      %cst = arith.constant dense<0.000000e+00> : vector<256xf32>
      %8 = vector.multi_reduction <add>, %7, %cst [0] : vector<4x256xf32> to vector<256xf32>
      %9 = vector.shape_cast %8 : vector<256xf32> to vector<1x256xf32>
      %cst_4 = arith.constant 4.000000e+00 : f32
      %10 = vector.broadcast %cst_4 : f32 to vector<1x256xf32>
      %11 = arith.divf %9, %10 : vector<1x256xf32>
      %c1 = arith.constant 1 : index
      %c0_5 = arith.constant 0 : index
      %c0_6 = arith.constant 0 : index
      %12 = vector.load %arg4[%c1, %c0_5, %c0_6] : memref<2x4x256xf32, #tpu.memory_space<vmem>>, vector<1x4x256xf32>
      %13 = vector.shape_cast %12 : vector<1x4x256xf32> to vector<4x256xf32>
      %cst_7 = arith.constant dense<0.000000e+00> : vector<256xf32>
      %14 = vector.multi_reduction <add>, %13, %cst_7 [0] : vector<4x256xf32> to vector<256xf32>
      %15 = vector.shape_cast %14 : vector<256xf32> to vector<1x256xf32>
      %cst_8 = arith.constant 4.000000e+00 : f32
      %16 = vector.broadcast %cst_8 : f32 to vector<1x256xf32>
      %17 = arith.divf %15, %16 : vector<1x256xf32>
      %c0_9 = arith.constant 0 : index
      %c0_10 = arith.constant 0 : index
      %c0_11 = arith.constant 0 : index
      %18 = vector.load %arg4[%c0_9, %c0_10, %c0_11] : memref<2x4x256xf32, #tpu.memory_space<vmem>>, vector<1x4x256xf32>
      %19 = vector.shape_cast %18 : vector<1x4x256xf32> to vector<4x256xf32>
      %cst_12 = arith.constant dense<0xFF800000> : vector<256xf32>
      %20 = vector.multi_reduction <maximumf>, %19, %cst_12 [0] : vector<4x256xf32> to vector<256xf32>
      %21 = vector.shape_cast %20 : vector<256xf32> to vector<1x256xf32>
      %c1_13 = arith.constant 1 : index
      %c0_14 = arith.constant 0 : index
      %c0_15 = arith.constant 0 : index
      %22 = vector.load %arg4[%c1_13, %c0_14, %c0_15] : memref<2x4x256xf32, #tpu.memory_space<vmem>>, vector<1x4x256xf32>
      %23 = vector.shape_cast %22 : vector<1x4x256xf32> to vector<4x256xf32>
      %cst_16 = arith.constant dense<0xFF800000> : vector<256xf32>
      %24 = vector.multi_reduction <maximumf>, %23, %cst_16 [0] : vector<4x256xf32> to vector<256xf32>
      %25 = vector.shape_cast %24 : vector<256xf32> to vector<1x256xf32>
      %26 = tpu.concatenate %11, %17, %21, %25 in 0 : vector<1x256xf32>, vector<1x256xf32>, vector<1x256xf32>, vector<1x256xf32> -> vector<4x256xf32>
      %cst_17 = arith.constant 0.000000e+00 : f32
      %27 = vector.broadcast %cst_17 : f32 to vector<4x51xf32>
      %28 = tpu.concatenate %27, %26, %27 in 1 : vector<4x51xf32>, vector<4x256xf32>, vector<4x51xf32> -> vector<4x358xf32>
      %cst_18 = arith.constant 0.000000e+00 : f32
      %29 = vector.broadcast %cst_18 : f32 to vector<4x256xf32>
      %cst_19 = arith.constant 0.000000e+00 : f32
      %30 = vector.broadcast %cst_19 : f32 to vector<4x256xf32>
      %c0_20 = arith.constant 0 : index
      %c0_21 = arith.constant 0 : index
      %31 = vector.load %arg1[%c0_20, %c0_21] : memref<4x196xf32, #tpu.memory_space<vmem>>, vector<4x1xf32>
      %32 = vector.extract_strided_slice %28 {offsets = [0, 0], sizes = [4, 256], strides = [1, 1]} : vector<4x358xf32> to vector<4x256xf32>
      %33 = vector.broadcast %31 : vector<4x1xf32> to vector<4x256xf32>
      %34 = arith.mulf %33, %32 : vector<4x256xf32>
      %35 = arith.addf %30, %34 : vector<4x256xf32>
      %c0_22 = arith.constant 0 : index
      %c7 = arith.constant 7 : index
      %36 = vector.load %arg1[%c0_22, %c7] : memref<4x196xf32, #tpu.memory_space<vmem>>, vector<4x1xf32>
      %37 = vector.extract_strided_slice %28 {offsets = [0, 16], sizes = [4, 256], strides = [1, 1]} : vector<4x358xf32> to vector<4x256xf32>
      %38 = vector.broadcast %36 : vector<4x1xf32> to vector<4x256xf32>
      %39 = arith.mulf %38, %37 : vector<4x256xf32>
      %40 = arith.addf %35, %39 : vector<4x256xf32>
      %c0_23 = arith.constant 0 : index
      %c14 = arith.constant 14 : index
      %41 = vector.load %arg1[%c0_23, %c14] : memref<4x196xf32, #tpu.memory_space<vmem>>, vector<4x1xf32>
      %42 = vector.extract_strided_slice %28 {offsets = [0, 32], sizes = [4, 256], strides = [1, 1]} : vector<4x358xf32> to vector<4x256xf32>
      %43 = vector.broadcast %41 : vector<4x1xf32> to vector<4x256xf32>
      %44 = arith.mulf %43, %42 : vector<4x256xf32>
      %45 = arith.addf %40, %44 : vector<4x256xf32>
      %c0_24 = arith.constant 0 : index
      %c21 = arith.constant 21 : index
      %46 = vector.load %arg1[%c0_24, %c21] : memref<4x196xf32, #tpu.memory_space<vmem>>, vector<4x1xf32>
      %47 = vector.extract_strided_slice %28 {offsets = [0, 48], sizes = [4, 256], strides = [1, 1]} : vector<4x358xf32> to vector<4x256xf32>
      %48 = vector.broadcast %46 : vector<4x1xf32> to vector<4x256xf32>
      %49 = arith.mulf %48, %47 : vector<4x256xf32>
      %50 = arith.addf %45, %49 : vector<4x256xf32>
      %c0_25 = arith.constant 0 : index
      %c28 = arith.constant 28 : index
      %51 = vector.load %arg1[%c0_25, %c28] : memref<4x196xf32, #tpu.memory_space<vmem>>, vector<4x1xf32>
      %52 = vector.extract_strided_slice %28 {offsets = [0, 64], sizes = [4, 256], strides = [1, 1]} : vector<4x358xf32> to vector<4x256xf32>
      %53 = vector.broadcast %51 : vector<4x1xf32> to vector<4x256xf32>
      %54 = arith.mulf %53, %52 : vector<4x256xf32>
      %55 = arith.addf %50, %54 : vector<4x256xf32>
      %c0_26 = arith.constant 0 : index
      %c35 = arith.constant 35 : index
      %56 = vector.load %arg1[%c0_26, %c35] : memref<4x196xf32, #tpu.memory_space<vmem>>, vector<4x1xf32>
      %57 = vector.extract_strided_slice %28 {offsets = [0, 80], sizes = [4, 256], strides = [1, 1]} : vector<4x358xf32> to vector<4x256xf32>
      %58 = vector.broadcast %56 : vector<4x1xf32> to vector<4x256xf32>
      %59 = arith.mulf %58, %57 : vector<4x256xf32>
      %60 = arith.addf %55, %59 : vector<4x256xf32>
      %c0_27 = arith.constant 0 : index
      %c42 = arith.constant 42 : index
      %61 = vector.load %arg1[%c0_27, %c42] : memref<4x196xf32, #tpu.memory_space<vmem>>, vector<4x1xf32>
      %62 = vector.extract_strided_slice %28 {offsets = [0, 96], sizes = [4, 256], strides = [1, 1]} : vector<4x358xf32> to vector<4x256xf32>
      %63 = vector.broadcast %61 : vector<4x1xf32> to vector<4x256xf32>
      %64 = arith.mulf %63, %62 : vector<4x256xf32>
      %65 = arith.addf %60, %64 : vector<4x256xf32>
      %c0_28 = arith.constant 0 : index
      %c0_29 = arith.constant 0 : index
      %66 = vector.load %arg3[%c0_28, %c0_29] : memref<28x256xf32, #tpu.memory_space<vmem>>, vector<1x256xf32>
      %67 = vector.broadcast %66 : vector<1x256xf32> to vector<4x256xf32>
      %68 = arith.mulf %67, %65 : vector<4x256xf32>
      %69 = arith.addf %29, %68 : vector<4x256xf32>
      %cst_30 = arith.constant 0.000000e+00 : f32
      %70 = vector.broadcast %cst_30 : f32 to vector<4x256xf32>
      %c0_31 = arith.constant 0 : index
      %c1_32 = arith.constant 1 : index
      %71 = vector.load %arg1[%c0_31, %c1_32] : memref<4x196xf32, #tpu.memory_space<vmem>>, vector<4x1xf32>
      %72 = vector.extract_strided_slice %28 {offsets = [0, 1], sizes = [4, 256], strides = [1, 1]} : vector<4x358xf32> to vector<4x256xf32>
      %73 = vector.broadcast %71 : vector<4x1xf32> to vector<4x256xf32>
      %74 = arith.mulf %73, %72 : vector<4x256xf32>
      %75 = arith.addf %70, %74 : vector<4x256xf32>
      %c0_33 = arith.constant 0 : index
      %c8 = arith.constant 8 : index
      %76 = vector.load %arg1[%c0_33, %c8] : memref<4x196xf32, #tpu.memory_space<vmem>>, vector<4x1xf32>
      %77 = vector.extract_strided_slice %28 {offsets = [0, 17], sizes = [4, 256], strides = [1, 1]} : vector<4x358xf32> to vector<4x256xf32>
      %78 = vector.broadcast %76 : vector<4x1xf32> to vector<4x256xf32>
      %79 = arith.mulf %78, %77 : vector<4x256xf32>
      %80 = arith.addf %75, %79 : vector<4x256xf32>
      %c0_34 = arith.constant 0 : index
      %c15 = arith.constant 15 : index
      %81 = vector.load %arg1[%c0_34, %c15] : memref<4x196xf32, #tpu.memory_space<vmem>>, vector<4x1xf32>
      %82 = vector.extract_strided_slice %28 {offsets = [0, 33], sizes = [4, 256], strides = [1, 1]} : vector<4x358xf32> to vector<4x256xf32>
      %83 = vector.broadcast %81 : vector<4x1xf32> to vector<4x256xf32>
      %84 = arith.mulf %83, %82 : vector<4x256xf32>
      %85 = arith.addf %80, %84 : vector<4x256xf32>
      %c0_35 = arith.constant 0 : index
      %c22 = arith.constant 22 : index
      %86 = vector.load %arg1[%c0_35, %c22] : memref<4x196xf32, #tpu.memory_space<vmem>>, vector<4x1xf32>
      %87 = vector.extract_strided_slice %28 {offsets = [0, 49], sizes = [4, 256], strides = [1, 1]} : vector<4x358xf32> to vector<4x256xf32>
      %88 = vector.broadcast %86 : vector<4x1xf32> to vector<4x256xf32>
      %89 = arith.mulf %88, %87 : vector<4x256xf32>
      %90 = arith.addf %85, %89 : vector<4x256xf32>
      %c0_36 = arith.constant 0 : index
      %c29 = arith.constant 29 : index
      %91 = vector.load %arg1[%c0_36, %c29] : memref<4x196xf32, #tpu.memory_space<vmem>>, vector<4x1xf32>
      %92 = vector.extract_strided_slice %28 {offsets = [0, 65], sizes = [4, 256], strides = [1, 1]} : vector<4x358xf32> to vector<4x256xf32>
      %93 = vector.broadcast %91 : vector<4x1xf32> to vector<4x256xf32>
      %94 = arith.mulf %93, %92 : vector<4x256xf32>
      %95 = arith.addf %90, %94 : vector<4x256xf32>
      %c0_37 = arith.constant 0 : index
      %c36 = arith.constant 36 : index
      %96 = vector.load %arg1[%c0_37, %c36] : memref<4x196xf32, #tpu.memory_space<vmem>>, vector<4x1xf32>
      %97 = vector.extract_strided_slice %28 {offsets = [0, 81], sizes = [4, 256], strides = [1, 1]} : vector<4x358xf32> to vector<4x256xf32>
      %98 = vector.broadcast %96 : vector<4x1xf32> to vector<4x256xf32>
      %99 = arith.mulf %98, %97 : vector<4x256xf32>
      %100 = arith.addf %95, %99 : vector<4x256xf32>
      %c0_38 = arith.constant 0 : index
      %c43 = arith.constant 43 : index
      %101 = vector.load %arg1[%c0_38, %c43] : memref<4x196xf32, #tpu.memory_space<vmem>>, vector<4x1xf32>
      %102 = vector.extract_strided_slice %28 {offsets = [0, 97], sizes = [4, 256], strides = [1, 1]} : vector<4x358xf32> to vector<4x256xf32>
      %103 = vector.broadcast %101 : vector<4x1xf32> to vector<4x256xf32>
      %104 = arith.mulf %103, %102 : vector<4x256xf32>
      %105 = arith.addf %100, %104 : vector<4x256xf32>
      %c1_39 = arith.constant 1 : index
      %c0_40 = arith.constant 0 : index
      %106 = vector.load %arg3[%c1_39, %c0_40] : memref<28x256xf32, #tpu.memory_space<vmem>>, vector<1x256xf32>
      %107 = vector.broadcast %106 : vector<1x256xf32> to vector<4x256xf32>
      %108 = arith.mulf %107, %105 : vector<4x256xf32>
      %109 = arith.addf %69, %108 : vector<4x256xf32>
      %cst_41 = arith.constant 0.000000e+00 : f32
      %110 = vector.broadcast %cst_41 : f32 to vector<4x256xf32>
      %c0_42 = arith.constant 0 : index
      %c2 = arith.constant 2 : index
      %111 = vector.load %arg1[%c0_42, %c2] : memref<4x196xf32, #tpu.memory_space<vmem>>, vector<4x1xf32>
      %112 = vector.extract_strided_slice %28 {offsets = [0, 2], sizes = [4, 256], strides = [1, 1]} : vector<4x358xf32> to vector<4x256xf32>
      %113 = vector.broadcast %111 : vector<4x1xf32> to vector<4x256xf32>
      %114 = arith.mulf %113, %112 : vector<4x256xf32>
      %115 = arith.addf %110, %114 : vector<4x256xf32>
      %c0_43 = arith.constant 0 : index
      %c9 = arith.constant 9 : index
      %116 = vector.load %arg1[%c0_43, %c9] : memref<4x196xf32, #tpu.memory_space<vmem>>, vector<4x1xf32>
      %117 = vector.extract_strided_slice %28 {offsets = [0, 18], sizes = [4, 256], strides = [1, 1]} : vector<4x358xf32> to vector<4x256xf32>
      %118 = vector.broadcast %116 : vector<4x1xf32> to vector<4x256xf32>
      %119 = arith.mulf %118, %117 : vector<4x256xf32>
      %120 = arith.addf %115, %119 : vector<4x256xf32>
      %c0_44 = arith.constant 0 : index
      %c16 = arith.constant 16 : index
      %121 = vector.load %arg1[%c0_44, %c16] : memref<4x196xf32, #tpu.memory_space<vmem>>, vector<4x1xf32>
      %122 = vector.extract_strided_slice %28 {offsets = [0, 34], sizes = [4, 256], strides = [1, 1]} : vector<4x358xf32> to vector<4x256xf32>
      %123 = vector.broadcast %121 : vector<4x1xf32> to vector<4x256xf32>
      %124 = arith.mulf %123, %122 : vector<4x256xf32>
      %125 = arith.addf %120, %124 : vector<4x256xf32>
      %c0_45 = arith.constant 0 : index
      %c23 = arith.constant 23 : index
      %126 = vector.load %arg1[%c0_45, %c23] : memref<4x196xf32, #tpu.memory_space<vmem>>, vector<4x1xf32>
      %127 = vector.extract_strided_slice %28 {offsets = [0, 50], sizes = [4, 256], strides = [1, 1]} : vector<4x358xf32> to vector<4x256xf32>
      %128 = vector.broadcast %126 : vector<4x1xf32> to vector<4x256xf32>
      %129 = arith.mulf %128, %127 : vector<4x256xf32>
      %130 = arith.addf %125, %129 : vector<4x256xf32>
      %c0_46 = arith.constant 0 : index
      %c30 = arith.constant 30 : index
      %131 = vector.load %arg1[%c0_46, %c30] : memref<4x196xf32, #tpu.memory_space<vmem>>, vector<4x1xf32>
      %132 = vector.extract_strided_slice %28 {offsets = [0, 66], sizes = [4, 256], strides = [1, 1]} : vector<4x358xf32> to vector<4x256xf32>
      %133 = vector.broadcast %131 : vector<4x1xf32> to vector<4x256xf32>
      %134 = arith.mulf %133, %132 : vector<4x256xf32>
      %135 = arith.addf %130, %134 : vector<4x256xf32>
      %c0_47 = arith.constant 0 : index
      %c37 = arith.constant 37 : index
      %136 = vector.load %arg1[%c0_47, %c37] : memref<4x196xf32, #tpu.memory_space<vmem>>, vector<4x1xf32>
      %137 = vector.extract_strided_slice %28 {offsets = [0, 82], sizes = [4, 256], strides = [1, 1]} : vector<4x358xf32> to vector<4x256xf32>
      %138 = vector.broadcast %136 : vector<4x1xf32> to vector<4x256xf32>
      %139 = arith.mulf %138, %137 : vector<4x256xf32>
      %140 = arith.addf %135, %139 : vector<4x256xf32>
      %c0_48 = arith.constant 0 : index
      %c44 = arith.constant 44 : index
      %141 = vector.load %arg1[%c0_48, %c44] : memref<4x196xf32, #tpu.memory_space<vmem>>, vector<4x1xf32>
      %142 = vector.extract_strided_slice %28 {offsets = [0, 98], sizes = [4, 256], strides = [1, 1]} : vector<4x358xf32> to vector<4x256xf32>
      %143 = vector.broadcast %141 : vector<4x1xf32> to vector<4x256xf32>
      %144 = arith.mulf %143, %142 : vector<4x256xf32>
      %145 = arith.addf %140, %144 : vector<4x256xf32>
      %c2_49 = arith.constant 2 : index
      %c0_50 = arith.constant 0 : index
      %146 = vector.load %arg3[%c2_49, %c0_50] : memref<28x256xf32, #tpu.memory_space<vmem>>, vector<1x256xf32>
      %147 = vector.broadcast %146 : vector<1x256xf32> to vector<4x256xf32>
      %148 = arith.mulf %147, %145 : vector<4x256xf32>
      %149 = arith.addf %109, %148 : vector<4x256xf32>
      %cst_51 = arith.constant 0.000000e+00 : f32
      %150 = vector.broadcast %cst_51 : f32 to vector<4x256xf32>
      %c0_52 = arith.constant 0 : index
      %c3 = arith.constant 3 : index
      %151 = vector.load %arg1[%c0_52, %c3] : memref<4x196xf32, #tpu.memory_space<vmem>>, vector<4x1xf32>
      %152 = vector.extract_strided_slice %28 {offsets = [0, 3], sizes = [4, 256], strides = [1, 1]} : vector<4x358xf32> to vector<4x256xf32>
      %153 = vector.broadcast %151 : vector<4x1xf32> to vector<4x256xf32>
      %154 = arith.mulf %153, %152 : vector<4x256xf32>
      %155 = arith.addf %150, %154 : vector<4x256xf32>
      %c0_53 = arith.constant 0 : index
      %c10 = arith.constant 10 : index
      %156 = vector.load %arg1[%c0_53, %c10] : memref<4x196xf32, #tpu.memory_space<vmem>>, vector<4x1xf32>
      %157 = vector.extract_strided_slice %28 {offsets = [0, 19], sizes = [4, 256], strides = [1, 1]} : vector<4x358xf32> to vector<4x256xf32>
      %158 = vector.broadcast %156 : vector<4x1xf32> to vector<4x256xf32>
      %159 = arith.mulf %158, %157 : vector<4x256xf32>
      %160 = arith.addf %155, %159 : vector<4x256xf32>
      %c0_54 = arith.constant 0 : index
      %c17 = arith.constant 17 : index
      %161 = vector.load %arg1[%c0_54, %c17] : memref<4x196xf32, #tpu.memory_space<vmem>>, vector<4x1xf32>
      %162 = vector.extract_strided_slice %28 {offsets = [0, 35], sizes = [4, 256], strides = [1, 1]} : vector<4x358xf32> to vector<4x256xf32>
      %163 = vector.broadcast %161 : vector<4x1xf32> to vector<4x256xf32>
      %164 = arith.mulf %163, %162 : vector<4x256xf32>
      %165 = arith.addf %160, %164 : vector<4x256xf32>
      %c0_55 = arith.constant 0 : index
      %c24 = arith.constant 24 : index
      %166 = vector.load %arg1[%c0_55, %c24] : memref<4x196xf32, #tpu.memory_space<vmem>>, vector<4x1xf32>
      %167 = vector.extract_strided_slice %28 {offsets = [0, 51], sizes = [4, 256], strides = [1, 1]} : vector<4x358xf32> to vector<4x256xf32>
      %168 = vector.broadcast %166 : vector<4x1xf32> to vector<4x256xf32>
      %169 = arith.mulf %168, %167 : vector<4x256xf32>
      %170 = arith.addf %165, %169 : vector<4x256xf32>
      %c0_56 = arith.constant 0 : index
      %c31 = arith.constant 31 : index
      %171 = vector.load %arg1[%c0_56, %c31] : memref<4x196xf32, #tpu.memory_space<vmem>>, vector<4x1xf32>
      %172 = vector.extract_strided_slice %28 {offsets = [0, 67], sizes = [4, 256], strides = [1, 1]} : vector<4x358xf32> to vector<4x256xf32>
      %173 = vector.broadcast %171 : vector<4x1xf32> to vector<4x256xf32>
      %174 = arith.mulf %173, %172 : vector<4x256xf32>
      %175 = arith.addf %170, %174 : vector<4x256xf32>
      %c0_57 = arith.constant 0 : index
      %c38 = arith.constant 38 : index
      %176 = vector.load %arg1[%c0_57, %c38] : memref<4x196xf32, #tpu.memory_space<vmem>>, vector<4x1xf32>
      %177 = vector.extract_strided_slice %28 {offsets = [0, 83], sizes = [4, 256], strides = [1, 1]} : vector<4x358xf32> to vector<4x256xf32>
      %178 = vector.broadcast %176 : vector<4x1xf32> to vector<4x256xf32>
      %179 = arith.mulf %178, %177 : vector<4x256xf32>
      %180 = arith.addf %175, %179 : vector<4x256xf32>
      %c0_58 = arith.constant 0 : index
      %c45 = arith.constant 45 : index
      %181 = vector.load %arg1[%c0_58, %c45] : memref<4x196xf32, #tpu.memory_space<vmem>>, vector<4x1xf32>
      %182 = vector.extract_strided_slice %28 {offsets = [0, 99], sizes = [4, 256], strides = [1, 1]} : vector<4x358xf32> to vector<4x256xf32>
      %183 = vector.broadcast %181 : vector<4x1xf32> to vector<4x256xf32>
      %184 = arith.mulf %183, %182 : vector<4x256xf32>
      %185 = arith.addf %180, %184 : vector<4x256xf32>
      %c3_59 = arith.constant 3 : index
      %c0_60 = arith.constant 0 : index
      %186 = vector.load %arg3[%c3_59, %c0_60] : memref<28x256xf32, #tpu.memory_space<vmem>>, vector<1x256xf32>
      %187 = vector.broadcast %186 : vector<1x256xf32> to vector<4x256xf32>
      %188 = arith.mulf %187, %185 : vector<4x256xf32>
      %189 = arith.addf %149, %188 : vector<4x256xf32>
      %cst_61 = arith.constant 0.000000e+00 : f32
      %190 = vector.broadcast %cst_61 : f32 to vector<4x256xf32>
      %c0_62 = arith.constant 0 : index
      %c4 = arith.constant 4 : index
      %191 = vector.load %arg1[%c0_62, %c4] : memref<4x196xf32, #tpu.memory_space<vmem>>, vector<4x1xf32>
      %192 = vector.extract_strided_slice %28 {offsets = [0, 4], sizes = [4, 256], strides = [1, 1]} : vector<4x358xf32> to vector<4x256xf32>
      %193 = vector.broadcast %191 : vector<4x1xf32> to vector<4x256xf32>
      %194 = arith.mulf %193, %192 : vector<4x256xf32>
      %195 = arith.addf %190, %194 : vector<4x256xf32>
      %c0_63 = arith.constant 0 : index
      %c11 = arith.constant 11 : index
      %196 = vector.load %arg1[%c0_63, %c11] : memref<4x196xf32, #tpu.memory_space<vmem>>, vector<4x1xf32>
      %197 = vector.extract_strided_slice %28 {offsets = [0, 20], sizes = [4, 256], strides = [1, 1]} : vector<4x358xf32> to vector<4x256xf32>
      %198 = vector.broadcast %196 : vector<4x1xf32> to vector<4x256xf32>
      %199 = arith.mulf %198, %197 : vector<4x256xf32>
      %200 = arith.addf %195, %199 : vector<4x256xf32>
      %c0_64 = arith.constant 0 : index
      %c18 = arith.constant 18 : index
      %201 = vector.load %arg1[%c0_64, %c18] : memref<4x196xf32, #tpu.memory_space<vmem>>, vector<4x1xf32>
      %202 = vector.extract_strided_slice %28 {offsets = [0, 36], sizes = [4, 256], strides = [1, 1]} : vector<4x358xf32> to vector<4x256xf32>
      %203 = vector.broadcast %201 : vector<4x1xf32> to vector<4x256xf32>
      %204 = arith.mulf %203, %202 : vector<4x256xf32>
      %205 = arith.addf %200, %204 : vector<4x256xf32>
      %c0_65 = arith.constant 0 : index
      %c25 = arith.constant 25 : index
      %206 = vector.load %arg1[%c0_65, %c25] : memref<4x196xf32, #tpu.memory_space<vmem>>, vector<4x1xf32>
      %207 = vector.extract_strided_slice %28 {offsets = [0, 52], sizes = [4, 256], strides = [1, 1]} : vector<4x358xf32> to vector<4x256xf32>
      %208 = vector.broadcast %206 : vector<4x1xf32> to vector<4x256xf32>
      %209 = arith.mulf %208, %207 : vector<4x256xf32>
      %210 = arith.addf %205, %209 : vector<4x256xf32>
      %c0_66 = arith.constant 0 : index
      %c32 = arith.constant 32 : index
      %211 = vector.load %arg1[%c0_66, %c32] : memref<4x196xf32, #tpu.memory_space<vmem>>, vector<4x1xf32>
      %212 = vector.extract_strided_slice %28 {offsets = [0, 68], sizes = [4, 256], strides = [1, 1]} : vector<4x358xf32> to vector<4x256xf32>
      %213 = vector.broadcast %211 : vector<4x1xf32> to vector<4x256xf32>
      %214 = arith.mulf %213, %212 : vector<4x256xf32>
      %215 = arith.addf %210, %214 : vector<4x256xf32>
      %c0_67 = arith.constant 0 : index
      %c39 = arith.constant 39 : index
      %216 = vector.load %arg1[%c0_67, %c39] : memref<4x196xf32, #tpu.memory_space<vmem>>, vector<4x1xf32>
      %217 = vector.extract_strided_slice %28 {offsets = [0, 84], sizes = [4, 256], strides = [1, 1]} : vector<4x358xf32> to vector<4x256xf32>
      %218 = vector.broadcast %216 : vector<4x1xf32> to vector<4x256xf32>
      %219 = arith.mulf %218, %217 : vector<4x256xf32>
      %220 = arith.addf %215, %219 : vector<4x256xf32>
      %c0_68 = arith.constant 0 : index
      %c46 = arith.constant 46 : index
      %221 = vector.load %arg1[%c0_68, %c46] : memref<4x196xf32, #tpu.memory_space<vmem>>, vector<4x1xf32>
      %222 = vector.extract_strided_slice %28 {offsets = [0, 100], sizes = [4, 256], strides = [1, 1]} : vector<4x358xf32> to vector<4x256xf32>
      %223 = vector.broadcast %221 : vector<4x1xf32> to vector<4x256xf32>
      %224 = arith.mulf %223, %222 : vector<4x256xf32>
      %225 = arith.addf %220, %224 : vector<4x256xf32>
      %c4_69 = arith.constant 4 : index
      %c0_70 = arith.constant 0 : index
      %226 = vector.load %arg3[%c4_69, %c0_70] : memref<28x256xf32, #tpu.memory_space<vmem>>, vector<1x256xf32>
      %227 = vector.broadcast %226 : vector<1x256xf32> to vector<4x256xf32>
      %228 = arith.mulf %227, %225 : vector<4x256xf32>
      %229 = arith.addf %189, %228 : vector<4x256xf32>
      %cst_71 = arith.constant 0.000000e+00 : f32
      %230 = vector.broadcast %cst_71 : f32 to vector<4x256xf32>
      %c0_72 = arith.constant 0 : index
      %c5 = arith.constant 5 : index
      %231 = vector.load %arg1[%c0_72, %c5] : memref<4x196xf32, #tpu.memory_space<vmem>>, vector<4x1xf32>
      %232 = vector.extract_strided_slice %28 {offsets = [0, 5], sizes = [4, 256], strides = [1, 1]} : vector<4x358xf32> to vector<4x256xf32>
      %233 = vector.broadcast %231 : vector<4x1xf32> to vector<4x256xf32>
      %234 = arith.mulf %233, %232 : vector<4x256xf32>
      %235 = arith.addf %230, %234 : vector<4x256xf32>
      %c0_73 = arith.constant 0 : index
      %c12 = arith.constant 12 : index
      %236 = vector.load %arg1[%c0_73, %c12] : memref<4x196xf32, #tpu.memory_space<vmem>>, vector<4x1xf32>
      %237 = vector.extract_strided_slice %28 {offsets = [0, 21], sizes = [4, 256], strides = [1, 1]} : vector<4x358xf32> to vector<4x256xf32>
      %238 = vector.broadcast %236 : vector<4x1xf32> to vector<4x256xf32>
      %239 = arith.mulf %238, %237 : vector<4x256xf32>
      %240 = arith.addf %235, %239 : vector<4x256xf32>
      %c0_74 = arith.constant 0 : index
      %c19 = arith.constant 19 : index
      %241 = vector.load %arg1[%c0_74, %c19] : memref<4x196xf32, #tpu.memory_space<vmem>>, vector<4x1xf32>
      %242 = vector.extract_strided_slice %28 {offsets = [0, 37], sizes = [4, 256], strides = [1, 1]} : vector<4x358xf32> to vector<4x256xf32>
      %243 = vector.broadcast %241 : vector<4x1xf32> to vector<4x256xf32>
      %244 = arith.mulf %243, %242 : vector<4x256xf32>
      %245 = arith.addf %240, %244 : vector<4x256xf32>
      %c0_75 = arith.constant 0 : index
      %c26 = arith.constant 26 : index
      %246 = vector.load %arg1[%c0_75, %c26] : memref<4x196xf32, #tpu.memory_space<vmem>>, vector<4x1xf32>
      %247 = vector.extract_strided_slice %28 {offsets = [0, 53], sizes = [4, 256], strides = [1, 1]} : vector<4x358xf32> to vector<4x256xf32>
      %248 = vector.broadcast %246 : vector<4x1xf32> to vector<4x256xf32>
      %249 = arith.mulf %248, %247 : vector<4x256xf32>
      %250 = arith.addf %245, %249 : vector<4x256xf32>
      %c0_76 = arith.constant 0 : index
      %c33 = arith.constant 33 : index
      %251 = vector.load %arg1[%c0_76, %c33] : memref<4x196xf32, #tpu.memory_space<vmem>>, vector<4x1xf32>
      %252 = vector.extract_strided_slice %28 {offsets = [0, 69], sizes = [4, 256], strides = [1, 1]} : vector<4x358xf32> to vector<4x256xf32>
      %253 = vector.broadcast %251 : vector<4x1xf32> to vector<4x256xf32>
      %254 = arith.mulf %253, %252 : vector<4x256xf32>
      %255 = arith.addf %250, %254 : vector<4x256xf32>
      %c0_77 = arith.constant 0 : index
      %c40 = arith.constant 40 : index
      %256 = vector.load %arg1[%c0_77, %c40] : memref<4x196xf32, #tpu.memory_space<vmem>>, vector<4x1xf32>
      %257 = vector.extract_strided_slice %28 {offsets = [0, 85], sizes = [4, 256], strides = [1, 1]} : vector<4x358xf32> to vector<4x256xf32>
      %258 = vector.broadcast %256 : vector<4x1xf32> to vector<4x256xf32>
      %259 = arith.mulf %258, %257 : vector<4x256xf32>
      %260 = arith.addf %255, %259 : vector<4x256xf32>
      %c0_78 = arith.constant 0 : index
      %c47 = arith.constant 47 : index
      %261 = vector.load %arg1[%c0_78, %c47] : memref<4x196xf32, #tpu.memory_space<vmem>>, vector<4x1xf32>
      %262 = vector.extract_strided_slice %28 {offsets = [0, 101], sizes = [4, 256], strides = [1, 1]} : vector<4x358xf32> to vector<4x256xf32>
      %263 = vector.broadcast %261 : vector<4x1xf32> to vector<4x256xf32>
      %264 = arith.mulf %263, %262 : vector<4x256xf32>
      %265 = arith.addf %260, %264 : vector<4x256xf32>
      %c5_79 = arith.constant 5 : index
      %c0_80 = arith.constant 0 : index
      %266 = vector.load %arg3[%c5_79, %c0_80] : memref<28x256xf32, #tpu.memory_space<vmem>>, vector<1x256xf32>
      %267 = vector.broadcast %266 : vector<1x256xf32> to vector<4x256xf32>
      %268 = arith.mulf %267, %265 : vector<4x256xf32>
      %269 = arith.addf %229, %268 : vector<4x256xf32>
      %cst_81 = arith.constant 0.000000e+00 : f32
      %270 = vector.broadcast %cst_81 : f32 to vector<4x256xf32>
      %c0_82 = arith.constant 0 : index
      %c6 = arith.constant 6 : index
      %271 = vector.load %arg1[%c0_82, %c6] : memref<4x196xf32, #tpu.memory_space<vmem>>, vector<4x1xf32>
      %272 = vector.extract_strided_slice %28 {offsets = [0, 6], sizes = [4, 256], strides = [1, 1]} : vector<4x358xf32> to vector<4x256xf32>
      %273 = vector.broadcast %271 : vector<4x1xf32> to vector<4x256xf32>
      %274 = arith.mulf %273, %272 : vector<4x256xf32>
      %275 = arith.addf %270, %274 : vector<4x256xf32>
      %c0_83 = arith.constant 0 : index
      %c13 = arith.constant 13 : index
      %276 = vector.load %arg1[%c0_83, %c13] : memref<4x196xf32, #tpu.memory_space<vmem>>, vector<4x1xf32>
      %277 = vector.extract_strided_slice %28 {offsets = [0, 22], sizes = [4, 256], strides = [1, 1]} : vector<4x358xf32> to vector<4x256xf32>
      %278 = vector.broadcast %276 : vector<4x1xf32> to vector<4x256xf32>
      %279 = arith.mulf %278, %277 : vector<4x256xf32>
      %280 = arith.addf %275, %279 : vector<4x256xf32>
      %c0_84 = arith.constant 0 : index
      %c20 = arith.constant 20 : index
      %281 = vector.load %arg1[%c0_84, %c20] : memref<4x196xf32, #tpu.memory_space<vmem>>, vector<4x1xf32>
      %282 = vector.extract_strided_slice %28 {offsets = [0, 38], sizes = [4, 256], strides = [1, 1]} : vector<4x358xf32> to vector<4x256xf32>
      %283 = vector.broadcast %281 : vector<4x1xf32> to vector<4x256xf32>
      %284 = arith.mulf %283, %282 : vector<4x256xf32>
      %285 = arith.addf %280, %284 : vector<4x256xf32>
      %c0_85 = arith.constant 0 : index
      %c27 = arith.constant 27 : index
      %286 = vector.load %arg1[%c0_85, %c27] : memref<4x196xf32, #tpu.memory_space<vmem>>, vector<4x1xf32>
      %287 = vector.extract_strided_slice %28 {offsets = [0, 54], sizes = [4, 256], strides = [1, 1]} : vector<4x358xf32> to vector<4x256xf32>
      %288 = vector.broadcast %286 : vector<4x1xf32> to vector<4x256xf32>
      %289 = arith.mulf %288, %287 : vector<4x256xf32>
      %290 = arith.addf %285, %289 : vector<4x256xf32>
      %c0_86 = arith.constant 0 : index
      %c34 = arith.constant 34 : index
      %291 = vector.load %arg1[%c0_86, %c34] : memref<4x196xf32, #tpu.memory_space<vmem>>, vector<4x1xf32>
      %292 = vector.extract_strided_slice %28 {offsets = [0, 70], sizes = [4, 256], strides = [1, 1]} : vector<4x358xf32> to vector<4x256xf32>
      %293 = vector.broadcast %291 : vector<4x1xf32> to vector<4x256xf32>
      %294 = arith.mulf %293, %292 : vector<4x256xf32>
      %295 = arith.addf %290, %294 : vector<4x256xf32>
      %c0_87 = arith.constant 0 : index
      %c41 = arith.constant 41 : index
      %296 = vector.load %arg1[%c0_87, %c41] : memref<4x196xf32, #tpu.memory_space<vmem>>, vector<4x1xf32>
      %297 = vector.extract_strided_slice %28 {offsets = [0, 86], sizes = [4, 256], strides = [1, 1]} : vector<4x358xf32> to vector<4x256xf32>
      %298 = vector.broadcast %296 : vector<4x1xf32> to vector<4x256xf32>
      %299 = arith.mulf %298, %297 : vector<4x256xf32>
      %300 = arith.addf %295, %299 : vector<4x256xf32>
      %c0_88 = arith.constant 0 : index
      %c48 = arith.constant 48 : index
      %301 = vector.load %arg1[%c0_88, %c48] : memref<4x196xf32, #tpu.memory_space<vmem>>, vector<4x1xf32>
      %302 = vector.extract_strided_slice %28 {offsets = [0, 102], sizes = [4, 256], strides = [1, 1]} : vector<4x358xf32> to vector<4x256xf32>
      %303 = vector.broadcast %301 : vector<4x1xf32> to vector<4x256xf32>
      %304 = arith.mulf %303, %302 : vector<4x256xf32>
      %305 = arith.addf %300, %304 : vector<4x256xf32>
      %c6_89 = arith.constant 6 : index
      %c0_90 = arith.constant 0 : index
      %306 = vector.load %arg3[%c6_89, %c0_90] : memref<28x256xf32, #tpu.memory_space<vmem>>, vector<1x256xf32>
      %307 = vector.broadcast %306 : vector<1x256xf32> to vector<4x256xf32>
      %308 = arith.mulf %307, %305 : vector<4x256xf32>
      %309 = arith.addf %269, %308 : vector<4x256xf32>
      %c0_91 = arith.constant 0 : index
      %310 = memref.load %arg2[%c0_91] : memref<4xf32, #tpu.memory_space<smem>>
      %311 = vector.extract_strided_slice %309 {offsets = [0, 0], sizes = [1, 256], strides = [1, 1]} : vector<4x256xf32> to vector<1x256xf32>
      %312 = vector.extract_strided_slice %309 {offsets = [2, 0], sizes = [1, 256], strides = [1, 1]} : vector<4x256xf32> to vector<1x256xf32>
      %313 = arith.addf %311, %312 : vector<1x256xf32>
      %314 = vector.broadcast %310 : f32 to vector<1x256xf32>
      %315 = arith.addf %313, %314 : vector<1x256xf32>
      %316 = arith.negf %315 : vector<1x256xf32>
      %317 = math.exp %316 : vector<1x256xf32>
      %cst_92 = arith.constant 1.000000e+00 : f32
      %318 = vector.broadcast %cst_92 : f32 to vector<1x256xf32>
      %319 = arith.addf %318, %317 : vector<1x256xf32>
      %320 = arith.divf %318, %319 : vector<1x256xf32>
      %c0_93 = arith.constant 0 : index
      %c0_94 = arith.constant 0 : index
      %c0_95 = arith.constant 0 : index
      %321 = vector.load %arg4[%c0_93, %c0_94, %c0_95] : memref<2x4x256xf32, #tpu.memory_space<vmem>>, vector<1x4x256xf32>
      %322 = vector.shape_cast %321 : vector<1x4x256xf32> to vector<4x256xf32>
      %323 = vector.broadcast %320 : vector<1x256xf32> to vector<4x256xf32>
      %324 = arith.mulf %323, %322 : vector<4x256xf32>
      %c0_96 = arith.constant 0 : index
      %c0_97 = arith.constant 0 : index
      %c0_98 = arith.constant 0 : index
      %c0_99 = arith.constant 0 : index
      %325 = vector.load %arg8[%c0_96, %c0_97, %c0_98, %c0_99] : memref<2x2x4x256xf32, #tpu.memory_space<vmem>>, vector<1x1x4x256xf32>
      %326 = vector.shape_cast %325 : vector<1x1x4x256xf32> to vector<4x256xf32>
      %327 = vector.shape_cast %324 : vector<4x256xf32> to vector<1x1x4x256xf32>
      tpu.vector_store %arg8[%c0_96, %c0_97, %c0_98, %c0_99], %327 {strides = array<i32>} : memref<2x2x4x256xf32, #tpu.memory_space<vmem>>, vector<1x1x4x256xf32>,
      %328 = vector.extract_strided_slice %309 {offsets = [1, 0], sizes = [1, 256], strides = [1, 1]} : vector<4x256xf32> to vector<1x256xf32>
      %329 = vector.extract_strided_slice %309 {offsets = [3, 0], sizes = [1, 256], strides = [1, 1]} : vector<4x256xf32> to vector<1x256xf32>
      %330 = arith.addf %328, %329 : vector<1x256xf32>
      %331 = vector.broadcast %310 : f32 to vector<1x256xf32>
      %332 = arith.addf %330, %331 : vector<1x256xf32>
      %333 = arith.negf %332 : vector<1x256xf32>
      %334 = math.exp %333 : vector<1x256xf32>
      %cst_100 = arith.constant 1.000000e+00 : f32
      %335 = vector.broadcast %cst_100 : f32 to vector<1x256xf32>
      %336 = arith.addf %335, %334 : vector<1x256xf32>
      %337 = arith.divf %335, %336 : vector<1x256xf32>
      %c1_101 = arith.constant 1 : index
      %c0_102 = arith.constant 0 : index
      %c0_103 = arith.constant 0 : index
      %338 = vector.load %arg4[%c1_101, %c0_102, %c0_103] : memref<2x4x256xf32, #tpu.memory_space<vmem>>, vector<1x4x256xf32>
      %339 = vector.shape_cast %338 : vector<1x4x256xf32> to vector<4x256xf32>
      %340 = vector.broadcast %337 : vector<1x256xf32> to vector<4x256xf32>
      %341 = arith.mulf %340, %339 : vector<4x256xf32>
      %c0_104 = arith.constant 0 : index
      %c1_105 = arith.constant 1 : index
      %c0_106 = arith.constant 0 : index
      %c0_107 = arith.constant 0 : index
      %342 = vector.load %arg8[%c0_104, %c1_105, %c0_106, %c0_107] : memref<2x2x4x256xf32, #tpu.memory_space<vmem>>, vector<1x1x4x256xf32>
      %343 = vector.shape_cast %342 : vector<1x1x4x256xf32> to vector<4x256xf32>
      %344 = vector.shape_cast %341 : vector<4x256xf32> to vector<1x1x4x256xf32>
      tpu.vector_store %arg8[%c0_104, %c1_105, %c0_106, %c0_107], %344 {strides = array<i32>} : memref<2x2x4x256xf32, #tpu.memory_space<vmem>>, vector<1x1x4x256xf32>,
      %c0_108 = arith.constant 0 : index
      %c0_109 = arith.constant 0 : index
      %c0_110 = arith.constant 0 : index
      %345 = vector.load %arg5[%c0_108, %c0_109, %c0_110] : memref<2x4x256xf32, #tpu.memory_space<vmem>>, vector<1x4x256xf32>
      %346 = vector.shape_cast %345 : vector<1x4x256xf32> to vector<4x256xf32>
      %cst_111 = arith.constant dense<0.000000e+00> : vector<256xf32>
      %347 = vector.multi_reduction <add>, %346, %cst_111 [0] : vector<4x256xf32> to vector<256xf32>
      %348 = vector.shape_cast %347 : vector<256xf32> to vector<1x256xf32>
      %cst_112 = arith.constant 4.000000e+00 : f32
      %349 = vector.broadcast %cst_112 : f32 to vector<1x256xf32>
      %350 = arith.divf %348, %349 : vector<1x256xf32>
      %c1_113 = arith.constant 1 : index
      %c0_114 = arith.constant 0 : index
      %c0_115 = arith.constant 0 : index
      %351 = vector.load %arg5[%c1_113, %c0_114, %c0_115] : memref<2x4x256xf32, #tpu.memory_space<vmem>>, vector<1x4x256xf32>
      %352 = vector.shape_cast %351 : vector<1x4x256xf32> to vector<4x256xf32>
      %cst_116 = arith.constant dense<0.000000e+00> : vector<256xf32>
      %353 = vector.multi_reduction <add>, %352, %cst_116 [0] : vector<4x256xf32> to vector<256xf32>
      %354 = vector.shape_cast %353 : vector<256xf32> to vector<1x256xf32>
      %cst_117 = arith.constant 4.000000e+00 : f32
      %355 = vector.broadcast %cst_117 : f32 to vector<1x256xf32>
      %356 = arith.divf %354, %355 : vector<1x256xf32>
      %c0_118 = arith.constant 0 : index
      %c0_119 = arith.constant 0 : index
      %c0_120 = arith.constant 0 : index
      %357 = vector.load %arg5[%c0_118, %c0_119, %c0_120] : memref<2x4x256xf32, #tpu.memory_space<vmem>>, vector<1x4x256xf32>
      %358 = vector.shape_cast %357 : vector<1x4x256xf32> to vector<4x256xf32>
      %cst_121 = arith.constant dense<0xFF800000> : vector<256xf32>
      %359 = vector.multi_reduction <maximumf>, %358, %cst_121 [0] : vector<4x256xf32> to vector<256xf32>
      %360 = vector.shape_cast %359 : vector<256xf32> to vector<1x256xf32>
      %c1_122 = arith.constant 1 : index
      %c0_123 = arith.constant 0 : index
      %c0_124 = arith.constant 0 : index
      %361 = vector.load %arg5[%c1_122, %c0_123, %c0_124] : memref<2x4x256xf32, #tpu.memory_space<vmem>>, vector<1x4x256xf32>
      %362 = vector.shape_cast %361 : vector<1x4x256xf32> to vector<4x256xf32>
      %cst_125 = arith.constant dense<0xFF800000> : vector<256xf32>
      %363 = vector.multi_reduction <maximumf>, %362, %cst_125 [0] : vector<4x256xf32> to vector<256xf32>
      %364 = vector.shape_cast %363 : vector<256xf32> to vector<1x256xf32>
      %365 = tpu.concatenate %350, %356, %360, %364 in 0 : vector<1x256xf32>, vector<1x256xf32>, vector<1x256xf32>, vector<1x256xf32> -> vector<4x256xf32>
      %cst_126 = arith.constant 0.000000e+00 : f32
      %366 = vector.broadcast %cst_126 : f32 to vector<4x102xf32>
      %367 = tpu.concatenate %366, %365, %366 in 1 : vector<4x102xf32>, vector<4x256xf32>, vector<4x102xf32> -> vector<4x460xf32>
      %cst_127 = arith.constant 0.000000e+00 : f32
      %368 = vector.broadcast %cst_127 : f32 to vector<4x256xf32>
      %cst_128 = arith.constant 0.000000e+00 : f32
      %369 = vector.broadcast %cst_128 : f32 to vector<4x256xf32>
      %c0_129 = arith.constant 0 : index
      %c49 = arith.constant 49 : index
      %370 = vector.load %arg1[%c0_129, %c49] : memref<4x196xf32, #tpu.memory_space<vmem>>, vector<4x1xf32>
      %371 = vector.extract_strided_slice %367 {offsets = [0, 0], sizes = [4, 256], strides = [1, 1]} : vector<4x460xf32> to vector<4x256xf32>
      %372 = vector.broadcast %370 : vector<4x1xf32> to vector<4x256xf32>
      %373 = arith.mulf %372, %371 : vector<4x256xf32>
      %374 = arith.addf %369, %373 : vector<4x256xf32>
      %c0_130 = arith.constant 0 : index
      %c56 = arith.constant 56 : index
      %375 = vector.load %arg1[%c0_130, %c56] : memref<4x196xf32, #tpu.memory_space<vmem>>, vector<4x1xf32>
      %376 = vector.extract_strided_slice %367 {offsets = [0, 32], sizes = [4, 256], strides = [1, 1]} : vector<4x460xf32> to vector<4x256xf32>
      %377 = vector.broadcast %375 : vector<4x1xf32> to vector<4x256xf32>
      %378 = arith.mulf %377, %376 : vector<4x256xf32>
      %379 = arith.addf %374, %378 : vector<4x256xf32>
      %c0_131 = arith.constant 0 : index
      %c63 = arith.constant 63 : index
      %380 = vector.load %arg1[%c0_131, %c63] : memref<4x196xf32, #tpu.memory_space<vmem>>, vector<4x1xf32>
      %381 = vector.extract_strided_slice %367 {offsets = [0, 64], sizes = [4, 256], strides = [1, 1]} : vector<4x460xf32> to vector<4x256xf32>
      %382 = vector.broadcast %380 : vector<4x1xf32> to vector<4x256xf32>
      %383 = arith.mulf %382, %381 : vector<4x256xf32>
      %384 = arith.addf %379, %383 : vector<4x256xf32>
      %c0_132 = arith.constant 0 : index
      %c70 = arith.constant 70 : index
      %385 = vector.load %arg1[%c0_132, %c70] : memref<4x196xf32, #tpu.memory_space<vmem>>, vector<4x1xf32>
      %386 = vector.extract_strided_slice %367 {offsets = [0, 96], sizes = [4, 256], strides = [1, 1]} : vector<4x460xf32> to vector<4x256xf32>
      %387 = vector.broadcast %385 : vector<4x1xf32> to vector<4x256xf32>
      %388 = arith.mulf %387, %386 : vector<4x256xf32>
      %389 = arith.addf %384, %388 : vector<4x256xf32>
      %c0_133 = arith.constant 0 : index
      %c77 = arith.constant 77 : index
      %390 = vector.load %arg1[%c0_133, %c77] : memref<4x196xf32, #tpu.memory_space<vmem>>, vector<4x1xf32>
      %391 = vector.extract_strided_slice %367 {offsets = [0, 128], sizes = [4, 256], strides = [1, 1]} : vector<4x460xf32> to vector<4x256xf32>
      %392 = vector.broadcast %390 : vector<4x1xf32> to vector<4x256xf32>
      %393 = arith.mulf %392, %391 : vector<4x256xf32>
      %394 = arith.addf %389, %393 : vector<4x256xf32>
      %c0_134 = arith.constant 0 : index
      %c84 = arith.constant 84 : index
      %395 = vector.load %arg1[%c0_134, %c84] : memref<4x196xf32, #tpu.memory_space<vmem>>, vector<4x1xf32>
      %396 = vector.extract_strided_slice %367 {offsets = [0, 160], sizes = [4, 256], strides = [1, 1]} : vector<4x460xf32> to vector<4x256xf32>
      %397 = vector.broadcast %395 : vector<4x1xf32> to vector<4x256xf32>
      %398 = arith.mulf %397, %396 : vector<4x256xf32>
      %399 = arith.addf %394, %398 : vector<4x256xf32>
      %c0_135 = arith.constant 0 : index
      %c91 = arith.constant 91 : index
      %400 = vector.load %arg1[%c0_135, %c91] : memref<4x196xf32, #tpu.memory_space<vmem>>, vector<4x1xf32>
      %401 = vector.extract_strided_slice %367 {offsets = [0, 192], sizes = [4, 256], strides = [1, 1]} : vector<4x460xf32> to vector<4x256xf32>
      %402 = vector.broadcast %400 : vector<4x1xf32> to vector<4x256xf32>
      %403 = arith.mulf %402, %401 : vector<4x256xf32>
      %404 = arith.addf %399, %403 : vector<4x256xf32>
      %c7_136 = arith.constant 7 : index
      %c0_137 = arith.constant 0 : index
      %405 = vector.load %arg3[%c7_136, %c0_137] : memref<28x256xf32, #tpu.memory_space<vmem>>, vector<1x256xf32>
      %406 = vector.broadcast %405 : vector<1x256xf32> to vector<4x256xf32>
      %407 = arith.mulf %406, %404 : vector<4x256xf32>
      %408 = arith.addf %368, %407 : vector<4x256xf32>
      %cst_138 = arith.constant 0.000000e+00 : f32
      %409 = vector.broadcast %cst_138 : f32 to vector<4x256xf32>
      %c0_139 = arith.constant 0 : index
      %c50 = arith.constant 50 : index
      %410 = vector.load %arg1[%c0_139, %c50] : memref<4x196xf32, #tpu.memory_space<vmem>>, vector<4x1xf32>
      %411 = vector.extract_strided_slice %367 {offsets = [0, 2], sizes = [4, 256], strides = [1, 1]} : vector<4x460xf32> to vector<4x256xf32>
      %412 = vector.broadcast %410 : vector<4x1xf32> to vector<4x256xf32>
      %413 = arith.mulf %412, %411 : vector<4x256xf32>
      %414 = arith.addf %409, %413 : vector<4x256xf32>
      %c0_140 = arith.constant 0 : index
      %c57 = arith.constant 57 : index
      %415 = vector.load %arg1[%c0_140, %c57] : memref<4x196xf32, #tpu.memory_space<vmem>>, vector<4x1xf32>
      %416 = vector.extract_strided_slice %367 {offsets = [0, 34], sizes = [4, 256], strides = [1, 1]} : vector<4x460xf32> to vector<4x256xf32>
      %417 = vector.broadcast %415 : vector<4x1xf32> to vector<4x256xf32>
      %418 = arith.mulf %417, %416 : vector<4x256xf32>
      %419 = arith.addf %414, %418 : vector<4x256xf32>
      %c0_141 = arith.constant 0 : index
      %c64 = arith.constant 64 : index
      %420 = vector.load %arg1[%c0_141, %c64] : memref<4x196xf32, #tpu.memory_space<vmem>>, vector<4x1xf32>
      %421 = vector.extract_strided_slice %367 {offsets = [0, 66], sizes = [4, 256], strides = [1, 1]} : vector<4x460xf32> to vector<4x256xf32>
      %422 = vector.broadcast %420 : vector<4x1xf32> to vector<4x256xf32>
      %423 = arith.mulf %422, %421 : vector<4x256xf32>
      %424 = arith.addf %419, %423 : vector<4x256xf32>
      %c0_142 = arith.constant 0 : index
      %c71 = arith.constant 71 : index
      %425 = vector.load %arg1[%c0_142, %c71] : memref<4x196xf32, #tpu.memory_space<vmem>>, vector<4x1xf32>
      %426 = vector.extract_strided_slice %367 {offsets = [0, 98], sizes = [4, 256], strides = [1, 1]} : vector<4x460xf32> to vector<4x256xf32>
      %427 = vector.broadcast %425 : vector<4x1xf32> to vector<4x256xf32>
      %428 = arith.mulf %427, %426 : vector<4x256xf32>
      %429 = arith.addf %424, %428 : vector<4x256xf32>
      %c0_143 = arith.constant 0 : index
      %c78 = arith.constant 78 : index
      %430 = vector.load %arg1[%c0_143, %c78] : memref<4x196xf32, #tpu.memory_space<vmem>>, vector<4x1xf32>
      %431 = vector.extract_strided_slice %367 {offsets = [0, 130], sizes = [4, 256], strides = [1, 1]} : vector<4x460xf32> to vector<4x256xf32>
      %432 = vector.broadcast %430 : vector<4x1xf32> to vector<4x256xf32>
      %433 = arith.mulf %432, %431 : vector<4x256xf32>
      %434 = arith.addf %429, %433 : vector<4x256xf32>
      %c0_144 = arith.constant 0 : index
      %c85 = arith.constant 85 : index
      %435 = vector.load %arg1[%c0_144, %c85] : memref<4x196xf32, #tpu.memory_space<vmem>>, vector<4x1xf32>
      %436 = vector.extract_strided_slice %367 {offsets = [0, 162], sizes = [4, 256], strides = [1, 1]} : vector<4x460xf32> to vector<4x256xf32>
      %437 = vector.broadcast %435 : vector<4x1xf32> to vector<4x256xf32>
      %438 = arith.mulf %437, %436 : vector<4x256xf32>
      %439 = arith.addf %434, %438 : vector<4x256xf32>
      %c0_145 = arith.constant 0 : index
      %c92 = arith.constant 92 : index
      %440 = vector.load %arg1[%c0_145, %c92] : memref<4x196xf32, #tpu.memory_space<vmem>>, vector<4x1xf32>
      %441 = vector.extract_strided_slice %367 {offsets = [0, 194], sizes = [4, 256], strides = [1, 1]} : vector<4x460xf32> to vector<4x256xf32>
      %442 = vector.broadcast %440 : vector<4x1xf32> to vector<4x256xf32>
      %443 = arith.mulf %442, %441 : vector<4x256xf32>
      %444 = arith.addf %439, %443 : vector<4x256xf32>
      %c8_146 = arith.constant 8 : index
      %c0_147 = arith.constant 0 : index
      %445 = vector.load %arg3[%c8_146, %c0_147] : memref<28x256xf32, #tpu.memory_space<vmem>>, vector<1x256xf32>
      %446 = vector.broadcast %445 : vector<1x256xf32> to vector<4x256xf32>
      %447 = arith.mulf %446, %444 : vector<4x256xf32>
      %448 = arith.addf %408, %447 : vector<4x256xf32>
      %cst_148 = arith.constant 0.000000e+00 : f32
      %449 = vector.broadcast %cst_148 : f32 to vector<4x256xf32>
      %c0_149 = arith.constant 0 : index
      %c51 = arith.constant 51 : index
      %450 = vector.load %arg1[%c0_149, %c51] : memref<4x196xf32, #tpu.memory_space<vmem>>, vector<4x1xf32>
      %451 = vector.extract_strided_slice %367 {offsets = [0, 4], sizes = [4, 256], strides = [1, 1]} : vector<4x460xf32> to vector<4x256xf32>
      %452 = vector.broadcast %450 : vector<4x1xf32> to vector<4x256xf32>
      %453 = arith.mulf %452, %451 : vector<4x256xf32>
      %454 = arith.addf %449, %453 : vector<4x256xf32>
      %c0_150 = arith.constant 0 : index
      %c58 = arith.constant 58 : index
      %455 = vector.load %arg1[%c0_150, %c58] : memref<4x196xf32, #tpu.memory_space<vmem>>, vector<4x1xf32>
      %456 = vector.extract_strided_slice %367 {offsets = [0, 36], sizes = [4, 256], strides = [1, 1]} : vector<4x460xf32> to vector<4x256xf32>
      %457 = vector.broadcast %455 : vector<4x1xf32> to vector<4x256xf32>
      %458 = arith.mulf %457, %456 : vector<4x256xf32>
      %459 = arith.addf %454, %458 : vector<4x256xf32>
      %c0_151 = arith.constant 0 : index
      %c65 = arith.constant 65 : index
      %460 = vector.load %arg1[%c0_151, %c65] : memref<4x196xf32, #tpu.memory_space<vmem>>, vector<4x1xf32>
      %461 = vector.extract_strided_slice %367 {offsets = [0, 68], sizes = [4, 256], strides = [1, 1]} : vector<4x460xf32> to vector<4x256xf32>
      %462 = vector.broadcast %460 : vector<4x1xf32> to vector<4x256xf32>
      %463 = arith.mulf %462, %461 : vector<4x256xf32>
      %464 = arith.addf %459, %463 : vector<4x256xf32>
      %c0_152 = arith.constant 0 : index
      %c72 = arith.constant 72 : index
      %465 = vector.load %arg1[%c0_152, %c72] : memref<4x196xf32, #tpu.memory_space<vmem>>, vector<4x1xf32>
      %466 = vector.extract_strided_slice %367 {offsets = [0, 100], sizes = [4, 256], strides = [1, 1]} : vector<4x460xf32> to vector<4x256xf32>
      %467 = vector.broadcast %465 : vector<4x1xf32> to vector<4x256xf32>
      %468 = arith.mulf %467, %466 : vector<4x256xf32>
      %469 = arith.addf %464, %468 : vector<4x256xf32>
      %c0_153 = arith.constant 0 : index
      %c79 = arith.constant 79 : index
      %470 = vector.load %arg1[%c0_153, %c79] : memref<4x196xf32, #tpu.memory_space<vmem>>, vector<4x1xf32>
      %471 = vector.extract_strided_slice %367 {offsets = [0, 132], sizes = [4, 256], strides = [1, 1]} : vector<4x460xf32> to vector<4x256xf32>
      %472 = vector.broadcast %470 : vector<4x1xf32> to vector<4x256xf32>
      %473 = arith.mulf %472, %471 : vector<4x256xf32>
      %474 = arith.addf %469, %473 : vector<4x256xf32>
      %c0_154 = arith.constant 0 : index
      %c86 = arith.constant 86 : index
      %475 = vector.load %arg1[%c0_154, %c86] : memref<4x196xf32, #tpu.memory_space<vmem>>, vector<4x1xf32>
      %476 = vector.extract_strided_slice %367 {offsets = [0, 164], sizes = [4, 256], strides = [1, 1]} : vector<4x460xf32> to vector<4x256xf32>
      %477 = vector.broadcast %475 : vector<4x1xf32> to vector<4x256xf32>
      %478 = arith.mulf %477, %476 : vector<4x256xf32>
      %479 = arith.addf %474, %478 : vector<4x256xf32>
      %c0_155 = arith.constant 0 : index
      %c93 = arith.constant 93 : index
      %480 = vector.load %arg1[%c0_155, %c93] : memref<4x196xf32, #tpu.memory_space<vmem>>, vector<4x1xf32>
      %481 = vector.extract_strided_slice %367 {offsets = [0, 196], sizes = [4, 256], strides = [1, 1]} : vector<4x460xf32> to vector<4x256xf32>
      %482 = vector.broadcast %480 : vector<4x1xf32> to vector<4x256xf32>
      %483 = arith.mulf %482, %481 : vector<4x256xf32>
      %484 = arith.addf %479, %483 : vector<4x256xf32>
      %c9_156 = arith.constant 9 : index
      %c0_157 = arith.constant 0 : index
      %485 = vector.load %arg3[%c9_156, %c0_157] : memref<28x256xf32, #tpu.memory_space<vmem>>, vector<1x256xf32>
      %486 = vector.broadcast %485 : vector<1x256xf32> to vector<4x256xf32>
      %487 = arith.mulf %486, %484 : vector<4x256xf32>
      %488 = arith.addf %448, %487 : vector<4x256xf32>
      %cst_158 = arith.constant 0.000000e+00 : f32
      %489 = vector.broadcast %cst_158 : f32 to vector<4x256xf32>
      %c0_159 = arith.constant 0 : index
      %c52 = arith.constant 52 : index
      %490 = vector.load %arg1[%c0_159, %c52] : memref<4x196xf32, #tpu.memory_space<vmem>>, vector<4x1xf32>
      %491 = vector.extract_strided_slice %367 {offsets = [0, 6], sizes = [4, 256], strides = [1, 1]} : vector<4x460xf32> to vector<4x256xf32>
      %492 = vector.broadcast %490 : vector<4x1xf32> to vector<4x256xf32>
      %493 = arith.mulf %492, %491 : vector<4x256xf32>
      %494 = arith.addf %489, %493 : vector<4x256xf32>
      %c0_160 = arith.constant 0 : index
      %c59 = arith.constant 59 : index
      %495 = vector.load %arg1[%c0_160, %c59] : memref<4x196xf32, #tpu.memory_space<vmem>>, vector<4x1xf32>
      %496 = vector.extract_strided_slice %367 {offsets = [0, 38], sizes = [4, 256], strides = [1, 1]} : vector<4x460xf32> to vector<4x256xf32>
      %497 = vector.broadcast %495 : vector<4x1xf32> to vector<4x256xf32>
      %498 = arith.mulf %497, %496 : vector<4x256xf32>
      %499 = arith.addf %494, %498 : vector<4x256xf32>
      %c0_161 = arith.constant 0 : index
      %c66 = arith.constant 66 : index
      %500 = vector.load %arg1[%c0_161, %c66] : memref<4x196xf32, #tpu.memory_space<vmem>>, vector<4x1xf32>
      %501 = vector.extract_strided_slice %367 {offsets = [0, 70], sizes = [4, 256], strides = [1, 1]} : vector<4x460xf32> to vector<4x256xf32>
      %502 = vector.broadcast %500 : vector<4x1xf32> to vector<4x256xf32>
      %503 = arith.mulf %502, %501 : vector<4x256xf32>
      %504 = arith.addf %499, %503 : vector<4x256xf32>
      %c0_162 = arith.constant 0 : index
      %c73 = arith.constant 73 : index
      %505 = vector.load %arg1[%c0_162, %c73] : memref<4x196xf32, #tpu.memory_space<vmem>>, vector<4x1xf32>
      %506 = vector.extract_strided_slice %367 {offsets = [0, 102], sizes = [4, 256], strides = [1, 1]} : vector<4x460xf32> to vector<4x256xf32>
      %507 = vector.broadcast %505 : vector<4x1xf32> to vector<4x256xf32>
      %508 = arith.mulf %507, %506 : vector<4x256xf32>
      %509 = arith.addf %504, %508 : vector<4x256xf32>
      %c0_163 = arith.constant 0 : index
      %c80 = arith.constant 80 : index
      %510 = vector.load %arg1[%c0_163, %c80] : memref<4x196xf32, #tpu.memory_space<vmem>>, vector<4x1xf32>
      %511 = vector.extract_strided_slice %367 {offsets = [0, 134], sizes = [4, 256], strides = [1, 1]} : vector<4x460xf32> to vector<4x256xf32>
      %512 = vector.broadcast %510 : vector<4x1xf32> to vector<4x256xf32>
      %513 = arith.mulf %512, %511 : vector<4x256xf32>
      %514 = arith.addf %509, %513 : vector<4x256xf32>
      %c0_164 = arith.constant 0 : index
      %c87 = arith.constant 87 : index
      %515 = vector.load %arg1[%c0_164, %c87] : memref<4x196xf32, #tpu.memory_space<vmem>>, vector<4x1xf32>
      %516 = vector.extract_strided_slice %367 {offsets = [0, 166], sizes = [4, 256], strides = [1, 1]} : vector<4x460xf32> to vector<4x256xf32>
      %517 = vector.broadcast %515 : vector<4x1xf32> to vector<4x256xf32>
      %518 = arith.mulf %517, %516 : vector<4x256xf32>
      %519 = arith.addf %514, %518 : vector<4x256xf32>
      %c0_165 = arith.constant 0 : index
      %c94 = arith.constant 94 : index
      %520 = vector.load %arg1[%c0_165, %c94] : memref<4x196xf32, #tpu.memory_space<vmem>>, vector<4x1xf32>
      %521 = vector.extract_strided_slice %367 {offsets = [0, 198], sizes = [4, 256], strides = [1, 1]} : vector<4x460xf32> to vector<4x256xf32>
      %522 = vector.broadcast %520 : vector<4x1xf32> to vector<4x256xf32>
      %523 = arith.mulf %522, %521 : vector<4x256xf32>
      %524 = arith.addf %519, %523 : vector<4x256xf32>
      %c10_166 = arith.constant 10 : index
      %c0_167 = arith.constant 0 : index
      %525 = vector.load %arg3[%c10_166, %c0_167] : memref<28x256xf32, #tpu.memory_space<vmem>>, vector<1x256xf32>
      %526 = vector.broadcast %525 : vector<1x256xf32> to vector<4x256xf32>
      %527 = arith.mulf %526, %524 : vector<4x256xf32>
      %528 = arith.addf %488, %527 : vector<4x256xf32>
      %cst_168 = arith.constant 0.000000e+00 : f32
      %529 = vector.broadcast %cst_168 : f32 to vector<4x256xf32>
      %c0_169 = arith.constant 0 : index
      %c53 = arith.constant 53 : index
      %530 = vector.load %arg1[%c0_169, %c53] : memref<4x196xf32, #tpu.memory_space<vmem>>, vector<4x1xf32>
      %531 = vector.extract_strided_slice %367 {offsets = [0, 8], sizes = [4, 256], strides = [1, 1]} : vector<4x460xf32> to vector<4x256xf32>
      %532 = vector.broadcast %530 : vector<4x1xf32> to vector<4x256xf32>
      %533 = arith.mulf %532, %531 : vector<4x256xf32>
      %534 = arith.addf %529, %533 : vector<4x256xf32>
      %c0_170 = arith.constant 0 : index
      %c60 = arith.constant 60 : index
      %535 = vector.load %arg1[%c0_170, %c60] : memref<4x196xf32, #tpu.memory_space<vmem>>, vector<4x1xf32>
      %536 = vector.extract_strided_slice %367 {offsets = [0, 40], sizes = [4, 256], strides = [1, 1]} : vector<4x460xf32> to vector<4x256xf32>
      %537 = vector.broadcast %535 : vector<4x1xf32> to vector<4x256xf32>
      %538 = arith.mulf %537, %536 : vector<4x256xf32>
      %539 = arith.addf %534, %538 : vector<4x256xf32>
      %c0_171 = arith.constant 0 : index
      %c67 = arith.constant 67 : index
      %540 = vector.load %arg1[%c0_171, %c67] : memref<4x196xf32, #tpu.memory_space<vmem>>, vector<4x1xf32>
      %541 = vector.extract_strided_slice %367 {offsets = [0, 72], sizes = [4, 256], strides = [1, 1]} : vector<4x460xf32> to vector<4x256xf32>
      %542 = vector.broadcast %540 : vector<4x1xf32> to vector<4x256xf32>
      %543 = arith.mulf %542, %541 : vector<4x256xf32>
      %544 = arith.addf %539, %543 : vector<4x256xf32>
      %c0_172 = arith.constant 0 : index
      %c74 = arith.constant 74 : index
      %545 = vector.load %arg1[%c0_172, %c74] : memref<4x196xf32, #tpu.memory_space<vmem>>, vector<4x1xf32>
      %546 = vector.extract_strided_slice %367 {offsets = [0, 104], sizes = [4, 256], strides = [1, 1]} : vector<4x460xf32> to vector<4x256xf32>
      %547 = vector.broadcast %545 : vector<4x1xf32> to vector<4x256xf32>
      %548 = arith.mulf %547, %546 : vector<4x256xf32>
      %549 = arith.addf %544, %548 : vector<4x256xf32>
      %c0_173 = arith.constant 0 : index
      %c81 = arith.constant 81 : index
      %550 = vector.load %arg1[%c0_173, %c81] : memref<4x196xf32, #tpu.memory_space<vmem>>, vector<4x1xf32>
      %551 = vector.extract_strided_slice %367 {offsets = [0, 136], sizes = [4, 256], strides = [1, 1]} : vector<4x460xf32> to vector<4x256xf32>
      %552 = vector.broadcast %550 : vector<4x1xf32> to vector<4x256xf32>
      %553 = arith.mulf %552, %551 : vector<4x256xf32>
      %554 = arith.addf %549, %553 : vector<4x256xf32>
      %c0_174 = arith.constant 0 : index
      %c88 = arith.constant 88 : index
      %555 = vector.load %arg1[%c0_174, %c88] : memref<4x196xf32, #tpu.memory_space<vmem>>, vector<4x1xf32>
      %556 = vector.extract_strided_slice %367 {offsets = [0, 168], sizes = [4, 256], strides = [1, 1]} : vector<4x460xf32> to vector<4x256xf32>
      %557 = vector.broadcast %555 : vector<4x1xf32> to vector<4x256xf32>
      %558 = arith.mulf %557, %556 : vector<4x256xf32>
      %559 = arith.addf %554, %558 : vector<4x256xf32>
      %c0_175 = arith.constant 0 : index
      %c95 = arith.constant 95 : index
      %560 = vector.load %arg1[%c0_175, %c95] : memref<4x196xf32, #tpu.memory_space<vmem>>, vector<4x1xf32>
      %561 = vector.extract_strided_slice %367 {offsets = [0, 200], sizes = [4, 256], strides = [1, 1]} : vector<4x460xf32> to vector<4x256xf32>
      %562 = vector.broadcast %560 : vector<4x1xf32> to vector<4x256xf32>
      %563 = arith.mulf %562, %561 : vector<4x256xf32>
      %564 = arith.addf %559, %563 : vector<4x256xf32>
      %c11_176 = arith.constant 11 : index
      %c0_177 = arith.constant 0 : index
      %565 = vector.load %arg3[%c11_176, %c0_177] : memref<28x256xf32, #tpu.memory_space<vmem>>, vector<1x256xf32>
      %566 = vector.broadcast %565 : vector<1x256xf32> to vector<4x256xf32>
      %567 = arith.mulf %566, %564 : vector<4x256xf32>
      %568 = arith.addf %528, %567 : vector<4x256xf32>
      %cst_178 = arith.constant 0.000000e+00 : f32
      %569 = vector.broadcast %cst_178 : f32 to vector<4x256xf32>
      %c0_179 = arith.constant 0 : index
      %c54 = arith.constant 54 : index
      %570 = vector.load %arg1[%c0_179, %c54] : memref<4x196xf32, #tpu.memory_space<vmem>>, vector<4x1xf32>
      %571 = vector.extract_strided_slice %367 {offsets = [0, 10], sizes = [4, 256], strides = [1, 1]} : vector<4x460xf32> to vector<4x256xf32>
      %572 = vector.broadcast %570 : vector<4x1xf32> to vector<4x256xf32>
      %573 = arith.mulf %572, %571 : vector<4x256xf32>
      %574 = arith.addf %569, %573 : vector<4x256xf32>
      %c0_180 = arith.constant 0 : index
      %c61 = arith.constant 61 : index
      %575 = vector.load %arg1[%c0_180, %c61] : memref<4x196xf32, #tpu.memory_space<vmem>>, vector<4x1xf32>
      %576 = vector.extract_strided_slice %367 {offsets = [0, 42], sizes = [4, 256], strides = [1, 1]} : vector<4x460xf32> to vector<4x256xf32>
      %577 = vector.broadcast %575 : vector<4x1xf32> to vector<4x256xf32>
      %578 = arith.mulf %577, %576 : vector<4x256xf32>
      %579 = arith.addf %574, %578 : vector<4x256xf32>
      %c0_181 = arith.constant 0 : index
      %c68 = arith.constant 68 : index
      %580 = vector.load %arg1[%c0_181, %c68] : memref<4x196xf32, #tpu.memory_space<vmem>>, vector<4x1xf32>
      %581 = vector.extract_strided_slice %367 {offsets = [0, 74], sizes = [4, 256], strides = [1, 1]} : vector<4x460xf32> to vector<4x256xf32>
      %582 = vector.broadcast %580 : vector<4x1xf32> to vector<4x256xf32>
      %583 = arith.mulf %582, %581 : vector<4x256xf32>
      %584 = arith.addf %579, %583 : vector<4x256xf32>
      %c0_182 = arith.constant 0 : index
      %c75 = arith.constant 75 : index
      %585 = vector.load %arg1[%c0_182, %c75] : memref<4x196xf32, #tpu.memory_space<vmem>>, vector<4x1xf32>
      %586 = vector.extract_strided_slice %367 {offsets = [0, 106], sizes = [4, 256], strides = [1, 1]} : vector<4x460xf32> to vector<4x256xf32>
      %587 = vector.broadcast %585 : vector<4x1xf32> to vector<4x256xf32>
      %588 = arith.mulf %587, %586 : vector<4x256xf32>
      %589 = arith.addf %584, %588 : vector<4x256xf32>
      %c0_183 = arith.constant 0 : index
      %c82 = arith.constant 82 : index
      %590 = vector.load %arg1[%c0_183, %c82] : memref<4x196xf32, #tpu.memory_space<vmem>>, vector<4x1xf32>
      %591 = vector.extract_strided_slice %367 {offsets = [0, 138], sizes = [4, 256], strides = [1, 1]} : vector<4x460xf32> to vector<4x256xf32>
      %592 = vector.broadcast %590 : vector<4x1xf32> to vector<4x256xf32>
      %593 = arith.mulf %592, %591 : vector<4x256xf32>
      %594 = arith.addf %589, %593 : vector<4x256xf32>
      %c0_184 = arith.constant 0 : index
      %c89 = arith.constant 89 : index
      %595 = vector.load %arg1[%c0_184, %c89] : memref<4x196xf32, #tpu.memory_space<vmem>>, vector<4x1xf32>
      %596 = vector.extract_strided_slice %367 {offsets = [0, 170], sizes = [4, 256], strides = [1, 1]} : vector<4x460xf32> to vector<4x256xf32>
      %597 = vector.broadcast %595 : vector<4x1xf32> to vector<4x256xf32>
      %598 = arith.mulf %597, %596 : vector<4x256xf32>
      %599 = arith.addf %594, %598 : vector<4x256xf32>
      %c0_185 = arith.constant 0 : index
      %c96 = arith.constant 96 : index
      %600 = vector.load %arg1[%c0_185, %c96] : memref<4x196xf32, #tpu.memory_space<vmem>>, vector<4x1xf32>
      %601 = vector.extract_strided_slice %367 {offsets = [0, 202], sizes = [4, 256], strides = [1, 1]} : vector<4x460xf32> to vector<4x256xf32>
      %602 = vector.broadcast %600 : vector<4x1xf32> to vector<4x256xf32>
      %603 = arith.mulf %602, %601 : vector<4x256xf32>
      %604 = arith.addf %599, %603 : vector<4x256xf32>
      %c12_186 = arith.constant 12 : index
      %c0_187 = arith.constant 0 : index
      %605 = vector.load %arg3[%c12_186, %c0_187] : memref<28x256xf32, #tpu.memory_space<vmem>>, vector<1x256xf32>
      %606 = vector.broadcast %605 : vector<1x256xf32> to vector<4x256xf32>
      %607 = arith.mulf %606, %604 : vector<4x256xf32>
      %608 = arith.addf %568, %607 : vector<4x256xf32>
      %cst_188 = arith.constant 0.000000e+00 : f32
      %609 = vector.broadcast %cst_188 : f32 to vector<4x256xf32>
      %c0_189 = arith.constant 0 : index
      %c55 = arith.constant 55 : index
      %610 = vector.load %arg1[%c0_189, %c55] : memref<4x196xf32, #tpu.memory_space<vmem>>, vector<4x1xf32>
      %611 = vector.extract_strided_slice %367 {offsets = [0, 12], sizes = [4, 256], strides = [1, 1]} : vector<4x460xf32> to vector<4x256xf32>
      %612 = vector.broadcast %610 : vector<4x1xf32> to vector<4x256xf32>
      %613 = arith.mulf %612, %611 : vector<4x256xf32>
      %614 = arith.addf %609, %613 : vector<4x256xf32>
      %c0_190 = arith.constant 0 : index
      %c62 = arith.constant 62 : index
      %615 = vector.load %arg1[%c0_190, %c62] : memref<4x196xf32, #tpu.memory_space<vmem>>, vector<4x1xf32>
      %616 = vector.extract_strided_slice %367 {offsets = [0, 44], sizes = [4, 256], strides = [1, 1]} : vector<4x460xf32> to vector<4x256xf32>
      %617 = vector.broadcast %615 : vector<4x1xf32> to vector<4x256xf32>
      %618 = arith.mulf %617, %616 : vector<4x256xf32>
      %619 = arith.addf %614, %618 : vector<4x256xf32>
      %c0_191 = arith.constant 0 : index
      %c69 = arith.constant 69 : index
      %620 = vector.load %arg1[%c0_191, %c69] : memref<4x196xf32, #tpu.memory_space<vmem>>, vector<4x1xf32>
      %621 = vector.extract_strided_slice %367 {offsets = [0, 76], sizes = [4, 256], strides = [1, 1]} : vector<4x460xf32> to vector<4x256xf32>
      %622 = vector.broadcast %620 : vector<4x1xf32> to vector<4x256xf32>
      %623 = arith.mulf %622, %621 : vector<4x256xf32>
      %624 = arith.addf %619, %623 : vector<4x256xf32>
      %c0_192 = arith.constant 0 : index
      %c76 = arith.constant 76 : index
      %625 = vector.load %arg1[%c0_192, %c76] : memref<4x196xf32, #tpu.memory_space<vmem>>, vector<4x1xf32>
      %626 = vector.extract_strided_slice %367 {offsets = [0, 108], sizes = [4, 256], strides = [1, 1]} : vector<4x460xf32> to vector<4x256xf32>
      %627 = vector.broadcast %625 : vector<4x1xf32> to vector<4x256xf32>
      %628 = arith.mulf %627, %626 : vector<4x256xf32>
      %629 = arith.addf %624, %628 : vector<4x256xf32>
      %c0_193 = arith.constant 0 : index
      %c83 = arith.constant 83 : index
      %630 = vector.load %arg1[%c0_193, %c83] : memref<4x196xf32, #tpu.memory_space<vmem>>, vector<4x1xf32>
      %631 = vector.extract_strided_slice %367 {offsets = [0, 140], sizes = [4, 256], strides = [1, 1]} : vector<4x460xf32> to vector<4x256xf32>
      %632 = vector.broadcast %630 : vector<4x1xf32> to vector<4x256xf32>
      %633 = arith.mulf %632, %631 : vector<4x256xf32>
      %634 = arith.addf %629, %633 : vector<4x256xf32>
      %c0_194 = arith.constant 0 : index
      %c90 = arith.constant 90 : index
      %635 = vector.load %arg1[%c0_194, %c90] : memref<4x196xf32, #tpu.memory_space<vmem>>, vector<4x1xf32>
      %636 = vector.extract_strided_slice %367 {offsets = [0, 172], sizes = [4, 256], strides = [1, 1]} : vector<4x460xf32> to vector<4x256xf32>
      %637 = vector.broadcast %635 : vector<4x1xf32> to vector<4x256xf32>
      %638 = arith.mulf %637, %636 : vector<4x256xf32>
      %639 = arith.addf %634, %638 : vector<4x256xf32>
      %c0_195 = arith.constant 0 : index
      %c97 = arith.constant 97 : index
      %640 = vector.load %arg1[%c0_195, %c97] : memref<4x196xf32, #tpu.memory_space<vmem>>, vector<4x1xf32>
      %641 = vector.extract_strided_slice %367 {offsets = [0, 204], sizes = [4, 256], strides = [1, 1]} : vector<4x460xf32> to vector<4x256xf32>
      %642 = vector.broadcast %640 : vector<4x1xf32> to vector<4x256xf32>
      %643 = arith.mulf %642, %641 : vector<4x256xf32>
      %644 = arith.addf %639, %643 : vector<4x256xf32>
      %c13_196 = arith.constant 13 : index
      %c0_197 = arith.constant 0 : index
      %645 = vector.load %arg3[%c13_196, %c0_197] : memref<28x256xf32, #tpu.memory_space<vmem>>, vector<1x256xf32>
      %646 = vector.broadcast %645 : vector<1x256xf32> to vector<4x256xf32>
      %647 = arith.mulf %646, %644 : vector<4x256xf32>
      %648 = arith.addf %608, %647 : vector<4x256xf32>
      %c1_198 = arith.constant 1 : index
      %649 = memref.load %arg2[%c1_198] : memref<4xf32, #tpu.memory_space<smem>>
      %650 = vector.extract_strided_slice %648 {offsets = [0, 0], sizes = [1, 256], strides = [1, 1]} : vector<4x256xf32> to vector<1x256xf32>
      %651 = vector.extract_strided_slice %648 {offsets = [2, 0], sizes = [1, 256], strides = [1, 1]} : vector<4x256xf32> to vector<1x256xf32>
      %652 = arith.addf %650, %651 : vector<1x256xf32>
      %653 = vector.broadcast %649 : f32 to vector<1x256xf32>
      %654 = arith.addf %652, %653 : vector<1x256xf32>
      %655 = arith.negf %654 : vector<1x256xf32>
      %656 = math.exp %655 : vector<1x256xf32>
      %cst_199 = arith.constant 1.000000e+00 : f32
      %657 = vector.broadcast %cst_199 : f32 to vector<1x256xf32>
      %658 = arith.addf %657, %656 : vector<1x256xf32>
      %659 = arith.divf %657, %658 : vector<1x256xf32>
      %c0_200 = arith.constant 0 : index
      %c0_201 = arith.constant 0 : index
      %c0_202 = arith.constant 0 : index
      %660 = vector.load %arg5[%c0_200, %c0_201, %c0_202] : memref<2x4x256xf32, #tpu.memory_space<vmem>>, vector<1x4x256xf32>
      %661 = vector.shape_cast %660 : vector<1x4x256xf32> to vector<4x256xf32>
      %662 = vector.broadcast %659 : vector<1x256xf32> to vector<4x256xf32>
      %663 = arith.mulf %662, %661 : vector<4x256xf32>
      %c1_203 = arith.constant 1 : index
      %c0_204 = arith.constant 0 : index
      %c0_205 = arith.constant 0 : index
      %c0_206 = arith.constant 0 : index
      %664 = vector.load %arg8[%c1_203, %c0_204, %c0_205, %c0_206] : memref<2x2x4x256xf32, #tpu.memory_space<vmem>>, vector<1x1x4x256xf32>
      %665 = vector.shape_cast %664 : vector<1x1x4x256xf32> to vector<4x256xf32>
      %666 = vector.shape_cast %663 : vector<4x256xf32> to vector<1x1x4x256xf32>
      tpu.vector_store %arg8[%c1_203, %c0_204, %c0_205, %c0_206], %666 {strides = array<i32>} : memref<2x2x4x256xf32, #tpu.memory_space<vmem>>, vector<1x1x4x256xf32>,
      %667 = vector.extract_strided_slice %648 {offsets = [1, 0], sizes = [1, 256], strides = [1, 1]} : vector<4x256xf32> to vector<1x256xf32>
      %668 = vector.extract_strided_slice %648 {offsets = [3, 0], sizes = [1, 256], strides = [1, 1]} : vector<4x256xf32> to vector<1x256xf32>
      %669 = arith.addf %667, %668 : vector<1x256xf32>
      %670 = vector.broadcast %649 : f32 to vector<1x256xf32>
      %671 = arith.addf %669, %670 : vector<1x256xf32>
      %672 = arith.negf %671 : vector<1x256xf32>
      %673 = math.exp %672 : vector<1x256xf32>
      %cst_207 = arith.constant 1.000000e+00 : f32
      %674 = vector.broadcast %cst_207 : f32 to vector<1x256xf32>
      %675 = arith.addf %674, %673 : vector<1x256xf32>
      %676 = arith.divf %674, %675 : vector<1x256xf32>
      %c1_208 = arith.constant 1 : index
      %c0_209 = arith.constant 0 : index
      %c0_210 = arith.constant 0 : index
      %677 = vector.load %arg5[%c1_208, %c0_209, %c0_210] : memref<2x4x256xf32, #tpu.memory_space<vmem>>, vector<1x4x256xf32>
      %678 = vector.shape_cast %677 : vector<1x4x256xf32> to vector<4x256xf32>
      %679 = vector.broadcast %676 : vector<1x256xf32> to vector<4x256xf32>
      %680 = arith.mulf %679, %678 : vector<4x256xf32>
      %c1_211 = arith.constant 1 : index
      %c1_212 = arith.constant 1 : index
      %c0_213 = arith.constant 0 : index
      %c0_214 = arith.constant 0 : index
      %681 = vector.load %arg8[%c1_211, %c1_212, %c0_213, %c0_214] : memref<2x2x4x256xf32, #tpu.memory_space<vmem>>, vector<1x1x4x256xf32>
      %682 = vector.shape_cast %681 : vector<1x1x4x256xf32> to vector<4x256xf32>
      %683 = vector.shape_cast %680 : vector<4x256xf32> to vector<1x1x4x256xf32>
      tpu.vector_store %arg8[%c1_211, %c1_212, %c0_213, %c0_214], %683 {strides = array<i32>} : memref<2x2x4x256xf32, #tpu.memory_space<vmem>>, vector<1x1x4x256xf32>,
    } else {
    }
    %c1_i32 = arith.constant 1 : i32
    %3 = arith.cmpi eq, %arg0, %c1_i32 : i32
    %4 = arith.extui %3 : i1 to i32
    %c0_i32_1 = arith.constant 0 : i32
    %5 = arith.cmpi ne, %4, %c0_i32_1 : i32
    scf.if %5 {
      %c0 = arith.constant 0 : index
      %c0_2 = arith.constant 0 : index
      %c0_3 = arith.constant 0 : index
      %6 = vector.load %arg6[%c0, %c0_2, %c0_3] : memref<2x4x256xf32, #tpu.memory_space<vmem>>, vector<1x4x256xf32>
      %7 = vector.shape_cast %6 : vector<1x4x256xf32> to vector<4x256xf32>
      %cst = arith.constant dense<0.000000e+00> : vector<256xf32>
      %8 = vector.multi_reduction <add>, %7, %cst [0] : vector<4x256xf32> to vector<256xf32>
      %9 = vector.shape_cast %8 : vector<256xf32> to vector<1x256xf32>
      %cst_4 = arith.constant 4.000000e+00 : f32
      %10 = vector.broadcast %cst_4 : f32 to vector<1x256xf32>
      %11 = arith.divf %9, %10 : vector<1x256xf32>
      %c1 = arith.constant 1 : index
      %c0_5 = arith.constant 0 : index
      %c0_6 = arith.constant 0 : index
      %12 = vector.load %arg6[%c1, %c0_5, %c0_6] : memref<2x4x256xf32, #tpu.memory_space<vmem>>, vector<1x4x256xf32>
      %13 = vector.shape_cast %12 : vector<1x4x256xf32> to vector<4x256xf32>
      %cst_7 = arith.constant dense<0.000000e+00> : vector<256xf32>
      %14 = vector.multi_reduction <add>, %13, %cst_7 [0] : vector<4x256xf32> to vector<256xf32>
      %15 = vector.shape_cast %14 : vector<256xf32> to vector<1x256xf32>
      %cst_8 = arith.constant 4.000000e+00 : f32
      %16 = vector.broadcast %cst_8 : f32 to vector<1x256xf32>
      %17 = arith.divf %15, %16 : vector<1x256xf32>
      %c0_9 = arith.constant 0 : index
      %c0_10 = arith.constant 0 : index
      %c0_11 = arith.constant 0 : index
      %18 = vector.load %arg6[%c0_9, %c0_10, %c0_11] : memref<2x4x256xf32, #tpu.memory_space<vmem>>, vector<1x4x256xf32>
      %19 = vector.shape_cast %18 : vector<1x4x256xf32> to vector<4x256xf32>
      %cst_12 = arith.constant dense<0xFF800000> : vector<256xf32>
      %20 = vector.multi_reduction <maximumf>, %19, %cst_12 [0] : vector<4x256xf32> to vector<256xf32>
      %21 = vector.shape_cast %20 : vector<256xf32> to vector<1x256xf32>
      %c1_13 = arith.constant 1 : index
      %c0_14 = arith.constant 0 : index
      %c0_15 = arith.constant 0 : index
      %22 = vector.load %arg6[%c1_13, %c0_14, %c0_15] : memref<2x4x256xf32, #tpu.memory_space<vmem>>, vector<1x4x256xf32>
      %23 = vector.shape_cast %22 : vector<1x4x256xf32> to vector<4x256xf32>
      %cst_16 = arith.constant dense<0xFF800000> : vector<256xf32>
      %24 = vector.multi_reduction <maximumf>, %23, %cst_16 [0] : vector<4x256xf32> to vector<256xf32>
      %25 = vector.shape_cast %24 : vector<256xf32> to vector<1x256xf32>
      %26 = tpu.concatenate %11, %17, %21, %25 in 0 : vector<1x256xf32>, vector<1x256xf32>, vector<1x256xf32>, vector<1x256xf32> -> vector<4x256xf32>
      %cst_17 = arith.constant 0.000000e+00 : f32
      %27 = vector.broadcast %cst_17 : f32 to vector<4x153xf32>
      %28 = tpu.concatenate %27, %26, %27 in 1 : vector<4x153xf32>, vector<4x256xf32>, vector<4x153xf32> -> vector<4x562xf32>
      %cst_18 = arith.constant 0.000000e+00 : f32
      %29 = vector.broadcast %cst_18 : f32 to vector<4x256xf32>
      %cst_19 = arith.constant 0.000000e+00 : f32
      %30 = vector.broadcast %cst_19 : f32 to vector<4x256xf32>
      %c0_20 = arith.constant 0 : index
      %c98 = arith.constant 98 : index
      %31 = vector.load %arg1[%c0_20, %c98] : memref<4x196xf32, #tpu.memory_space<vmem>>, vector<4x1xf32>
      %32 = vector.extract_strided_slice %28 {offsets = [0, 0], sizes = [4, 256], strides = [1, 1]} : vector<4x562xf32> to vector<4x256xf32>
      %33 = vector.broadcast %31 : vector<4x1xf32> to vector<4x256xf32>
      %34 = arith.mulf %33, %32 : vector<4x256xf32>
      %35 = arith.addf %30, %34 : vector<4x256xf32>
      %c0_21 = arith.constant 0 : index
      %c105 = arith.constant 105 : index
      %36 = vector.load %arg1[%c0_21, %c105] : memref<4x196xf32, #tpu.memory_space<vmem>>, vector<4x1xf32>
      %37 = vector.extract_strided_slice %28 {offsets = [0, 48], sizes = [4, 256], strides = [1, 1]} : vector<4x562xf32> to vector<4x256xf32>
      %38 = vector.broadcast %36 : vector<4x1xf32> to vector<4x256xf32>
      %39 = arith.mulf %38, %37 : vector<4x256xf32>
      %40 = arith.addf %35, %39 : vector<4x256xf32>
      %c0_22 = arith.constant 0 : index
      %c112 = arith.constant 112 : index
      %41 = vector.load %arg1[%c0_22, %c112] : memref<4x196xf32, #tpu.memory_space<vmem>>, vector<4x1xf32>
      %42 = vector.extract_strided_slice %28 {offsets = [0, 96], sizes = [4, 256], strides = [1, 1]} : vector<4x562xf32> to vector<4x256xf32>
      %43 = vector.broadcast %41 : vector<4x1xf32> to vector<4x256xf32>
      %44 = arith.mulf %43, %42 : vector<4x256xf32>
      %45 = arith.addf %40, %44 : vector<4x256xf32>
      %c0_23 = arith.constant 0 : index
      %c119 = arith.constant 119 : index
      %46 = vector.load %arg1[%c0_23, %c119] : memref<4x196xf32, #tpu.memory_space<vmem>>, vector<4x1xf32>
      %47 = vector.extract_strided_slice %28 {offsets = [0, 144], sizes = [4, 256], strides = [1, 1]} : vector<4x562xf32> to vector<4x256xf32>
      %48 = vector.broadcast %46 : vector<4x1xf32> to vector<4x256xf32>
      %49 = arith.mulf %48, %47 : vector<4x256xf32>
      %50 = arith.addf %45, %49 : vector<4x256xf32>
      %c0_24 = arith.constant 0 : index
      %c126 = arith.constant 126 : index
      %51 = vector.load %arg1[%c0_24, %c126] : memref<4x196xf32, #tpu.memory_space<vmem>>, vector<4x1xf32>
      %52 = vector.extract_strided_slice %28 {offsets = [0, 192], sizes = [4, 256], strides = [1, 1]} : vector<4x562xf32> to vector<4x256xf32>
      %53 = vector.broadcast %51 : vector<4x1xf32> to vector<4x256xf32>
      %54 = arith.mulf %53, %52 : vector<4x256xf32>
      %55 = arith.addf %50, %54 : vector<4x256xf32>
      %c0_25 = arith.constant 0 : index
      %c133 = arith.constant 133 : index
      %56 = vector.load %arg1[%c0_25, %c133] : memref<4x196xf32, #tpu.memory_space<vmem>>, vector<4x1xf32>
      %57 = vector.extract_strided_slice %28 {offsets = [0, 240], sizes = [4, 256], strides = [1, 1]} : vector<4x562xf32> to vector<4x256xf32>
      %58 = vector.broadcast %56 : vector<4x1xf32> to vector<4x256xf32>
      %59 = arith.mulf %58, %57 : vector<4x256xf32>
      %60 = arith.addf %55, %59 : vector<4x256xf32>
      %c0_26 = arith.constant 0 : index
      %c140 = arith.constant 140 : index
      %61 = vector.load %arg1[%c0_26, %c140] : memref<4x196xf32, #tpu.memory_space<vmem>>, vector<4x1xf32>
      %62 = vector.extract_strided_slice %28 {offsets = [0, 288], sizes = [4, 256], strides = [1, 1]} : vector<4x562xf32> to vector<4x256xf32>
      %63 = vector.broadcast %61 : vector<4x1xf32> to vector<4x256xf32>
      %64 = arith.mulf %63, %62 : vector<4x256xf32>
      %65 = arith.addf %60, %64 : vector<4x256xf32>
      %c14 = arith.constant 14 : index
      %c0_27 = arith.constant 0 : index
      %66 = vector.load %arg3[%c14, %c0_27] : memref<28x256xf32, #tpu.memory_space<vmem>>, vector<1x256xf32>
      %67 = vector.broadcast %66 : vector<1x256xf32> to vector<4x256xf32>
      %68 = arith.mulf %67, %65 : vector<4x256xf32>
      %69 = arith.addf %29, %68 : vector<4x256xf32>
      %cst_28 = arith.constant 0.000000e+00 : f32
      %70 = vector.broadcast %cst_28 : f32 to vector<4x256xf32>
      %c0_29 = arith.constant 0 : index
      %c99 = arith.constant 99 : index
      %71 = vector.load %arg1[%c0_29, %c99] : memref<4x196xf32, #tpu.memory_space<vmem>>, vector<4x1xf32>
      %72 = vector.extract_strided_slice %28 {offsets = [0, 3], sizes = [4, 256], strides = [1, 1]} : vector<4x562xf32> to vector<4x256xf32>
      %73 = vector.broadcast %71 : vector<4x1xf32> to vector<4x256xf32>
      %74 = arith.mulf %73, %72 : vector<4x256xf32>
      %75 = arith.addf %70, %74 : vector<4x256xf32>
      %c0_30 = arith.constant 0 : index
      %c106 = arith.constant 106 : index
      %76 = vector.load %arg1[%c0_30, %c106] : memref<4x196xf32, #tpu.memory_space<vmem>>, vector<4x1xf32>
      %77 = vector.extract_strided_slice %28 {offsets = [0, 51], sizes = [4, 256], strides = [1, 1]} : vector<4x562xf32> to vector<4x256xf32>
      %78 = vector.broadcast %76 : vector<4x1xf32> to vector<4x256xf32>
      %79 = arith.mulf %78, %77 : vector<4x256xf32>
      %80 = arith.addf %75, %79 : vector<4x256xf32>
      %c0_31 = arith.constant 0 : index
      %c113 = arith.constant 113 : index
      %81 = vector.load %arg1[%c0_31, %c113] : memref<4x196xf32, #tpu.memory_space<vmem>>, vector<4x1xf32>
      %82 = vector.extract_strided_slice %28 {offsets = [0, 99], sizes = [4, 256], strides = [1, 1]} : vector<4x562xf32> to vector<4x256xf32>
      %83 = vector.broadcast %81 : vector<4x1xf32> to vector<4x256xf32>
      %84 = arith.mulf %83, %82 : vector<4x256xf32>
      %85 = arith.addf %80, %84 : vector<4x256xf32>
      %c0_32 = arith.constant 0 : index
      %c120 = arith.constant 120 : index
      %86 = vector.load %arg1[%c0_32, %c120] : memref<4x196xf32, #tpu.memory_space<vmem>>, vector<4x1xf32>
      %87 = vector.extract_strided_slice %28 {offsets = [0, 147], sizes = [4, 256], strides = [1, 1]} : vector<4x562xf32> to vector<4x256xf32>
      %88 = vector.broadcast %86 : vector<4x1xf32> to vector<4x256xf32>
      %89 = arith.mulf %88, %87 : vector<4x256xf32>
      %90 = arith.addf %85, %89 : vector<4x256xf32>
      %c0_33 = arith.constant 0 : index
      %c127 = arith.constant 127 : index
      %91 = vector.load %arg1[%c0_33, %c127] : memref<4x196xf32, #tpu.memory_space<vmem>>, vector<4x1xf32>
      %92 = vector.extract_strided_slice %28 {offsets = [0, 195], sizes = [4, 256], strides = [1, 1]} : vector<4x562xf32> to vector<4x256xf32>
      %93 = vector.broadcast %91 : vector<4x1xf32> to vector<4x256xf32>
      %94 = arith.mulf %93, %92 : vector<4x256xf32>
      %95 = arith.addf %90, %94 : vector<4x256xf32>
      %c0_34 = arith.constant 0 : index
      %c134 = arith.constant 134 : index
      %96 = vector.load %arg1[%c0_34, %c134] : memref<4x196xf32, #tpu.memory_space<vmem>>, vector<4x1xf32>
      %97 = vector.extract_strided_slice %28 {offsets = [0, 243], sizes = [4, 256], strides = [1, 1]} : vector<4x562xf32> to vector<4x256xf32>
      %98 = vector.broadcast %96 : vector<4x1xf32> to vector<4x256xf32>
      %99 = arith.mulf %98, %97 : vector<4x256xf32>
      %100 = arith.addf %95, %99 : vector<4x256xf32>
      %c0_35 = arith.constant 0 : index
      %c141 = arith.constant 141 : index
      %101 = vector.load %arg1[%c0_35, %c141] : memref<4x196xf32, #tpu.memory_space<vmem>>, vector<4x1xf32>
      %102 = vector.extract_strided_slice %28 {offsets = [0, 291], sizes = [4, 256], strides = [1, 1]} : vector<4x562xf32> to vector<4x256xf32>
      %103 = vector.broadcast %101 : vector<4x1xf32> to vector<4x256xf32>
      %104 = arith.mulf %103, %102 : vector<4x256xf32>
      %105 = arith.addf %100, %104 : vector<4x256xf32>
      %c15 = arith.constant 15 : index
      %c0_36 = arith.constant 0 : index
      %106 = vector.load %arg3[%c15, %c0_36] : memref<28x256xf32, #tpu.memory_space<vmem>>, vector<1x256xf32>
      %107 = vector.broadcast %106 : vector<1x256xf32> to vector<4x256xf32>
      %108 = arith.mulf %107, %105 : vector<4x256xf32>
      %109 = arith.addf %69, %108 : vector<4x256xf32>
      %cst_37 = arith.constant 0.000000e+00 : f32
      %110 = vector.broadcast %cst_37 : f32 to vector<4x256xf32>
      %c0_38 = arith.constant 0 : index
      %c100 = arith.constant 100 : index
      %111 = vector.load %arg1[%c0_38, %c100] : memref<4x196xf32, #tpu.memory_space<vmem>>, vector<4x1xf32>
      %112 = vector.extract_strided_slice %28 {offsets = [0, 6], sizes = [4, 256], strides = [1, 1]} : vector<4x562xf32> to vector<4x256xf32>
      %113 = vector.broadcast %111 : vector<4x1xf32> to vector<4x256xf32>
      %114 = arith.mulf %113, %112 : vector<4x256xf32>
      %115 = arith.addf %110, %114 : vector<4x256xf32>
      %c0_39 = arith.constant 0 : index
      %c107 = arith.constant 107 : index
      %116 = vector.load %arg1[%c0_39, %c107] : memref<4x196xf32, #tpu.memory_space<vmem>>, vector<4x1xf32>
      %117 = vector.extract_strided_slice %28 {offsets = [0, 54], sizes = [4, 256], strides = [1, 1]} : vector<4x562xf32> to vector<4x256xf32>
      %118 = vector.broadcast %116 : vector<4x1xf32> to vector<4x256xf32>
      %119 = arith.mulf %118, %117 : vector<4x256xf32>
      %120 = arith.addf %115, %119 : vector<4x256xf32>
      %c0_40 = arith.constant 0 : index
      %c114 = arith.constant 114 : index
      %121 = vector.load %arg1[%c0_40, %c114] : memref<4x196xf32, #tpu.memory_space<vmem>>, vector<4x1xf32>
      %122 = vector.extract_strided_slice %28 {offsets = [0, 102], sizes = [4, 256], strides = [1, 1]} : vector<4x562xf32> to vector<4x256xf32>
      %123 = vector.broadcast %121 : vector<4x1xf32> to vector<4x256xf32>
      %124 = arith.mulf %123, %122 : vector<4x256xf32>
      %125 = arith.addf %120, %124 : vector<4x256xf32>
      %c0_41 = arith.constant 0 : index
      %c121 = arith.constant 121 : index
      %126 = vector.load %arg1[%c0_41, %c121] : memref<4x196xf32, #tpu.memory_space<vmem>>, vector<4x1xf32>
      %127 = vector.extract_strided_slice %28 {offsets = [0, 150], sizes = [4, 256], strides = [1, 1]} : vector<4x562xf32> to vector<4x256xf32>
      %128 = vector.broadcast %126 : vector<4x1xf32> to vector<4x256xf32>
      %129 = arith.mulf %128, %127 : vector<4x256xf32>
      %130 = arith.addf %125, %129 : vector<4x256xf32>
      %c0_42 = arith.constant 0 : index
      %c128 = arith.constant 128 : index
      %131 = vector.load %arg1[%c0_42, %c128] : memref<4x196xf32, #tpu.memory_space<vmem>>, vector<4x1xf32>
      %132 = vector.extract_strided_slice %28 {offsets = [0, 198], sizes = [4, 256], strides = [1, 1]} : vector<4x562xf32> to vector<4x256xf32>
      %133 = vector.broadcast %131 : vector<4x1xf32> to vector<4x256xf32>
      %134 = arith.mulf %133, %132 : vector<4x256xf32>
      %135 = arith.addf %130, %134 : vector<4x256xf32>
      %c0_43 = arith.constant 0 : index
      %c135 = arith.constant 135 : index
      %136 = vector.load %arg1[%c0_43, %c135] : memref<4x196xf32, #tpu.memory_space<vmem>>, vector<4x1xf32>
      %137 = vector.extract_strided_slice %28 {offsets = [0, 246], sizes = [4, 256], strides = [1, 1]} : vector<4x562xf32> to vector<4x256xf32>
      %138 = vector.broadcast %136 : vector<4x1xf32> to vector<4x256xf32>
      %139 = arith.mulf %138, %137 : vector<4x256xf32>
      %140 = arith.addf %135, %139 : vector<4x256xf32>
      %c0_44 = arith.constant 0 : index
      %c142 = arith.constant 142 : index
      %141 = vector.load %arg1[%c0_44, %c142] : memref<4x196xf32, #tpu.memory_space<vmem>>, vector<4x1xf32>
      %142 = vector.extract_strided_slice %28 {offsets = [0, 294], sizes = [4, 256], strides = [1, 1]} : vector<4x562xf32> to vector<4x256xf32>
      %143 = vector.broadcast %141 : vector<4x1xf32> to vector<4x256xf32>
      %144 = arith.mulf %143, %142 : vector<4x256xf32>
      %145 = arith.addf %140, %144 : vector<4x256xf32>
      %c16 = arith.constant 16 : index
      %c0_45 = arith.constant 0 : index
      %146 = vector.load %arg3[%c16, %c0_45] : memref<28x256xf32, #tpu.memory_space<vmem>>, vector<1x256xf32>
      %147 = vector.broadcast %146 : vector<1x256xf32> to vector<4x256xf32>
      %148 = arith.mulf %147, %145 : vector<4x256xf32>
      %149 = arith.addf %109, %148 : vector<4x256xf32>
      %cst_46 = arith.constant 0.000000e+00 : f32
      %150 = vector.broadcast %cst_46 : f32 to vector<4x256xf32>
      %c0_47 = arith.constant 0 : index
      %c101 = arith.constant 101 : index
      %151 = vector.load %arg1[%c0_47, %c101] : memref<4x196xf32, #tpu.memory_space<vmem>>, vector<4x1xf32>
      %152 = vector.extract_strided_slice %28 {offsets = [0, 9], sizes = [4, 256], strides = [1, 1]} : vector<4x562xf32> to vector<4x256xf32>
      %153 = vector.broadcast %151 : vector<4x1xf32> to vector<4x256xf32>
      %154 = arith.mulf %153, %152 : vector<4x256xf32>
      %155 = arith.addf %150, %154 : vector<4x256xf32>
      %c0_48 = arith.constant 0 : index
      %c108 = arith.constant 108 : index
      %156 = vector.load %arg1[%c0_48, %c108] : memref<4x196xf32, #tpu.memory_space<vmem>>, vector<4x1xf32>
      %157 = vector.extract_strided_slice %28 {offsets = [0, 57], sizes = [4, 256], strides = [1, 1]} : vector<4x562xf32> to vector<4x256xf32>
      %158 = vector.broadcast %156 : vector<4x1xf32> to vector<4x256xf32>
      %159 = arith.mulf %158, %157 : vector<4x256xf32>
      %160 = arith.addf %155, %159 : vector<4x256xf32>
      %c0_49 = arith.constant 0 : index
      %c115 = arith.constant 115 : index
      %161 = vector.load %arg1[%c0_49, %c115] : memref<4x196xf32, #tpu.memory_space<vmem>>, vector<4x1xf32>
      %162 = vector.extract_strided_slice %28 {offsets = [0, 105], sizes = [4, 256], strides = [1, 1]} : vector<4x562xf32> to vector<4x256xf32>
      %163 = vector.broadcast %161 : vector<4x1xf32> to vector<4x256xf32>
      %164 = arith.mulf %163, %162 : vector<4x256xf32>
      %165 = arith.addf %160, %164 : vector<4x256xf32>
      %c0_50 = arith.constant 0 : index
      %c122 = arith.constant 122 : index
      %166 = vector.load %arg1[%c0_50, %c122] : memref<4x196xf32, #tpu.memory_space<vmem>>, vector<4x1xf32>
      %167 = vector.extract_strided_slice %28 {offsets = [0, 153], sizes = [4, 256], strides = [1, 1]} : vector<4x562xf32> to vector<4x256xf32>
      %168 = vector.broadcast %166 : vector<4x1xf32> to vector<4x256xf32>
      %169 = arith.mulf %168, %167 : vector<4x256xf32>
      %170 = arith.addf %165, %169 : vector<4x256xf32>
      %c0_51 = arith.constant 0 : index
      %c129 = arith.constant 129 : index
      %171 = vector.load %arg1[%c0_51, %c129] : memref<4x196xf32, #tpu.memory_space<vmem>>, vector<4x1xf32>
      %172 = vector.extract_strided_slice %28 {offsets = [0, 201], sizes = [4, 256], strides = [1, 1]} : vector<4x562xf32> to vector<4x256xf32>
      %173 = vector.broadcast %171 : vector<4x1xf32> to vector<4x256xf32>
      %174 = arith.mulf %173, %172 : vector<4x256xf32>
      %175 = arith.addf %170, %174 : vector<4x256xf32>
      %c0_52 = arith.constant 0 : index
      %c136 = arith.constant 136 : index
      %176 = vector.load %arg1[%c0_52, %c136] : memref<4x196xf32, #tpu.memory_space<vmem>>, vector<4x1xf32>
      %177 = vector.extract_strided_slice %28 {offsets = [0, 249], sizes = [4, 256], strides = [1, 1]} : vector<4x562xf32> to vector<4x256xf32>
      %178 = vector.broadcast %176 : vector<4x1xf32> to vector<4x256xf32>
      %179 = arith.mulf %178, %177 : vector<4x256xf32>
      %180 = arith.addf %175, %179 : vector<4x256xf32>
      %c0_53 = arith.constant 0 : index
      %c143 = arith.constant 143 : index
      %181 = vector.load %arg1[%c0_53, %c143] : memref<4x196xf32, #tpu.memory_space<vmem>>, vector<4x1xf32>
      %182 = vector.extract_strided_slice %28 {offsets = [0, 297], sizes = [4, 256], strides = [1, 1]} : vector<4x562xf32> to vector<4x256xf32>
      %183 = vector.broadcast %181 : vector<4x1xf32> to vector<4x256xf32>
      %184 = arith.mulf %183, %182 : vector<4x256xf32>
      %185 = arith.addf %180, %184 : vector<4x256xf32>
      %c17 = arith.constant 17 : index
      %c0_54 = arith.constant 0 : index
      %186 = vector.load %arg3[%c17, %c0_54] : memref<28x256xf32, #tpu.memory_space<vmem>>, vector<1x256xf32>
      %187 = vector.broadcast %186 : vector<1x256xf32> to vector<4x256xf32>
      %188 = arith.mulf %187, %185 : vector<4x256xf32>
      %189 = arith.addf %149, %188 : vector<4x256xf32>
      %cst_55 = arith.constant 0.000000e+00 : f32
      %190 = vector.broadcast %cst_55 : f32 to vector<4x256xf32>
      %c0_56 = arith.constant 0 : index
      %c102 = arith.constant 102 : index
      %191 = vector.load %arg1[%c0_56, %c102] : memref<4x196xf32, #tpu.memory_space<vmem>>, vector<4x1xf32>
      %192 = vector.extract_strided_slice %28 {offsets = [0, 12], sizes = [4, 256], strides = [1, 1]} : vector<4x562xf32> to vector<4x256xf32>
      %193 = vector.broadcast %191 : vector<4x1xf32> to vector<4x256xf32>
      %194 = arith.mulf %193, %192 : vector<4x256xf32>
      %195 = arith.addf %190, %194 : vector<4x256xf32>
      %c0_57 = arith.constant 0 : index
      %c109 = arith.constant 109 : index
      %196 = vector.load %arg1[%c0_57, %c109] : memref<4x196xf32, #tpu.memory_space<vmem>>, vector<4x1xf32>
      %197 = vector.extract_strided_slice %28 {offsets = [0, 60], sizes = [4, 256], strides = [1, 1]} : vector<4x562xf32> to vector<4x256xf32>
      %198 = vector.broadcast %196 : vector<4x1xf32> to vector<4x256xf32>
      %199 = arith.mulf %198, %197 : vector<4x256xf32>
      %200 = arith.addf %195, %199 : vector<4x256xf32>
      %c0_58 = arith.constant 0 : index
      %c116 = arith.constant 116 : index
      %201 = vector.load %arg1[%c0_58, %c116] : memref<4x196xf32, #tpu.memory_space<vmem>>, vector<4x1xf32>
      %202 = vector.extract_strided_slice %28 {offsets = [0, 108], sizes = [4, 256], strides = [1, 1]} : vector<4x562xf32> to vector<4x256xf32>
      %203 = vector.broadcast %201 : vector<4x1xf32> to vector<4x256xf32>
      %204 = arith.mulf %203, %202 : vector<4x256xf32>
      %205 = arith.addf %200, %204 : vector<4x256xf32>
      %c0_59 = arith.constant 0 : index
      %c123 = arith.constant 123 : index
      %206 = vector.load %arg1[%c0_59, %c123] : memref<4x196xf32, #tpu.memory_space<vmem>>, vector<4x1xf32>
      %207 = vector.extract_strided_slice %28 {offsets = [0, 156], sizes = [4, 256], strides = [1, 1]} : vector<4x562xf32> to vector<4x256xf32>
      %208 = vector.broadcast %206 : vector<4x1xf32> to vector<4x256xf32>
      %209 = arith.mulf %208, %207 : vector<4x256xf32>
      %210 = arith.addf %205, %209 : vector<4x256xf32>
      %c0_60 = arith.constant 0 : index
      %c130 = arith.constant 130 : index
      %211 = vector.load %arg1[%c0_60, %c130] : memref<4x196xf32, #tpu.memory_space<vmem>>, vector<4x1xf32>
      %212 = vector.extract_strided_slice %28 {offsets = [0, 204], sizes = [4, 256], strides = [1, 1]} : vector<4x562xf32> to vector<4x256xf32>
      %213 = vector.broadcast %211 : vector<4x1xf32> to vector<4x256xf32>
      %214 = arith.mulf %213, %212 : vector<4x256xf32>
      %215 = arith.addf %210, %214 : vector<4x256xf32>
      %c0_61 = arith.constant 0 : index
      %c137 = arith.constant 137 : index
      %216 = vector.load %arg1[%c0_61, %c137] : memref<4x196xf32, #tpu.memory_space<vmem>>, vector<4x1xf32>
      %217 = vector.extract_strided_slice %28 {offsets = [0, 252], sizes = [4, 256], strides = [1, 1]} : vector<4x562xf32> to vector<4x256xf32>
      %218 = vector.broadcast %216 : vector<4x1xf32> to vector<4x256xf32>
      %219 = arith.mulf %218, %217 : vector<4x256xf32>
      %220 = arith.addf %215, %219 : vector<4x256xf32>
      %c0_62 = arith.constant 0 : index
      %c144 = arith.constant 144 : index
      %221 = vector.load %arg1[%c0_62, %c144] : memref<4x196xf32, #tpu.memory_space<vmem>>, vector<4x1xf32>
      %222 = vector.extract_strided_slice %28 {offsets = [0, 300], sizes = [4, 256], strides = [1, 1]} : vector<4x562xf32> to vector<4x256xf32>
      %223 = vector.broadcast %221 : vector<4x1xf32> to vector<4x256xf32>
      %224 = arith.mulf %223, %222 : vector<4x256xf32>
      %225 = arith.addf %220, %224 : vector<4x256xf32>
      %c18 = arith.constant 18 : index
      %c0_63 = arith.constant 0 : index
      %226 = vector.load %arg3[%c18, %c0_63] : memref<28x256xf32, #tpu.memory_space<vmem>>, vector<1x256xf32>
      %227 = vector.broadcast %226 : vector<1x256xf32> to vector<4x256xf32>
      %228 = arith.mulf %227, %225 : vector<4x256xf32>
      %229 = arith.addf %189, %228 : vector<4x256xf32>
      %cst_64 = arith.constant 0.000000e+00 : f32
      %230 = vector.broadcast %cst_64 : f32 to vector<4x256xf32>
      %c0_65 = arith.constant 0 : index
      %c103 = arith.constant 103 : index
      %231 = vector.load %arg1[%c0_65, %c103] : memref<4x196xf32, #tpu.memory_space<vmem>>, vector<4x1xf32>
      %232 = vector.extract_strided_slice %28 {offsets = [0, 15], sizes = [4, 256], strides = [1, 1]} : vector<4x562xf32> to vector<4x256xf32>
      %233 = vector.broadcast %231 : vector<4x1xf32> to vector<4x256xf32>
      %234 = arith.mulf %233, %232 : vector<4x256xf32>
      %235 = arith.addf %230, %234 : vector<4x256xf32>
      %c0_66 = arith.constant 0 : index
      %c110 = arith.constant 110 : index
      %236 = vector.load %arg1[%c0_66, %c110] : memref<4x196xf32, #tpu.memory_space<vmem>>, vector<4x1xf32>
      %237 = vector.extract_strided_slice %28 {offsets = [0, 63], sizes = [4, 256], strides = [1, 1]} : vector<4x562xf32> to vector<4x256xf32>
      %238 = vector.broadcast %236 : vector<4x1xf32> to vector<4x256xf32>
      %239 = arith.mulf %238, %237 : vector<4x256xf32>
      %240 = arith.addf %235, %239 : vector<4x256xf32>
      %c0_67 = arith.constant 0 : index
      %c117 = arith.constant 117 : index
      %241 = vector.load %arg1[%c0_67, %c117] : memref<4x196xf32, #tpu.memory_space<vmem>>, vector<4x1xf32>
      %242 = vector.extract_strided_slice %28 {offsets = [0, 111], sizes = [4, 256], strides = [1, 1]} : vector<4x562xf32> to vector<4x256xf32>
      %243 = vector.broadcast %241 : vector<4x1xf32> to vector<4x256xf32>
      %244 = arith.mulf %243, %242 : vector<4x256xf32>
      %245 = arith.addf %240, %244 : vector<4x256xf32>
      %c0_68 = arith.constant 0 : index
      %c124 = arith.constant 124 : index
      %246 = vector.load %arg1[%c0_68, %c124] : memref<4x196xf32, #tpu.memory_space<vmem>>, vector<4x1xf32>
      %247 = vector.extract_strided_slice %28 {offsets = [0, 159], sizes = [4, 256], strides = [1, 1]} : vector<4x562xf32> to vector<4x256xf32>
      %248 = vector.broadcast %246 : vector<4x1xf32> to vector<4x256xf32>
      %249 = arith.mulf %248, %247 : vector<4x256xf32>
      %250 = arith.addf %245, %249 : vector<4x256xf32>
      %c0_69 = arith.constant 0 : index
      %c131 = arith.constant 131 : index
      %251 = vector.load %arg1[%c0_69, %c131] : memref<4x196xf32, #tpu.memory_space<vmem>>, vector<4x1xf32>
      %252 = vector.extract_strided_slice %28 {offsets = [0, 207], sizes = [4, 256], strides = [1, 1]} : vector<4x562xf32> to vector<4x256xf32>
      %253 = vector.broadcast %251 : vector<4x1xf32> to vector<4x256xf32>
      %254 = arith.mulf %253, %252 : vector<4x256xf32>
      %255 = arith.addf %250, %254 : vector<4x256xf32>
      %c0_70 = arith.constant 0 : index
      %c138 = arith.constant 138 : index
      %256 = vector.load %arg1[%c0_70, %c138] : memref<4x196xf32, #tpu.memory_space<vmem>>, vector<4x1xf32>
      %257 = vector.extract_strided_slice %28 {offsets = [0, 255], sizes = [4, 256], strides = [1, 1]} : vector<4x562xf32> to vector<4x256xf32>
      %258 = vector.broadcast %256 : vector<4x1xf32> to vector<4x256xf32>
      %259 = arith.mulf %258, %257 : vector<4x256xf32>
      %260 = arith.addf %255, %259 : vector<4x256xf32>
      %c0_71 = arith.constant 0 : index
      %c145 = arith.constant 145 : index
      %261 = vector.load %arg1[%c0_71, %c145] : memref<4x196xf32, #tpu.memory_space<vmem>>, vector<4x1xf32>
      %262 = vector.extract_strided_slice %28 {offsets = [0, 303], sizes = [4, 256], strides = [1, 1]} : vector<4x562xf32> to vector<4x256xf32>
      %263 = vector.broadcast %261 : vector<4x1xf32> to vector<4x256xf32>
      %264 = arith.mulf %263, %262 : vector<4x256xf32>
      %265 = arith.addf %260, %264 : vector<4x256xf32>
      %c19 = arith.constant 19 : index
      %c0_72 = arith.constant 0 : index
      %266 = vector.load %arg3[%c19, %c0_72] : memref<28x256xf32, #tpu.memory_space<vmem>>, vector<1x256xf32>
      %267 = vector.broadcast %266 : vector<1x256xf32> to vector<4x256xf32>
      %268 = arith.mulf %267, %265 : vector<4x256xf32>
      %269 = arith.addf %229, %268 : vector<4x256xf32>
      %cst_73 = arith.constant 0.000000e+00 : f32
      %270 = vector.broadcast %cst_73 : f32 to vector<4x256xf32>
      %c0_74 = arith.constant 0 : index
      %c104 = arith.constant 104 : index
      %271 = vector.load %arg1[%c0_74, %c104] : memref<4x196xf32, #tpu.memory_space<vmem>>, vector<4x1xf32>
      %272 = vector.extract_strided_slice %28 {offsets = [0, 18], sizes = [4, 256], strides = [1, 1]} : vector<4x562xf32> to vector<4x256xf32>
      %273 = vector.broadcast %271 : vector<4x1xf32> to vector<4x256xf32>
      %274 = arith.mulf %273, %272 : vector<4x256xf32>
      %275 = arith.addf %270, %274 : vector<4x256xf32>
      %c0_75 = arith.constant 0 : index
      %c111 = arith.constant 111 : index
      %276 = vector.load %arg1[%c0_75, %c111] : memref<4x196xf32, #tpu.memory_space<vmem>>, vector<4x1xf32>
      %277 = vector.extract_strided_slice %28 {offsets = [0, 66], sizes = [4, 256], strides = [1, 1]} : vector<4x562xf32> to vector<4x256xf32>
      %278 = vector.broadcast %276 : vector<4x1xf32> to vector<4x256xf32>
      %279 = arith.mulf %278, %277 : vector<4x256xf32>
      %280 = arith.addf %275, %279 : vector<4x256xf32>
      %c0_76 = arith.constant 0 : index
      %c118 = arith.constant 118 : index
      %281 = vector.load %arg1[%c0_76, %c118] : memref<4x196xf32, #tpu.memory_space<vmem>>, vector<4x1xf32>
      %282 = vector.extract_strided_slice %28 {offsets = [0, 114], sizes = [4, 256], strides = [1, 1]} : vector<4x562xf32> to vector<4x256xf32>
      %283 = vector.broadcast %281 : vector<4x1xf32> to vector<4x256xf32>
      %284 = arith.mulf %283, %282 : vector<4x256xf32>
      %285 = arith.addf %280, %284 : vector<4x256xf32>
      %c0_77 = arith.constant 0 : index
      %c125 = arith.constant 125 : index
      %286 = vector.load %arg1[%c0_77, %c125] : memref<4x196xf32, #tpu.memory_space<vmem>>, vector<4x1xf32>
      %287 = vector.extract_strided_slice %28 {offsets = [0, 162], sizes = [4, 256], strides = [1, 1]} : vector<4x562xf32> to vector<4x256xf32>
      %288 = vector.broadcast %286 : vector<4x1xf32> to vector<4x256xf32>
      %289 = arith.mulf %288, %287 : vector<4x256xf32>
      %290 = arith.addf %285, %289 : vector<4x256xf32>
      %c0_78 = arith.constant 0 : index
      %c132 = arith.constant 132 : index
      %291 = vector.load %arg1[%c0_78, %c132] : memref<4x196xf32, #tpu.memory_space<vmem>>, vector<4x1xf32>
      %292 = vector.extract_strided_slice %28 {offsets = [0, 210], sizes = [4, 256], strides = [1, 1]} : vector<4x562xf32> to vector<4x256xf32>
      %293 = vector.broadcast %291 : vector<4x1xf32> to vector<4x256xf32>
      %294 = arith.mulf %293, %292 : vector<4x256xf32>
      %295 = arith.addf %290, %294 : vector<4x256xf32>
      %c0_79 = arith.constant 0 : index
      %c139 = arith.constant 139 : index
      %296 = vector.load %arg1[%c0_79, %c139] : memref<4x196xf32, #tpu.memory_space<vmem>>, vector<4x1xf32>
      %297 = vector.extract_strided_slice %28 {offsets = [0, 258], sizes = [4, 256], strides = [1, 1]} : vector<4x562xf32> to vector<4x256xf32>
      %298 = vector.broadcast %296 : vector<4x1xf32> to vector<4x256xf32>
      %299 = arith.mulf %298, %297 : vector<4x256xf32>
      %300 = arith.addf %295, %299 : vector<4x256xf32>
      %c0_80 = arith.constant 0 : index
      %c146 = arith.constant 146 : index
      %301 = vector.load %arg1[%c0_80, %c146] : memref<4x196xf32, #tpu.memory_space<vmem>>, vector<4x1xf32>
      %302 = vector.extract_strided_slice %28 {offsets = [0, 306], sizes = [4, 256], strides = [1, 1]} : vector<4x562xf32> to vector<4x256xf32>
      %303 = vector.broadcast %301 : vector<4x1xf32> to vector<4x256xf32>
      %304 = arith.mulf %303, %302 : vector<4x256xf32>
      %305 = arith.addf %300, %304 : vector<4x256xf32>
      %c20 = arith.constant 20 : index
      %c0_81 = arith.constant 0 : index
      %306 = vector.load %arg3[%c20, %c0_81] : memref<28x256xf32, #tpu.memory_space<vmem>>, vector<1x256xf32>
      %307 = vector.broadcast %306 : vector<1x256xf32> to vector<4x256xf32>
      %308 = arith.mulf %307, %305 : vector<4x256xf32>
      %309 = arith.addf %269, %308 : vector<4x256xf32>
      %c2 = arith.constant 2 : index
      %310 = memref.load %arg2[%c2] : memref<4xf32, #tpu.memory_space<smem>>
      %311 = vector.extract_strided_slice %309 {offsets = [0, 0], sizes = [1, 256], strides = [1, 1]} : vector<4x256xf32> to vector<1x256xf32>
      %312 = vector.extract_strided_slice %309 {offsets = [2, 0], sizes = [1, 256], strides = [1, 1]} : vector<4x256xf32> to vector<1x256xf32>
      %313 = arith.addf %311, %312 : vector<1x256xf32>
      %314 = vector.broadcast %310 : f32 to vector<1x256xf32>
      %315 = arith.addf %313, %314 : vector<1x256xf32>
      %316 = arith.negf %315 : vector<1x256xf32>
      %317 = math.exp %316 : vector<1x256xf32>
      %cst_82 = arith.constant 1.000000e+00 : f32
      %318 = vector.broadcast %cst_82 : f32 to vector<1x256xf32>
      %319 = arith.addf %318, %317 : vector<1x256xf32>
      %320 = arith.divf %318, %319 : vector<1x256xf32>
      %c0_83 = arith.constant 0 : index
      %c0_84 = arith.constant 0 : index
      %c0_85 = arith.constant 0 : index
      %321 = vector.load %arg6[%c0_83, %c0_84, %c0_85] : memref<2x4x256xf32, #tpu.memory_space<vmem>>, vector<1x4x256xf32>
      %322 = vector.shape_cast %321 : vector<1x4x256xf32> to vector<4x256xf32>
      %323 = vector.broadcast %320 : vector<1x256xf32> to vector<4x256xf32>
      %324 = arith.mulf %323, %322 : vector<4x256xf32>
      %c0_86 = arith.constant 0 : index
      %c0_87 = arith.constant 0 : index
      %c0_88 = arith.constant 0 : index
      %c0_89 = arith.constant 0 : index
      %325 = vector.load %arg8[%c0_86, %c0_87, %c0_88, %c0_89] : memref<2x2x4x256xf32, #tpu.memory_space<vmem>>, vector<1x1x4x256xf32>
      %326 = vector.shape_cast %325 : vector<1x1x4x256xf32> to vector<4x256xf32>
      %327 = vector.shape_cast %324 : vector<4x256xf32> to vector<1x1x4x256xf32>
      tpu.vector_store %arg8[%c0_86, %c0_87, %c0_88, %c0_89], %327 {strides = array<i32>} : memref<2x2x4x256xf32, #tpu.memory_space<vmem>>, vector<1x1x4x256xf32>,
      %328 = vector.extract_strided_slice %309 {offsets = [1, 0], sizes = [1, 256], strides = [1, 1]} : vector<4x256xf32> to vector<1x256xf32>
      %329 = vector.extract_strided_slice %309 {offsets = [3, 0], sizes = [1, 256], strides = [1, 1]} : vector<4x256xf32> to vector<1x256xf32>
      %330 = arith.addf %328, %329 : vector<1x256xf32>
      %331 = vector.broadcast %310 : f32 to vector<1x256xf32>
      %332 = arith.addf %330, %331 : vector<1x256xf32>
      %333 = arith.negf %332 : vector<1x256xf32>
      %334 = math.exp %333 : vector<1x256xf32>
      %cst_90 = arith.constant 1.000000e+00 : f32
      %335 = vector.broadcast %cst_90 : f32 to vector<1x256xf32>
      %336 = arith.addf %335, %334 : vector<1x256xf32>
      %337 = arith.divf %335, %336 : vector<1x256xf32>
      %c1_91 = arith.constant 1 : index
      %c0_92 = arith.constant 0 : index
      %c0_93 = arith.constant 0 : index
      %338 = vector.load %arg6[%c1_91, %c0_92, %c0_93] : memref<2x4x256xf32, #tpu.memory_space<vmem>>, vector<1x4x256xf32>
      %339 = vector.shape_cast %338 : vector<1x4x256xf32> to vector<4x256xf32>
      %340 = vector.broadcast %337 : vector<1x256xf32> to vector<4x256xf32>
      %341 = arith.mulf %340, %339 : vector<4x256xf32>
      %c0_94 = arith.constant 0 : index
      %c1_95 = arith.constant 1 : index
      %c0_96 = arith.constant 0 : index
      %c0_97 = arith.constant 0 : index
      %342 = vector.load %arg8[%c0_94, %c1_95, %c0_96, %c0_97] : memref<2x2x4x256xf32, #tpu.memory_space<vmem>>, vector<1x1x4x256xf32>
      %343 = vector.shape_cast %342 : vector<1x1x4x256xf32> to vector<4x256xf32>
      %344 = vector.shape_cast %341 : vector<4x256xf32> to vector<1x1x4x256xf32>
      tpu.vector_store %arg8[%c0_94, %c1_95, %c0_96, %c0_97], %344 {strides = array<i32>} : memref<2x2x4x256xf32, #tpu.memory_space<vmem>>, vector<1x1x4x256xf32>,
      %c0_98 = arith.constant 0 : index
      %c0_99 = arith.constant 0 : index
      %c0_100 = arith.constant 0 : index
      %345 = vector.load %arg7[%c0_98, %c0_99, %c0_100] : memref<2x4x256xf32, #tpu.memory_space<vmem>>, vector<1x4x256xf32>
      %346 = vector.shape_cast %345 : vector<1x4x256xf32> to vector<4x256xf32>
      %cst_101 = arith.constant dense<0.000000e+00> : vector<256xf32>
      %347 = vector.multi_reduction <add>, %346, %cst_101 [0] : vector<4x256xf32> to vector<256xf32>
      %348 = vector.shape_cast %347 : vector<256xf32> to vector<1x256xf32>
      %cst_102 = arith.constant 4.000000e+00 : f32
      %349 = vector.broadcast %cst_102 : f32 to vector<1x256xf32>
      %350 = arith.divf %348, %349 : vector<1x256xf32>
      %c1_103 = arith.constant 1 : index
      %c0_104 = arith.constant 0 : index
      %c0_105 = arith.constant 0 : index
      %351 = vector.load %arg7[%c1_103, %c0_104, %c0_105] : memref<2x4x256xf32, #tpu.memory_space<vmem>>, vector<1x4x256xf32>
      %352 = vector.shape_cast %351 : vector<1x4x256xf32> to vector<4x256xf32>
      %cst_106 = arith.constant dense<0.000000e+00> : vector<256xf32>
      %353 = vector.multi_reduction <add>, %352, %cst_106 [0] : vector<4x256xf32> to vector<256xf32>
      %354 = vector.shape_cast %353 : vector<256xf32> to vector<1x256xf32>
      %cst_107 = arith.constant 4.000000e+00 : f32
      %355 = vector.broadcast %cst_107 : f32 to vector<1x256xf32>
      %356 = arith.divf %354, %355 : vector<1x256xf32>
      %c0_108 = arith.constant 0 : index
      %c0_109 = arith.constant 0 : index
      %c0_110 = arith.constant 0 : index
      %357 = vector.load %arg7[%c0_108, %c0_109, %c0_110] : memref<2x4x256xf32, #tpu.memory_space<vmem>>, vector<1x4x256xf32>
      %358 = vector.shape_cast %357 : vector<1x4x256xf32> to vector<4x256xf32>
      %cst_111 = arith.constant dense<0xFF800000> : vector<256xf32>
      %359 = vector.multi_reduction <maximumf>, %358, %cst_111 [0] : vector<4x256xf32> to vector<256xf32>
      %360 = vector.shape_cast %359 : vector<256xf32> to vector<1x256xf32>
      %c1_112 = arith.constant 1 : index
      %c0_113 = arith.constant 0 : index
      %c0_114 = arith.constant 0 : index
      %361 = vector.load %arg7[%c1_112, %c0_113, %c0_114] : memref<2x4x256xf32, #tpu.memory_space<vmem>>, vector<1x4x256xf32>
      %362 = vector.shape_cast %361 : vector<1x4x256xf32> to vector<4x256xf32>
      %cst_115 = arith.constant dense<0xFF800000> : vector<256xf32>
      %363 = vector.multi_reduction <maximumf>, %362, %cst_115 [0] : vector<4x256xf32> to vector<256xf32>
      %364 = vector.shape_cast %363 : vector<256xf32> to vector<1x256xf32>
      %365 = tpu.concatenate %350, %356, %360, %364 in 0 : vector<1x256xf32>, vector<1x256xf32>, vector<1x256xf32>, vector<1x256xf32> -> vector<4x256xf32>
      %cst_116 = arith.constant 0.000000e+00 : f32
      %366 = vector.broadcast %cst_116 : f32 to vector<4x204xf32>
      %367 = tpu.concatenate %366, %365, %366 in 1 : vector<4x204xf32>, vector<4x256xf32>, vector<4x204xf32> -> vector<4x664xf32>
      %cst_117 = arith.constant 0.000000e+00 : f32
      %368 = vector.broadcast %cst_117 : f32 to vector<4x256xf32>
      %cst_118 = arith.constant 0.000000e+00 : f32
      %369 = vector.broadcast %cst_118 : f32 to vector<4x256xf32>
      %c0_119 = arith.constant 0 : index
      %c147 = arith.constant 147 : index
      %370 = vector.load %arg1[%c0_119, %c147] : memref<4x196xf32, #tpu.memory_space<vmem>>, vector<4x1xf32>
      %371 = vector.extract_strided_slice %367 {offsets = [0, 0], sizes = [4, 256], strides = [1, 1]} : vector<4x664xf32> to vector<4x256xf32>
      %372 = vector.broadcast %370 : vector<4x1xf32> to vector<4x256xf32>
      %373 = arith.mulf %372, %371 : vector<4x256xf32>
      %374 = arith.addf %369, %373 : vector<4x256xf32>
      %c0_120 = arith.constant 0 : index
      %c154 = arith.constant 154 : index
      %375 = vector.load %arg1[%c0_120, %c154] : memref<4x196xf32, #tpu.memory_space<vmem>>, vector<4x1xf32>
      %376 = vector.extract_strided_slice %367 {offsets = [0, 64], sizes = [4, 256], strides = [1, 1]} : vector<4x664xf32> to vector<4x256xf32>
      %377 = vector.broadcast %375 : vector<4x1xf32> to vector<4x256xf32>
      %378 = arith.mulf %377, %376 : vector<4x256xf32>
      %379 = arith.addf %374, %378 : vector<4x256xf32>
      %c0_121 = arith.constant 0 : index
      %c161 = arith.constant 161 : index
      %380 = vector.load %arg1[%c0_121, %c161] : memref<4x196xf32, #tpu.memory_space<vmem>>, vector<4x1xf32>
      %381 = vector.extract_strided_slice %367 {offsets = [0, 128], sizes = [4, 256], strides = [1, 1]} : vector<4x664xf32> to vector<4x256xf32>
      %382 = vector.broadcast %380 : vector<4x1xf32> to vector<4x256xf32>
      %383 = arith.mulf %382, %381 : vector<4x256xf32>
      %384 = arith.addf %379, %383 : vector<4x256xf32>
      %c0_122 = arith.constant 0 : index
      %c168 = arith.constant 168 : index
      %385 = vector.load %arg1[%c0_122, %c168] : memref<4x196xf32, #tpu.memory_space<vmem>>, vector<4x1xf32>
      %386 = vector.extract_strided_slice %367 {offsets = [0, 192], sizes = [4, 256], strides = [1, 1]} : vector<4x664xf32> to vector<4x256xf32>
      %387 = vector.broadcast %385 : vector<4x1xf32> to vector<4x256xf32>
      %388 = arith.mulf %387, %386 : vector<4x256xf32>
      %389 = arith.addf %384, %388 : vector<4x256xf32>
      %c0_123 = arith.constant 0 : index
      %c175 = arith.constant 175 : index
      %390 = vector.load %arg1[%c0_123, %c175] : memref<4x196xf32, #tpu.memory_space<vmem>>, vector<4x1xf32>
      %391 = vector.extract_strided_slice %367 {offsets = [0, 256], sizes = [4, 256], strides = [1, 1]} : vector<4x664xf32> to vector<4x256xf32>
      %392 = vector.broadcast %390 : vector<4x1xf32> to vector<4x256xf32>
      %393 = arith.mulf %392, %391 : vector<4x256xf32>
      %394 = arith.addf %389, %393 : vector<4x256xf32>
      %c0_124 = arith.constant 0 : index
      %c182 = arith.constant 182 : index
      %395 = vector.load %arg1[%c0_124, %c182] : memref<4x196xf32, #tpu.memory_space<vmem>>, vector<4x1xf32>
      %396 = vector.extract_strided_slice %367 {offsets = [0, 320], sizes = [4, 256], strides = [1, 1]} : vector<4x664xf32> to vector<4x256xf32>
      %397 = vector.broadcast %395 : vector<4x1xf32> to vector<4x256xf32>
      %398 = arith.mulf %397, %396 : vector<4x256xf32>
      %399 = arith.addf %394, %398 : vector<4x256xf32>
      %c0_125 = arith.constant 0 : index
      %c189 = arith.constant 189 : index
      %400 = vector.load %arg1[%c0_125, %c189] : memref<4x196xf32, #tpu.memory_space<vmem>>, vector<4x1xf32>
      %401 = vector.extract_strided_slice %367 {offsets = [0, 384], sizes = [4, 256], strides = [1, 1]} : vector<4x664xf32> to vector<4x256xf32>
      %402 = vector.broadcast %400 : vector<4x1xf32> to vector<4x256xf32>
      %403 = arith.mulf %402, %401 : vector<4x256xf32>
      %404 = arith.addf %399, %403 : vector<4x256xf32>
      %c21 = arith.constant 21 : index
      %c0_126 = arith.constant 0 : index
      %405 = vector.load %arg3[%c21, %c0_126] : memref<28x256xf32, #tpu.memory_space<vmem>>, vector<1x256xf32>
      %406 = vector.broadcast %405 : vector<1x256xf32> to vector<4x256xf32>
      %407 = arith.mulf %406, %404 : vector<4x256xf32>
      %408 = arith.addf %368, %407 : vector<4x256xf32>
      %cst_127 = arith.constant 0.000000e+00 : f32
      %409 = vector.broadcast %cst_127 : f32 to vector<4x256xf32>
      %c0_128 = arith.constant 0 : index
      %c148 = arith.constant 148 : index
      %410 = vector.load %arg1[%c0_128, %c148] : memref<4x196xf32, #tpu.memory_space<vmem>>, vector<4x1xf32>
      %411 = vector.extract_strided_slice %367 {offsets = [0, 4], sizes = [4, 256], strides = [1, 1]} : vector<4x664xf32> to vector<4x256xf32>
      %412 = vector.broadcast %410 : vector<4x1xf32> to vector<4x256xf32>
      %413 = arith.mulf %412, %411 : vector<4x256xf32>
      %414 = arith.addf %409, %413 : vector<4x256xf32>
      %c0_129 = arith.constant 0 : index
      %c155 = arith.constant 155 : index
      %415 = vector.load %arg1[%c0_129, %c155] : memref<4x196xf32, #tpu.memory_space<vmem>>, vector<4x1xf32>
      %416 = vector.extract_strided_slice %367 {offsets = [0, 68], sizes = [4, 256], strides = [1, 1]} : vector<4x664xf32> to vector<4x256xf32>
      %417 = vector.broadcast %415 : vector<4x1xf32> to vector<4x256xf32>
      %418 = arith.mulf %417, %416 : vector<4x256xf32>
      %419 = arith.addf %414, %418 : vector<4x256xf32>
      %c0_130 = arith.constant 0 : index
      %c162 = arith.constant 162 : index
      %420 = vector.load %arg1[%c0_130, %c162] : memref<4x196xf32, #tpu.memory_space<vmem>>, vector<4x1xf32>
      %421 = vector.extract_strided_slice %367 {offsets = [0, 132], sizes = [4, 256], strides = [1, 1]} : vector<4x664xf32> to vector<4x256xf32>
      %422 = vector.broadcast %420 : vector<4x1xf32> to vector<4x256xf32>
      %423 = arith.mulf %422, %421 : vector<4x256xf32>
      %424 = arith.addf %419, %423 : vector<4x256xf32>
      %c0_131 = arith.constant 0 : index
      %c169 = arith.constant 169 : index
      %425 = vector.load %arg1[%c0_131, %c169] : memref<4x196xf32, #tpu.memory_space<vmem>>, vector<4x1xf32>
      %426 = vector.extract_strided_slice %367 {offsets = [0, 196], sizes = [4, 256], strides = [1, 1]} : vector<4x664xf32> to vector<4x256xf32>
      %427 = vector.broadcast %425 : vector<4x1xf32> to vector<4x256xf32>
      %428 = arith.mulf %427, %426 : vector<4x256xf32>
      %429 = arith.addf %424, %428 : vector<4x256xf32>
      %c0_132 = arith.constant 0 : index
      %c176 = arith.constant 176 : index
      %430 = vector.load %arg1[%c0_132, %c176] : memref<4x196xf32, #tpu.memory_space<vmem>>, vector<4x1xf32>
      %431 = vector.extract_strided_slice %367 {offsets = [0, 260], sizes = [4, 256], strides = [1, 1]} : vector<4x664xf32> to vector<4x256xf32>
      %432 = vector.broadcast %430 : vector<4x1xf32> to vector<4x256xf32>
      %433 = arith.mulf %432, %431 : vector<4x256xf32>
      %434 = arith.addf %429, %433 : vector<4x256xf32>
      %c0_133 = arith.constant 0 : index
      %c183 = arith.constant 183 : index
      %435 = vector.load %arg1[%c0_133, %c183] : memref<4x196xf32, #tpu.memory_space<vmem>>, vector<4x1xf32>
      %436 = vector.extract_strided_slice %367 {offsets = [0, 324], sizes = [4, 256], strides = [1, 1]} : vector<4x664xf32> to vector<4x256xf32>
      %437 = vector.broadcast %435 : vector<4x1xf32> to vector<4x256xf32>
      %438 = arith.mulf %437, %436 : vector<4x256xf32>
      %439 = arith.addf %434, %438 : vector<4x256xf32>
      %c0_134 = arith.constant 0 : index
      %c190 = arith.constant 190 : index
      %440 = vector.load %arg1[%c0_134, %c190] : memref<4x196xf32, #tpu.memory_space<vmem>>, vector<4x1xf32>
      %441 = vector.extract_strided_slice %367 {offsets = [0, 388], sizes = [4, 256], strides = [1, 1]} : vector<4x664xf32> to vector<4x256xf32>
      %442 = vector.broadcast %440 : vector<4x1xf32> to vector<4x256xf32>
      %443 = arith.mulf %442, %441 : vector<4x256xf32>
      %444 = arith.addf %439, %443 : vector<4x256xf32>
      %c22 = arith.constant 22 : index
      %c0_135 = arith.constant 0 : index
      %445 = vector.load %arg3[%c22, %c0_135] : memref<28x256xf32, #tpu.memory_space<vmem>>, vector<1x256xf32>
      %446 = vector.broadcast %445 : vector<1x256xf32> to vector<4x256xf32>
      %447 = arith.mulf %446, %444 : vector<4x256xf32>
      %448 = arith.addf %408, %447 : vector<4x256xf32>
      %cst_136 = arith.constant 0.000000e+00 : f32
      %449 = vector.broadcast %cst_136 : f32 to vector<4x256xf32>
      %c0_137 = arith.constant 0 : index
      %c149 = arith.constant 149 : index
      %450 = vector.load %arg1[%c0_137, %c149] : memref<4x196xf32, #tpu.memory_space<vmem>>, vector<4x1xf32>
      %451 = vector.extract_strided_slice %367 {offsets = [0, 8], sizes = [4, 256], strides = [1, 1]} : vector<4x664xf32> to vector<4x256xf32>
      %452 = vector.broadcast %450 : vector<4x1xf32> to vector<4x256xf32>
      %453 = arith.mulf %452, %451 : vector<4x256xf32>
      %454 = arith.addf %449, %453 : vector<4x256xf32>
      %c0_138 = arith.constant 0 : index
      %c156 = arith.constant 156 : index
      %455 = vector.load %arg1[%c0_138, %c156] : memref<4x196xf32, #tpu.memory_space<vmem>>, vector<4x1xf32>
      %456 = vector.extract_strided_slice %367 {offsets = [0, 72], sizes = [4, 256], strides = [1, 1]} : vector<4x664xf32> to vector<4x256xf32>
      %457 = vector.broadcast %455 : vector<4x1xf32> to vector<4x256xf32>
      %458 = arith.mulf %457, %456 : vector<4x256xf32>
      %459 = arith.addf %454, %458 : vector<4x256xf32>
      %c0_139 = arith.constant 0 : index
      %c163 = arith.constant 163 : index
      %460 = vector.load %arg1[%c0_139, %c163] : memref<4x196xf32, #tpu.memory_space<vmem>>, vector<4x1xf32>
      %461 = vector.extract_strided_slice %367 {offsets = [0, 136], sizes = [4, 256], strides = [1, 1]} : vector<4x664xf32> to vector<4x256xf32>
      %462 = vector.broadcast %460 : vector<4x1xf32> to vector<4x256xf32>
      %463 = arith.mulf %462, %461 : vector<4x256xf32>
      %464 = arith.addf %459, %463 : vector<4x256xf32>
      %c0_140 = arith.constant 0 : index
      %c170 = arith.constant 170 : index
      %465 = vector.load %arg1[%c0_140, %c170] : memref<4x196xf32, #tpu.memory_space<vmem>>, vector<4x1xf32>
      %466 = vector.extract_strided_slice %367 {offsets = [0, 200], sizes = [4, 256], strides = [1, 1]} : vector<4x664xf32> to vector<4x256xf32>
      %467 = vector.broadcast %465 : vector<4x1xf32> to vector<4x256xf32>
      %468 = arith.mulf %467, %466 : vector<4x256xf32>
      %469 = arith.addf %464, %468 : vector<4x256xf32>
      %c0_141 = arith.constant 0 : index
      %c177 = arith.constant 177 : index
      %470 = vector.load %arg1[%c0_141, %c177] : memref<4x196xf32, #tpu.memory_space<vmem>>, vector<4x1xf32>
      %471 = vector.extract_strided_slice %367 {offsets = [0, 264], sizes = [4, 256], strides = [1, 1]} : vector<4x664xf32> to vector<4x256xf32>
      %472 = vector.broadcast %470 : vector<4x1xf32> to vector<4x256xf32>
      %473 = arith.mulf %472, %471 : vector<4x256xf32>
      %474 = arith.addf %469, %473 : vector<4x256xf32>
      %c0_142 = arith.constant 0 : index
      %c184 = arith.constant 184 : index
      %475 = vector.load %arg1[%c0_142, %c184] : memref<4x196xf32, #tpu.memory_space<vmem>>, vector<4x1xf32>
      %476 = vector.extract_strided_slice %367 {offsets = [0, 328], sizes = [4, 256], strides = [1, 1]} : vector<4x664xf32> to vector<4x256xf32>
      %477 = vector.broadcast %475 : vector<4x1xf32> to vector<4x256xf32>
      %478 = arith.mulf %477, %476 : vector<4x256xf32>
      %479 = arith.addf %474, %478 : vector<4x256xf32>
      %c0_143 = arith.constant 0 : index
      %c191 = arith.constant 191 : index
      %480 = vector.load %arg1[%c0_143, %c191] : memref<4x196xf32, #tpu.memory_space<vmem>>, vector<4x1xf32>
      %481 = vector.extract_strided_slice %367 {offsets = [0, 392], sizes = [4, 256], strides = [1, 1]} : vector<4x664xf32> to vector<4x256xf32>
      %482 = vector.broadcast %480 : vector<4x1xf32> to vector<4x256xf32>
      %483 = arith.mulf %482, %481 : vector<4x256xf32>
      %484 = arith.addf %479, %483 : vector<4x256xf32>
      %c23 = arith.constant 23 : index
      %c0_144 = arith.constant 0 : index
      %485 = vector.load %arg3[%c23, %c0_144] : memref<28x256xf32, #tpu.memory_space<vmem>>, vector<1x256xf32>
      %486 = vector.broadcast %485 : vector<1x256xf32> to vector<4x256xf32>
      %487 = arith.mulf %486, %484 : vector<4x256xf32>
      %488 = arith.addf %448, %487 : vector<4x256xf32>
      %cst_145 = arith.constant 0.000000e+00 : f32
      %489 = vector.broadcast %cst_145 : f32 to vector<4x256xf32>
      %c0_146 = arith.constant 0 : index
      %c150 = arith.constant 150 : index
      %490 = vector.load %arg1[%c0_146, %c150] : memref<4x196xf32, #tpu.memory_space<vmem>>, vector<4x1xf32>
      %491 = vector.extract_strided_slice %367 {offsets = [0, 12], sizes = [4, 256], strides = [1, 1]} : vector<4x664xf32> to vector<4x256xf32>
      %492 = vector.broadcast %490 : vector<4x1xf32> to vector<4x256xf32>
      %493 = arith.mulf %492, %491 : vector<4x256xf32>
      %494 = arith.addf %489, %493 : vector<4x256xf32>
      %c0_147 = arith.constant 0 : index
      %c157 = arith.constant 157 : index
      %495 = vector.load %arg1[%c0_147, %c157] : memref<4x196xf32, #tpu.memory_space<vmem>>, vector<4x1xf32>
      %496 = vector.extract_strided_slice %367 {offsets = [0, 76], sizes = [4, 256], strides = [1, 1]} : vector<4x664xf32> to vector<4x256xf32>
      %497 = vector.broadcast %495 : vector<4x1xf32> to vector<4x256xf32>
      %498 = arith.mulf %497, %496 : vector<4x256xf32>
      %499 = arith.addf %494, %498 : vector<4x256xf32>
      %c0_148 = arith.constant 0 : index
      %c164 = arith.constant 164 : index
      %500 = vector.load %arg1[%c0_148, %c164] : memref<4x196xf32, #tpu.memory_space<vmem>>, vector<4x1xf32>
      %501 = vector.extract_strided_slice %367 {offsets = [0, 140], sizes = [4, 256], strides = [1, 1]} : vector<4x664xf32> to vector<4x256xf32>
      %502 = vector.broadcast %500 : vector<4x1xf32> to vector<4x256xf32>
      %503 = arith.mulf %502, %501 : vector<4x256xf32>
      %504 = arith.addf %499, %503 : vector<4x256xf32>
      %c0_149 = arith.constant 0 : index
      %c171 = arith.constant 171 : index
      %505 = vector.load %arg1[%c0_149, %c171] : memref<4x196xf32, #tpu.memory_space<vmem>>, vector<4x1xf32>
      %506 = vector.extract_strided_slice %367 {offsets = [0, 204], sizes = [4, 256], strides = [1, 1]} : vector<4x664xf32> to vector<4x256xf32>
      %507 = vector.broadcast %505 : vector<4x1xf32> to vector<4x256xf32>
      %508 = arith.mulf %507, %506 : vector<4x256xf32>
      %509 = arith.addf %504, %508 : vector<4x256xf32>
      %c0_150 = arith.constant 0 : index
      %c178 = arith.constant 178 : index
      %510 = vector.load %arg1[%c0_150, %c178] : memref<4x196xf32, #tpu.memory_space<vmem>>, vector<4x1xf32>
      %511 = vector.extract_strided_slice %367 {offsets = [0, 268], sizes = [4, 256], strides = [1, 1]} : vector<4x664xf32> to vector<4x256xf32>
      %512 = vector.broadcast %510 : vector<4x1xf32> to vector<4x256xf32>
      %513 = arith.mulf %512, %511 : vector<4x256xf32>
      %514 = arith.addf %509, %513 : vector<4x256xf32>
      %c0_151 = arith.constant 0 : index
      %c185 = arith.constant 185 : index
      %515 = vector.load %arg1[%c0_151, %c185] : memref<4x196xf32, #tpu.memory_space<vmem>>, vector<4x1xf32>
      %516 = vector.extract_strided_slice %367 {offsets = [0, 332], sizes = [4, 256], strides = [1, 1]} : vector<4x664xf32> to vector<4x256xf32>
      %517 = vector.broadcast %515 : vector<4x1xf32> to vector<4x256xf32>
      %518 = arith.mulf %517, %516 : vector<4x256xf32>
      %519 = arith.addf %514, %518 : vector<4x256xf32>
      %c0_152 = arith.constant 0 : index
      %c192 = arith.constant 192 : index
      %520 = vector.load %arg1[%c0_152, %c192] : memref<4x196xf32, #tpu.memory_space<vmem>>, vector<4x1xf32>
      %521 = vector.extract_strided_slice %367 {offsets = [0, 396], sizes = [4, 256], strides = [1, 1]} : vector<4x664xf32> to vector<4x256xf32>
      %522 = vector.broadcast %520 : vector<4x1xf32> to vector<4x256xf32>
      %523 = arith.mulf %522, %521 : vector<4x256xf32>
      %524 = arith.addf %519, %523 : vector<4x256xf32>
      %c24 = arith.constant 24 : index
      %c0_153 = arith.constant 0 : index
      %525 = vector.load %arg3[%c24, %c0_153] : memref<28x256xf32, #tpu.memory_space<vmem>>, vector<1x256xf32>
      %526 = vector.broadcast %525 : vector<1x256xf32> to vector<4x256xf32>
      %527 = arith.mulf %526, %524 : vector<4x256xf32>
      %528 = arith.addf %488, %527 : vector<4x256xf32>
      %cst_154 = arith.constant 0.000000e+00 : f32
      %529 = vector.broadcast %cst_154 : f32 to vector<4x256xf32>
      %c0_155 = arith.constant 0 : index
      %c151 = arith.constant 151 : index
      %530 = vector.load %arg1[%c0_155, %c151] : memref<4x196xf32, #tpu.memory_space<vmem>>, vector<4x1xf32>
      %531 = vector.extract_strided_slice %367 {offsets = [0, 16], sizes = [4, 256], strides = [1, 1]} : vector<4x664xf32> to vector<4x256xf32>
      %532 = vector.broadcast %530 : vector<4x1xf32> to vector<4x256xf32>
      %533 = arith.mulf %532, %531 : vector<4x256xf32>
      %534 = arith.addf %529, %533 : vector<4x256xf32>
      %c0_156 = arith.constant 0 : index
      %c158 = arith.constant 158 : index
      %535 = vector.load %arg1[%c0_156, %c158] : memref<4x196xf32, #tpu.memory_space<vmem>>, vector<4x1xf32>
      %536 = vector.extract_strided_slice %367 {offsets = [0, 80], sizes = [4, 256], strides = [1, 1]} : vector<4x664xf32> to vector<4x256xf32>
      %537 = vector.broadcast %535 : vector<4x1xf32> to vector<4x256xf32>
      %538 = arith.mulf %537, %536 : vector<4x256xf32>
      %539 = arith.addf %534, %538 : vector<4x256xf32>
      %c0_157 = arith.constant 0 : index
      %c165 = arith.constant 165 : index
      %540 = vector.load %arg1[%c0_157, %c165] : memref<4x196xf32, #tpu.memory_space<vmem>>, vector<4x1xf32>
      %541 = vector.extract_strided_slice %367 {offsets = [0, 144], sizes = [4, 256], strides = [1, 1]} : vector<4x664xf32> to vector<4x256xf32>
      %542 = vector.broadcast %540 : vector<4x1xf32> to vector<4x256xf32>
      %543 = arith.mulf %542, %541 : vector<4x256xf32>
      %544 = arith.addf %539, %543 : vector<4x256xf32>
      %c0_158 = arith.constant 0 : index
      %c172 = arith.constant 172 : index
      %545 = vector.load %arg1[%c0_158, %c172] : memref<4x196xf32, #tpu.memory_space<vmem>>, vector<4x1xf32>
      %546 = vector.extract_strided_slice %367 {offsets = [0, 208], sizes = [4, 256], strides = [1, 1]} : vector<4x664xf32> to vector<4x256xf32>
      %547 = vector.broadcast %545 : vector<4x1xf32> to vector<4x256xf32>
      %548 = arith.mulf %547, %546 : vector<4x256xf32>
      %549 = arith.addf %544, %548 : vector<4x256xf32>
      %c0_159 = arith.constant 0 : index
      %c179 = arith.constant 179 : index
      %550 = vector.load %arg1[%c0_159, %c179] : memref<4x196xf32, #tpu.memory_space<vmem>>, vector<4x1xf32>
      %551 = vector.extract_strided_slice %367 {offsets = [0, 272], sizes = [4, 256], strides = [1, 1]} : vector<4x664xf32> to vector<4x256xf32>
      %552 = vector.broadcast %550 : vector<4x1xf32> to vector<4x256xf32>
      %553 = arith.mulf %552, %551 : vector<4x256xf32>
      %554 = arith.addf %549, %553 : vector<4x256xf32>
      %c0_160 = arith.constant 0 : index
      %c186 = arith.constant 186 : index
      %555 = vector.load %arg1[%c0_160, %c186] : memref<4x196xf32, #tpu.memory_space<vmem>>, vector<4x1xf32>
      %556 = vector.extract_strided_slice %367 {offsets = [0, 336], sizes = [4, 256], strides = [1, 1]} : vector<4x664xf32> to vector<4x256xf32>
      %557 = vector.broadcast %555 : vector<4x1xf32> to vector<4x256xf32>
      %558 = arith.mulf %557, %556 : vector<4x256xf32>
      %559 = arith.addf %554, %558 : vector<4x256xf32>
      %c0_161 = arith.constant 0 : index
      %c193 = arith.constant 193 : index
      %560 = vector.load %arg1[%c0_161, %c193] : memref<4x196xf32, #tpu.memory_space<vmem>>, vector<4x1xf32>
      %561 = vector.extract_strided_slice %367 {offsets = [0, 400], sizes = [4, 256], strides = [1, 1]} : vector<4x664xf32> to vector<4x256xf32>
      %562 = vector.broadcast %560 : vector<4x1xf32> to vector<4x256xf32>
      %563 = arith.mulf %562, %561 : vector<4x256xf32>
      %564 = arith.addf %559, %563 : vector<4x256xf32>
      %c25 = arith.constant 25 : index
      %c0_162 = arith.constant 0 : index
      %565 = vector.load %arg3[%c25, %c0_162] : memref<28x256xf32, #tpu.memory_space<vmem>>, vector<1x256xf32>
      %566 = vector.broadcast %565 : vector<1x256xf32> to vector<4x256xf32>
      %567 = arith.mulf %566, %564 : vector<4x256xf32>
      %568 = arith.addf %528, %567 : vector<4x256xf32>
      %cst_163 = arith.constant 0.000000e+00 : f32
      %569 = vector.broadcast %cst_163 : f32 to vector<4x256xf32>
      %c0_164 = arith.constant 0 : index
      %c152 = arith.constant 152 : index
      %570 = vector.load %arg1[%c0_164, %c152] : memref<4x196xf32, #tpu.memory_space<vmem>>, vector<4x1xf32>
      %571 = vector.extract_strided_slice %367 {offsets = [0, 20], sizes = [4, 256], strides = [1, 1]} : vector<4x664xf32> to vector<4x256xf32>
      %572 = vector.broadcast %570 : vector<4x1xf32> to vector<4x256xf32>
      %573 = arith.mulf %572, %571 : vector<4x256xf32>
      %574 = arith.addf %569, %573 : vector<4x256xf32>
      %c0_165 = arith.constant 0 : index
      %c159 = arith.constant 159 : index
      %575 = vector.load %arg1[%c0_165, %c159] : memref<4x196xf32, #tpu.memory_space<vmem>>, vector<4x1xf32>
      %576 = vector.extract_strided_slice %367 {offsets = [0, 84], sizes = [4, 256], strides = [1, 1]} : vector<4x664xf32> to vector<4x256xf32>
      %577 = vector.broadcast %575 : vector<4x1xf32> to vector<4x256xf32>
      %578 = arith.mulf %577, %576 : vector<4x256xf32>
      %579 = arith.addf %574, %578 : vector<4x256xf32>
      %c0_166 = arith.constant 0 : index
      %c166 = arith.constant 166 : index
      %580 = vector.load %arg1[%c0_166, %c166] : memref<4x196xf32, #tpu.memory_space<vmem>>, vector<4x1xf32>
      %581 = vector.extract_strided_slice %367 {offsets = [0, 148], sizes = [4, 256], strides = [1, 1]} : vector<4x664xf32> to vector<4x256xf32>
      %582 = vector.broadcast %580 : vector<4x1xf32> to vector<4x256xf32>
      %583 = arith.mulf %582, %581 : vector<4x256xf32>
      %584 = arith.addf %579, %583 : vector<4x256xf32>
      %c0_167 = arith.constant 0 : index
      %c173 = arith.constant 173 : index
      %585 = vector.load %arg1[%c0_167, %c173] : memref<4x196xf32, #tpu.memory_space<vmem>>, vector<4x1xf32>
      %586 = vector.extract_strided_slice %367 {offsets = [0, 212], sizes = [4, 256], strides = [1, 1]} : vector<4x664xf32> to vector<4x256xf32>
      %587 = vector.broadcast %585 : vector<4x1xf32> to vector<4x256xf32>
      %588 = arith.mulf %587, %586 : vector<4x256xf32>
      %589 = arith.addf %584, %588 : vector<4x256xf32>
      %c0_168 = arith.constant 0 : index
      %c180 = arith.constant 180 : index
      %590 = vector.load %arg1[%c0_168, %c180] : memref<4x196xf32, #tpu.memory_space<vmem>>, vector<4x1xf32>
      %591 = vector.extract_strided_slice %367 {offsets = [0, 276], sizes = [4, 256], strides = [1, 1]} : vector<4x664xf32> to vector<4x256xf32>
      %592 = vector.broadcast %590 : vector<4x1xf32> to vector<4x256xf32>
      %593 = arith.mulf %592, %591 : vector<4x256xf32>
      %594 = arith.addf %589, %593 : vector<4x256xf32>
      %c0_169 = arith.constant 0 : index
      %c187 = arith.constant 187 : index
      %595 = vector.load %arg1[%c0_169, %c187] : memref<4x196xf32, #tpu.memory_space<vmem>>, vector<4x1xf32>
      %596 = vector.extract_strided_slice %367 {offsets = [0, 340], sizes = [4, 256], strides = [1, 1]} : vector<4x664xf32> to vector<4x256xf32>
      %597 = vector.broadcast %595 : vector<4x1xf32> to vector<4x256xf32>
      %598 = arith.mulf %597, %596 : vector<4x256xf32>
      %599 = arith.addf %594, %598 : vector<4x256xf32>
      %c0_170 = arith.constant 0 : index
      %c194 = arith.constant 194 : index
      %600 = vector.load %arg1[%c0_170, %c194] : memref<4x196xf32, #tpu.memory_space<vmem>>, vector<4x1xf32>
      %601 = vector.extract_strided_slice %367 {offsets = [0, 404], sizes = [4, 256], strides = [1, 1]} : vector<4x664xf32> to vector<4x256xf32>
      %602 = vector.broadcast %600 : vector<4x1xf32> to vector<4x256xf32>
      %603 = arith.mulf %602, %601 : vector<4x256xf32>
      %604 = arith.addf %599, %603 : vector<4x256xf32>
      %c26 = arith.constant 26 : index
      %c0_171 = arith.constant 0 : index
      %605 = vector.load %arg3[%c26, %c0_171] : memref<28x256xf32, #tpu.memory_space<vmem>>, vector<1x256xf32>
      %606 = vector.broadcast %605 : vector<1x256xf32> to vector<4x256xf32>
      %607 = arith.mulf %606, %604 : vector<4x256xf32>
      %608 = arith.addf %568, %607 : vector<4x256xf32>
      %cst_172 = arith.constant 0.000000e+00 : f32
      %609 = vector.broadcast %cst_172 : f32 to vector<4x256xf32>
      %c0_173 = arith.constant 0 : index
      %c153 = arith.constant 153 : index
      %610 = vector.load %arg1[%c0_173, %c153] : memref<4x196xf32, #tpu.memory_space<vmem>>, vector<4x1xf32>
      %611 = vector.extract_strided_slice %367 {offsets = [0, 24], sizes = [4, 256], strides = [1, 1]} : vector<4x664xf32> to vector<4x256xf32>
      %612 = vector.broadcast %610 : vector<4x1xf32> to vector<4x256xf32>
      %613 = arith.mulf %612, %611 : vector<4x256xf32>
      %614 = arith.addf %609, %613 : vector<4x256xf32>
      %c0_174 = arith.constant 0 : index
      %c160 = arith.constant 160 : index
      %615 = vector.load %arg1[%c0_174, %c160] : memref<4x196xf32, #tpu.memory_space<vmem>>, vector<4x1xf32>
      %616 = vector.extract_strided_slice %367 {offsets = [0, 88], sizes = [4, 256], strides = [1, 1]} : vector<4x664xf32> to vector<4x256xf32>
      %617 = vector.broadcast %615 : vector<4x1xf32> to vector<4x256xf32>
      %618 = arith.mulf %617, %616 : vector<4x256xf32>
      %619 = arith.addf %614, %618 : vector<4x256xf32>
      %c0_175 = arith.constant 0 : index
      %c167 = arith.constant 167 : index
      %620 = vector.load %arg1[%c0_175, %c167] : memref<4x196xf32, #tpu.memory_space<vmem>>, vector<4x1xf32>
      %621 = vector.extract_strided_slice %367 {offsets = [0, 152], sizes = [4, 256], strides = [1, 1]} : vector<4x664xf32> to vector<4x256xf32>
      %622 = vector.broadcast %620 : vector<4x1xf32> to vector<4x256xf32>
      %623 = arith.mulf %622, %621 : vector<4x256xf32>
      %624 = arith.addf %619, %623 : vector<4x256xf32>
      %c0_176 = arith.constant 0 : index
      %c174 = arith.constant 174 : index
      %625 = vector.load %arg1[%c0_176, %c174] : memref<4x196xf32, #tpu.memory_space<vmem>>, vector<4x1xf32>
      %626 = vector.extract_strided_slice %367 {offsets = [0, 216], sizes = [4, 256], strides = [1, 1]} : vector<4x664xf32> to vector<4x256xf32>
      %627 = vector.broadcast %625 : vector<4x1xf32> to vector<4x256xf32>
      %628 = arith.mulf %627, %626 : vector<4x256xf32>
      %629 = arith.addf %624, %628 : vector<4x256xf32>
      %c0_177 = arith.constant 0 : index
      %c181 = arith.constant 181 : index
      %630 = vector.load %arg1[%c0_177, %c181] : memref<4x196xf32, #tpu.memory_space<vmem>>, vector<4x1xf32>
      %631 = vector.extract_strided_slice %367 {offsets = [0, 280], sizes = [4, 256], strides = [1, 1]} : vector<4x664xf32> to vector<4x256xf32>
      %632 = vector.broadcast %630 : vector<4x1xf32> to vector<4x256xf32>
      %633 = arith.mulf %632, %631 : vector<4x256xf32>
      %634 = arith.addf %629, %633 : vector<4x256xf32>
      %c0_178 = arith.constant 0 : index
      %c188 = arith.constant 188 : index
      %635 = vector.load %arg1[%c0_178, %c188] : memref<4x196xf32, #tpu.memory_space<vmem>>, vector<4x1xf32>
      %636 = vector.extract_strided_slice %367 {offsets = [0, 344], sizes = [4, 256], strides = [1, 1]} : vector<4x664xf32> to vector<4x256xf32>
      %637 = vector.broadcast %635 : vector<4x1xf32> to vector<4x256xf32>
      %638 = arith.mulf %637, %636 : vector<4x256xf32>
      %639 = arith.addf %634, %638 : vector<4x256xf32>
      %c0_179 = arith.constant 0 : index
      %c195 = arith.constant 195 : index
      %640 = vector.load %arg1[%c0_179, %c195] : memref<4x196xf32, #tpu.memory_space<vmem>>, vector<4x1xf32>
      %641 = vector.extract_strided_slice %367 {offsets = [0, 408], sizes = [4, 256], strides = [1, 1]} : vector<4x664xf32> to vector<4x256xf32>
      %642 = vector.broadcast %640 : vector<4x1xf32> to vector<4x256xf32>
      %643 = arith.mulf %642, %641 : vector<4x256xf32>
      %644 = arith.addf %639, %643 : vector<4x256xf32>
      %c27 = arith.constant 27 : index
      %c0_180 = arith.constant 0 : index
      %645 = vector.load %arg3[%c27, %c0_180] : memref<28x256xf32, #tpu.memory_space<vmem>>, vector<1x256xf32>
      %646 = vector.broadcast %645 : vector<1x256xf32> to vector<4x256xf32>
      %647 = arith.mulf %646, %644 : vector<4x256xf32>
      %648 = arith.addf %608, %647 : vector<4x256xf32>
      %c3 = arith.constant 3 : index
      %649 = memref.load %arg2[%c3] : memref<4xf32, #tpu.memory_space<smem>>
      %650 = vector.extract_strided_slice %648 {offsets = [0, 0], sizes = [1, 256], strides = [1, 1]} : vector<4x256xf32> to vector<1x256xf32>
      %651 = vector.extract_strided_slice %648 {offsets = [2, 0], sizes = [1, 256], strides = [1, 1]} : vector<4x256xf32> to vector<1x256xf32>
      %652 = arith.addf %650, %651 : vector<1x256xf32>
      %653 = vector.broadcast %649 : f32 to vector<1x256xf32>
      %654 = arith.addf %652, %653 : vector<1x256xf32>
      %655 = arith.negf %654 : vector<1x256xf32>
      %656 = math.exp %655 : vector<1x256xf32>
      %cst_181 = arith.constant 1.000000e+00 : f32
      %657 = vector.broadcast %cst_181 : f32 to vector<1x256xf32>
      %658 = arith.addf %657, %656 : vector<1x256xf32>
      %659 = arith.divf %657, %658 : vector<1x256xf32>
      %c0_182 = arith.constant 0 : index
      %c0_183 = arith.constant 0 : index
      %c0_184 = arith.constant 0 : index
      %660 = vector.load %arg7[%c0_182, %c0_183, %c0_184] : memref<2x4x256xf32, #tpu.memory_space<vmem>>, vector<1x4x256xf32>
      %661 = vector.shape_cast %660 : vector<1x4x256xf32> to vector<4x256xf32>
      %662 = vector.broadcast %659 : vector<1x256xf32> to vector<4x256xf32>
      %663 = arith.mulf %662, %661 : vector<4x256xf32>
      %c1_185 = arith.constant 1 : index
      %c0_186 = arith.constant 0 : index
      %c0_187 = arith.constant 0 : index
      %c0_188 = arith.constant 0 : index
      %664 = vector.load %arg8[%c1_185, %c0_186, %c0_187, %c0_188] : memref<2x2x4x256xf32, #tpu.memory_space<vmem>>, vector<1x1x4x256xf32>
      %665 = vector.shape_cast %664 : vector<1x1x4x256xf32> to vector<4x256xf32>
      %666 = vector.shape_cast %663 : vector<4x256xf32> to vector<1x1x4x256xf32>
      tpu.vector_store %arg8[%c1_185, %c0_186, %c0_187, %c0_188], %666 {strides = array<i32>} : memref<2x2x4x256xf32, #tpu.memory_space<vmem>>, vector<1x1x4x256xf32>,
      %667 = vector.extract_strided_slice %648 {offsets = [1, 0], sizes = [1, 256], strides = [1, 1]} : vector<4x256xf32> to vector<1x256xf32>
      %668 = vector.extract_strided_slice %648 {offsets = [3, 0], sizes = [1, 256], strides = [1, 1]} : vector<4x256xf32> to vector<1x256xf32>
      %669 = arith.addf %667, %668 : vector<1x256xf32>
      %670 = vector.broadcast %649 : f32 to vector<1x256xf32>
      %671 = arith.addf %669, %670 : vector<1x256xf32>
      %672 = arith.negf %671 : vector<1x256xf32>
      %673 = math.exp %672 : vector<1x256xf32>
      %cst_189 = arith.constant 1.000000e+00 : f32
      %674 = vector.broadcast %cst_189 : f32 to vector<1x256xf32>
      %675 = arith.addf %674, %673 : vector<1x256xf32>
      %676 = arith.divf %674, %675 : vector<1x256xf32>
      %c1_190 = arith.constant 1 : index
      %c0_191 = arith.constant 0 : index
      %c0_192 = arith.constant 0 : index
      %677 = vector.load %arg7[%c1_190, %c0_191, %c0_192] : memref<2x4x256xf32, #tpu.memory_space<vmem>>, vector<1x4x256xf32>
      %678 = vector.shape_cast %677 : vector<1x4x256xf32> to vector<4x256xf32>
      %679 = vector.broadcast %676 : vector<1x256xf32> to vector<4x256xf32>
      %680 = arith.mulf %679, %678 : vector<4x256xf32>
      %c1_193 = arith.constant 1 : index
      %c1_194 = arith.constant 1 : index
      %c0_195 = arith.constant 0 : index
      %c0_196 = arith.constant 0 : index
      %681 = vector.load %arg8[%c1_193, %c1_194, %c0_195, %c0_196] : memref<2x2x4x256xf32, #tpu.memory_space<vmem>>, vector<1x1x4x256xf32>
      %682 = vector.shape_cast %681 : vector<1x1x4x256xf32> to vector<4x256xf32>
      %683 = vector.shape_cast %680 : vector<4x256xf32> to vector<1x1x4x256xf32>
      tpu.vector_store %arg8[%c1_193, %c1_194, %c0_195, %c0_196], %683 {strides = array<i32>} : memref<2x2x4x256xf32, #tpu.memory_space<vmem>>, vector<1x1x4x256xf32>,
    } else {
    }
    return
  }
  func.func @transform_0(%arg0: i32) -> (i32, i32) {
    %c0_i32 = arith.constant 0 : i32
    %c0_i32_0 = arith.constant 0 : i32
    %c0_i32_1 = arith.constant 0 : i32
    return %c0_i32, %c0_i32_0 : i32, i32
  }
  func.func @transform_1(%arg0: i32) -> i32 {
    %c0_i32 = arith.constant 0 : i32
    %c0_i32_0 = arith.constant 0 : i32
    return %c0_i32 : i32
  }
  func.func @transform_2(%arg0: i32) -> (i32, i32) {
    %c0_i32 = arith.constant 0 : i32
    %c0_i32_0 = arith.constant 0 : i32
    %c0_i32_1 = arith.constant 0 : i32
    return %c0_i32, %c0_i32_0 : i32, i32
  }
  func.func @transform_3(%arg0: i32) -> (i32, i32, i32) {
    %c0_i32 = arith.constant 0 : i32
    %c0_i32_0 = arith.constant 0 : i32
    %c0_i32_1 = arith.constant 0 : i32
    %c0_i32_2 = arith.constant 0 : i32
    return %c0_i32, %c0_i32_0, %c0_i32_1 : i32, i32, i32
  }
  func.func @transform_4(%arg0: i32) -> (i32, i32, i32) {
    %c0_i32 = arith.constant 0 : i32
    %c0_i32_0 = arith.constant 0 : i32
    %c0_i32_1 = arith.constant 0 : i32
    %c0_i32_2 = arith.constant 0 : i32
    return %c0_i32, %c0_i32_0, %c0_i32_1 : i32, i32, i32
  }
  func.func @transform_5(%arg0: i32) -> (i32, i32, i32) {
    %c0_i32 = arith.constant 0 : i32
    %c0_i32_0 = arith.constant 0 : i32
    %c0_i32_1 = arith.constant 0 : i32
    %c0_i32_2 = arith.constant 0 : i32
    return %c0_i32, %c0_i32_0, %c0_i32_1 : i32, i32, i32
  }
  func.func @transform_6(%arg0: i32) -> (i32, i32, i32) {
    %c0_i32 = arith.constant 0 : i32
    %c0_i32_0 = arith.constant 0 : i32
    %c0_i32_1 = arith.constant 0 : i32
    %c0_i32_2 = arith.constant 0 : i32
    return %c0_i32, %c0_i32_0, %c0_i32_1 : i32, i32, i32
  }
  func.func @transform_7(%arg0: i32) -> (i32, i32, i32, i32) {
    %c0_i32 = arith.constant 0 : i32
    %c0_i32_0 = arith.constant 0 : i32
    %c0_i32_1 = arith.constant 0 : i32
    %c0_i32_2 = arith.constant 0 : i32
    return %arg0, %c0_i32, %c0_i32_0, %c0_i32_1 : i32, i32, i32, i32
  }
}

</mosaic_0001>

<bundles_post_ra>
// kernel: tpu_custom_call.1
= control target key start
LH: loop header
LB: loop body
LE: loop exit
PB: predicated region body
PF: predicated region fallthrough
CT: control target
= control target key end

     0   :  { %s10900_s0 = inlined_call_operand.hbm [shape: f32[4,196], index: 0, kind: input, shape index: {}]   ;;  %s10901_s1 = inlined_call_operand.vmem [shape: f32[4], index: 1, kind: input, shape index: {}]   ;;  %s10902_s2 = inlined_call_operand.hbm [shape: f32[28,256], index: 2, kind: input, shape index: {}]   ;;  %s10903_s3 = inlined_call_operand.hbm [shape: f32[2,4,256], index: 3, kind: input, shape index: {}]   ;;  %s10904_s4 = inlined_call_operand.hbm [shape: f32[2,4,256], index: 4, kind: input, shape index: {}]   ;;  %s10905_s5 = inlined_call_operand.vmem [shape: f32[2,4,256], index: 5, kind: input, shape index: {}]   ;;  %s10906_s6 = inlined_call_operand.hbm [shape: f32[2,4,256], index: 6, kind: input, shape index: {}]   ;;  %s10907_s7 = inlined_call_operand.hbm [shape: f32[4,2,4,256], index: 7, kind: output, shape index: {}]  }
   0x1   :  { %11037 = sst [smem:[#allocation179_spill]] %s10902_s2 }
   0x2   :  { %12 = vsyncpa [#allocation3], 0 }
   0x3   :  { %13 = vsyncpa [#allocation5], 0 }
   0x4   :  { %14 = vsyncpa [#allocation8], 0 }
   0x5   :  { %15 = vsyncpa [#allocation11], 0 }
   0x6   :  { %16 = vsyncpa [#allocation4], 0 }
   0x7   :  { %18 = vsyncpa [#allocation4 + $0x1], 0  ;;  %s7718_s24 = smov 0   ;;  %s7720_s25 = smov 0  }
   0x8   :  { %s7722_s26 = smov 0   ;;  %s7724_s27 = smov 0  }
   0x9 LB: > { %11038 = sst [smem:[#allocation19_spill]] %s7338_s26  ;;  %s7739_s28 = sadd.s32 4294967295, %s7342_s27   ;;  %s7342_s27 = sphi %s7724_s27, %s11501_s27   ;;  %s7338_s26 = sphi %s7722_s26, %s11503_s26   ;;  %s7334_s25 = sphi %s7720_s25, %s11505_s25   ;;  %s7330_s24 = sphi %s7718_s24, %s11504_s24  }
   0xa   : > { %s6392_s29 = sadd.s32 4294967294, %s7342_s27   ;;  %s7743_s30 = sadd.s32 1, %s7342_s27  }
   0xb   : > { %11039 = sst [smem:[#allocation20_spill]] %s7743_s30  ;;  %s178_s8 = sadd.s32 1, %s7338_s26 }
   0xc   : > { %s175_s9 = ssub.s32 %s7342_s27, %s7743_s30  ;;  %p188_p0 = scmp.ne.s32.totalorder %s7338_s26, %s7334_s25 }
   0xd   : > { %p176_p1 = scmp.eq.s32.totalorder %s175_s9, 0  ;;  %p189_p2 = scmp.eq.s32.totalorder %s7739_s28, 1 }
   0xe   : > { %p194_p3 = scmp.ne.s32.totalorder %s7334_s25, %s7330_s24  ;;  %p195_p4 = scmp.eq.s32.totalorder %s6392_s29, 1 }
   0xf   : > { %s7754_s10 = scalar_select %p176_p1, %s7338_s26, %s178_s8  }
  0x10   : > { %p7756_p5 = por %p189_p2, %p188_p0  ;;  %p7760_p6 = por %p195_p4, %p194_p3 }
  0x11   : > { %11040 = sst [smem:[#allocation21_spill]] %s7754_s10  ;;  %p6393_p7 = scmp.ge.s32.totalorder %s7342_s27, 1 }
  0x12   : > { %s11041_s11 = scalar_select %p7756_p5, 1, 0 }
  0x13   : > { %s11042_s12 = scalar_select %p7760_p6, 1, 0 }
  0x14   : > { %p202_p8 = scmp.lt.s32.totalorder %s7342_s27, 3  ;;  %p10908_p10 = scmp.eq.s32.totalorder %s7739_s28, 0 }
  0x15   : > { %11043 = sst [smem:[#allocation22_spill]] %s11042_s12  ;;  %s7344_s14 = smov [#allocation7]  }
  0x16   : > { %p7768_p11 = pnand %p6393_p7, %p202_p8  ;;  %s236_s15 = sshll.u32 %s7344_s14, 4  ;;  %s237_s15 = int_to_ptr.vmem [resolvable:$true] %s236_s15 }
  0x17   : > { %s7345_s17 = smov [#allocation10]   ;;  %s11046_s2 = sld [smem:[#allocation179_spill]] }
  0x18   : > { %s11044_s13 = scalar_select %p7768_p11, 1, 0 }
  0x19   : > { %p6463_p12 = pneg %p7768_p11  ;;  %s262_s18 = sshll.u32 %s7345_s17, 4  ;;  %s263_s18 = int_to_ptr.vmem [resolvable:$true] %s262_s18 }
  0x1b   : > { %p7776_p13 = pnand %p10908_p10, %p6463_p12 }
  0x1d   : > { %s7109_s21 = scalar_lea.hbm %s11046_s2, 1024  ;;  %p7788_p1 = pneg %p7776_p13 }
  0x1e   : > { %p7110_p0 = scmp.ne.s32.totalorder %s11046_s2, %s7109_s21  ;;  %p7116_p4 = scmp.lt.u32.totalorder %s7109_s21, %s11046_s2 }
  0x20   : > { %p7112_p2 = pnand %p7788_p1, %p7110_p0 }
  0x22   : > { %p7113_p3 = pneg %p7112_p2 }
  0x24   : > { %p7118_p7 = pnand %p7116_p4, %p7113_p3 }
  0x26   : > { %7121 = shalt.err (!%p7118_p7)
}
  0x27   : > { %s7122_s14 = scalar_lea.vmem %s237_s15, 1024  ;;  %p7130_p10 = scmp.lt.s32.totalorder %s237_s15, %s237_s15 }
  0x28   : > { %p7123_p8 = scmp.ne.s32.totalorder %s237_s15, %s7122_s14  ;;  %p7131_p6 = scmp.lt.s32.totalorder %s7122_s14, %s7122_s14 }
  0x2a   : > { %p7125_p12 = pnand %p7123_p8, %p7788_p1  ;;  %p7132_p5 = por %p7131_p6, %p7130_p10 }
  0x2c   : > { %p7126_p9 = pneg %p7125_p12 }
  0x2e   : > { %p7133_p11 = pnand %p7132_p5, %p7126_p9 }
  0x30   : > { %7136 = shalt.err (!%p7133_p11)
}
  0x31   : > { %s7346_s17 = smov 256   ;;  %s7347_s19 = smov 16  }
  0x32   : > { %6472 = dma.hbm_to_vmem [thread:$0]  (!%p7776_p13), %s11046_s2, 1024, %s237_s15, [#allocation8], %s7346_s17, %s7346_s17, %s7347_s19  }
  0x33   : > { %s7348_s22 = smov [#allocation2]   ;;  %s7137_s10 = scalar_lea.hbm %s10904_s4, 256 }
  0x34   : > { %s215_s23 = sshll.u32 %s7348_s22, 4  ;;  %p7138_p5 = scmp.ne.s32.totalorder %s10904_s4, %s7137_s10  ;;  %s216_s23 = int_to_ptr.vmem [resolvable:$true] %s215_s23 }
  0x35   : > { %p7144_p10 = scmp.lt.u32.totalorder %s7137_s10, %s10904_s4 }
  0x36   : > { %p7140_p6 = pnand %p7138_p5, %p7788_p1 }
  0x38   : > { %p7141_p9 = pneg %p7140_p6 }
  0x3a   : > { %p7146_p11 = pnand %p7144_p10, %p7141_p9 }
  0x3c   : > { %7149 = shalt.err (!%p7146_p11)
}
  0x3d   : > { %s7150_s15 = scalar_lea.vmem %s263_s18, 256  ;;  %p7158_p4 = scmp.lt.s32.totalorder %s263_s18, %s263_s18 }
  0x3e   : > { %p7151_p0 = scmp.ne.s32.totalorder %s263_s18, %s7150_s15  ;;  %p7159_p7 = scmp.lt.s32.totalorder %s7150_s15, %s7150_s15 }
  0x40   : > { %p7153_p2 = pnand %p7151_p0, %p7788_p1  ;;  %p7160_p8 = por %p7159_p7, %p7158_p4 }
  0x42   : > { %p7154_p3 = pneg %p7153_p2 }
  0x44   : > { %p7161_p12 = pnand %p7160_p8, %p7154_p3 }
  0x46   : > { %7164 = shalt.err (!%p7161_p12)
}
  0x47   : > { %s7349_s26 = smov 128   ;;  %s7350_s17 = smov 8  }
  0x48   : > { %6478 = dma.hbm_to_vmem [thread:$0]  (!%p7776_p13), %s10904_s4, 256, %s263_s18, [#allocation11], %s7349_s26, %s7349_s26, %s7350_s17  }
  0x49   : > { %s226_s20 = sshll.u32 %s10901_s1, 4  ;;  %s7165_s8 = scalar_lea.hbm %s10900_s0, 128  ;;  %s227_s20 = int_to_ptr.vmem [resolvable:$true] %s226_s20 }
  0x4a   : > { %p7166_p5 = scmp.ne.s32.totalorder %s10900_s0, %s7165_s8  ;;  %p7172_p10 = scmp.lt.u32.totalorder %s7165_s8, %s10900_s0 }
  0x4c   : > { %p7168_p6 = pnand %p7166_p5, %p7788_p1 }
  0x4e   : > { %p7169_p9 = pneg %p7168_p6 }
  0x50   : > { %p7174_p11 = pnand %p7172_p10, %p7169_p9 }
  0x52   : > { %7177 = shalt.err (!%p7174_p11)
}
  0x53   : > { %s7178_s18 = scalar_lea.vmem %s216_s23, 128  ;;  %p7186_p4 = scmp.lt.s32.totalorder %s216_s23, %s216_s23 }
  0x54   : > { %p7179_p0 = scmp.ne.s32.totalorder %s216_s23, %s7178_s18  ;;  %p7187_p7 = scmp.lt.s32.totalorder %s7178_s18, %s7178_s18 }
  0x56   : > { %p7181_p2 = pnand %p7179_p0, %p7788_p1  ;;  %p7188_p8 = por %p7187_p7, %p7186_p4 }
  0x58   : > { %p7182_p3 = pneg %p7181_p2 }
  0x5a   : > { %p7189_p12 = pnand %p7188_p8, %p7182_p3 }
  0x5c   : > { %7192 = shalt.err (!%p7189_p12)
}
  0x5d   : > { %6466 = dma.hbm_to_vmem [thread:$0]  (!%p7776_p13), %s10900_s0, 128, %s216_s23, [#allocation3]  }
  0x5e   : > { %s7193_s2 = scalar_lea.vmem %s227_s20, 16  ;;  %p7201_p10 = scmp.lt.s32.totalorder %s227_s20, %s227_s20 }
  0x5f   : > { %p7194_p5 = scmp.ne.s32.totalorder %s227_s20, %s7193_s2  ;;  %p7202_p11 = scmp.lt.s32.totalorder %s7193_s2, %s7193_s2 }
  0x61   : > { %p7196_p6 = pnand %p7194_p5, %p7788_p1  ;;  %p7203_p0 = por %p7202_p11, %p7201_p10 }
  0x63   : > { %p7197_p9 = pneg %p7196_p6 }
  0x65   : > { %p7204_p2 = pnand %p7203_p0, %p7197_p9 }
  0x67   : > { %7207 = shalt.err (!%p7204_p2)
}
  0x68   : > { %s7351_s12 = smov [#allocation6]   ;;  %s7352_s19 = smov [#allocation9]  }
  0x69   : > { %6469 = dma.vmem_to_smem (!%p7776_p13), %s227_s20, 16, %s7351_s12, [#allocation5]  }
  0x6a   : > { %s249_s21 = sshll.u32 %s7352_s19, 4  ;;  %s7353_s22 = smov [#allocation12]   ;;  %s250_s21 = int_to_ptr.vmem [resolvable:$true] %s249_s21 }
  0x6b   : > { %s278_s23 = sshll.u32 %s7353_s22, 4  ;;  %s7208_s14 = scalar_lea.hbm %s10903_s3, 256  ;;  %s7850_s23 = int_to_ptr.vmem [resolvable:$true] %s278_s23 }
  0x6c   : > { %p7209_p3 = scmp.ne.s32.totalorder %s10903_s3, %s7208_s14  ;;  %p7215_p8 = scmp.lt.u32.totalorder %s7208_s14, %s10903_s3 }
  0x6e   : > { %p7211_p4 = pnand %p7209_p3, %p7788_p1 }
  0x70   : > { %p7212_p7 = pneg %p7211_p4 }
  0x72   : > { %p7217_p12 = pnand %p7215_p8, %p7212_p7 }
  0x74   : > { %7220 = shalt.err (!%p7217_p12)
}
  0x75   : > { %s7221_s10 = scalar_lea.vmem %s250_s21, 256  ;;  %p7229_p10 = scmp.lt.s32.totalorder %s250_s21, %s250_s21 }
  0x76   : > { %p7222_p5 = scmp.ne.s32.totalorder %s250_s21, %s7221_s10  ;;  %p7230_p11 = scmp.lt.s32.totalorder %s7221_s10, %s7221_s10 }
  0x78   : > { %p7224_p6 = pnand %p7222_p5, %p7788_p1  ;;  %p7231_p0 = por %p7230_p11, %p7229_p10 }
  0x7a   : > { %p7225_p9 = pneg %p7224_p6 }
  0x7c   : > { %p7232_p2 = pnand %p7231_p0, %p7225_p9 }
  0x7e   : > { %7235 = shalt.err (!%p7232_p2)
}
  0x7f   : > { %6475 = dma.hbm_to_vmem [thread:$0]  (!%p7776_p13), %s10903_s3, 256, %s250_s21, [#allocation8], %s7349_s26, %s7349_s26, %s7350_s17  }
  0x80   : > { %s7236_s8 = scalar_lea.hbm %s10906_s6, 256 }
  0x81   : > { %p7237_p3 = scmp.ne.s32.totalorder %s10906_s6, %s7236_s8  ;;  %p7243_p8 = scmp.lt.u32.totalorder %s7236_s8, %s10906_s6 }
  0x83   : > { %p7239_p4 = pnand %p7237_p3, %p7788_p1 }
  0x85   : > { %p7240_p7 = pneg %p7239_p4 }
  0x87   : > { %p7245_p12 = pnand %p7243_p8, %p7240_p7 }
  0x89   : > { %7248 = shalt.err (!%p7245_p12)
}
  0x8a   : > { %s7249_s21 = scalar_lea.vmem %s7850_s23, 256  ;;  %p7257_p10 = scmp.lt.s32.totalorder %s7850_s23, %s7850_s23 }
  0x8b   : > { %p7250_p5 = scmp.ne.s32.totalorder %s7850_s23, %s7249_s21  ;;  %p7258_p11 = scmp.lt.s32.totalorder %s7249_s21, %s7249_s21 }
  0x8d   : > { %p7252_p6 = pnand %p7250_p5, %p7788_p1  ;;  %p7259_p0 = por %p7258_p11, %p7257_p10 }
  0x8f   : > { %p7253_p9 = pneg %p7252_p6 }
  0x91   : > { %p7260_p2 = pnand %p7259_p0, %p7253_p9 }
  0x93   : > { %7263 = shalt.err (!%p7260_p2)
}
  0x94   : > { %6481 = dma.hbm_to_vmem [thread:$0]  (!%p7776_p13), %s10906_s6, 256, %s7850_s23, [#allocation11], %s7349_s26, %s7349_s26, %s7350_s17  }
  0x95   : > { %p11048_p3 = scmp.ne.s32.totalorder %s11044_s13, 0 }
  0x96   : > { %p11049_p1 = scmp.eq.s32.totalorder (!%p11048_p3), %s7739_s28, 0 }
  0x97   : > { %294 = sbr.rel (%p11048_p3) target bundleno = 2533 (0x9e5), region = 48 }
  0x9e   : > { %7309 = dma.done.wait (%p11049_p1), [#allocation3], 128   ;;  %p11050_p4 = pmov %p11049_p1 }
  0x9f   : > { %p11051_p7 = pmov %p11049_p1 }
  0xa0   : > { %7311 = vsyncadd (%p11050_p4), [#allocation3], 4294967168 }
  0xa1   : > { %7313 = dma.done.wait (%p11051_p7), [#allocation5], 16   ;;  %p11052_p8 = pmov %p11049_p1 }
  0xa2   : > { %p11053_p12 = pmov %p11049_p1 }
  0xa3   : > { %7315 = vsyncadd (%p11052_p8), [#allocation5], 4294967280 }
  0xa4   : > { %7317 = dma.done.wait (%p11053_p12), [#allocation8], 1280   ;;  %p11054_p13 = pmov %p11049_p1 }
  0xa5   : > { %p11055_p5 = pmov %p11049_p1 }
  0xa6   : > { %7319 = vsyncadd (%p11054_p13), [#allocation8], 4294966016 }
  0xa7   : > { %7321 = dma.done.wait (%p11055_p5), [#allocation11], 512   ;;  %p11056_p6 = pmov %p11049_p1 }
  0xa9   : > { %7323 = vsyncadd (%p11056_p6), [#allocation11], 4294966784 }
  0xaa   : > { %320 = sfence }
  0xab   : > { %s339_s13 = sand.u32 1, %s7334_s25   ;;  %p11057_p9 = scmp.ne.s32.totalorder %s7739_s28, 0 }
  0xac   : > { %s6407_s16 = sshll.u32 %s339_s13, 5 }
  0xad   : > { %s7920_s29 = scalar_lea.vmem [#allocation13], %s6407_s16  ;;  %346 = sbr.rel (%p11057_p9) target bundleno = 1360 (0x550), region = 76 }
  0xb4   : > { %v483_v0 = vld [vmem:[#allocation2] sm:$0xf]  ;;  %v7354_v1 = vmov 14   ;;  %v347_v3 = vld [vmem:[#allocation9] sm:$0xff]  ;;  %vm351_vm0 = vcmask 1043456   ;;  %v370_v4 = vld [vmem:[#allocation9 + $0x8] sm:$0xff] }
  0xb5   : > { %6866 = vset.pattern.permute.xlu0 %v7354_v1  ;;  %v439_v2 = vld [vmem:[#allocation2] sm:$0xf]  ;;  %v7355_v5 = vmov 0   ;;  %v352_v6 = vsel %vm351_vm0, %v347_v3, 0.0  ;;  %v374_v7 = vsel %vm351_vm0, %v370_v4, 0.0  ;;  %v390_v8 = vsel %vm351_vm0, %v347_v3, -inf }
  0xb6   : > { %486 = vperm.xlu0 %6866, %v483_v0   ;;  %6864 = vset.pattern.permute.xlu1 %v7355_v5  ;;  %v404_v9 = vsel %vm351_vm0, %v370_v4, -inf  ;;  %v353_v10 = vrot.slane %v352_v6, 4  ;;  %v375_v11 = vrot.slane %v374_v7, 4  ;;  %v391_v12 = vrot.slane %v390_v8, 4  ;;  %v508_v14 = vld [vmem:[#allocation2] sm:$0xf] }
  0xb7   : > { %442 = vperm.xlu1 %6864, %v439_v2   ;;  %v405_v13 = vrot.slane %v404_v9, 4  ;;  %v7928_v15 = vcombine.high %v347_v3, %v347_v3  ;;  %v7356_v20 = vmov 21   ;;  %v372_v22 = vcombine.high %v370_v4, %v370_v4  ;;  %s7358_s26 = smov 51   ;;  %s7374_s17 = smov 112  }
  0xb8   : > { %v354_v16 = vadd.f32 %v353_v10, %v352_v6  ;;  %v376_v17 = vadd.f32 %v375_v11, %v374_v7  ;;  %v392_v18 = vmax.f32 %v390_v8, %v391_v12  ;;  %v7357_v44 = vmov 28   ;;  %v457_v8 = vld [vmem:[#allocation2] sm:$0xf]  ;;  %s7375_s23 = smov 96   ;;  %s7376_s10 = smov 80  }
  0xb9   : > { %11058 = vst [vmem:[#allocation23_spill] sm:$0xff] %v7928_v15  ;;  %v406_v19 = vmax.f32 %v404_v9, %v405_v13  ;;  %v359_v21 = vsel %vm351_vm0, %v7928_v15, 0.0  ;;  %v397_v23 = vsel %vm351_vm0, %v7928_v15, -inf  ;;  %v381_v29 = vsel %vm351_vm0, %v372_v22, 0.0  ;;  %s7378_s2 = smov 64   ;;  %s7380_s12 = smov 48  }
  0xba   : > { %6867 = vset.pattern.permute.xlu0 %v7356_v20  ;;  %v355_v24 = vrot.slane %v354_v16, 2  ;;  %v377_v25 = vrot.slane %v376_v17, 2  ;;  %v393_v26 = vrot.slane %v392_v18, 2  ;;  %v360_v28 = vrot.slane %v359_v21, 4  ;;  %s7381_s19 = smov 32   ;;  %s7383_s22 = smov 127  }
  0xbb   : > { %511 = vperm.xlu0 %6867, %v508_v14   ;;  %v407_v27 = vrot.slane %v406_v19, 2  ;;  %v398_v30 = vrot.slane %v397_v23, 4  ;;  %v411_v31 = vsel %vm351_vm0, %v372_v22, -inf  ;;  %v382_v37 = vrot.slane %v381_v29, 4  ;;  %s7384_s8 = smov 111   ;;  %s7386_s9 = smov 95  }
  0xbc   : > { %v356_v32 = vadd.f32 %v355_v24, %v354_v16  ;;  %v378_v33 = vadd.f32 %v377_v25, %v376_v17  ;;  %v394_v34 = vmax.f32 %v392_v18, %v393_v26  ;;  %v361_v36 = vadd.f32 %v360_v28, %v359_v21  ;;  %v533_v16 = vld [vmem:[#allocation2] sm:$0xf]  ;;  %s7387_s14 = smov 79   ;;  %s7389_s15 = smov 63  }
  0xbd   : > { %v408_v35 = vmax.f32 %v406_v19, %v407_v27  ;;  %v399_v38 = vmax.f32 %v397_v23, %v398_v30  ;;  %v412_v39 = vrot.slane %v411_v31, 4  ;;  %v383_v46 = vadd.f32 %v382_v37, %v381_v29  ;;  %v558_v17 = vld [vmem:[#allocation2] sm:$0xf]  ;;  %s7390_s18 = smov 47   ;;  %s7392_s21 = smov 31  }
  0xbe   : > { %v357_v40 = vrot.slane %v356_v32, 1  ;;  %v379_v41 = vrot.slane %v378_v33, 1  ;;  %v395_v42 = vrot.slane %v394_v34, 1  ;;  %v362_v45 = vrot.slane %v361_v36, 2  ;;  %v583_v19 = vld [vmem:[#allocation2] sm:$0xf] }
  0xbf   : > { %v409_v43 = vrot.slane %v408_v35, 1  ;;  %6868 = vset.pattern.permute.xlu0 %v7357_v44  ;;  %v400_v47 = vrot.slane %v399_v38, 2  ;;  %v413_v48 = vmax.f32 %v411_v31, %v412_v39  ;;  %vm418_vm1 = vcmask 1040384   ;;  %v627_v21 = vld [vmem:[#allocation2] sm:$0xf]  ;;  %s7393_s30 = smov 126  }
  0xc0   : > { %v358_v49 = vadd.f32 %v357_v40, %v356_v32  ;;  %v380_v50 = vadd.f32 %v379_v41, %v378_v33  ;;  %v396_v51 = vmax.f32 %v394_v34, %v395_v42  ;;  %v363_v52 = vadd.f32 %v362_v45, %v361_v36  ;;  %v652_v23 = vld [vmem:[#allocation2] sm:$0xf]  ;;  %s7395_s20 = smov 110   ;;  %s7396_s16 = smov 94  }
  0xc1   : > { %v384_v53 = vrot.slane %v383_v46, 2  ;;  %v401_v54 = vmax.f32 %v399_v38, %v400_v47  ;;  %v414_v55 = vrot.slane %v413_v48, 2  ;;  %v410_v58 = vmax.f32 %v408_v35, %v409_v43  ;;  %v677_v25 = vld [vmem:[#allocation2] sm:$0xf] }
  0xc2   : > { %v367_v56 = vmul.f32 0.25, %v358_v49  ;;  %v388_v57 = vmul.f32 0.25, %v380_v50  ;;  %vm421_vm2 = vcmask 1041408   ;;  %vm424_vm3 = vcmask 1042432   ;;  %v702_v27 = vld [vmem:[#allocation2] sm:$0xf] }
  0xc3   : > { %v364_v59 = vrot.slane %v363_v52, 1  ;;  %v385_v60 = vadd.f32 %v384_v53, %v383_v46  ;;  %v415_v61 = vmax.f32 %v413_v48, %v414_v55  ;;  %v402_v63 = vrot.slane %v401_v54, 1  ;;  %v727_v29 = vld [vmem:[#allocation2] sm:$0xf] }
  0xc4   : > { %v419_v62 = vsel %vm418_vm1, %v367_v56, %v388_v57  ;;  %v7359_v11 = vmov 7   ;;  %v7360_v18 = vmov 35   ;;  %v7361_v20 = vmov 42   ;;  %v752_v31 = vld [vmem:[#allocation2] sm:$0xf] }
  0xc5   : > { %v422_v0 = vsel %vm421_vm2, %v419_v62, %v396_v51  ;;  %v365_v1 = vadd.f32 %v364_v59, %v363_v52  ;;  %v386_v2 = vrot.slane %v385_v60, 1  ;;  %v416_v4 = vrot.slane %v415_v61, 1  ;;  %6865 = vset.pattern.permute.xlu1 %v7359_v11  ;;  %v777_v33 = vld [vmem:[#allocation2] sm:$0xf] }
  0xc6   : > { %v425_v3 = vsel %vm424_vm3, %v422_v0, %v410_v58  ;;  %v403_v7 = vmax.f32 %v401_v54, %v402_v63  ;;  %460 = vperm.xlu1 %6865, %v457_v8   ;;  %v7362_v22 = vmov 1   ;;  %v7363_v24 = vmov 8   ;;  %v822_v35 = vld [vmem:[#allocation2] sm:$0xf] }
  0xc7   : > { %429 = vrot.lane.b32.xlu0 %v425_v3, %s7358_s26  ;;  %v368_v5 = vmul.f32 0.25, %v365_v1  ;;  %v387_v6 = vadd.f32 %v386_v2, %v385_v60  ;;  %v417_v10 = vmax.f32 %v415_v61, %v416_v4  ;;  %v7364_v26 = vmov 15   ;;  %v847_v37 = vld [vmem:[#allocation2] sm:$0xf] }
  0xc8   : > { %v7365_v28 = vmov 22   ;;  %v7366_v30 = vmov 29   ;;  %v7367_v32 = vmov 36   ;;  %v7368_v34 = vmov 43   ;;  %v872_v39 = vld [vmem:[#allocation2] sm:$0xf] }
  0xc9   : > { %v389_v9 = vmul.f32 0.25, %v387_v6  ;;  %v7369_v36 = vmov 2   ;;  %v7370_v38 = vmov 9   ;;  %v7371_v40 = vmov 16   ;;  %v897_v41 = vld [vmem:[#allocation2] sm:$0xf] }
  0xca   : > { %v7372_v42 = vmov 23   ;;  %vm433_vm4 = vcmask 416768   ;;  %v7373_v46 = vmov 30   ;;  %v922_v52 = vld [vmem:[#allocation2] sm:$0xf]  ;;  %v7377_v54 = vmov 37  }
  0xcb   : > { %v420_v12 = vsel %vm418_vm1, %v368_v5, %v389_v9  ;;  %v947_v53 = vld [vmem:[#allocation2] sm:$0xf]  ;;  %v7379_v56 = vmov 44   ;;  %v7382_v57 = vmov 3   ;;  %v7385_v59 = vmov 10  }
  0xcc   : > { %v423_v13 = vsel %vm421_vm2, %v420_v12, %v403_v7  ;;  %v972_v55 = vld [vmem:[#allocation2] sm:$0xf]  ;;  %v7388_v61 = vmov 17   ;;  %v7391_v63 = vmov 24   ;;  %v7394_v1 = vmov 31  }
  0xcd   : > { %v426_v14 = vsel %vm424_vm3, %v423_v13, %v417_v10  ;;  %v1017_v58 = vld [vmem:[#allocation2] sm:$0xf]  ;;  %v7397_v3 = vmov 38   ;;  %v7399_v5 = vmov 45   ;;  %v7400_v7 = vmov 4  }
  0xce   : > { %431 = vrot.lane.b32.xlu0 %v426_v14, %s7358_s26  ;;  %v1042_v60 = vld [vmem:[#allocation2] sm:$0xf]  ;;  %s7398_s26 = smov 78   ;;  %v7401_v9 = vmov 11   ;;  %v7402_v11 = vmov 18   ;;  %v7403_v13 = vmov 25  }
  0xcf   : > { %v1067_v62 = vld [vmem:[#allocation2] sm:$0xf]  ;;  %vm478_vm5 = vcmask 916480   ;;  %vm503_vm6 = vcmask 785408   ;;  %vm528_vm7 = vcmask 654336   ;;  %vm553_vm8 = vcmask 523264  }
  0xd0   : > { %v1092_v0 = vld [vmem:[#allocation2] sm:$0xf]  ;;  %vm647_vm9 = vcmask 1039360   ;;  %vm672_vm10 = vcmask 908288   ;;  %vm697_vm11 = vcmask 777216   ;;  %vm722_vm12 = vcmask 646144  }
  0xd1   : > { %v1117_v2 = vld [vmem:[#allocation2] sm:$0xf]  ;;  %vm747_vm13 = vcmask 515072   ;;  %vm578_vm14 = vcmask 392192   ;;  %vm772_vm15 = vcmask 384000  }
  0xd2   : > { %536 = vperm.xlu0 %6868, %v533_v16   ;;  %v1142_v4 = vld [vmem:[#allocation2] sm:$0xf] }
  0xd3   : > { %v1167_v6 = vld [vmem:[#allocation2] sm:$0xf] }
  0xd4   : > { %v1212_v8 = vld [vmem:[#allocation2] sm:$0xf] }
  0xd5   : > { %v1237_v10 = vld [vmem:[#allocation2] sm:$0xf] }
  0xd6   : > { %6869 = vset.pattern.permute.xlu0 %v7360_v18  ;;  %v1262_v12 = vld [vmem:[#allocation2] sm:$0xf]  ;;  %v7404_v18 = vmov 32  }
  0xd7   : > { %561 = vperm.xlu0 %6869, %v558_v17   ;;  %v1287_v14 = vld [vmem:[#allocation2] sm:$0xf] }
  0xdb   : > { %6870 = vset.pattern.permute.xlu0 %v7361_v20 }
  0xdc   : > { %586 = vperm.xlu0 %6870, %v583_v19   ;;  %v1312_v19 = vld [vmem:[#allocation2] sm:$0xf] }
  0xe0   : > { %6871 = vset.pattern.permute.xlu0 %v7362_v22  ;;  %v1337_v22 = vld [vmem:[#allocation2] sm:$0xf] }
  0xe1   : > { %630 = vperm.xlu0 %6871, %v627_v21   ;;  %v7405_v21 = vmov 39  }
  0xe5   : > { %6872 = vset.pattern.permute.xlu0 %v7363_v24 }
  0xe6   : > { %655 = vperm.xlu0 %6872, %v652_v23  }
  0xea   : > { %6873 = vset.pattern.permute.xlu0 %v7364_v26  ;;  %v1362_v26 = vld [vmem:[#allocation2] sm:$0xf] }
  0xeb   : > { %680 = vperm.xlu0 %6873, %v677_v25   ;;  %v7406_v25 = vmov 46  }
  0xef   : > { %6874 = vset.pattern.permute.xlu0 %v7365_v28 }
  0xf0   : > { %705 = vperm.xlu0 %6874, %v702_v27  }
  0xf4   : > { %6875 = vset.pattern.permute.xlu0 %v7366_v30  ;;  %v1407_v30 = vld [vmem:[#allocation2] sm:$0xf] }
  0xf5   : > { %730 = vperm.xlu0 %6875, %v727_v29   ;;  %v7408_v29 = vmov 5  }
  0xf9   : > { %6876 = vset.pattern.permute.xlu0 %v7367_v32 }
  0xfa   : > { %755 = vperm.xlu0 %6876, %v752_v31  }
  0xfe   : > { %6877 = vset.pattern.permute.xlu0 %v7368_v34  ;;  %v1432_v34 = vld [vmem:[#allocation2] sm:$0xf] }
  0xff   : > { %780 = vperm.xlu0 %6877, %v777_v33   ;;  %v7410_v33 = vmov 12  }
 0x103   : > { %6878 = vset.pattern.permute.xlu0 %v7369_v36 }
 0x104   : > { %825 = vperm.xlu0 %6878, %v822_v35  }
 0x108   : > { %6879 = vset.pattern.permute.xlu0 %v7370_v38  ;;  %v1457_v38 = vld [vmem:[#allocation2] sm:$0xf] }
 0x109   : > { %850 = vperm.xlu0 %6879, %v847_v37   ;;  %v7412_v37 = vmov 19  }
 0x10d   : > { %6880 = vset.pattern.permute.xlu0 %v7371_v40 }
 0x10e   : > { %875 = vperm.xlu0 %6880, %v872_v39  }
 0x112   : > { %6881 = vset.pattern.permute.xlu0 %v7372_v42  ;;  %v1482_v42 = vld [vmem:[#allocation2] sm:$0xf] }
 0x113   : > { %900 = vperm.xlu0 %6881, %v897_v41   ;;  %v7414_v41 = vmov 26  }
 0x117   : > { %6882 = vset.pattern.permute.xlu0 %v7373_v46 }
 0x135   : > { %v7942_v43 = vpop.permute.xlu0 %486 }
 0x136   : > { %v8002_v16 = vpop.permute.xlu1 %442 }
 0x13a   : > { %v7944_v44 = vpop.permute.xlu0 %511 }
 0x13e   : > { %v430_v45 = vpop.permute.xlu0 %429 }
 0x13f   : > { %v437_v48 = vsel %vm433_vm4, 0.0, %v430_v45 }
 0x142   : > { %v432_v47 = vpop.permute.xlu0 %431 }
 0x143   : > { %v434_v49 = vsel %vm433_vm4, %v430_v45, %v432_v47  ;;  %v7946_v50 = vsel %vm433_vm4, %v432_v47, 0.0  ;;  %v7416_v47 = vmov 33   ;;  %vm842_vm4 = vcmask 1031168  }
 0x144   : > { %v7948_v51 = vcombine.low %v437_v48, %v434_v49  ;;  %473 = vrot.lane.b32.xlu1 %v7946_v50, %s7374_s17  ;;  %v1507_v48 = vld [vmem:[#allocation2] sm:$0xf] }
 0x145   : > { %v8008_v17 = vpop.permute.xlu1 %460 }
 0x146   : > { %471 = vrot.lane.b32.xlu0 %v7948_v51, %s7374_s17  ;;  %s7407_s17 = smov 62  }
 0x148   : > { %498 = vrot.lane.b32.xlu1 %v7946_v50, %s7375_s23 }
 0x14a   : > { %925 = vperm.xlu0 %6882, %v922_v52  }
 0x14c   : > { %523 = vrot.lane.b32.xlu1 %v7946_v50, %s7376_s10 }
 0x14e   : > { %6883 = vset.pattern.permute.xlu0 %v7377_v54  ;;  %v1532_v54 = vld [vmem:[#allocation2] sm:$0xf] }
 0x14f   : > { %950 = vperm.xlu0 %6883, %v947_v53   ;;  %v7418_v53 = vmov 40  }
 0x150   : > { %548 = vrot.lane.b32.xlu1 %v7946_v50, %s7378_s2 }
 0x153   : > { %6884 = vset.pattern.permute.xlu0 %v7379_v56 }
 0x154   : > { %573 = vrot.lane.b32.xlu1 %v7946_v50, %s7380_s12  ;;  %975 = vperm.xlu0 %6884, %v972_v55  }
 0x158   : > { %598 = vrot.lane.b32.xlu1 %v7946_v50, %s7381_s19  ;;  %6885 = vset.pattern.permute.xlu0 %v7382_v57  ;;  %v7420_v57 = vmov 47  }
 0x159   : > { %1020 = vperm.xlu0 %6885, %v1017_v58   ;;  %v1557_v58 = vld [vmem:[#allocation2] sm:$0xf] }
 0x15c   : > { %642 = vrot.lane.b32.xlu1 %v7946_v50, %s7383_s22 }
 0x15d   : > { %6886 = vset.pattern.permute.xlu0 %v7385_v59 }
 0x15e   : > { %1045 = vperm.xlu0 %6886, %v1042_v60  }
 0x160   : > { %667 = vrot.lane.b32.xlu1 %v7946_v50, %s7384_s8 }
 0x162   : > { %6887 = vset.pattern.permute.xlu0 %v7388_v61  ;;  %v7422_v61 = vmov 6  }
 0x163   : > { %1070 = vperm.xlu0 %6887, %v1067_v62   ;;  %v1602_v62 = vld [vmem:[#allocation2] sm:$0xf] }
 0x164   : > { %692 = vrot.lane.b32.xlu1 %v7946_v50, %s7386_s9 }
 0x167   : > { %6888 = vset.pattern.permute.xlu0 %v7391_v63 }
 0x168   : > { %717 = vrot.lane.b32.xlu1 %v7946_v50, %s7387_s14  ;;  %1095 = vperm.xlu0 %6888, %v1092_v0  }
 0x16c   : > { %742 = vrot.lane.b32.xlu1 %v7946_v50, %s7389_s15  ;;  %6889 = vset.pattern.permute.xlu0 %v7394_v1  ;;  %v7424_v1 = vmov 13  }
 0x16d   : > { %1120 = vperm.xlu0 %6889, %v1117_v2   ;;  %v1627_v2 = vld [vmem:[#allocation2] sm:$0xf] }
 0x170   : > { %767 = vrot.lane.b32.xlu1 %v7946_v50, %s7390_s18 }
 0x171   : > { %6890 = vset.pattern.permute.xlu0 %v7397_v3 }
 0x172   : > { %1145 = vperm.xlu0 %6890, %v1142_v4  }
 0x174   : > { %792 = vrot.lane.b32.xlu1 %v7946_v50, %s7392_s21 }
 0x176   : > { %6891 = vset.pattern.permute.xlu0 %v7399_v5  ;;  %v7426_v5 = vmov 20  }
 0x177   : > { %1170 = vperm.xlu0 %6891, %v1167_v6   ;;  %v1652_v6 = vld [vmem:[#allocation2] sm:$0xf] }
 0x178   : > { %837 = vrot.lane.b32.xlu1 %v7946_v50, %s7393_s30 }
 0x17b   : > { %6892 = vset.pattern.permute.xlu0 %v7400_v7 }
 0x17c   : > { %862 = vrot.lane.b32.xlu1 %v7946_v50, %s7395_s20  ;;  %1215 = vperm.xlu0 %6892, %v1212_v8  }
 0x180   : > { %887 = vrot.lane.b32.xlu1 %v7946_v50, %s7396_s16  ;;  %6893 = vset.pattern.permute.xlu0 %v7401_v9  ;;  %v7428_v9 = vmov 27  }
 0x181   : > { %1240 = vperm.xlu0 %6893, %v1237_v10   ;;  %v1677_v10 = vld [vmem:[#allocation2] sm:$0xf] }
 0x184   : > { %912 = vrot.lane.b32.xlu1 %v7946_v50, %s7398_s26 }
 0x185   : > { %6894 = vset.pattern.permute.xlu0 %v7402_v11 }
 0x186   : > { %1265 = vperm.xlu0 %6894, %v1262_v12   ;;  %v8100_v12 = vld [vmem:[#allocation10] sm:$0xff] }
 0x188   : > { %496 = vrot.lane.b32.xlu1 %v7948_v51, %s7375_s23 }
 0x18a   : > { %6895 = vset.pattern.permute.xlu0 %v7403_v13  ;;  %v8102_v13 = vld [vmem:[#allocation10 + $0x8] sm:$0xff] }
 0x18b   : > { %1290 = vperm.xlu0 %6895, %v1287_v14  }
 0x18c   : > { %521 = vrot.lane.b32.xlu1 %v7948_v51, %s7376_s10  ;;  %s7409_s10 = smov 46  }
 0x18f   : > { %6896 = vset.pattern.permute.xlu0 %v7404_v18  ;;  %v1860_v18 = vsel %vm351_vm0, %v8100_v12, 0.0 }
 0x190   : > { %546 = vrot.lane.b32.xlu1 %v7948_v51, %s7378_s2  ;;  %1315 = vperm.xlu0 %6896, %v1312_v19   ;;  %v1881_v19 = vsel %vm351_vm0, %v8102_v13, 0.0 }
 0x194   : > { %571 = vrot.lane.b32.xlu1 %v7948_v51, %s7380_s12  ;;  %6897 = vset.pattern.permute.xlu0 %v7405_v21  ;;  %s7411_s12 = smov 30   ;;  %v1861_v21 = vrot.slane %v1860_v18, 4 }
 0x195   : > { %1340 = vperm.xlu0 %6897, %v1337_v22   ;;  %v7430_v22 = vmov 34  }
 0x198   : > { %596 = vrot.lane.b32.xlu1 %v7948_v51, %s7381_s19 }
 0x199   : > { %6898 = vset.pattern.permute.xlu0 %v7406_v25  ;;  %v1702_v25 = vld [vmem:[#allocation2] sm:$0xf] }
 0x19a   : > { %1365 = vperm.xlu0 %6898, %v1362_v26   ;;  %v1882_v26 = vrot.slane %v1881_v19, 4 }
 0x19c   : > { %640 = vrot.lane.b32.xlu1 %v7948_v51, %s7383_s22  ;;  %s7413_s22 = smov 125  }
 0x19e   : > { %6899 = vset.pattern.permute.xlu0 %v7408_v29 }
 0x19f   : > { %1410 = vperm.xlu0 %6899, %v1407_v30   ;;  %v1862_v30 = vadd.f32 %v1861_v21, %v1860_v18  ;;  %v1752_v21 = vld [vmem:[#allocation2] sm:$0xf] }
 0x1a0   : > { %665 = vrot.lane.b32.xlu1 %v7948_v51, %s7384_s8  ;;  %s7415_s8 = smov 109  }
 0x1a3   : > { %6900 = vset.pattern.permute.xlu0 %v7410_v33  ;;  %v1883_v33 = vadd.f32 %v1882_v26, %v1881_v19  ;;  %v7433_v19 = vmov 48  }
 0x1a4   : > { %690 = vrot.lane.b32.xlu1 %v7948_v51, %s7386_s9  ;;  %1435 = vperm.xlu0 %6900, %v1432_v34   ;;  %s7417_s9 = smov 93   ;;  %v1897_v34 = vsel %vm351_vm0, %v8100_v12, -inf }
 0x1a8   : > { %715 = vrot.lane.b32.xlu1 %v7948_v51, %s7387_s14  ;;  %6901 = vset.pattern.permute.xlu0 %v7412_v37  ;;  %s7419_s14 = smov 77   ;;  %v1898_v37 = vrot.slane %v1897_v34, 4 }
 0x1a9   : > { %1460 = vperm.xlu0 %6901, %v1457_v38   ;;  %v1911_v38 = vsel %vm351_vm0, %v8102_v13, -inf }
 0x1ac   : > { %740 = vrot.lane.b32.xlu1 %v7948_v51, %s7389_s15  ;;  %s7421_s15 = smov 61  }
 0x1ad   : > { %6902 = vset.pattern.permute.xlu0 %v7414_v41  ;;  %v1863_v41 = vrot.slane %v1862_v30, 2 }
 0x1ae   : > { %1485 = vperm.xlu0 %6902, %v1482_v42   ;;  %v1884_v42 = vrot.slane %v1883_v33, 2 }
 0x1b0   : > { %765 = vrot.lane.b32.xlu1 %v7948_v51, %s7390_s18  ;;  %s7423_s18 = smov 45  }
 0x1b2   : > { %6903 = vset.pattern.permute.xlu0 %v7416_v47  ;;  %v1912_v47 = vrot.slane %v1911_v38, 4 }
 0x1b3   : > { %1510 = vperm.xlu0 %6903, %v1507_v48   ;;  %v1899_v48 = vmax.f32 %v1897_v34, %v1898_v37 }
 0x1b4   : > { %790 = vrot.lane.b32.xlu1 %v7948_v51, %s7392_s21  ;;  %s7425_s21 = smov 29  }
 0x1b6   : > { %v8012_v20 = vpop.permute.xlu1 %473 }
 0x1b7   : > { %6904 = vset.pattern.permute.xlu0 %v7418_v53 }
 0x1b8   : > { %835 = vrot.lane.b32.xlu1 %v7948_v51, %s7393_s30  ;;  %1535 = vperm.xlu0 %6904, %v1532_v54   ;;  %v7431_v54 = vmov 41  }
 0x1ba   : > { %v8016_v23 = vpop.permute.xlu1 %498 }
 0x1bc   : > { %860 = vrot.lane.b32.xlu1 %v7948_v51, %s7395_s20  ;;  %6905 = vset.pattern.permute.xlu0 %v7420_v57  ;;  %s7427_s20 = smov 124   ;;  %v1727_v57 = vld [vmem:[#allocation2] sm:$0xf] }
 0x1bd   : > { %1560 = vperm.xlu0 %6905, %v1557_v58   ;;  %v1864_v58 = vadd.f32 %v1863_v41, %v1862_v30 }
 0x1be   : > { %v8020_v24 = vpop.permute.xlu1 %523 }
 0x1c0   : > { %885 = vrot.lane.b32.xlu1 %v7948_v51, %s7396_s16 }
 0x1c1   : > { %6906 = vset.pattern.permute.xlu0 %v7422_v61  ;;  %v1885_v61 = vadd.f32 %v1884_v42, %v1883_v33 }
 0x1c2   : > { %v8024_v27 = vpop.permute.xlu1 %548  ;;  %1605 = vperm.xlu0 %6906, %v1602_v62   ;;  %v1913_v62 = vmax.f32 %v1911_v38, %v1912_v47 }
 0x1c4   : > { %910 = vrot.lane.b32.xlu1 %v7948_v51, %s7398_s26  ;;  %s7429_s26 = smov 108  }
 0x1c6   : > { %v8028_v28 = vpop.permute.xlu1 %573  ;;  %6907 = vset.pattern.permute.xlu0 %v7424_v1  ;;  %v1900_v1 = vrot.slane %v1899_v48, 2 }
 0x1c7   : > { %1630 = vperm.xlu0 %6907, %v1627_v2   ;;  %v1865_v2 = vrot.slane %v1864_v58, 1 }
 0x1c8   : > { %935 = vrot.lane.b32.xlu1 %v7948_v51, %s7407_s17 }
 0x1ca   : > { %v8032_v31 = vpop.permute.xlu1 %598 }
 0x1cb   : > { %6908 = vset.pattern.permute.xlu0 %v7426_v5  ;;  %v1886_v5 = vrot.slane %v1885_v61, 1 }
 0x1cc   : > { %937 = vrot.lane.b32.xlu1 %v7946_v50, %s7407_s17  ;;  %1655 = vperm.xlu0 %6908, %v1652_v6   ;;  %v1914_v6 = vrot.slane %v1913_v62, 2 }
 0x1cd   : > { %v1887_v18 = vadd.f32 %v1886_v5, %v1885_v61 }
 0x1ce   : > { %v8036_v32 = vpop.permute.xlu1 %642 }
 0x1cf   : > { %v1895_v30 = vmul.f32 0.25, %v1887_v18  ;;  %v8160_v18 = vpop.permute.xlu0 %536 }
 0x1d0   : > { %960 = vrot.lane.b32.xlu1 %v7948_v51, %s7409_s10  ;;  %6909 = vset.pattern.permute.xlu0 %v7428_v9 }
 0x1d1   : > { %1680 = vperm.xlu0 %6909, %v1677_v10   ;;  %v1866_v10 = vadd.f32 %v1865_v2, %v1864_v58  ;;  %v1943_v58 = vld [vmem:[#allocation2] sm:$0xf] }
 0x1d2   : > { %v8039_v35 = vpop.permute.xlu1 %667 }
 0x1d3   : > { %v1874_v26 = vmul.f32 0.25, %v1866_v10 }
 0x1d4   : > { %962 = vrot.lane.b32.xlu1 %v7946_v50, %s7409_s10  ;;  %s7432_s10 = smov 92  }
 0x1d5   : > { %6910 = vset.pattern.permute.xlu0 %v7430_v22  ;;  %v1901_v22 = vmax.f32 %v1899_v48, %v1900_v1  ;;  %v1925_v38 = vsel %vm418_vm1, %v1874_v26, %v1895_v30 }
 0x1d6   : > { %v8042_v36 = vpop.permute.xlu1 %692  ;;  %1705 = vperm.xlu0 %6910, %v1702_v25   ;;  %v1915_v25 = vmax.f32 %v1913_v62, %v1914_v6 }
 0x1d7   : > { %v1902_v33 = vrot.slane %v1901_v22, 1 }
 0x1d8   : > { %985 = vrot.lane.b32.xlu1 %v7948_v51, %s7411_s12  ;;  %v1916_v34 = vrot.slane %v1915_v25, 1 }
 0x1d9   : > { %v1903_v41 = vmax.f32 %v1901_v22, %v1902_v33 }
 0x1da   : > { %v8046_v39 = vpop.permute.xlu1 %717  ;;  %6911 = vset.pattern.permute.xlu0 %v7431_v54  ;;  %v1917_v42 = vmax.f32 %v1915_v25, %v1916_v34 }
 0x1db   : > { %1730 = vperm.xlu0 %6911, %v1727_v57   ;;  %v1927_v48 = vsel %vm421_vm2, %v1925_v38, %v1903_v41  ;;  %v7435_v57 = vmov 49  }
 0x1dc   : > { %987 = vrot.lane.b32.xlu1 %v7946_v50, %s7411_s12  ;;  %v1929_v54 = vsel %vm424_vm3, %v1927_v48, %v1917_v42 }
 0x1de   : > { %v8050_v40 = vpop.permute.xlu1 %742 }
 0x1df   : > { %6912 = vset.pattern.permute.xlu0 %v7433_v19 }
 0x1e0   : > { %1030 = vrot.lane.b32.xlu1 %v7948_v51, %s7413_s22  ;;  %1755 = vperm.xlu0 %6912, %v1752_v21   ;;  %v8166_v21 = vpop.permute.xlu0 %561 }
 0x1e2   : > { %v8053_v45 = vpop.permute.xlu1 %767 }
 0x1e4   : > { %1032 = vrot.lane.b32.xlu1 %v7946_v50, %s7413_s22  ;;  %s7434_s22 = smov 76   ;;  %6913 = vset.pattern.permute.xlu0 %v7435_v57  ;;  %v8173_v26 = vpop.permute.xlu0 %586 }
 0x1e6   : > { %v8056_v46 = vpop.permute.xlu1 %792 }
 0x1e8   : > { %1055 = vrot.lane.b32.xlu1 %v7948_v51, %s7415_s8  ;;  %v8179_v33 = vpop.permute.xlu0 %630 }
 0x1ea   : > { %v8059_v49 = vpop.permute.xlu1 %837 }
 0x1eb   : > { %11059 = vst [vmem:[#allocation24_spill] sm:$0xff] %v8059_v49 }
 0x1ec   : > { %1057 = vrot.lane.b32.xlu1 %v7946_v50, %s7415_s8  ;;  %s7436_s8 = smov 102   ;;  %v8186_v41 = vpop.permute.xlu0 %655 }
 0x1ed   : > { %1933 = vrot.lane.b32.xlu0 %v1929_v54, %s7436_s8 }
 0x1ee   : > { %v8062_v52 = vpop.permute.xlu1 %862 }
 0x1ef   : > { %11060 = vst [vmem:[#allocation25_spill] sm:$0xff] %v8062_v52 }
 0x1f0   : > { %1080 = vrot.lane.b32.xlu1 %v7948_v51, %s7417_s9  ;;  %v8192_v48 = vpop.permute.xlu0 %680 }
 0x1f1   : > { %1946 = vperm.xlu0 %6913, %v1943_v58  }
 0x1f2   : > { %v8065_v55 = vpop.permute.xlu1 %887 }
 0x1f3   : > { %11061 = vst [vmem:[#allocation26_spill] sm:$0xff] %v8065_v55 }
 0x1f4   : > { %1082 = vrot.lane.b32.xlu1 %v7946_v50, %s7417_s9  ;;  %s7437_s9 = smov 60   ;;  %v8199_v58 = vpop.permute.xlu0 %705 }
 0x1f6   : > { %v8068_v56 = vpop.permute.xlu1 %912 }
 0x1f7   : > { %11062 = vst [vmem:[#allocation27_spill] sm:$0xff] %v8068_v56 }
 0x1f8   : > { %1105 = vrot.lane.b32.xlu1 %v7948_v51, %s7419_s14 }
 0x1fa   : > { %v8071_v59 = vpop.permute.xlu1 %496 }
 0x1fc   : > { %1107 = vrot.lane.b32.xlu1 %v7946_v50, %s7419_s14  ;;  %s7438_s14 = smov 44  }
 0x1fe   : > { %v8074_v60 = vpop.permute.xlu1 %521 }
 0x200   : > { %1130 = vrot.lane.b32.xlu1 %v7948_v51, %s7421_s15 }
 0x202   : > { %v8077_v63 = vpop.permute.xlu1 %546 }
 0x204   : > { %1132 = vrot.lane.b32.xlu1 %v7946_v50, %s7421_s15  ;;  %s7439_s15 = smov 28  }
 0x206   : > { %v8080_v0 = vpop.permute.xlu1 %571 }
 0x207   : > { %11063 = vst [vmem:[#allocation28_spill] sm:$0xff] %v8080_v0 }
 0x208   : > { %1155 = vrot.lane.b32.xlu1 %v7948_v51, %s7423_s18 }
 0x20a   : > { %v8083_v3 = vpop.permute.xlu1 %596 }
 0x20b   : > { %11064 = vst [vmem:[#allocation29_spill] sm:$0xff] %v8083_v3 }
 0x20c   : > { %1157 = vrot.lane.b32.xlu1 %v7946_v50, %s7423_s18  ;;  %s7440_s18 = smov 123  }
 0x20e   : > { %v8086_v4 = vpop.permute.xlu1 %640 }
 0x210   : > { %1180 = vrot.lane.b32.xlu1 %v7948_v51, %s7425_s21 }
 0x212   : > { %v8089_v7 = vpop.permute.xlu1 %665 }
 0x214   : > { %1182 = vrot.lane.b32.xlu1 %v7946_v50, %s7425_s21  ;;  %s7441_s21 = smov 107  }
 0x216   : > { %v8092_v8 = vpop.permute.xlu1 %690 }
 0x218   : > { %1225 = vrot.lane.b32.xlu1 %v7948_v51, %s7427_s20 }
 0x21a   : > { %v8096_v11 = vpop.permute.xlu1 %715 }
 0x21c   : > { %1227 = vrot.lane.b32.xlu1 %v7946_v50, %s7427_s20 }
 0x21e   : > { %v8104_v14 = vpop.permute.xlu1 %740 }
 0x220   : > { %1250 = vrot.lane.b32.xlu1 %v7948_v51, %s7429_s26 }
 0x222   : > { %v8111_v29 = vpop.permute.xlu1 %765 }
 0x223   : > { %11065 = vst [vmem:[#allocation30_spill] sm:$0xff] %v8111_v29 }
 0x224   : > { %1252 = vrot.lane.b32.xlu1 %v7946_v50, %s7429_s26  ;;  %s7442_s26 = smov 91  }
 0x226   : > { %v8118_v53 = vpop.permute.xlu1 %790 }
 0x227   : > { %11066 = vst [vmem:[#allocation31_spill] sm:$0xff] %v8118_v53 }
 0x228   : > { %1275 = vrot.lane.b32.xlu1 %v7948_v51, %s7432_s10 }
 0x22a   : > { %v8122_v9 = vpop.permute.xlu1 %835 }
 0x22b   : > { %11067 = vst [vmem:[#allocation32_spill] sm:$0xff] %v8122_v9 }
 0x22c   : > { %1277 = vrot.lane.b32.xlu1 %v7946_v50, %s7432_s10 }
 0x22e   : > { %v8126_v37 = vpop.permute.xlu1 %860 }
 0x22f   : > { %11068 = vst [vmem:[#allocation33_spill] sm:$0xff] %v8126_v37 }
 0x230   : > { %1300 = vrot.lane.b32.xlu1 %v7948_v51, %s7434_s22 }
 0x232   : > { %v8130_v47 = vpop.permute.xlu1 %885 }
 0x233   : > { %11069 = vst [vmem:[#allocation34_spill] sm:$0xff] %v8130_v47 }
 0x234   : > { %1302 = vrot.lane.b32.xlu1 %v7946_v50, %s7434_s22  ;;  %s7443_s22 = smov 75  }
 0x236   : > { %v8136_v61 = vpop.permute.xlu1 %910 }
 0x237   : > { %11070 = vst [vmem:[#allocation35_spill] sm:$0xff] %v8136_v61 }
 0x238   : > { %1325 = vrot.lane.b32.xlu1 %v7948_v51, %s7437_s9 }
 0x23a   : > { %v8140_v62 = vpop.permute.xlu1 %935 }
 0x23b   : > { %11071 = vst [vmem:[#allocation36_spill] sm:$0xff] %v8140_v62 }
 0x23c   : > { %1327 = vrot.lane.b32.xlu1 %v7946_v50, %s7437_s9 }
 0x23e   : > { %v8144_v1 = vpop.permute.xlu1 %937 }
 0x23f   : > { %11072 = vst [vmem:[#allocation37_spill] sm:$0xff] %v8144_v1 }
 0x240   : > { %1350 = vrot.lane.b32.xlu1 %v7948_v51, %s7438_s14 }
 0x242   : > { %v8147_v2 = vpop.permute.xlu1 %960 }
 0x243   : > { %11073 = vst [vmem:[#allocation38_spill] sm:$0xff] %v8147_v2 }
 0x244   : > { %1352 = vrot.lane.b32.xlu1 %v7946_v50, %s7438_s14  ;;  %s7444_s14 = smov 59  }
 0x246   : > { %v8150_v5 = vpop.permute.xlu1 %962 }
 0x247   : > { %11074 = vst [vmem:[#allocation39_spill] sm:$0xff] %v8150_v5 }
 0x248   : > { %1375 = vrot.lane.b32.xlu1 %v7948_v51, %s7439_s15 }
 0x24a   : > { %v8154_v6 = vpop.permute.xlu1 %985 }
 0x24b   : > { %11075 = vst [vmem:[#allocation40_spill] sm:$0xff] %v8154_v6 }
 0x24c   : > { %1377 = vrot.lane.b32.xlu1 %v7946_v50, %s7439_s15 }
 0x24e   : > { %v8158_v10 = vpop.permute.xlu1 %987 }
 0x24f   : > { %11076 = vst [vmem:[#allocation41_spill] sm:$0xff] %v8158_v10 }
 0x250   : > { %1420 = vrot.lane.b32.xlu1 %v7948_v51, %s7440_s18 }
 0x252   : > { %v8163_v19 = vpop.permute.xlu1 %1030 }
 0x253   : > { %11077 = vst [vmem:[#allocation42_spill] sm:$0xff] %v8163_v19 }
 0x254   : > { %1422 = vrot.lane.b32.xlu1 %v7946_v50, %s7440_s18  ;;  %s7445_s18 = smov 43  }
 0x256   : > { %v8168_v22 = vpop.permute.xlu1 %1032 }
 0x257   : > { %11078 = vst [vmem:[#allocation43_spill] sm:$0xff] %v8168_v22 }
 0x258   : > { %1445 = vrot.lane.b32.xlu1 %v7948_v51, %s7441_s21 }
 0x25a   : > { %v8171_v25 = vpop.permute.xlu1 %1055 }
 0x25b   : > { %11079 = vst [vmem:[#allocation44_spill] sm:$0xff] %v8171_v25 }
 0x25c   : > { %1447 = vrot.lane.b32.xlu1 %v7946_v50, %s7441_s21  ;;  %s7446_s21 = smov 27  }
 0x25e   : > { %v8176_v30 = vpop.permute.xlu1 %1057 }
 0x25f   : > { %11080 = vst [vmem:[#allocation45_spill] sm:$0xff] %v8176_v30 }
 0x260   : > { %1470 = vrot.lane.b32.xlu1 %v7948_v51, %s7442_s26 }
 0x262   : > { %v8181_v34 = vpop.permute.xlu1 %1080 }
 0x263   : > { %11081 = vst [vmem:[#allocation46_spill] sm:$0xff] %v8181_v34 }
 0x264   : > { %1472 = vrot.lane.b32.xlu1 %v7946_v50, %s7442_s26  ;;  %s7447_s26 = smov 122  }
 0x266   : > { %v8184_v38 = vpop.permute.xlu1 %1082 }
 0x267   : > { %11082 = vst [vmem:[#allocation47_spill] sm:$0xff] %v8184_v38 }
 0x268   : > { %1495 = vrot.lane.b32.xlu1 %v7948_v51, %s7443_s22 }
 0x26a   : > { %v8189_v42 = vpop.permute.xlu1 %1105 }
 0x26b   : > { %11083 = vst [vmem:[#allocation48_spill] sm:$0xff] %v8189_v42  ;;  %v8205_v42 = vpop.permute.xlu0 %730 }
 0x26c   : > { %1497 = vrot.lane.b32.xlu1 %v7946_v50, %s7443_s22  ;;  %s7448_s22 = smov 106  }
 0x26e   : > { %v8194_v54 = vpop.permute.xlu1 %1107 }
 0x26f   : > { %11084 = vst [vmem:[#allocation49_spill] sm:$0xff] %v8194_v54  ;;  %v8212_v19 = vpop.permute.xlu0 %755 }
 0x270   : > { %1520 = vrot.lane.b32.xlu1 %v7948_v51, %s7444_s14 }
 0x272   : > { %v8197_v57 = vpop.permute.xlu1 %1130 }
 0x273   : > { %11085 = vst [vmem:[#allocation50_spill] sm:$0xff] %v8197_v57 }
 0x274   : > { %1522 = vrot.lane.b32.xlu1 %v7946_v50, %s7444_s14  ;;  %s7449_s14 = smov 90  }
 0x276   : > { %v8202_v15 = vpop.permute.xlu1 %1132 }
 0x277   : > { %11086 = vst [vmem:[#allocation51_spill] sm:$0xff] %v8202_v15  ;;  %v8218_v15 = vpop.permute.xlu0 %780 }
 0x278   : > { %1545 = vrot.lane.b32.xlu1 %v7948_v51, %s7445_s18 }
 0x27a   : > { %v8207_v34 = vpop.permute.xlu1 %1155 }
 0x27b   : > { %11087 = vst [vmem:[#allocation52_spill] sm:$0xff] %v8207_v34 }
 0x27c   : > { %1547 = vrot.lane.b32.xlu1 %v7946_v50, %s7445_s18  ;;  %s7450_s18 = smov 74  }
 0x27e   : > { %v8210_v54 = vpop.permute.xlu1 %1157 }
 0x27f   : > { %11088 = vst [vmem:[#allocation53_spill] sm:$0xff] %v8210_v54  ;;  %v8226_v54 = vpop.permute.xlu0 %825 }
 0x280   : > { %1570 = vrot.lane.b32.xlu1 %v7948_v51, %s7446_s21 }
 0x282   : > { %v8215_v57 = vpop.permute.xlu1 %1180 }
 0x283   : > { %11089 = vst [vmem:[#allocation54_spill] sm:$0xff] %v8215_v57  ;;  %v8233_v57 = vpop.permute.xlu0 %850 }
 0x284   : > { %1572 = vrot.lane.b32.xlu1 %v7946_v50, %s7446_s21  ;;  %s7452_s21 = smov 58  }
 0x286   : > { %v8220_v38 = vpop.permute.xlu1 %1182 }
 0x287   : > { %11090 = vst [vmem:[#allocation55_spill] sm:$0xff] %v8220_v38  ;;  %v8240_v38 = vcombine.high %v8100_v12, %v8100_v12  ;;  %v8246_v6 = vpop.permute.xlu0 %875 }
 0x288   : > { %1615 = vrot.lane.b32.xlu1 %v7948_v51, %s7447_s26 }
 0x289   : > { %11094 = vst [vmem:[#allocation59_spill] sm:$0xff] %v8240_v38  ;;  %v1904_v1 = vsel %vm351_vm0, %v8240_v38, -inf }
 0x28a   : > { %v8224_v34 = vpop.permute.xlu1 %1225 }
 0x28b   : > { %11091 = vst [vmem:[#allocation56_spill] sm:$0xff] %v8224_v34  ;;  %v1879_v34 = vcombine.high %v8102_v13, %v8102_v13  ;;  %v8257_v13 = vpop.permute.xlu0 %900 }
 0x28c   : > { %1617 = vrot.lane.b32.xlu1 %v7946_v50, %s7447_s26 }
 0x28d   : > { %v1918_v61 = vsel %vm351_vm0, %v1879_v34, -inf }
 0x28e   : > { %v8230_v25 = vpop.permute.xlu1 %1227 }
 0x28f   : > { %11092 = vst [vmem:[#allocation57_spill] sm:$0xff] %v8230_v25  ;;  %v1888_v25 = vsel %vm351_vm0, %v1879_v34, 0.0  ;;  %v8267_v55 = vpop.permute.xlu0 %471 }
 0x290   : > { %1640 = vrot.lane.b32.xlu1 %v7948_v51, %s7448_s22  ;;  %v1889_v2 = vrot.slane %v1888_v25, 4 }
 0x292   : > { %v8235_v22 = vpop.permute.xlu1 %1250  ;;  %v1890_v62 = vadd.f32 %v1889_v2, %v1888_v25 }
 0x293   : > { %11093 = vst [vmem:[#allocation58_spill] sm:$0xff] %v8235_v22  ;;  %v1867_v22 = vsel %vm351_vm0, %v8240_v38, 0.0 }
 0x294   : > { %1642 = vrot.lane.b32.xlu1 %v7946_v50, %s7448_s22  ;;  %v1868_v12 = vrot.slane %v1867_v22, 4  ;;  %v1891_v9 = vrot.slane %v1890_v62, 2  ;;  %s7453_s22 = smov 42  }
 0x296   : > { %v8244_v30 = vpop.permute.xlu1 %1252  ;;  %v1869_v5 = vadd.f32 %v1868_v12, %v1867_v22  ;;  %v7451_v22 = vmov 56   ;;  %v8272_v12 = vpop.permute.xlu0 %925  ;;  %v1892_v37 = vadd.f32 %v1891_v9, %v1890_v62 }
 0x297   : > { %11095 = vst [vmem:[#allocation60_spill] sm:$0xff] %v8244_v30  ;;  %6914 = vset.pattern.permute.xlu1 %v7451_v22 }
 0x298   : > { %1665 = vrot.lane.b32.xlu1 %v7948_v51, %s7449_s14  ;;  %v1870_v47 = vrot.slane %v1869_v5, 2  ;;  %v1893_v3 = vrot.slane %v1892_v37, 1 }
 0x29a   : > { %v8253_v10 = vpop.permute.xlu1 %1275  ;;  %v1871_v38 = vadd.f32 %v1870_v47, %v1869_v5  ;;  %v8278_v49 = vpop.permute.xlu0 %950  ;;  %v1894_v5 = vadd.f32 %v1893_v3, %v1892_v37 }
 0x29b   : > { %11096 = vst [vmem:[#allocation61_spill] sm:$0xff] %v8253_v10  ;;  %v1905_v10 = vrot.slane %v1904_v1, 4  ;;  %11101 = vst [vmem:[#allocation66_spill] sm:$0xff] %v8278_v49 }
 0x29c   : > { %1667 = vrot.lane.b32.xlu1 %v7946_v50, %s7449_s14  ;;  %v1872_v53 = vrot.slane %v1871_v38, 1  ;;  %v1896_v29 = vmul.f32 0.25, %v1894_v5 }
 0x29d   : > { %v1906_v25 = vmax.f32 %v1904_v1, %v1905_v10 }
 0x29e   : > { %v8259_v30 = vpop.permute.xlu1 %1277  ;;  %v8284_v9 = vpop.permute.xlu0 %975  ;;  %v1873_v62 = vadd.f32 %v1872_v53, %v1871_v38 }
 0x29f   : > { %11097 = vst [vmem:[#allocation62_spill] sm:$0xff] %v8259_v30  ;;  %v1919_v30 = vrot.slane %v1918_v61, 4  ;;  %v1907_v52 = vrot.slane %v1906_v25, 2 }
 0x2a0   : > { %1690 = vrot.lane.b32.xlu1 %v7948_v51, %s7450_s18 }
 0x2a1   : > { %v1920_v34 = vmax.f32 %v1918_v61, %v1919_v30  ;;  %v1908_v47 = vmax.f32 %v1906_v25, %v1907_v52 }
 0x2a2   : > { %v8264_v56 = vpop.permute.xlu1 %1300 }
 0x2a3   : > { %11098 = vst [vmem:[#allocation63_spill] sm:$0xff] %v8264_v56  ;;  %v1921_v1 = vrot.slane %v1920_v34, 2  ;;  %v1909_v22 = vrot.slane %v1908_v47, 1 }
 0x2a4   : > { %1692 = vrot.lane.b32.xlu1 %v7946_v50, %s7450_s18  ;;  %s7454_s18 = smov 26  }
 0x2a5   : > { %v1922_v61 = vmax.f32 %v1920_v34, %v1921_v1  ;;  %v1910_v52 = vmax.f32 %v1908_v47, %v1909_v22  ;;  %v7455_v1 = vmov 70  }
 0x2a6   : > { %v8270_v2 = vpop.permute.xlu1 %1302  ;;  %6916 = vset.pattern.permute.xlu0 %v7455_v1 }
 0x2a7   : > { %11099 = vst [vmem:[#allocation64_spill] sm:$0xff] %v8270_v2  ;;  %v1875_v2 = vmul.f32 0.25, %v1873_v62  ;;  %v1923_v0 = vrot.slane %v1922_v61, 1 }
 0x2a8   : > { %1715 = vrot.lane.b32.xlu1 %v7948_v51, %s7452_s21 }
 0x2a9   : > { %v1926_v3 = vsel %vm418_vm1, %v1875_v2, %v1896_v29  ;;  %v1924_v53 = vmax.f32 %v1922_v61, %v1923_v0  ;;  %v1961_v0 = vld [vmem:[#allocation2] sm:$0xf]  ;;  %vm603_vm1 = vcmask 261120  }
 0x2aa   : > { %v8276_v56 = vpop.permute.xlu1 %1325  ;;  %v1928_v38 = vsel %vm421_vm2, %v1926_v3, %v1910_v52  ;;  %v7456_v52 = vmov 839922192   ;;  %v448_v3 = vlaneseq  ;;  %vm797_vm2 = vcmask 252928  }
 0x2ab   : > { %11100 = vst [vmem:[#allocation65_spill] sm:$0xff] %v8276_v56  ;;  %v8289_v56 = vpop.permute.xlu0 %1020  ;;  %v1930_v47 = vsel %vm424_vm3, %v1928_v38, %v1924_v53  ;;  %v7457_v53 = vmov 63   ;;  %vm867_vm3 = vcmask 900096  }
 0x2ac   : > { %1717 = vrot.lane.b32.xlu1 %v7946_v50, %s7452_s21 }
 0x2ae   : > { %v8282_v10 = vpop.permute.xlu1 %1327 }
 0x2af   : > { %11102 = vst [vmem:[#allocation67_spill] sm:$0xff] %v8282_v10  ;;  %v8294_v25 = vpop.permute.xlu0 %1045 }
 0x2b0   : > { %1740 = vrot.lane.b32.xlu1 %v7948_v51, %s7453_s22 }
 0x2b2   : > { %v8287_v30 = vpop.permute.xlu1 %1350 }
 0x2b3   : > { %11103 = vst [vmem:[#allocation68_spill] sm:$0xff] %v8287_v30  ;;  %v8302_v34 = vpop.permute.xlu0 %1070 }
 0x2b4   : > { %1742 = vrot.lane.b32.xlu1 %v7946_v50, %s7453_s22 }
 0x2b6   : > { %v8292_v10 = vpop.permute.xlu1 %1352 }
 0x2b7   : > { %11104 = vst [vmem:[#allocation69_spill] sm:$0xff] %v8292_v10  ;;  %v8309_v29 = vpop.permute.xlu0 %1095 }
 0x2b8   : > { %1765 = vrot.lane.b32.xlu1 %v7948_v51, %s7454_s18 }
 0x2ba   : > { %v8299_v37 = vpop.permute.xlu1 %1375 }
 0x2bb   : > { %11105 = vst [vmem:[#allocation70_spill] sm:$0xff] %v8299_v37  ;;  %v8314_v5 = vpop.permute.xlu0 %1120  ;;  %v449_v37 = vshrl.u32 %v448_v3, 7  ;;  %v8361_v3 = vld [vmem:[#allocation7] ss:$8 sm:$0x3] }
 0x2bc   : > { %1767 = vrot.lane.b32.xlu1 %v7946_v50, %s7454_s18  ;;  %v446_v50 = vunpack.c.l.s4 %v7456_v52  ;;  %11117 = vst [vmem:[#allocation82_spill] sm:$0xff] %v8361_v3 }
 0x2be   : > { %v8307_v62 = vpop.permute.xlu1 %1377 }
 0x2bf   : > { %11106 = vst [vmem:[#allocation71_spill] sm:$0xff] %v8307_v62  ;;  %v8318_v22 = vpop.permute.xlu0 %1145 }
 0x2c0   : > { %1935 = vrot.lane.b32.xlu1 %v1930_v47, %s7436_s8  ;;  %v447_v47 = vunpack.c.0.s8 %v446_v50  ;;  %s8954_s8 = sld [smem:[#allocation6]] }
 0x2c2   : > { %v8312_v2 = vpop.permute.xlu1 %1420 }
 0x2c3   : > { %11107 = vst [vmem:[#allocation72_spill] sm:$0xff] %v8312_v2  ;;  %v8322_v1 = vpop.permute.xlu0 %1170  ;;  %v475_v2 = vrot.slane %v8267_v55, 4 }
 0x2c4   : > { %1964 = vperm.xlu1 %6914, %v1961_v0   ;;  %v8328_v0 = vsub.s32 %v447_v47, %v449_v37  ;;  %v526_v47 = vrot.slane %v8020_v24, 4 }
 0x2c6   : > { %v8316_v61 = vpop.permute.xlu1 %1422  ;;  %v451_v52 = vrot.slane %v8002_v16, %v8328_v0  ;;  %v8363_v16 = vsub.s32 1, %v449_v37 }
 0x2c7   : > { %11108 = vst [vmem:[#allocation73_spill] sm:$0xff] %v8316_v61  ;;  %v8326_v30 = vpop.permute.xlu0 %1215 }
 0x2c8   : > { %6915 = vset.pattern.permute.xlu1 %v7457_v53  ;;  %11111 = vst [vmem:[#allocation76_spill] sm:$0xff] %v8326_v30  ;;  %v476_v53 = vrot.slane %v8012_v20, 4  ;;  %v455_v61 = vmul.f32 %v7948_v51, %v451_v52  ;;  %v501_v51 = vrot.slane %v8016_v23, 4  ;;  %v525_v30 = vrot.slane %v8074_v60, 4 }
 0x2ca   : > { %v8320_v38 = vpop.permute.xlu1 %1445  ;;  %v477_v50 = vsel %vm351_vm0, %v475_v2, %v476_v53  ;;  %v8352_v2 = vsub.s32 0, %v449_v37  ;;  %v551_v37 = vrot.slane %v8024_v27, 4  ;;  %v550_v27 = vrot.slane %v8077_v63, 4 }
 0x2cb   : > { %11109 = vst [vmem:[#allocation74_spill] sm:$0xff] %v8320_v38  ;;  %v8336_v38 = vpop.permute.xlu0 %1240  ;;  %v479_v52 = vsel %vm478_vm5, %v8267_v55, %v477_v50  ;;  %v8379_v50 = vld [vmem:[#allocation7 + $0x1] ss:$8 sm:$0x3]  ;;  %vm10966_vm5 = vcmask 769024  }
 0x2cc   : > { %11113 = vst [vmem:[#allocation78_spill] sm:$0xff] %v8336_v38  ;;  %11115 = vst [vmem:[#allocation80_spill] sm:$0xff] %v8352_v2  ;;  %v576_v38 = vrot.slane %v8028_v28, 4  ;;  %v645_v28 = vrot.slane %v8036_v32, 4  ;;  %v720_v32 = vrot.slane %v8046_v39, 4  ;;  %v745_v39 = vrot.slane %v8050_v40, 4 }
 0x2cd   : > { %11118 = vst [vmem:[#allocation83_spill] sm:$0xff] %v8379_v50  ;;  %v644_v50 = vrot.slane %v8086_v4, 4  ;;  %v11127_v40 = vrot.slane %v7942_v43, %v8328_v0 }
 0x2ce   : > { %v8324_v62 = vpop.permute.xlu1 %1447 }
 0x2cf   : > { %11110 = vst [vmem:[#allocation75_spill] sm:$0xff] %v8324_v62  ;;  %v8354_v53 = vpop.permute.xlu0 %1265 }
 0x2d0   : > { %11116 = vst [vmem:[#allocation81_spill] sm:$0xff] %v8354_v53  ;;  %v500_v53 = vrot.slane %v8071_v59, 4 }
 0x2d2   : > { %v8333_v10 = vpop.permute.xlu1 %1470  ;;  %v502_v24 = vsel %vm351_vm0, %v500_v53, %v501_v51  ;;  %v719_v51 = vrot.slane %v8096_v11, 4 }
 0x2d3   : > { %11112 = vst [vmem:[#allocation77_spill] sm:$0xff] %v8333_v10  ;;  %v469_v10 = vrot.slane %v8008_v17, %v8328_v0  ;;  %v8389_v55 = vpop.permute.xlu0 %1290 }
 0x2d4   : > { %11120 = vst [vmem:[#allocation85_spill] sm:$0xff] %v8389_v55 }
 0x2d5   : > { %v481_v17 = vmul.f32 %v479_v52, %v469_v10  ;;  %v670_v10 = vrot.slane %v8039_v35, 4  ;;  %v8411_v52 = vld [vmem:[#allocation7 + $0x2] ss:$8 sm:$0x3]  ;;  %v504_v35 = vsel %vm503_vm6, %v8071_v59, %v502_v24  ;;  %v770_v59 = vrot.slane %v8053_v45, 4  ;;  %v11124_v24 = vld [vmem:[#allocation28_spill] sm:$0xff] }
 0x2d6   : > { %v8344_v62 = vpop.permute.xlu1 %1472  ;;  %v506_v45 = vmul.f32 %v504_v35, %v11127_v40  ;;  %v11130_v35 = vld [vmem:[#allocation31_spill] sm:$0xff] }
 0x2d7   : > { %11114 = vst [vmem:[#allocation79_spill] sm:$0xff] %v8344_v62  ;;  %v669_v62 = vrot.slane %v8089_v7, 4  ;;  %v8413_v23 = vpop.permute.xlu0 %1315  ;;  %v794_v40 = vrot.slane %v11130_v35, 4 }
 0x2d8   : > { %11122 = vst [vmem:[#allocation87_spill] sm:$0xff] %v8413_v23  ;;  %v695_v23 = vrot.slane %v8042_v36, 4 }
 0x2d9   : > { %v671_v53 = vsel %vm351_vm0, %v669_v62, %v670_v10  ;;  %v552_v62 = vsel %vm351_vm0, %v550_v27, %v551_v37  ;;  %v646_v10 = vsel %vm351_vm0, %v644_v50, %v645_v28  ;;  %v575_v27 = vrot.slane %v11124_v24, 4 }
 0x2da   : > { %v8381_v20 = vpop.permute.xlu1 %1495  ;;  %v721_v50 = vsel %vm351_vm0, %v719_v51, %v720_v32  ;;  %v11129_v32 = vrot.slane %v8186_v41, %v8328_v0 }
 0x2db   : > { %11119 = vst [vmem:[#allocation84_spill] sm:$0xff] %v8381_v20  ;;  %v8406_v20 = vadd.f32 %v481_v17, %v455_v61  ;;  %v601_v61 = vrot.slane %v8032_v31, 4  ;;  %v527_v17 = vsel %vm351_vm0, %v525_v30, %v526_v47  ;;  %v8438_v49 = vpop.permute.xlu0 %1340  ;;  %v795_v30 = vrot.slane %v8056_v46, 4 }
 0x2dc   : > { %v673_v47 = vsel %vm672_vm10, %v8089_v7, %v671_v53  ;;  %v529_v37 = vsel %vm528_vm7, %v8074_v60, %v527_v17  ;;  %v554_v46 = vsel %vm553_vm8, %v8077_v63, %v552_v62  ;;  %v648_v7 = vsel %vm647_vm9, %v8086_v4, %v646_v10  ;;  %v11128_v53 = vld [vmem:[#allocation29_spill] sm:$0xff]  ;;  %v11131_v63 = vld [vmem:[#allocation24_spill] sm:$0xff] }
 0x2dd   : > { %v600_v51 = vrot.slane %v11128_v53, 4  ;;  %v675_v36 = vmul.f32 %v673_v47, %v11129_v32  ;;  %v840_v62 = vrot.slane %v11131_v63, 4  ;;  %v723_v10 = vsel %vm722_vm12, %v8096_v11, %v721_v50 }
 0x2de   : > { %v8404_v55 = vpop.permute.xlu1 %1497  ;;  %v577_v41 = vsel %vm351_vm0, %v575_v27, %v576_v38  ;;  %v11135_v47 = vrot.slane %v8192_v48, %v8328_v0  ;;  %v11136_v11 = vrot.slane %v8160_v18, %v8328_v0  ;;  %v11137_v27 = vld [vmem:[#allocation33_spill] sm:$0xff]  ;;  %vm917_vm7 = vcmask 637952  }
 0x2df   : > { %11121 = vst [vmem:[#allocation86_spill] sm:$0xff] %v8404_v55  ;;  %v694_v55 = vrot.slane %v8092_v8, 4  ;;  %v8465_v17 = vpop.permute.xlu0 %1365  ;;  %v602_v48 = vsel %vm351_vm0, %v600_v51, %v601_v61  ;;  %v579_v18 = vsel %vm578_vm14, %v11124_v24, %v577_v41  ;;  %vm10964_vm9 = vcmask 506880   ;;  %v11143_v41 = vld [vmem:[#allocation35_spill] sm:$0xff] }
 0x2e0   : > { %v604_v24 = vsel %vm603_vm1, %v11128_v53, %v602_v48  ;;  %vm967_vm10 = vcmask 375808   ;;  %v11146_v53 = vrot.slane %v8212_v19, %v8328_v0  ;;  %v11148_v48 = vrot.slane %v8173_v26, %v8328_v0 }
 0x2e1   : > { %v696_v3 = vsel %vm351_vm0, %v694_v55, %v695_v23  ;;  %v11125_v55 = vld [vmem:[#allocation30_spill] sm:$0xff]  ;;  %v984_v26 = vrot.slane %v8284_v9, %v8328_v0  ;;  %vm1062_vm12 = vcmask 891904   ;;  %vm1087_vm14 = vcmask 760832  }
 0x2e2   : > { %v8430_v31 = vpop.permute.xlu1 %1520  ;;  %v769_v23 = vrot.slane %v11125_v55, 4  ;;  %v698_v60 = vsel %vm697_vm11, %v8092_v8, %v696_v3  ;;  %v11133_v8 = vrot.slane %v7944_v44, %v8328_v0  ;;  %v507_v44 = vadd.f32 %v506_v45, %v8406_v20  ;;  %v11139_v45 = vld [vmem:[#allocation32_spill] sm:$0xff] }
 0x2e3   : > { %11123 = vst [vmem:[#allocation88_spill] sm:$0xff] %v8430_v31  ;;  %v744_v31 = vrot.slane %v8104_v14, 4  ;;  %v700_v32 = vmul.f32 %v698_v60, %v11135_v47  ;;  %v8497_v50 = vpop.permute.xlu0 %1410  ;;  %v796_v20 = vsel %vm351_vm0, %v794_v40, %v795_v30  ;;  %v11140_v60 = vld [vmem:[#allocation34_spill] sm:$0xff]  ;;  %vm10957_vm11 = vcmask 244736  }
 0x2e4   : > { %v531_v3 = vmul.f32 %v529_v37, %v11133_v8  ;;  %v556_v37 = vmul.f32 %v554_v46, %v11136_v11  ;;  %v839_v46 = vrot.slane %v11139_v45, 4  ;;  %v11141_v8 = vld [vmem:[#allocation26_spill] sm:$0xff] }
 0x2e5   : > { %v746_v43 = vsel %vm351_vm0, %v744_v31, %v745_v39  ;;  %v11134_v31 = vrot.slane %v8179_v33, %v8328_v0  ;;  %v864_v33 = vrot.slane %v11137_v27, 4  ;;  %v890_v61 = vrot.slane %v11141_v8, 4 }
 0x2e6   : > { %v8454_v28 = vpop.permute.xlu1 %1522  ;;  %v748_v38 = vsel %vm747_vm13, %v8104_v14, %v746_v43  ;;  %v889_v43 = vrot.slane %v11140_v60, 4  ;;  %vm1037_vm13 = vcmask 1022976  }
 0x2e7   : > { %11126 = vst [vmem:[#allocation28_spill] sm:$0xff] %v8454_v28  ;;  %v11132_v28 = vld [vmem:[#allocation25_spill] sm:$0xff]  ;;  %v650_v39 = vmul.f32 %v648_v7, %v11134_v31  ;;  %v914_v31 = vrot.slane %v11143_v41, 4 }
 0x2e8   : > { %v865_v4 = vrot.slane %v11132_v28, 4  ;;  %v771_v28 = vsel %vm351_vm0, %v769_v23, %v770_v59  ;;  %v11138_v59 = vrot.slane %v8199_v58, %v8328_v0  ;;  %v11142_v58 = vrot.slane %v8205_v42, %v8328_v0 }
 0x2e9   : > { %v676_v7 = vadd.f32 %v675_v36, %v650_v39  ;;  %v773_v14 = vsel %vm772_vm15, %v11125_v55, %v771_v28  ;;  %v532_v36 = vadd.f32 %v531_v3, %v507_v44  ;;  %v798_v55 = vsel %vm797_vm2, %v11130_v35, %v796_v20  ;;  %v8522_v39 = vpop.permute.xlu0 %1435  ;;  %v11144_v3 = vld [vmem:[#allocation27_spill] sm:$0xff]  ;;  %v11150_v20 = vld [vmem:[#allocation36_spill] sm:$0xff] }
 0x2ea   : > { %v8488_v63 = vpop.permute.xlu1 %1545  ;;  %v725_v23 = vmul.f32 %v723_v10, %v11138_v59  ;;  %v750_v10 = vmul.f32 %v748_v38, %v11142_v58  ;;  %v866_v40 = vsel %vm351_vm0, %v864_v33, %v865_v4  ;;  %v915_v47 = vrot.slane %v11144_v3, 4  ;;  %v11147_v38 = vld [vmem:[#allocation37_spill] sm:$0xff] }
 0x2eb   : > { %v701_v51 = vadd.f32 %v700_v32, %v676_v7  ;;  %v11145_v42 = vrot.slane %v8166_v21, %v8328_v0  ;;  %v775_v44 = vmul.f32 %v773_v14, %v11146_v53  ;;  %v557_v11 = vadd.f32 %v556_v37, %v532_v36  ;;  %v11151_v14 = vld [vmem:[#allocation39_spill] sm:$0xff]  ;;  %v11157_v53 = vld [vmem:[#allocation40_spill] sm:$0xff] }
 0x2ec   : > { %v841_v35 = vsel %vm351_vm0, %v839_v46, %v840_v62  ;;  %v891_v4 = vsel %vm351_vm0, %v889_v43, %v890_v61  ;;  %v940_v33 = vrot.slane %v11147_v38, 4  ;;  %v606_v7 = vmul.f32 %v604_v24, %v11148_v48 }
 0x2ed   : > { %v581_v32 = vmul.f32 %v579_v18, %v11145_v42  ;;  %v726_v28 = vadd.f32 %v725_v23, %v701_v51  ;;  %v11149_v21 = vrot.slane %v8218_v15, %v8328_v0  ;;  %v868_v19 = vsel %vm867_vm3, %v11137_v27, %v866_v40  ;;  %v8549_v43 = vpop.permute.xlu0 %1460 }
 0x2ee   : > { %v8514_v30 = vpop.permute.xlu1 %1547  ;;  %v916_v62 = vsel %vm351_vm0, %v914_v31, %v915_v47  ;;  %v939_v18 = vrot.slane %v11150_v20, 4  ;;  %v965_v46 = vrot.slane %v11151_v14, 4  ;;  %v843_v15 = vsel %vm842_vm4, %v11139_v45, %v841_v35 }
 0x2ef   : > { %v751_v59 = vadd.f32 %v750_v10, %v726_v28  ;;  %v800_v23 = vmul.f32 %v798_v55, %v11149_v21  ;;  %v582_v8 = vadd.f32 %v581_v32, %v557_v11  ;;  %v893_v27 = vsel %vm10966_vm5, %v11140_v60, %v891_v4  ;;  %v11153_v10 = vld [vmem:[#allocation38_spill] sm:$0xff]  ;;  %v11154_v55 = vld [vmem:[#allocation41_spill] sm:$0xff] }
 0x2f0   : > { %v11152_v36 = vrot.slane %v8233_v57, %v8328_v0  ;;  %v941_v58 = vsel %vm351_vm0, %v939_v18, %v940_v33  ;;  %v964_v24 = vrot.slane %v11153_v10, 4  ;;  %v990_v9 = vrot.slane %v11154_v55, 4  ;;  %v11164_v55 = vld [vmem:[#allocation66_spill] sm:$0xff] }
 0x2f1   : > { %v776_v61 = vadd.f32 %v775_v44, %v751_v59  ;;  %v607_v40 = vadd.f32 %v606_v7, %v582_v8  ;;  %v918_v3 = vsel %vm917_vm7, %v11143_v41, %v916_v62  ;;  %v1029_v45 = vrot.slane %v8289_v56, %v8328_v0  ;;  %v8575_v11 = vpop.permute.xlu0 %1485  ;;  %v8589_v7 = vld [vmem:[#allocation7 + $0x3] ss:$8 sm:$0x3] }
 0x2f2   : > { %v8542_v37 = vpop.permute.xlu1 %1570  ;;  %v870_v51 = vmul.f32 %v868_v19, %v11152_v36  ;;  %v11155_v57 = vrot.slane %v8226_v54, %v8328_v0  ;;  %v11156_v42 = vrot.slane %v8246_v6, %v8328_v0  ;;  %v966_v28 = vsel %vm351_vm0, %v964_v24, %v965_v46  ;;  %11159 = vst [vmem:[#allocation30_spill] sm:$0xff] %v8589_v7  ;;  %v11197_v7 = vld [vmem:[#allocation63_spill] sm:$0xff] }
 0x2f3   : > { %v801_v31 = vadd.f32 %v800_v23, %v776_v61  ;;  %v989_v44 = vrot.slane %v11157_v53, 4  ;;  %v943_v41 = vsel %vm10964_vm9, %v11150_v20, %v941_v58  ;;  %v1054_v35 = vrot.slane %v8294_v25, %v8328_v0  ;;  %v11162_v58 = vld [vmem:[#allocation82_spill] sm:$0xff]  ;;  %v11193_v25 = vld [vmem:[#allocation64_spill] sm:$0xff] }
 0x2f4   : > { %v845_v60 = vmul.f32 %v843_v15, %v11155_v57  ;;  %v895_v32 = vmul.f32 %v893_v27, %v11156_v42  ;;  %v1079_v54 = vrot.slane %v8302_v34, %v8328_v0  ;;  %v11158_v6 = vrot.slane %v8257_v13, %v8328_v0  ;;  %v11161_v15 = vld [vmem:[#allocation45_spill] sm:$0xff]  ;;  %v11166_v57 = vld [vmem:[#allocation76_spill] sm:$0xff] }
 0x2f5   : > { %v991_v33 = vsel %vm351_vm0, %v989_v44, %v990_v9  ;;  %v1104_v48 = vrot.slane %v8309_v29, %v8328_v0  ;;  %v621_v59 = vcombine.high %v607_v40, %v607_v40  ;;  %v968_v21 = vsel %vm967_vm10, %v11153_v10, %v966_v28  ;;  %v8604_v8 = vpop.permute.xlu0 %1510  ;;  %v11168_v28 = vld [vmem:[#allocation43_spill] sm:$0xff]  ;;  %v11169_v44 = vld [vmem:[#allocation44_spill] sm:$0xff] }
 0x2f6   : > { %v8565_v47 = vpop.permute.xlu1 %1572  ;;  %v871_v4 = vadd.f32 %v870_v51, %v845_v60  ;;  %v920_v38 = vmul.f32 %v918_v3, %v11158_v6  ;;  %v1129_v23 = vrot.slane %v8314_v5, %v8328_v0  ;;  %v816_v62 = vcombine.high %v801_v31, %v801_v31 }
 0x2f7   : > { %v11160_v18 = vrot.slane %v8272_v12, %v8328_v0  ;;  %v993_v61 = vsel %vm10957_vm11, %v11157_v53, %v991_v33  ;;  %v1060_v27 = vrot.slane %v11161_v15, 4  ;;  %vm1112_vm15 = vcmask 629760  }
 0x2f8   : > { %v896_v20 = vadd.f32 %v895_v32, %v871_v4  ;;  %v11163_v12 = vrot.slane %v11162_v58, %v8352_v2  ;;  %v11165_v9 = vrot.slane %v11164_v55, %v8328_v0  ;;  %v11167_v42 = vrot.slane %v11162_v58, %v8363_v16  ;;  %v11170_v4 = vld [vmem:[#allocation47_spill] sm:$0xff] }
 0x2f9   : > { %v945_v14 = vmul.f32 %v943_v41, %v11160_v18  ;;  %v1035_v53 = vrot.slane %v11168_v28, 4  ;;  %v1059_v41 = vrot.slane %v11169_v44, 4  ;;  %v1085_v6 = vrot.slane %v11170_v4, 4  ;;  %v11176_v4 = vld [vmem:[#allocation49_spill] sm:$0xff] }
 0x2fa   : > { %v8597_v19 = vpop.permute.xlu1 %1615  ;;  %v623_v10 = vmul.f32 %v11163_v12, %v607_v40  ;;  %v921_v24 = vadd.f32 %v920_v38, %v896_v20  ;;  %v970_v3 = vmul.f32 %v968_v21, %v11165_v9  ;;  %v624_v32 = vmul.f32 %v621_v59, %v11167_v42  ;;  %v11171_v38 = vld [vmem:[#allocation83_spill] sm:$0xff]  ;;  %v8635_v59 = vpop.permute.xlu0 %1535  ;;  %v11174_v12 = vld [vmem:[#allocation42_spill] sm:$0xff] }
 0x2fb   : > { %vm1137_vm2 = vcmask 498688   ;;  %v11172_v33 = vrot.slane %v11171_v38, %v8352_v2  ;;  %v11173_v20 = vrot.slane %v11171_v38, %v8363_v16  ;;  %v995_v58 = vmul.f32 %v993_v61, %v984_v26  ;;  %v11175_v42 = vld [vmem:[#allocation46_spill] sm:$0xff]  ;;  %v11178_v38 = vld [vmem:[#allocation81_spill] sm:$0xff] }
 0x2fc   : > { %v946_v15 = vadd.f32 %v945_v14, %v921_v24  ;;  %vm1162_vm3 = vcmask 367616   ;;  %v1034_v55 = vrot.slane %v11174_v12, 4  ;;  %v1061_v9 = vsel %vm351_vm0, %v1059_v41, %v1060_v27  ;;  %v11179_v26 = vld [vmem:[#allocation85_spill] sm:$0xff]  ;;  %v11181_v41 = vld [vmem:[#allocation51_spill] sm:$0xff] }
 0x2fd   : > { %v818_v21 = vmul.f32 %v11172_v33, %v801_v31  ;;  %v819_v18 = vmul.f32 %v816_v62, %v11173_v20  ;;  %v1084_v28 = vrot.slane %v11175_v42, 4  ;;  %v1110_v51 = vrot.slane %v11176_v4, 4  ;;  %v11177_v31 = vld [vmem:[#allocation78_spill] sm:$0xff]  ;;  %v11180_v20 = vld [vmem:[#allocation48_spill] sm:$0xff]  ;;  %v11182_v4 = vld [vmem:[#allocation53_spill] sm:$0xff] }
 0x2fe   : > { %v8627_v40 = vpop.permute.xlu1 %1617  ;;  %v971_v36 = vadd.f32 %v970_v3, %v946_v15  ;;  %v1036_v61 = vsel %vm351_vm0, %v1034_v55, %v1035_v53  ;;  %v1109_v27 = vrot.slane %v11180_v20, 4  ;;  %v1135_v60 = vrot.slane %v11181_v41, 4  ;;  %v11183_v14 = vld [vmem:[#allocation87_spill] sm:$0xff]  ;;  %v8660_v53 = vld [vmem:[#allocation7 + $0x4] ss:$8 sm:$0x3] }
 0x2ff   : > { %v1086_v24 = vsel %vm351_vm0, %v1084_v28, %v1085_v6  ;;  %v8653_v3 = vadd.f32 %v818_v21, %v623_v10  ;;  %v1063_v15 = vsel %vm1062_vm12, %v11169_v44, %v1061_v9  ;;  %v1160_v62 = vrot.slane %v11182_v4, 4  ;;  %v8662_v6 = vpop.permute.xlu0 %1560  ;;  %v11184_v10 = vld [vmem:[#allocation50_spill] sm:$0xff]  ;;  %v11185_v4 = vld [vmem:[#allocation52_spill] sm:$0xff] }
 0x300   : > { %vm1257_vm7 = vcmask 883712   ;;  %v8664_v55 = vadd.f32 %v819_v18, %v624_v32  ;;  %v996_v28 = vadd.f32 %v995_v58, %v971_v36  ;;  %v1111_v41 = vsel %vm351_vm0, %v1109_v27, %v1110_v51  ;;  %v11189_v32 = vld [vmem:[#allocation58_spill] sm:$0xff] }
 0x301   : > { %v1134_v21 = vrot.slane %v11184_v10, 4  ;;  %v1038_v44 = vsel %vm1037_vm13, %v11174_v12, %v1036_v61  ;;  %v1088_v9 = vsel %vm1087_vm14, %v11175_v42, %v1086_v24  ;;  %v1159_v13 = vrot.slane %v11185_v4, 4  ;;  %v11186_v61 = vld [vmem:[#allocation60_spill] sm:$0xff] }
 0x302   : > { %v8651_v46 = vpop.permute.xlu1 %1640  ;;  %vm1187_vm10 = vcmask 236544   ;;  %vm10963_vm12 = vcmask 1014784   ;;  %v1065_v36 = vmul.f32 %v1063_v15, %v1054_v35  ;;  %vm10962_vm11 = vcmask 752640  }
 0x303   : > { %v1136_v51 = vsel %vm351_vm0, %v1134_v21, %v1135_v60  ;;  %v1113_v12 = vsel %vm1112_vm15, %v11180_v20, %v1111_v41  ;;  %v1161_v42 = vsel %vm351_vm0, %v1159_v13, %v1160_v62  ;;  %v1255_v24 = vrot.slane %v11186_v61, 4  ;;  %v8691_v35 = vpop.permute.xlu0 %1605  ;;  %v11187_v20 = vld [vmem:[#allocation55_spill] sm:$0xff]  ;;  %v11188_v21 = vld [vmem:[#allocation57_spill] sm:$0xff] }
 0x304   : > { %vm1307_vm13 = vcmask 621568   ;;  %v1011_v60 = vcombine.high %v996_v28, %v996_v28  ;;  %v1040_v27 = vmul.f32 %v1038_v44, %v1029_v45  ;;  %v1090_v15 = vmul.f32 %v1088_v9, %v1079_v54  ;;  %v11190_v45 = vld [vmem:[#allocation62_spill] sm:$0xff] }
 0x305   : > { %v1138_v62 = vsel %vm1137_vm2, %v11184_v10, %v1136_v51  ;;  %v1185_v41 = vrot.slane %v11187_v20, 4  ;;  %v1230_v61 = vrot.slane %v11188_v21, 4  ;;  %v1254_v18 = vrot.slane %v11189_v32, 4  ;;  %v11191_v9 = vld [vmem:[#allocation54_spill] sm:$0xff]  ;;  %v11192_v51 = vld [vmem:[#allocation56_spill] sm:$0xff] }
 0x306   : > { %v8683_v58 = vpop.permute.xlu1 %1642  ;;  %v1066_v33 = vadd.f32 %v1065_v36, %v1040_v27  ;;  %v1115_v56 = vmul.f32 %v1113_v12, %v1104_v48  ;;  %v1163_v34 = vsel %vm1162_vm3, %v11185_v4, %v1161_v42  ;;  %v1280_v54 = vrot.slane %v11190_v45, 4  ;;  %v11195_v42 = vld [vmem:[#allocation61_spill] sm:$0xff] }
 0x307   : > { %v1184_v10 = vrot.slane %v11191_v9, 4  ;;  %v1229_v20 = vrot.slane %v11192_v51, 4  ;;  %v1256_v21 = vsel %vm351_vm0, %v1254_v18, %v1255_v24  ;;  %v1305_v13 = vrot.slane %v11193_v25, 4  ;;  %v8718_v36 = vpop.permute.xlu0 %1630 }
 0x308   : > { %v11194_v29 = vrot.slane %v8411_v52, %v8352_v2  ;;  %v1091_v4 = vadd.f32 %v1090_v15, %v1066_v33  ;;  %v1140_v12 = vmul.f32 %v1138_v62, %v1129_v23  ;;  %v1279_v27 = vrot.slane %v11195_v42, 4  ;;  %v11217_v62 = vld [vmem:[#allocation71_spill] sm:$0xff] }
 0x309   : > { %v11196_v45 = vrot.slane %v8411_v52, %v8363_v16  ;;  %v1186_v24 = vsel %vm351_vm0, %v1184_v10, %v1185_v41  ;;  %v1231_v25 = vsel %vm351_vm0, %v1229_v20, %v1230_v61  ;;  %v1304_v2 = vrot.slane %v11197_v7, 4  ;;  %v11200_v20 = vld [vmem:[#allocation67_spill] sm:$0xff] }
 0x30a   : > { %v8712_v44 = vpop.permute.xlu1 %1665  ;;  %v8723_v48 = vmul.f32 %v11194_v29, %v996_v28  ;;  %v1116_v28 = vadd.f32 %v1115_v56, %v1091_v4  ;;  %v11198_v33 = vrot.slane %v8318_v22, %v8328_v0  ;;  %v1258_v5 = vsel %vm1257_vm7, %v11189_v32, %v1256_v21  ;;  %v11201_v4 = vld [vmem:[#allocation75_spill] sm:$0xff] }
 0x30b   : > { %v8732_v18 = vmul.f32 %v1011_v60, %v11196_v45  ;;  %v1281_v23 = vsel %vm351_vm0, %v1279_v27, %v1280_v54  ;;  %vm10965_vm14 = vcmask 490496   ;;  %vm1452_vm15 = vcmask 875520   ;;  %v8752_v61 = vpop.permute.xlu0 %1655 }
 0x30c   : > { %v1165_v15 = vmul.f32 %v1163_v34, %v11198_v33  ;;  %v1306_v60 = vsel %vm351_vm0, %v1304_v2, %v1305_v13  ;;  %v1141_v32 = vadd.f32 %v1140_v12, %v1116_v28  ;;  %v1188_v56 = vsel %vm1187_vm10, %v11191_v9, %v1186_v24  ;;  %v11204_v28 = vld [vmem:[#allocation65_spill] sm:$0xff]  ;;  %v11211_v9 = vld [vmem:[#allocation72_spill] sm:$0xff] }
 0x30d   : > { %v1233_v34 = vsel %vm10963_vm12, %v11192_v51, %v1231_v25  ;;  %vm1427_vm2 = vcmask 1006592   ;;  %vm1477_vm3 = vcmask 744448   ;;  %v11199_v13 = vrot.slane %v11177_v31, %v8328_v0 }
 0x30e   : > { %v8743_v52 = vpop.permute.xlu1 %1667  ;;  %v1283_v10 = vsel %vm10962_vm11, %v11195_v42, %v1281_v23  ;;  %v1330_v21 = vrot.slane %v11200_v20, 4  ;;  %vm1357_vm7 = vcmask 359424   ;;  %v1166_v29 = vadd.f32 %v1165_v15, %v1141_v32 }
 0x30f   : > { %v1260_v54 = vmul.f32 %v1258_v5, %v11199_v13  ;;  %v1308_v51 = vsel %vm1307_vm13, %v11197_v7, %v1306_v60  ;;  %v1450_v12 = vrot.slane %v11201_v4, 4  ;;  %vm1502_vm10 = vcmask 613376   ;;  %v8784_v15 = vpop.permute.xlu0 %1680  ;;  %v11206_v60 = vld [vmem:[#allocation73_spill] sm:$0xff]  ;;  %v11207_v13 = vld [vmem:[#allocation74_spill] sm:$0xff] }
 0x310   : > { %v11202_v42 = vrot.slane %v8322_v1, %v8328_v0  ;;  %v11203_v24 = vrot.slane %v11166_v57, %v8328_v0  ;;  %v1329_v33 = vrot.slane %v11204_v28, 4  ;;  %v11205_v5 = vrot.slane %v11178_v38, %v8328_v0 }
 0x311   : > { %v1425_v32 = vrot.slane %v11206_v60, 4  ;;  %v1449_v1 = vrot.slane %v11207_v13, 4  ;;  %v11209_v57 = vrot.slane %v11179_v26, %v8328_v0  ;;  %vm1527_vm13 = vcmask 482304   ;;  %v11213_v60 = vld [vmem:[#allocation86_spill] sm:$0xff] }
 0x312   : > { %v8773_v27 = vpop.permute.xlu1 %1690  ;;  %v1190_v45 = vmul.f32 %v1188_v56, %v11202_v42  ;;  %v1235_v25 = vmul.f32 %v1233_v34, %v11203_v24  ;;  %v1285_v23 = vmul.f32 %v1283_v10, %v11205_v5  ;;  %v11208_v56 = vld [vmem:[#allocation79_spill] sm:$0xff]  ;;  %v1331_v42 = vsel %vm351_vm0, %v1329_v33, %v1330_v21  ;;  %v11210_v24 = vld [vmem:[#allocation69_spill] sm:$0xff]  ;;  %v11216_v21 = vld [vmem:[#allocation28_spill] sm:$0xff] }
 0x313   : > { %v1475_v20 = vrot.slane %v11208_v56, 4  ;;  %v1310_v34 = vmul.f32 %v1308_v51, %v11209_v57  ;;  %v1355_v31 = vrot.slane %v11210_v24, 4  ;;  %v1424_v7 = vrot.slane %v11211_v9, 4  ;;  %v11212_v10 = vld [vmem:[#allocation77_spill] sm:$0xff]  ;;  %v8810_v33 = vpop.permute.xlu0 %1705  ;;  %v11215_v57 = vld [vmem:[#allocation84_spill] sm:$0xff] }
 0x314   : > { %v1261_v4 = vadd.f32 %v1260_v54, %v1235_v25  ;;  %v1451_v38 = vsel %vm351_vm0, %v1449_v1, %v1450_v12  ;;  %v1474_v5 = vrot.slane %v11212_v10, 4  ;;  %v1500_v2 = vrot.slane %v11213_v60, 4  ;;  %v11214_v25 = vld [vmem:[#allocation68_spill] sm:$0xff] }
 0x315   : > { %v8803_v54 = vadd.f32 %v1190_v45, %v1166_v29  ;;  %v1354_v26 = vrot.slane %v11214_v25, 4  ;;  %vm1382_vm11 = vcmask 228352   ;;  %vm1552_vm12 = vcmask 351232  }
 0x316   : > { %v8801_v22 = vpop.permute.xlu1 %1692  ;;  %v1286_v12 = vadd.f32 %v1285_v23, %v1261_v4  ;;  %v1426_v1 = vsel %vm351_vm0, %v1424_v7, %v1425_v32  ;;  %v1476_v56 = vsel %vm351_vm0, %v1474_v5, %v1475_v20  ;;  %v1499_v29 = vrot.slane %v11215_v57, 4 }
 0x317   : > { %v1333_v45 = vsel %vm10965_vm14, %v11204_v28, %v1331_v42  ;;  %v1356_v24 = vsel %vm351_vm0, %v1354_v26, %v1355_v31  ;;  %v1453_v60 = vsel %vm1452_vm15, %v11207_v13, %v1451_v38  ;;  %v1525_v41 = vrot.slane %v11216_v21, 4  ;;  %v11218_v13 = vld [vmem:[#allocation88_spill] sm:$0xff]  ;;  %v11220_v38 = vld [vmem:[#allocation70_spill] sm:$0xff] }
 0x318   : > { %vm1647_vm9 = vcmask 867328   ;;  %v1311_v51 = vadd.f32 %v1310_v34, %v1286_v12  ;;  %v1380_v23 = vrot.slane %v11217_v62, 4  ;;  %v1501_v7 = vsel %vm351_vm0, %v1499_v29, %v1500_v2 }
 0x319   : > { %v1714_v20 = vrot.slane %v8810_v33, %v8328_v0  ;;  %v1428_v28 = vsel %vm1427_vm2, %v11211_v9, %v1426_v1  ;;  %v1478_v31 = vsel %vm1477_vm3, %v11212_v10, %v1476_v56  ;;  %v1524_v4 = vrot.slane %v11218_v13, 4 }
 0x31a   : > { %v8823_v32 = vpop.permute.xlu1 %1715  ;;  %v1550_v42 = vrot.slane %v8514_v30, 4  ;;  %vm1577_vm15 = vcmask 220160   ;;  %vm1622_vm14 = vcmask 998400   ;;  %vm1672_vm5 = vcmask 736256  }
 0x31b   : > { %v11219_v62 = vrot.slane %v11183_v14, %v8328_v0  ;;  %v1358_v34 = vsel %vm1357_vm7, %v11214_v25, %v1356_v24  ;;  %v1379_v5 = vrot.slane %v11220_v38, 4  ;;  %v11221_v9 = vrot.slane %v8522_v39, %v8328_v0 }
 0x31c   : > { %v1503_v26 = vsel %vm1502_vm10, %v11215_v57, %v1501_v7  ;;  %v1526_v30 = vsel %vm351_vm0, %v1524_v4, %v1525_v41  ;;  %v1549_v21 = vrot.slane %v8488_v63, 4  ;;  %v1645_v12 = vrot.slane %v8683_v58, 4 }
 0x31d   : > { %v1335_v2 = vmul.f32 %v1333_v45, %v11219_v62  ;;  %v1455_v10 = vmul.f32 %v1453_v60, %v11221_v9  ;;  %vm1697_vm2 = vcmask 605184   ;;  %v1381_v14 = vsel %vm351_vm0, %v1379_v5, %v1380_v23 }
 0x31e   : > { %v11222_v25 = vrot.slane %v8497_v50, %v8328_v0  ;;  %v11223_v39 = vrot.slane %v8549_v43, %v8328_v0  ;;  %v1575_v29 = vrot.slane %v8565_v47, 4  ;;  %v1718_v57 = vpop.permute.xlu1 %1717  ;;  %v1551_v41 = vsel %vm351_vm0, %v1549_v21, %v1550_v42 }
 0x31f   : > { %v1620_v45 = vrot.slane %v8627_v40, 4  ;;  %v1644_v58 = vrot.slane %v8651_v46, 4  ;;  %v1670_v24 = vrot.slane %v8743_v52, 4  ;;  %vm1722_vm3 = vcmask 474112  }
 0x320   : > { %v1430_v1 = vmul.f32 %v1428_v28, %v11222_v25  ;;  %v1480_v56 = vmul.f32 %v1478_v31, %v11223_v39  ;;  %v11224_v50 = vrot.slane %v8575_v11, %v8328_v0  ;;  %v1528_v43 = vsel %vm1527_vm13, %v11218_v13, %v1526_v30 }
 0x321   : > { %v1574_v47 = vrot.slane %v8542_v37, 4  ;;  %v1619_v7 = vrot.slane %v8597_v19, 4  ;;  %v1646_v28 = vsel %vm351_vm0, %v1644_v58, %v1645_v12  ;;  %v1669_v40 = vrot.slane %v8712_v44, 4 }
 0x322   : > { %v1456_v60 = vadd.f32 %v1455_v10, %v1430_v1  ;;  %v1505_v23 = vmul.f32 %v1503_v26, %v11224_v50  ;;  %v1695_v31 = vrot.slane %v8801_v22, 4  ;;  %v1383_v52 = vsel %vm1382_vm11, %v11220_v38, %v1381_v14  ;;  %v1741_v13 = vpop.permute.xlu1 %1740  ;;  %v1731_v26 = vpop.permute.xlu0 %1730 }
 0x323   : > { %v1553_v11 = vsel %vm1552_vm12, %v8488_v63, %v1551_v41  ;;  %v1576_v42 = vsel %vm351_vm0, %v1574_v47, %v1575_v29  ;;  %v1621_v62 = vsel %vm351_vm0, %v1619_v7, %v1620_v45  ;;  %v1671_v5 = vsel %vm351_vm0, %v1669_v40, %v1670_v24  ;;  %v1583_v40 = vld [vmem:[#allocation7 + $0x5] ss:$8 sm:$0x3] }
 0x324   : > { %v1481_v4 = vadd.f32 %v1480_v56, %v1456_v60  ;;  %v1694_v9 = vrot.slane %v8773_v27, 4  ;;  %v1720_v10 = vrot.slane %v1718_v57, 4  ;;  %v1336_v30 = vadd.f32 %v1335_v2, %v1311_v51 }
 0x325   : > { %v11225_v22 = vrot.slane %v8438_v49, %v8328_v0  ;;  %v11226_v21 = vrot.slane %v8604_v8, %v8328_v0  ;;  %v1648_v12 = vsel %vm1647_vm9, %v8651_v46, %v1646_v28  ;;  %v11227_v14 = vrot.slane %v8465_v17, %v8328_v0 }
 0x326   : > { %v1506_v1 = vadd.f32 %v1505_v23, %v1481_v4  ;;  %v1696_v39 = vsel %vm351_vm0, %v1694_v9, %v1695_v31  ;;  %v1719_v51 = vrot.slane %v8823_v32, 4  ;;  %v11228_v49 = vrot.slane %v8635_v59, %v8328_v0  ;;  %v1743_v17 = vpop.permute.xlu1 %1742 }
 0x327   : > { %v1360_v38 = vmul.f32 %v1358_v34, %v11225_v22  ;;  %v1530_v63 = vmul.f32 %v1528_v43, %v11226_v21  ;;  %v1385_v25 = vmul.f32 %v1383_v52, %v11227_v14  ;;  %v1578_v8 = vsel %vm1577_vm15, %v8542_v37, %v1576_v42  ;;  %v1756_v43 = vpop.permute.xlu0 %1755  ;;  %v11235_v42 = vld [vmem:[#allocation80_spill] sm:$0xff] }
 0x328   : > { %v1555_v2 = vmul.f32 %v1553_v11, %v11228_v49  ;;  %v1623_v34 = vsel %vm1622_vm14, %v8597_v19, %v1621_v62  ;;  %v1673_v46 = vsel %vm1672_vm5, %v8712_v44, %v1671_v5  ;;  %v11229_v56 = vrot.slane %v8718_v36, %v8328_v0  ;;  %v11234_v11 = vld [vmem:[#allocation30_spill] sm:$0xff] }
 0x329   : > { %v1721_v57 = vsel %vm351_vm0, %v1719_v51, %v1720_v10  ;;  %v1744_v41 = vrot.slane %v1741_v13, 4  ;;  %v1745_v45 = vrot.slane %v1743_v17, 4  ;;  %v1361_v59 = vadd.f32 %v1360_v38, %v1336_v30 }
 0x32a   : > { %v1650_v29 = vmul.f32 %v1648_v12, %v11229_v56  ;;  %v1531_v58 = vadd.f32 %v1530_v63, %v1506_v1  ;;  %v1698_v37 = vsel %vm1697_vm2, %v8773_v27, %v1696_v39  ;;  %vm1747_vm9 = vcmask 343040   ;;  %v1766_v28 = vpop.permute.xlu1 %1765 }
 0x32b   : > { %v11230_v19 = vrot.slane %v8662_v6, %v8328_v0  ;;  %v11231_v44 = vrot.slane %v8691_v35, %v8328_v0  ;;  %v11232_v36 = vrot.slane %v8752_v61, %v8328_v0  ;;  %v1746_v23 = vsel %vm351_vm0, %v1744_v41, %v1745_v45 }
 0x32c   : > { %v1015_v47 = vadd.f32 %v8723_v48, %v8653_v3  ;;  %v1397_v27 = vrot.slane %v8660_v53, %v8363_v16  ;;  %v1386_v7 = vadd.f32 %v1385_v25, %v1361_v59  ;;  %v1723_v6 = vsel %vm1722_vm3, %v8823_v32, %v1721_v57 }
 0x32d   : > { %v1580_v24 = vmul.f32 %v1578_v8, %v11230_v19  ;;  %v1625_v60 = vmul.f32 %v1623_v34, %v11231_v44  ;;  %v1675_v50 = vmul.f32 %v1673_v46, %v11232_v36  ;;  %v1556_v35 = vadd.f32 %v1555_v2, %v1531_v58 }
 0x32e   : > { %v11233_v61 = vrot.slane %v8784_v15, %v8328_v0  ;;  %v1739_v4 = vrot.slane %v1731_v26, %v8328_v0  ;;  %v1016_v3 = vadd.f32 %v8732_v18, %v8664_v55  ;;  %v1206_v48 = vcombine.high %v8803_v54, %v8803_v54  ;;  %v1768_v30 = vpop.permute.xlu1 %1767 }
 0x32f   : > { %v1651_v31 = vadd.f32 %v1650_v29, %v1625_v60  ;;  %v11236_v32 = vrot.slane %v11234_v11, %v11235_v42  ;;  %v1748_v5 = vsel %vm1747_vm9, %v1741_v13, %v1746_v23  ;;  %v1581_v9 = vadd.f32 %v1580_v24, %v1556_v35  ;;  %v1934_v13 = vpop.permute.xlu0 %1933  ;;  %v1986_v23 = vld [vmem:[#allocation2] sm:$0xf] }
 0x330   : > { %v1700_v52 = vmul.f32 %v1698_v37, %v11233_v61  ;;  %v1725_v15 = vmul.f32 %v1723_v6, %v1714_v20  ;;  %vm1937_vm12 = vcmask 834560   ;;  %v1401_v26 = vcombine.high %v1386_v7, %v1386_v7  ;;  %v2034_v61 = vld [vmem:[#allocation2] sm:$0xf] }
 0x331   : > { %v1208_v62 = vmul.f32 %v11236_v32, %v8803_v54  ;;  %v1676_v10 = vadd.f32 %v1675_v50, %v1651_v31  ;;  %v1588_v55 = vrot.slane %v1583_v40, %v11235_v42  ;;  %v1592_v18 = vrot.slane %v1583_v40, %v8363_v16  ;;  %v1778_v54 = vld [vmem:[#allocation7 + $0x6] ss:$8 sm:$0x3] }
 0x332   : > { %vm1772_vm7 = vcmask 211968   ;;  %v1750_v38 = vmul.f32 %v1748_v5, %v1739_v4  ;;  %v1769_v21 = vrot.slane %v1766_v28, 4  ;;  %v1770_v63 = vrot.slane %v1768_v30, 4  ;;  %v1936_v56 = vpop.permute.xlu1 %1935 }
 0x333   : > { %v1701_v22 = vadd.f32 %v1700_v52, %v1676_v10  ;;  %v11237_v12 = vrot.slane %v11234_v11, %v8363_v16  ;;  %v1210_v33 = vadd.f32 %v1208_v62, %v1015_v47  ;;  %v1764_v20 = vrot.slane %v1756_v43, %v8328_v0 }
 0x334   : > { %v1941_v25 = vsel %vm1937_vm12, 0.0, %v1934_v13  ;;  %v11238_v1 = vrot.slane %v8660_v53, %v11235_v42  ;;  %v1596_v51 = vcombine.high %v1581_v9, %v1581_v9  ;;  %v1771_v2 = vsel %vm351_vm0, %v1769_v21, %v1770_v63  ;;  %v2076_v21 = vld [vmem:[#allocation2] sm:$0xf] }
 0x335   : > { %v1209_v14 = vmul.f32 %v1206_v48, %v11237_v12  ;;  %v1726_v49 = vadd.f32 %v1725_v15, %v1701_v22  ;;  %v1404_v8 = vmul.f32 %v1401_v26, %v1397_v27  ;;  %v1598_v34 = vmul.f32 %v1588_v55, %v1581_v9  ;;  %v2051_v15 = vld [vmem:[#allocation2] sm:$0xf] }
 0x336   : > { %v1403_v39 = vmul.f32 %v11238_v1, %v1386_v7  ;;  %v1783_v46 = vrot.slane %v1778_v54, %v11235_v42  ;;  %v1773_v17 = vsel %vm1772_vm7, %v1766_v28, %v1771_v2  ;;  %v1938_v41 = vsel %vm1937_vm12, %v1934_v13, %v1936_v56  ;;  %v2010_v7 = vld [vmem:[#allocation2] sm:$0xf] }
 0x337   : > { %v1751_v29 = vadd.f32 %v1750_v38, %v1726_v49  ;;  %v1775_v57 = vmul.f32 %v1773_v17, %v1764_v20  ;;  %v8952_v45 = vsel %vm1937_vm12, %v1936_v56, 0.0  ;;  %v1211_v53 = vadd.f32 %v1209_v14, %v1016_v3  ;;  %v2120_v26 = vld [vmem:[#allocation2] sm:$0xf]  ;;  %v1836_v14 = vld [vmem:[#allocation9 + $0x8] sm:$0xff]  ;;  %v11239_v56 = vld [vmem:[#allocation23_spill] sm:$0xff] }
 0x338   : > { %v8956_v59 = vcombine.low %v1941_v25, %v1938_v41  ;;  %1977 = vrot.lane.b32.xlu0 %v8952_v45, %s7375_s23  ;;  %v1405_v58 = vadd.f32 %v1403_v39, %v1210_v33  ;;  %v1599_v37 = vmul.f32 %v1596_v51, %v1592_v18  ;;  %v1787_v19 = vrot.slane %v1778_v54, %v8363_v16  ;;  %v2144_v38 = vld [vmem:[#allocation2] sm:$0xf] }
 0x339   : > { %v1776_v24 = vadd.f32 %v1775_v57, %v1751_v29  ;;  %v1406_v44 = vadd.f32 %v1404_v8, %v1211_v53  ;;  %v1806_v35 = vstv %s8954_s8  ;;  %v7458_v3 = vmov 84   ;;  %v2168_v13 = vld [vmem:[#allocation2] sm:$0xf] }
 0x33a   : > { %1975 = vrot.lane.b32.xlu1 %v8956_v59, %s7375_s23  ;;  %v1600_v60 = vadd.f32 %v1598_v34, %v1405_v58  ;;  %v7459_v48 = vmov 77   ;;  %v7460_v5 = vmov 0.0   ;;  %v7461_v9 = vmov 50   ;;  %v2192_v33 = vld [vmem:[#allocation2] sm:$0xf] }
 0x33b   : > { %v1791_v36 = vcombine.high %v1776_v24, %v1776_v24  ;;  %v1793_v50 = vmul.f32 %v1783_v46, %v1776_v24  ;;  %v1601_v43 = vadd.f32 %v1599_v37, %v1406_v44  ;;  %v8975_v10 = vcombine.low %v1938_v41, %v8952_v45  ;;  %v2216_v34 = vld [vmem:[#allocation2] sm:$0xf]  ;;  %v6985_v46 = vld [vmem:[#allocation9] sm:$0xff] }
 0x33c   : > { %1999 = vrot.lane.b32.xlu0 %v8956_v59, %s7378_s2  ;;  %v7462_v22 = vmov 91   ;;  %v7463_v63 = vmov 57   ;;  %v7464_v12 = vmov 64   ;;  %v1846_v25 = vcombine.high %v1836_v14, %v1836_v14  ;;  %v2264_v44 = vld [vmem:[#allocation2] sm:$0xf] }
 0x33d   : > { %v1794_v47 = vmul.f32 %v1791_v36, %v1787_v19  ;;  %v1795_v27 = vadd.f32 %v1793_v50, %v1600_v60  ;;  %v7465_v51 = vmov 71   ;;  %v7466_v53 = vmov 78   ;;  %v2240_v19 = vld [vmem:[#allocation2] sm:$0xf] }
 0x33e   : > { %1989 = vperm.xlu1 %6915, %v1986_v23   ;;  %v7467_v24 = vmov 85   ;;  %v7468_v60 = vmov 92   ;;  %v2308_v36 = vld [vmem:[#allocation2] sm:$0xf]  ;;  %v7469_v50 = vmov 51   ;;  %vm11245_vm13 = vcmask 1014784  }
 0x33f   : > { %v1796_v6 = vadd.f32 %v1794_v47, %v1601_v43  ;;  %v1800_v28 = vrot.slane %v1795_v27, 2  ;;  %v2332_v23 = vld [vmem:[#allocation2] sm:$0xf]  ;;  %v7470_v43 = vmov 58   ;;  %vm11246_vm15 = vcmask 752640   ;;  %vm11248_vm9 = vmmov %vm11245_vm13 }
 0x340   : > { %2013 = vperm.xlu0 %6916, %v2010_v7   ;;  %v2356_v47 = vld [vmem:[#allocation2] sm:$0xf]  ;;  %vm11247_vm2 = vcmask 490496  }
 0x341   : > { %v1801_v40 = vrot.slane %v1796_v6, 2  ;;  %v1804_v31 = vadd.f32 %v1800_v28, %v1795_v27  ;;  %v7471_v27 = vmov 65   ;;  %v2380_v7 = vld [vmem:[#allocation2] sm:$0xf]  ;;  %vm11250_vm12 = vmmov %vm11247_vm2 }
 0x342   : > { %2001 = vrot.lane.b32.xlu1 %v8952_v45, %s7378_s2  ;;  %v2404_v28 = vld [vmem:[#allocation2] sm:$0xf] }
 0x343   : > { %v1805_v52 = vadd.f32 %v1801_v40, %v1796_v6  ;;  %v1807_v4 = vadd.f32 %v1806_v35, %v1804_v31  ;;  %6918 = vset.pattern.permute.xlu1 %v7458_v3  ;;  %v7472_v6 = vmov 72   ;;  %v2428_v40 = vld [vmem:[#allocation2] sm:$0xf]  ;;  %v7474_v31 = vmov 86  }
 0x344   : > { %6917 = vset.pattern.permute.xlu0 %v7459_v48  ;;  %v7476_v3 = vmov 52   ;;  %v2520_v48 = vld [vmem:[#allocation2] sm:$0xf] }
 0x345   : > { %v1808_v11 = vadd.f32 %v1806_v35, %v1805_v52  ;;  %v6409_v32 = vmul.f32 -1.442695, %v1807_v4  ;;  %2037 = vperm.xlu0 %6917, %v2034_v61   ;;  %v7473_v35 = vmov 79   ;;  %v2452_v61 = vld [vmem:[#allocation2] sm:$0xf]  ;;  %v7475_v52 = vmov 93  }
 0x346   : > { %2023 = vrot.lane.b32.xlu1 %v8956_v59, %s7381_s19  ;;  %v2496_v4 = vld [vmem:[#allocation2] sm:$0xf] }
 0x347   : > { %6969 = vpow2.f32 %v6409_v32  ;;  %v6410_v62 = vmul.f32 -1.442695, %v1808_v11  ;;  %v7477_v11 = vmov 59   ;;  %v2544_v32 = vld [vmem:[#allocation2] sm:$0xf] }
 0x349   : > { %6971 = vpow2.f32 %v6410_v62  ;;  %2067 = vrot.lane.b32.xlu0 %v7460_v5, %s7375_s23  ;;  %v7478_v62 = vmov 66  }
 0x34a   : > { %2025 = vrot.lane.b32.xlu1 %v8952_v45, %s7381_s19  ;;  %6920 = vset.pattern.permute.xlu0 %v7461_v9  ;;  %v2568_v9 = vld [vmem:[#allocation2] sm:$0xf]  ;;  %s7495_s19 = smov 116  }
 0x34d   : > { %2089 = vrot.lane.b32.xlu0 %v8975_v10, %s7378_s2 }
 0x34e   : > { %2054 = vperm.xlu1 %6918, %v2051_v15   ;;  %v7479_v15 = vmov 73  }
 0x351   : > { %v6970_v55 = vpop.eup %6969  ;;  %2123 = vperm.xlu0 %6920, %v2120_v26   ;;  %v2592_v26 = vld [vmem:[#allocation2] sm:$0xf] }
 0x352   : > { %v1815_v18 = vadd.f32 1.0, %v6970_v55  ;;  %2065 = vrot.lane.b32.xlu1 %v8975_v10, %s7375_s23  ;;  %v7480_v55 = vmov 80   ;;  %s7492_s23 = smov 118  }
 0x353   : > { %v6972_v30 = vpop.eup %6971  ;;  %6919 = vset.pattern.permute.xlu1 %v7462_v22  ;;  %v7482_v22 = vmov 87  }
 0x354   : > { %v1816_v54 = vadd.f32 1.0, %v6972_v30  ;;  %6973 = vrcp.f32 %v1815_v18  ;;  %v2616_v18 = vld [vmem:[#allocation2] sm:$0xf]  ;;  %v7481_v30 = vmov 54  }
 0x355   : > { %6921 = vset.pattern.permute.xlu0 %v7463_v63  ;;  %v1947_v63 = vpop.permute.xlu0 %1946 }
 0x356   : > { %6975 = vrcp.f32 %v1816_v54  ;;  %2147 = vperm.xlu0 %6921, %v2144_v38   ;;  %2079 = vperm.xlu1 %6919, %v2076_v21   ;;  %v2640_v38 = vld [vmem:[#allocation2] sm:$0xf]  ;;  %v1965_v21 = vpop.permute.xlu1 %1964  ;;  %v7483_v54 = vmov 94  }
 0x35a   : > { %6922 = vset.pattern.permute.xlu0 %v7464_v12  ;;  %2091 = vrot.lane.b32.xlu1 %v7460_v5, %s7378_s2  ;;  %s7494_s2 = smov 86  }
 0x35b   : > { %2171 = vperm.xlu0 %6922, %v2168_v13   ;;  %6947 = vset.pattern.permute.xlu1 %v7481_v30  ;;  %v2684_v13 = vld [vmem:[#allocation2] sm:$0xf] }
 0x35e   : > { %v6974_v20 = vpop.eup %6973  ;;  %2133 = vrot.lane.b32.xlu1 %v8956_v59, %s7393_s30 }
 0x35f   : > { %v1824_v1 = vrot.slane %v6974_v20, %v11235_v42  ;;  %v1840_v39 = vrot.slane %v6974_v20, %v8363_v16  ;;  %6923 = vset.pattern.permute.xlu0 %v7465_v51  ;;  %v2709_v20 = vld [vmem:[#allocation2] sm:$0xf] }
 0x360   : > { %v6976_v49 = vpop.eup %6975  ;;  %2195 = vperm.xlu0 %6923, %v2192_v33   ;;  %v7484_v33 = vmov 53  }
 0x361   : > { %v1828_v2 = vrot.slane %v6976_v49, %v11235_v42  ;;  %v1844_v8 = vrot.slane %v6976_v49, %v8363_v16  ;;  %v1829_v17 = vmul.f32 %v6985_v46, %v1824_v1  ;;  %v1848_v57 = vmul.f32 %v1840_v39, %v1836_v14  ;;  %v2734_v49 = vld [vmem:[#allocation2] sm:$0xf] }
 0x362   : > { %2135 = vrot.lane.b32.xlu1 %v8952_v45, %s7393_s30  ;;  %v7485_v1 = vmov 60  }
 0x363   : > { %v1830_v29 = vmul.f32 %v1828_v2, %v11239_v56  ;;  %v1849_v41 = vmul.f32 %v1846_v25, %v1844_v8  ;;  %v7486_v8 = vmov 67  }
 0x364   : > { %6924 = vset.pattern.permute.xlu0 %v7466_v53 }
 0x365   : > { %v1833_v58 = vcombine.low %v1829_v17, %v1830_v29  ;;  %v1852_v37 = vcombine.low %v1848_v57, %v1849_v41  ;;  %2219 = vperm.xlu0 %6924, %v2216_v34   ;;  %v2759_v17 = vld [vmem:[#allocation2] sm:$0xf]  ;;  %v7487_v57 = vmov 74  }
 0x366   : > { %2157 = vrot.lane.b32.xlu1 %v8956_v59, %s7396_s16 }
 0x367   : > { %1835 = vst [vmem:[%s7920_s29] sm:$0xff] %v1833_v58  ;;  %6411 = vst [vmem:[%s7920_s29 + $0x8] sm:$0xff] %v1852_v37 }
 0x369   : > { %6925 = vset.pattern.permute.xlu0 %v7467_v24  ;;  %v2784_v24 = vld [vmem:[#allocation2] sm:$0xf] }
 0x36a   : > { %2243 = vperm.xlu0 %6925, %v2240_v19   ;;  %2159 = vrot.lane.b32.xlu1 %v8952_v45, %s7396_s16 }
 0x36e   : > { %6926 = vset.pattern.permute.xlu0 %v7468_v60  ;;  %2181 = vrot.lane.b32.xlu1 %v8956_v59, %s7407_s17 }
 0x36f   : > { %2267 = vperm.xlu0 %6926, %v2264_v44   ;;  %v1973_v44 = vrot.slane %v1965_v21, %v8328_v0  ;;  %v7490_v21 = vmov 68  }
 0x372   : > { %2183 = vrot.lane.b32.xlu1 %v8952_v45, %s7407_s17 }
 0x373   : > { %6927 = vset.pattern.permute.xlu0 %v7469_v50 }
 0x374   : > { %2311 = vperm.xlu0 %6927, %v2308_v36  }
 0x376   : > { %2205 = vrot.lane.b32.xlu1 %v8956_v59, %s7411_s12 }
 0x378   : > { %6928 = vset.pattern.permute.xlu0 %v7470_v43 }
 0x379   : > { %2335 = vperm.xlu0 %6928, %v2332_v23   ;;  %v7488_v23 = vmov 81  }
 0x37a   : > { %2207 = vrot.lane.b32.xlu1 %v8952_v45, %s7411_s12  ;;  %s7501_s12 = smov 88  }
 0x37d   : > { %6929 = vset.pattern.permute.xlu0 %v7471_v27 }
 0x37e   : > { %2359 = vperm.xlu0 %6929, %v2356_v47   ;;  %2229 = vrot.lane.b32.xlu1 %v8975_v10, %s7393_s30  ;;  %v1955_v47 = vrot.slane %v1947_v63, %v8328_v0 }
 0x382   : > { %6930 = vset.pattern.permute.xlu0 %v7472_v6  ;;  %2231 = vrot.lane.b32.xlu1 %v7460_v5, %s7393_s30  ;;  %s7497_s30 = smov 84  }
 0x383   : > { %2383 = vperm.xlu0 %6930, %v2380_v7  }
 0x386   : > { %2253 = vrot.lane.b32.xlu1 %v8975_v10, %s7396_s16 }
 0x387   : > { %6931 = vset.pattern.permute.xlu0 %v7473_v35 }
 0x388   : > { %2407 = vperm.xlu0 %6931, %v2404_v28  }
 0x38a   : > { %2255 = vrot.lane.b32.xlu1 %v7460_v5, %s7396_s16  ;;  %s7498_s16 = smov 22  }
 0x38c   : > { %6932 = vset.pattern.permute.xlu0 %v7474_v31 }
 0x38d   : > { %2431 = vperm.xlu0 %6932, %v2428_v40  }
 0x38e   : > { %2277 = vrot.lane.b32.xlu1 %v8975_v10, %s7407_s17 }
 0x391   : > { %6933 = vset.pattern.permute.xlu0 %v7475_v52 }
 0x392   : > { %2455 = vperm.xlu0 %6933, %v2452_v61   ;;  %2279 = vrot.lane.b32.xlu1 %v7460_v5, %s7407_s17  ;;  %v2808_v61 = vld [vmem:[#allocation2] sm:$0xf]  ;;  %s7500_s17 = smov 52  }
 0x396   : > { %6934 = vset.pattern.permute.xlu0 %v7476_v3  ;;  %2321 = vrot.lane.b32.xlu1 %v8956_v59, %s7427_s20  ;;  %v1959_v3 = vmul.f32 %v8956_v59, %v1955_v47 }
 0x397   : > { %2499 = vperm.xlu0 %6934, %v2496_v4  }
 0x39a   : > { %2323 = vrot.lane.b32.xlu1 %v8952_v45, %s7427_s20 }
 0x39b   : > { %6935 = vset.pattern.permute.xlu0 %v7477_v11 }
 0x39c   : > { %2523 = vperm.xlu0 %6935, %v2520_v48  }
 0x39e   : > { %2345 = vrot.lane.b32.xlu1 %v8956_v59, %s7432_s10 }
 0x3a0   : > { %6936 = vset.pattern.permute.xlu0 %v7478_v62 }
 0x3a1   : > { %2547 = vperm.xlu0 %6936, %v2544_v32   ;;  %v7489_v32 = vmov 88  }
 0x3a2   : > { %2347 = vrot.lane.b32.xlu1 %v8952_v45, %s7432_s10 }
 0x3a5   : > { %6937 = vset.pattern.permute.xlu0 %v7479_v15 }
 0x3a6   : > { %2571 = vperm.xlu0 %6937, %v2568_v9   ;;  %2369 = vrot.lane.b32.xlu1 %v8956_v59, %s7437_s9 }
 0x3aa   : > { %6938 = vset.pattern.permute.xlu0 %v7480_v55  ;;  %2371 = vrot.lane.b32.xlu1 %v8952_v45, %s7437_s9  ;;  %v1978_v12 = vpop.permute.xlu0 %1977  ;;  %v2926_v55 = vld [vmem:[#allocation2] sm:$0xf] }
 0x3ab   : > { %2595 = vperm.xlu0 %6938, %v2592_v26   ;;  %v1980_v56 = vrot.slane %v1978_v12, 4 }
 0x3ac   : > { %v1976_v14 = vpop.permute.xlu1 %1975 }
 0x3ad   : > { %v1979_v46 = vrot.slane %v1976_v14, 4 }
 0x3ae   : > { %2393 = vrot.lane.b32.xlu1 %v8956_v59, %s7439_s15  ;;  %v2000_v39 = vpop.permute.xlu0 %1999 }
 0x3af   : > { %6939 = vset.pattern.permute.xlu0 %v7482_v22  ;;  %v1981_v58 = vsel %vm351_vm0, %v1979_v46, %v1980_v56  ;;  %v2003_v37 = vrot.slane %v2000_v39, 4 }
 0x3b0   : > { %2619 = vperm.xlu0 %6939, %v2616_v18   ;;  %v1982_v50 = vsel %vm503_vm6, %v1976_v14, %v1981_v58 }
 0x3b1   : > { %v1984_v28 = vmul.f32 %v1982_v50, %v1973_v44 }
 0x3b2   : > { %2395 = vrot.lane.b32.xlu1 %v8952_v45, %s7439_s15  ;;  %s7506_s15 = smov 54  }
 0x3b3   : > { %v1985_v62 = vadd.f32 %v1984_v28, %v1959_v3 }
 0x3b4   : > { %6940 = vset.pattern.permute.xlu0 %v7483_v54 }
 0x3b5   : > { %2643 = vperm.xlu0 %6940, %v2640_v38  }
 0x3b6   : > { %2417 = vrot.lane.b32.xlu1 %v8975_v10, %s7427_s20 }
 0x3b9   : > { %6941 = vset.pattern.permute.xlu0 %v7484_v33 }
 0x3ba   : > { %2687 = vperm.xlu0 %6941, %v2684_v13   ;;  %2419 = vrot.lane.b32.xlu1 %v7460_v5, %s7427_s20  ;;  %s7502_s20 = smov 120  }
 0x3bd   : > { %v1990_v25 = vpop.permute.xlu1 %1989 }
 0x3be   : > { %6942 = vset.pattern.permute.xlu0 %v7485_v1  ;;  %2441 = vrot.lane.b32.xlu1 %v8975_v10, %s7432_s10  ;;  %v1998_v35 = vrot.slane %v1990_v25, %v8328_v0  ;;  %v2951_v25 = vld [vmem:[#allocation2] sm:$0xf] }
 0x3bf   : > { %2712 = vperm.xlu0 %6942, %v2709_v20   ;;  %v2014_v2 = vpop.permute.xlu0 %2013 }
 0x3c0   : > { %v2022_v40 = vrot.slane %v2014_v2, %v8328_v0 }
 0x3c1   : > { %v2002_v51 = vpop.permute.xlu1 %2001 }
 0x3c2   : > { %2443 = vrot.lane.b32.xlu1 %v7460_v5, %s7432_s10  ;;  %v2004_v29 = vrot.slane %v2002_v51, 4  ;;  %s7504_s10 = smov 20  }
 0x3c3   : > { %6943 = vset.pattern.permute.xlu0 %v7486_v8 }
 0x3c4   : > { %2737 = vperm.xlu0 %6943, %v2734_v49   ;;  %v2038_v41 = vpop.permute.xlu0 %2037  ;;  %v2005_v60 = vsel %vm351_vm0, %v2003_v37, %v2004_v29  ;;  %v7491_v49 = vmov 75   ;;  %v7493_v29 = vmov 76   ;;  %v3143_v37 = vld [vmem:[#allocation2] sm:$0xf] }
 0x3c5   : > { %v2024_v34 = vpop.permute.xlu1 %2023  ;;  %v2006_v7 = vsel %vm553_vm8, %v2000_v39, %v2005_v60  ;;  %v2046_v30 = vrot.slane %v2038_v41, %v8328_v0 }
 0x3c6   : > { %2465 = vrot.lane.b32.xlu1 %v8975_v10, %s7437_s9  ;;  %v2027_v36 = vrot.slane %v2024_v34, 4  ;;  %v2008_v48 = vmul.f32 %v2006_v7, %v1998_v35  ;;  %v7496_v35 = vmov 95  }
 0x3c7   : > { %v2049_v12 = vmul.f32 %v8975_v10, %v2046_v30 }
 0x3c8   : > { %6944 = vset.pattern.permute.xlu0 %v7487_v57  ;;  %v2068_v6 = vpop.permute.xlu0 %2067  ;;  %v2009_v18 = vadd.f32 %v2008_v48, %v1985_v62  ;;  %v2832_v48 = vld [vmem:[#allocation2] sm:$0xf] }
 0x3c9   : > { %2762 = vperm.xlu0 %6944, %v2759_v17   ;;  %v2026_v53 = vpop.permute.xlu1 %2025  ;;  %v2070_v31 = vrot.slane %v2068_v6, 4 }
 0x3ca   : > { %v2028_v19 = vrot.slane %v2026_v53, 4  ;;  %2467 = vrot.lane.b32.xlu1 %v7460_v5, %s7437_s9  ;;  %s7505_s9 = smov 56  }
 0x3cc   : > { %v2029_v27 = vsel %vm351_vm0, %v2027_v36, %v2028_v19  ;;  %v2090_v22 = vpop.permute.xlu0 %2089 }
 0x3cd   : > { %6945 = vset.pattern.permute.xlu0 %v7488_v23  ;;  %v2055_v43 = vpop.permute.xlu1 %2054  ;;  %v2030_v52 = vsel %vm603_vm1, %v2024_v34, %v2029_v27  ;;  %v2093_v14 = vrot.slane %v2090_v22, 4  ;;  %vm11242_vm1 = vcmask 244736  }
 0x3ce   : > { %2787 = vperm.xlu0 %6945, %v2784_v24   ;;  %2509 = vrot.lane.b32.xlu1 %v8956_v59, %s7447_s26  ;;  %v2032_v9 = vmul.f32 %v2030_v52, %v2022_v40  ;;  %v2063_v54 = vrot.slane %v2055_v43, %v8328_v0 }
 0x3d0   : > { %v2033_v63 = vadd.f32 %v2032_v9, %v2009_v18  ;;  %v2124_v57 = vpop.permute.xlu0 %2123 }
 0x3d1   : > { %v2066_v4 = vpop.permute.xlu1 %2065  ;;  %v2132_v60 = vrot.slane %v2124_v57, %v8328_v0 }
 0x3d2   : > { %v2069_v11 = vrot.slane %v2066_v4, 4  ;;  %6946 = vset.pattern.permute.xlu0 %v7489_v32  ;;  %2511 = vrot.lane.b32.xlu1 %v8952_v45, %s7447_s26  ;;  %v2050_v1 = vadd.f32 %v2049_v12, %v2033_v63  ;;  %v3024_v12 = vld [vmem:[#allocation2] sm:$0xf] }
 0x3d3   : > { %2811 = vperm.xlu0 %6946, %v2808_v61  }
 0x3d4   : > { %v2071_v15 = vsel %vm351_vm0, %v2069_v11, %v2070_v31 }
 0x3d5   : > { %v2080_v26 = vpop.permute.xlu1 %2079  ;;  %v2072_v38 = vsel %vm503_vm6, %v2066_v4, %v2071_v15  ;;  %v2148_v19 = vpop.permute.xlu0 %2147  ;;  %vm11240_vm6 = vcmask 769024  }
 0x3d6   : > { %2533 = vrot.lane.b32.xlu1 %v8956_v59, %s7449_s14  ;;  %v2074_v33 = vmul.f32 %v2072_v38, %v2063_v54  ;;  %v2088_v39 = vrot.slane %v2080_v26, %v8328_v0  ;;  %v2156_v23 = vrot.slane %v2148_v19, %v8328_v0  ;;  %v7499_v38 = vmov 96  }
 0x3d7   : > { %6949 = vset.pattern.permute.xlu0 %v7490_v21 }
 0x3d8   : > { %2929 = vperm.xlu0 %6949, %v2926_v55   ;;  %v2075_v34 = vadd.f32 %v2074_v33, %v2050_v1 }
 0x3d9   : > { %v2092_v13 = vpop.permute.xlu1 %2091 }
 0x3da   : > { %v2094_v20 = vrot.slane %v2092_v13, 4  ;;  %2535 = vrot.lane.b32.xlu1 %v8952_v45, %s7449_s14  ;;  %v2172_v40 = vpop.permute.xlu0 %2171 }
 0x3db   : > { %v2180_v3 = vrot.slane %v2172_v40, %v8328_v0 }
 0x3dc   : > { %v2095_v51 = vsel %vm351_vm0, %v2093_v14, %v2094_v20  ;;  %6952 = vset.pattern.permute.xlu0 %v7491_v49 }
 0x3dd   : > { %v2096_v2 = vsel %vm553_vm8, %v2090_v22, %v2095_v51  ;;  %2954 = vperm.xlu0 %6952, %v2951_v25   ;;  %v2134_v8 = vpop.permute.xlu1 %2133  ;;  %vm11241_vm8 = vcmask 506880  }
 0x3de   : > { %v2098_v46 = vmul.f32 %v2096_v2, %v2088_v39  ;;  %2557 = vrot.lane.b32.xlu1 %v8956_v59, %s7452_s21  ;;  %v2137_v58 = vrot.slane %v2134_v8, 4  ;;  %vm11244_vm10 = vmmov %vm11241_vm8 }
 0x3df   : > { %v2196_v26 = vpop.permute.xlu0 %2195 }
 0x3e0   : > { %v9075_v17 = vadd.f32 %v2098_v46, %v2075_v34  ;;  %v2204_v30 = vrot.slane %v2196_v26, %v8328_v0  ;;  %v7503_v34 = vmov 97  }
 0x3e1   : > { %2891 = vrot.lane.b32.xlu0 %v8952_v45, %s7492_s23  ;;  %v2136_v56 = vpop.permute.xlu1 %2135 }
 0x3e2   : > { %2559 = vrot.lane.b32.xlu1 %v8952_v45, %s7452_s21  ;;  %6955 = vset.pattern.permute.xlu0 %v7493_v29  ;;  %v2138_v41 = vrot.slane %v2136_v56, 4 }
 0x3e4   : > { %v2139_v24 = vsel %vm351_vm0, %v2137_v58, %v2138_v41  ;;  %v2220_v33 = vpop.permute.xlu0 %2219 }
 0x3e5   : > { %2916 = vrot.lane.b32.xlu0 %v8952_v45, %s7494_s2  ;;  %v2158_v53 = vpop.permute.xlu1 %2157  ;;  %v2140_v43 = vsel %vm842_vm4, %v2134_v8, %v2139_v24  ;;  %v2228_v25 = vrot.slane %v2220_v33, %v8328_v0 }
 0x3e6   : > { %2581 = vrot.lane.b32.xlu1 %v8956_v59, %s7454_s18  ;;  %v2161_v36 = vrot.slane %v2158_v53, 4  ;;  %v2142_v6 = vmul.f32 %v2140_v43, %v2132_v60 }
 0x3e9   : > { %3146 = vperm.xlu0 %6955, %v3143_v37   ;;  %v2160_v44 = vpop.permute.xlu1 %2159  ;;  %v2244_v56 = vpop.permute.xlu0 %2243 }
 0x3ea   : > { %v2162_v50 = vrot.slane %v2160_v44, 4  ;;  %2583 = vrot.lane.b32.xlu1 %v8952_v45, %s7454_s18  ;;  %v2252_v57 = vrot.slane %v2244_v56, %v8328_v0 }
 0x3ec   : > { %v2163_v47 = vsel %vm351_vm0, %v2161_v36, %v2162_v50 }
 0x3ed   : > { %v2164_v27 = vsel %vm11240_vm6, %v2158_v53, %v2163_v47  ;;  %3081 = vrot.lane.b32.xlu0 %v8956_v59, %s7495_s19  ;;  %v2182_v7 = vpop.permute.xlu1 %2181  ;;  %v2101_v47 = vld [vmem:[#allocation7 + $0x7] ss:$8 sm:$0x3] }
 0x3ee   : > { %v2166_v28 = vmul.f32 %v2164_v27, %v2156_v23  ;;  %2605 = vrot.lane.b32.xlu1 %v8975_v10, %s7447_s26  ;;  %6956 = vset.pattern.permute.xlu0 %v7496_v35  ;;  %v2185_v52 = vrot.slane %v2182_v7, 4  ;;  %v2268_v60 = vpop.permute.xlu0 %2267  ;;  %v2289_v27 = vld [vmem:[#allocation7 + $0x10] ss:$8 sm:$0x3]  ;;  %v2106_v35 = vrot.slane %v2101_v47, %v11235_v42 }
 0x3ef   : > { %v2276_v50 = vrot.slane %v2268_v60, %v8328_v0  ;;  %v2294_v40 = vrot.slane %v2289_v27, %v11235_v42 }
 0x3f0   : > { %v2167_v31 = vadd.f32 %v2166_v28, %v2142_v6 }
 0x3f1   : > { %3106 = vrot.lane.b32.xlu0 %v8956_v59, %s7497_s30  ;;  %v2184_v61 = vpop.permute.xlu1 %2183 }
 0x3f2   : > { %v2186_v4 = vrot.slane %v2184_v61, 4  ;;  %2607 = vrot.lane.b32.xlu1 %v7460_v5, %s7447_s26  ;;  %v2110_v61 = vrot.slane %v2101_v47, %v8363_v16  ;;  %s7507_s26 = smov 24  }
 0x3f4   : > { %v2187_v11 = vsel %vm351_vm0, %v2185_v52, %v2186_v4  ;;  %v2114_v52 = vcombine.high %v9075_v17, %v9075_v17  ;;  %v2298_v4 = vrot.slane %v2289_v27, %v8363_v16 }
 0x3f5   : > { %v2188_v32 = vsel %vm11241_vm8, %v2182_v7, %v2187_v11  ;;  %2835 = vperm.xlu0 %6956, %v2832_v48   ;;  %v2206_v62 = vpop.permute.xlu1 %2205  ;;  %v2116_v11 = vmul.f32 %v2106_v35, %v9075_v17  ;;  %v7509_v35 = vmov 55   ;;  %vm2921_vm8 = vcmask 703488  }
 0x3f6   : > { %v2190_v9 = vmul.f32 %v2188_v32, %v2180_v3  ;;  %2629 = vrot.lane.b32.xlu1 %v8975_v10, %s7449_s14  ;;  %v2209_v18 = vrot.slane %v2206_v62, 4 }
 0x3f8   : > { %v2191_v15 = vadd.f32 %v2190_v9, %v2167_v31  ;;  %v2312_v9 = vpop.permute.xlu0 %2311 }
 0x3f9   : > { %2964 = vrot.lane.b32.xlu0 %v8956_v59, %s7498_s16  ;;  %v2208_v55 = vpop.permute.xlu1 %2207 }
 0x3fa   : > { %v2210_v22 = vrot.slane %v2208_v55, 4  ;;  %2631 = vrot.lane.b32.xlu1 %v7460_v5, %s7449_s14  ;;  %6959 = vset.pattern.permute.xlu0 %v7499_v38  ;;  %s6412_s14 = sld [smem:[#allocation6 + $0x1]] }
 0x3fc   : > { %v2211_v21 = vsel %vm351_vm0, %v2209_v18, %v2210_v22 }
 0x3fd   : > { %v2212_v54 = vsel %vm11242_vm1, %v2206_v62, %v2211_v21  ;;  %3131 = vrot.lane.b32.xlu0 %v8956_v59, %s7500_s17  ;;  %v2230_v63 = vpop.permute.xlu1 %2229  ;;  %v2336_v21 = vpop.permute.xlu0 %2335  ;;  %vm2946_vm1 = vcmask 441344  }
 0x3fe   : > { %v2214_v13 = vmul.f32 %v2212_v54, %v2204_v30  ;;  %2653 = vrot.lane.b32.xlu1 %v8975_v10, %s7452_s21  ;;  %v2233_v1 = vrot.slane %v2230_v63, 4 }
 0x400   : > { %v2215_v14 = vadd.f32 %v2214_v13, %v2191_v15  ;;  %v2117_v15 = vmul.f32 %v2114_v52, %v2110_v61  ;;  %v2344_v13 = vrot.slane %v2336_v21, %v8328_v0 }
 0x401   : > { %3027 = vperm.xlu0 %6959, %v3024_v12   ;;  %v2232_v20 = vpop.permute.xlu1 %2231 }
 0x402   : > { %v2234_v39 = vrot.slane %v2232_v20, 4  ;;  %2655 = vrot.lane.b32.xlu1 %v7460_v5, %s7452_s21 }
 0x404   : > { %v2235_v51 = vsel %vm351_vm0, %v2233_v1, %v2234_v39 }
 0x405   : > { %v2236_v49 = vsel %vm842_vm4, %v2230_v63, %v2235_v51  ;;  %2823 = vrot.lane.b32.xlu0 %v7460_v5, %s7501_s12  ;;  %v2254_v2 = vpop.permute.xlu1 %2253  ;;  %vm11243_vm4 = vmmov %vm11240_vm6  ;;  %v2320_v63 = vrot.slane %v2312_v9, %v8328_v0  ;;  %vm2896_vm6 = vcmask 965632  }
 0x406   : > { %v2238_v8 = vmul.f32 %v2236_v49, %v2228_v25  ;;  %2697 = vrot.lane.b32.xlu1 %v8956_v59, %s7502_s20  ;;  %6962 = vset.pattern.permute.xlu0 %v7503_v34  ;;  %v2257_v41 = vrot.slane %v2254_v2, 4 }
 0x408   : > { %v2239_v46 = vadd.f32 %v2238_v8, %v2215_v14 }
 0x409   : > { %2991 = vrot.lane.b32.xlu0 %v7460_v5, %s7492_s23  ;;  %v2256_v29 = vpop.permute.xlu1 %2255 }
 0x40a   : > { %v2258_v53 = vrot.slane %v2256_v29, 4  ;;  %2699 = vrot.lane.b32.xlu1 %v8952_v45, %s7502_s20 }
 0x40c   : > { %v2259_v58 = vsel %vm351_vm0, %v2257_v41, %v2258_v53 }
 0x40d   : > { %v2260_v37 = vsel %vm11243_vm4, %v2254_v2, %v2259_v58  ;;  %3158 = vrot.lane.b32.xlu0 %v8952_v45, %s7504_s10  ;;  %v2278_v19 = vpop.permute.xlu1 %2277  ;;  %v2360_v2 = vpop.permute.xlu0 %2359  ;;  %vm3088_vm4 = vcmask 949248  }
 0x40e   : > { %v2262_v24 = vmul.f32 %v2260_v37, %v2252_v57  ;;  %2722 = vrot.lane.b32.xlu1 %v8956_v59, %s7501_s12  ;;  %v2281_v23 = vrot.slane %v2278_v19, 4  ;;  %v2876_v57 = vld [vmem:[#allocation2] sm:$0xf] }
 0x410   : > { %v2263_v44 = vadd.f32 %v2262_v24, %v2239_v46  ;;  %v2368_v46 = vrot.slane %v2360_v2, %v8328_v0  ;;  %v2901_v24 = vld [vmem:[#allocation2] sm:$0xf] }
 0x411   : > { %2845 = vrot.lane.b32.xlu0 %v8975_v10, %s7505_s9  ;;  %v2280_v36 = vpop.permute.xlu1 %2279 }
 0x412   : > { %v2282_v43 = vrot.slane %v2280_v36, 4  ;;  %2724 = vrot.lane.b32.xlu1 %v8952_v45, %s7501_s12 }
 0x414   : > { %v2283_v7 = vsel %vm351_vm0, %v2281_v23, %v2282_v43  ;;  %v7508_v43 = vmov 61  }
 0x415   : > { %v2284_v6 = vsel %vm11244_vm10, %v2278_v19, %v2283_v7  ;;  %v2322_v28 = vpop.permute.xlu1 %2321  ;;  %3013 = vrot.lane.b32.xlu0 %v8975_v10, %s7494_s2  ;;  %vm3113_vm10 = vcmask 687104  }
 0x416   : > { %v2286_v31 = vmul.f32 %v2284_v6, %v2276_v50  ;;  %2747 = vrot.lane.b32.xlu1 %v8956_v59, %s7505_s9  ;;  %v2325_v38 = vrot.slane %v2322_v28, 4  ;;  %v3068_v6 = vld [vmem:[#allocation2] sm:$0xf] }
 0x418   : > { %v2287_v3 = vadd.f32 %v2286_v31, %v2263_v44  ;;  %v2384_v44 = vpop.permute.xlu0 %2383 }
 0x419   : > { %v2324_v48 = vpop.permute.xlu1 %2323  ;;  %3181 = vrot.lane.b32.xlu0 %v8975_v10, %s7495_s19  ;;  %v2392_v36 = vrot.slane %v2384_v44, %v8328_v0 }
 0x41a   : > { %v2302_v32 = vcombine.high %v2287_v3, %v2287_v3  ;;  %v2304_v62 = vmul.f32 %v2294_v40, %v2287_v3  ;;  %2749 = vrot.lane.b32.xlu1 %v8952_v45, %s7505_s9  ;;  %v2326_v18 = vrot.slane %v2324_v48, 4  ;;  %v3093_v48 = vld [vmem:[#allocation2] sm:$0xf] }
 0x41c   : > { %v2305_v26 = vmul.f32 %v2302_v32, %v2298_v4  ;;  %v9160_v55 = vadd.f32 %v2304_v62, %v2116_v11  ;;  %v2327_v17 = vsel %vm351_vm0, %v2325_v38, %v2326_v18  ;;  %v2408_v31 = vpop.permute.xlu0 %2407  ;;  %v7510_v32 = vmov 62  }
 0x41d   : > { %v2346_v30 = vpop.permute.xlu1 %2345  ;;  %3037 = vrot.lane.b32.xlu0 %v8975_v10, %s7506_s15  ;;  %v2328_v33 = vsel %vm11245_vm13, %v2322_v28, %v2327_v17  ;;  %v2416_v52 = vrot.slane %v2408_v31, %v8328_v0  ;;  %v7511_v38 = vmov 69   ;;  %vm2971_vm13 = vcmask 179200  }
 0x41e   : > { %v9164_v22 = vadd.f32 %v2305_v26, %v2117_v15  ;;  %2772 = vrot.lane.b32.xlu1 %v8956_v59, %s7507_s26  ;;  %v2349_v12 = vrot.slane %v2346_v30, 4  ;;  %v2330_v39 = vmul.f32 %v2328_v33, %v2320_v63  ;;  %v3118_v26 = vld [vmem:[#allocation2] sm:$0xf] }
 0x421   : > { %v2348_v54 = vpop.permute.xlu1 %2347  ;;  %3205 = vrot.lane.b32.xlu0 %v8975_v10, %s7497_s30 }
 0x422   : > { %v2350_v14 = vrot.slane %v2348_v54, 4  ;;  %2774 = vrot.lane.b32.xlu1 %v8952_v45, %s7507_s26 }
 0x424   : > { %v2351_v20 = vsel %vm351_vm0, %v2349_v12, %v2350_v14 }
 0x425   : > { %v2352_v25 = vsel %vm11246_vm15, %v2346_v30, %v2351_v20  ;;  %v2370_v1 = vpop.permute.xlu1 %2369  ;;  %3229 = vrot.lane.b32.xlu0 %v8975_v10, %s7500_s17  ;;  %v2432_v30 = vpop.permute.xlu0 %2431  ;;  %v7512_v20 = vmov 82  }
 0x426   : > { %v2354_v51 = vmul.f32 %v2352_v25, %v2344_v13  ;;  %2797 = vrot.lane.b32.xlu1 %v8975_v10, %s7502_s20  ;;  %v2373_v56 = vrot.slane %v2370_v1, 4  ;;  %v2440_v21 = vrot.slane %v2432_v30, %v8328_v0 }
 0x428   : > { %v2355_v49 = vadd.f32 %v2354_v51, %v2330_v39 }
 0x429   : > { %v2372_v8 = vpop.permute.xlu1 %2371 }
 0x42a   : > { %v2374_v29 = vrot.slane %v2372_v8, 4  ;;  %2799 = vrot.lane.b32.xlu1 %v7460_v5, %s7502_s20  ;;  %v2477_v8 = vld [vmem:[#allocation7 + $0x11] ss:$8 sm:$0x3] }
 0x42c   : > { %v2375_v41 = vsel %vm351_vm0, %v2373_v56, %v2374_v29 }
 0x42d   : > { %v2376_v53 = vsel %vm11247_vm2, %v2370_v1, %v2375_v41  ;;  %v2394_v58 = vpop.permute.xlu1 %2393  ;;  %v2456_v1 = vpop.permute.xlu0 %2455  ;;  %v2482_v41 = vrot.slane %v2477_v8, %v11235_v42  ;;  %vm3163_vm2 = vcmask 162816  }
 0x42e   : > { %v2378_v37 = vmul.f32 %v2376_v53, %v2368_v46  ;;  %2879 = vperm.xlu1 %6947, %v2876_v57   ;;  %v2397_v50 = vrot.slane %v2394_v58, 4  ;;  %v2464_v51 = vrot.slane %v2456_v1, %v8328_v0  ;;  %v2976_v46 = vld [vmem:[#allocation2] sm:$0xf] }
 0x430   : > { %v2379_v19 = vadd.f32 %v2378_v37, %v2355_v49 }
 0x431   : > { %v2396_v60 = vpop.permute.xlu1 %2395 }
 0x432   : > { %v2398_v23 = vrot.slane %v2396_v60, 4  ;;  %6948 = vset.pattern.permute.xlu1 %v7508_v43  ;;  %v2500_v60 = vpop.permute.xlu0 %2499 }
 0x433   : > { %2904 = vperm.xlu1 %6948, %v2901_v24  }
 0x434   : > { %v2399_v47 = vsel %vm351_vm0, %v2397_v50, %v2398_v23 }
 0x435   : > { %v2400_v27 = vsel %vm1382_vm11, %v2394_v58, %v2399_v47  ;;  %v2418_v7 = vpop.permute.xlu1 %2417  ;;  %vm11249_vm11 = vmmov %vm11246_vm15  ;;  %v2486_v58 = vrot.slane %v2477_v8, %v8363_v16  ;;  %vm3138_vm15 = vcmask 424960  }
 0x436   : > { %v2402_v28 = vmul.f32 %v2400_v27, %v2392_v36  ;;  %v2421_v4 = vrot.slane %v2418_v7, 4  ;;  %v7513_v36 = vmov 89  }
 0x437   : > { %6950 = vset.pattern.permute.xlu1 %v7509_v35 }
 0x438   : > { %v2403_v40 = vadd.f32 %v2402_v28, %v2379_v19  ;;  %3071 = vperm.xlu1 %6950, %v3068_v6   ;;  %v2524_v28 = vpop.permute.xlu0 %2523 }
 0x439   : > { %v2420_v61 = vpop.permute.xlu1 %2419  ;;  %v2532_v31 = vrot.slane %v2524_v28, %v8328_v0 }
 0x43a   : > { %v2422_v3 = vrot.slane %v2420_v61, 4 }
 0x43c   : > { %v2423_v11 = vsel %vm351_vm0, %v2421_v4, %v2422_v3  ;;  %6951 = vset.pattern.permute.xlu1 %v7510_v32  ;;  %v3000_v32 = vld [vmem:[#allocation2] sm:$0xf] }
 0x43d   : > { %v2424_v62 = vsel %vm11248_vm9, %v2418_v7, %v2423_v11  ;;  %3096 = vperm.xlu1 %6951, %v3093_v48   ;;  %v2442_v9 = vpop.permute.xlu1 %2441 }
 0x43e   : > { %v2426_v15 = vmul.f32 %v2424_v62, %v2416_v52  ;;  %v2445_v54 = vrot.slane %v2442_v9, 4 }
 0x440   : > { %v2427_v18 = vadd.f32 %v2426_v15, %v2403_v40  ;;  %v2508_v40 = vrot.slane %v2500_v60, %v8328_v0 }
 0x441   : > { %6953 = vset.pattern.permute.xlu1 %v7511_v38  ;;  %v2444_v17 = vpop.permute.xlu1 %2443 }
 0x442   : > { %v2446_v63 = vrot.slane %v2444_v17, 4  ;;  %3121 = vperm.xlu1 %6953, %v3118_v26   ;;  %v3168_v17 = vld [vmem:[#allocation2] sm:$0xf] }
 0x444   : > { %v2447_v13 = vsel %vm351_vm0, %v2445_v54, %v2446_v63 }
 0x445   : > { %v2448_v12 = vsel %vm11249_vm11, %v2442_v9, %v2447_v13  ;;  %v2466_v14 = vpop.permute.xlu1 %2465  ;;  %v2548_v9 = vpop.permute.xlu0 %2547  ;;  %v7514_v13 = vmov 83  }
 0x446   : > { %v2450_v33 = vmul.f32 %v2448_v12, %v2440_v21  ;;  %2889 = vrot.lane.b32.xlu1 %v8956_v59, %s7492_s23  ;;  %v2469_v49 = vrot.slane %v2466_v14, 4  ;;  %v2556_v26 = vrot.slane %v2548_v9, %v8328_v0 }
 0x447   : > { %6954 = vset.pattern.permute.xlu1 %v7512_v20 }
 0x448   : > { %v2451_v25 = vadd.f32 %v2450_v33, %v2427_v18 }
 0x449   : > { %v2468_v39 = vpop.permute.xlu1 %2467 }
 0x44a   : > { %v2470_v2 = vrot.slane %v2468_v39, 4  ;;  %2914 = vrot.lane.b32.xlu1 %v8956_v59, %s7494_s2 }
 0x44c   : > { %v2471_v56 = vsel %vm351_vm0, %v2469_v49, %v2470_v2 }
 0x44d   : > { %v2472_v29 = vsel %vm11250_vm12, %v2466_v14, %v2471_v56  ;;  %v2510_v57 = vpop.permute.xlu1 %2509  ;;  %v2572_v14 = vpop.permute.xlu0 %2571 }
 0x44e   : > { %v2474_v53 = vmul.f32 %v2472_v29, %v2464_v51  ;;  %2979 = vperm.xlu1 %6954, %v2976_v46   ;;  %v2513_v7 = vrot.slane %v2510_v57, 4  ;;  %v2580_v20 = vrot.slane %v2572_v14, %v8328_v0  ;;  %v7515_v51 = vmov 90   ;;  %v3192_v29 = vld [vmem:[#allocation2] sm:$0xf] }
 0x450   : > { %v2475_v37 = vadd.f32 %v2474_v53, %v2451_v25 }
 0x451   : > { %v2512_v19 = vpop.permute.xlu1 %2511  ;;  %v2596_v46 = vpop.permute.xlu0 %2595 }
 0x452   : > { %v2490_v24 = vcombine.high %v2475_v37, %v2475_v37  ;;  %v2492_v44 = vmul.f32 %v2482_v41, %v2475_v37  ;;  %2939 = vrot.lane.b32.xlu1 %v8956_v59, %s7506_s15  ;;  %v2514_v43 = vrot.slane %v2512_v19, 4  ;;  %v2604_v41 = vrot.slane %v2596_v46, %v8328_v0 }
 0x453   : > { %6957 = vset.pattern.permute.xlu1 %v7513_v36 }
 0x454   : > { %v2493_v50 = vmul.f32 %v2490_v24, %v2486_v58  ;;  %v9206_v23 = vadd.f32 %v2492_v44, %v9160_v55  ;;  %v2515_v6 = vsel %vm351_vm0, %v2513_v7, %v2514_v43 }
 0x455   : > { %v2534_v47 = vpop.permute.xlu1 %2533  ;;  %v2620_v19 = vpop.permute.xlu0 %2619 }
 0x456   : > { %v9209_v27 = vadd.f32 %v2493_v50, %v9164_v22  ;;  %2941 = vrot.lane.b32.xlu1 %v8952_v45, %s7506_s15  ;;  %v2537_v61 = vrot.slane %v2534_v47, 4  ;;  %v2516_v22 = vsel %vm1622_vm14, %v2510_v57, %v2515_v6  ;;  %v2628_v50 = vrot.slane %v2620_v19, %v8328_v0 }
 0x457   : > { %v2518_v48 = vmul.f32 %v2516_v22, %v2508_v40 }
 0x459   : > { %v2536_v35 = vpop.permute.xlu1 %2535  ;;  %v2644_v7 = vpop.permute.xlu0 %2643 }
 0x45a   : > { %v2538_v55 = vrot.slane %v2536_v35, 4  ;;  %3083 = vrot.lane.b32.xlu1 %v8952_v45, %s7495_s19  ;;  %v2652_v22 = vrot.slane %v2644_v7, %v8328_v0 }
 0x45c   : > { %v2539_v52 = vsel %vm351_vm0, %v2537_v61, %v2538_v55 }
 0x45d   : > { %v2540_v4 = vsel %vm1672_vm5, %v2534_v47, %v2539_v52  ;;  %v2558_v3 = vpop.permute.xlu1 %2557  ;;  %v2688_v61 = vpop.permute.xlu0 %2687 }
 0x45e   : > { %v2542_v11 = vmul.f32 %v2540_v4, %v2532_v31  ;;  %3108 = vrot.lane.b32.xlu1 %v8952_v45, %s7497_s30  ;;  %v2561_v18 = vrot.slane %v2558_v3, 4 }
 0x460   : > { %v2543_v62 = vadd.f32 %v2542_v11, %v2518_v48 }
 0x461   : > { %v2560_v15 = vpop.permute.xlu1 %2559  ;;  %v2713_v9 = vpop.permute.xlu0 %2712 }
 0x462   : > { %v2562_v30 = vrot.slane %v2560_v15, 4  ;;  %3003 = vperm.xlu1 %6957, %v3000_v32  }
 0x464   : > { %v2563_v38 = vsel %vm351_vm0, %v2561_v18, %v2562_v30 }
 0x465   : > { %v2564_v21 = vsel %vm1722_vm3, %v2558_v3, %v2563_v38  ;;  %v2582_v54 = vpop.permute.xlu1 %2581  ;;  %v2665_v3 = vld [vmem:[#allocation7 + $0x12] ss:$8 sm:$0x3] }
 0x466   : > { %v2566_v63 = vmul.f32 %v2564_v21, %v2556_v26  ;;  %6958 = vset.pattern.permute.xlu1 %v7514_v13  ;;  %v2585_v25 = vrot.slane %v2582_v54, 4  ;;  %v2670_v32 = vrot.slane %v2665_v3, %v11235_v42  ;;  %v2696_v26 = vrot.slane %v2688_v61, %v8328_v0 }
 0x467   : > { %3171 = vperm.xlu1 %6958, %v3168_v17  }
 0x468   : > { %v2567_v12 = vadd.f32 %v2566_v63, %v2543_v62 }
 0x469   : > { %v2584_v33 = vpop.permute.xlu1 %2583 }
 0x46a   : > { %v2586_v1 = vrot.slane %v2584_v33, 4 }
 0x46b   : > { %2966 = vrot.lane.b32.xlu1 %v8952_v45, %s7498_s16 }
 0x46c   : > { %v2587_v39 = vsel %vm351_vm0, %v2585_v25, %v2586_v1  ;;  %6960 = vset.pattern.permute.xlu1 %v7515_v51 }
 0x46d   : > { %v2588_v49 = vsel %vm1772_vm7, %v2582_v54, %v2587_v39  ;;  %v2606_v2 = vpop.permute.xlu1 %2605  ;;  %v2721_v39 = vrot.slane %v2713_v9, %v8328_v0  ;;  %vm2779_vm7 = vcmask 195584  }
 0x46e   : > { %v2590_v8 = vmul.f32 %v2588_v49, %v2580_v20  ;;  %v2609_v53 = vrot.slane %v2606_v2, 4 }
 0x46f   : > { %3133 = vrot.lane.b32.xlu1 %v8952_v45, %s7500_s17 }
 0x470   : > { %v2591_v56 = vadd.f32 %v2590_v8, %v2567_v12  ;;  %v2738_v12 = vpop.permute.xlu0 %2737 }
 0x471   : > { %v2608_v57 = vpop.permute.xlu1 %2607 }
 0x472   : > { %v2610_v58 = vrot.slane %v2608_v57, 4 }
 0x473   : > { %3195 = vperm.xlu1 %6960, %v3192_v29  }
 0x474   : > { %v2611_v37 = vsel %vm351_vm0, %v2609_v53, %v2610_v58 }
 0x475   : > { %v2612_v24 = vsel %vm1622_vm14, %v2606_v2, %v2611_v37  ;;  %v2630_v44 = vpop.permute.xlu1 %2629  ;;  %vm2729_vm14 = vcmask 719872  }
 0x476   : > { %v2614_v60 = vmul.f32 %v2612_v24, %v2604_v41  ;;  %v2633_v43 = vrot.slane %v2630_v44, 4  ;;  %v2746_v41 = vrot.slane %v2738_v12, %v8328_v0 }
 0x477   : > { %2821 = vrot.lane.b32.xlu1 %v8975_v10, %s7501_s12 }
 0x478   : > { %v2615_v36 = vadd.f32 %v2614_v60, %v2591_v56  ;;  %6961 = vset.pattern.permute.xlu1 %v7503_v34  ;;  %v3216_v34 = vld [vmem:[#allocation2] sm:$0xf] }
 0x479   : > { %v2632_v45 = vpop.permute.xlu1 %2631 }
 0x47a   : > { %v2634_v47 = vrot.slane %v2632_v45, 4 }
 0x47b   : > { %2989 = vrot.lane.b32.xlu1 %v8975_v10, %s7492_s23 }
 0x47c   : > { %v2635_v6 = vsel %vm351_vm0, %v2633_v43, %v2634_v47 }
 0x47d   : > { %v2636_v28 = vsel %vm1672_vm5, %v2630_v44, %v2635_v6  ;;  %v2654_v35 = vpop.permute.xlu1 %2653  ;;  %vm2704_vm5 = vcmask 982016  }
 0x47e   : > { %v2638_v40 = vmul.f32 %v2636_v28, %v2628_v50  ;;  %v2657_v52 = vrot.slane %v2654_v35, 4 }
 0x47f   : > { %3156 = vrot.lane.b32.xlu1 %v8956_v59, %s7504_s10  ;;  %v2674_v59 = vrot.slane %v2665_v3, %v8363_v16 }
 0x480   : > { %v2639_v31 = vadd.f32 %v2638_v40, %v2615_v36 }
 0x481   : > { %v2656_v55 = vpop.permute.xlu1 %2655 }
 0x482   : > { %v2658_v4 = vrot.slane %v2656_v55, 4 }
 0x483   : > { %3219 = vperm.xlu1 %6961, %v3216_v34  }
 0x484   : > { %v2659_v10 = vsel %vm351_vm0, %v2657_v52, %v2658_v4 }
 0x485   : > { %v2660_v48 = vsel %vm1722_vm3, %v2654_v35, %v2659_v10  ;;  %v2698_v11 = vpop.permute.xlu1 %2697  ;;  %vm2754_vm3 = vcmask 457728  }
 0x486   : > { %v2662_v62 = vmul.f32 %v2660_v48, %v2652_v22  ;;  %v2701_v17 = vrot.slane %v2698_v11, 4 }
 0x487   : > { %2847 = vrot.lane.b32.xlu1 %v7460_v5, %s7505_s9 }
 0x488   : > { %v2663_v15 = vadd.f32 %v2662_v62, %v2639_v31 }
 0x489   : > { %v2700_v18 = vpop.permute.xlu1 %2699 }
 0x48a   : > { %v2678_v30 = vcombine.high %v2663_v15, %v2663_v15  ;;  %v2680_v38 = vmul.f32 %v2670_v32, %v2663_v15  ;;  %v2702_v21 = vrot.slane %v2700_v18, 4 }
 0x48b   : > { %3015 = vrot.lane.b32.xlu1 %v7460_v5, %s7494_s2 }
 0x48c   : > { %v2681_v54 = vmul.f32 %v2678_v30, %v2674_v59  ;;  %v9257_v63 = vadd.f32 %v2680_v38, %v9206_v23  ;;  %v2703_v13 = vsel %vm351_vm0, %v2701_v17, %v2702_v21  ;;  %v2763_v23 = vpop.permute.xlu0 %2762 }
 0x48d   : > { %v2705_v14 = vsel %vm2704_vm5, %v2698_v11, %v2703_v13  ;;  %v2723_v33 = vpop.permute.xlu1 %2722  ;;  %v2771_v50 = vrot.slane %v2763_v23, %v8328_v0 }
 0x48e   : > { %v9262_v20 = vadd.f32 %v2681_v54, %v9209_v27  ;;  %v2707_v25 = vmul.f32 %v2705_v14, %v2696_v26  ;;  %v2726_v51 = vrot.slane %v2723_v33, 4 }
 0x48f   : > { %3183 = vrot.lane.b32.xlu1 %v7460_v5, %s7495_s19 }
 0x490   : > { %v2788_v29 = vpop.permute.xlu0 %2787 }
 0x491   : > { %v2725_v1 = vpop.permute.xlu1 %2724  ;;  %v2796_v34 = vrot.slane %v2788_v29, %v8328_v0 }
 0x492   : > { %v2727_v49 = vrot.slane %v2725_v1, 4 }
 0x493   : > { %3039 = vrot.lane.b32.xlu1 %v7460_v5, %s7506_s15 }
 0x494   : > { %v2728_v2 = vsel %vm351_vm0, %v2726_v51, %v2727_v49  ;;  %v9278_v60 = vpop.permute.xlu0 %2811 }
 0x495   : > { %v2748_v8 = vpop.permute.xlu1 %2747  ;;  %v2730_v27 = vsel %vm2729_vm14, %v2723_v33, %v2728_v2 }
 0x496   : > { %v2732_v46 = vmul.f32 %v2730_v27, %v2721_v39  ;;  %v2751_v53 = vrot.slane %v2748_v8, 4 }
 0x497   : > { %3207 = vrot.lane.b32.xlu1 %v7460_v5, %s7497_s30 }
 0x498   : > { %v2733_v56 = vadd.f32 %v2732_v46, %v2707_v25  ;;  %v2930_v6 = vpop.permute.xlu0 %2929 }
 0x499   : > { %v2750_v57 = vpop.permute.xlu1 %2749 }
 0x49a   : > { %v2752_v58 = vrot.slane %v2750_v57, 4 }
 0x49b   : > { %3231 = vrot.lane.b32.xlu1 %v7460_v5, %s7500_s17 }
 0x49c   : > { %v2753_v37 = vsel %vm351_vm0, %v2751_v53, %v2752_v58  ;;  %v9283_v22 = vpop.permute.xlu0 %2954  ;;  %v2938_v53 = vrot.slane %v2930_v6, %v8328_v0 }
 0x49d   : > { %v2755_v19 = vsel %vm2754_vm3, %v2748_v8, %v2753_v37  ;;  %v2773_v24 = vpop.permute.xlu1 %2772 }
 0x49e   : > { %v2757_v44 = vmul.f32 %v2755_v19, %v2746_v41  ;;  %v2776_v43 = vrot.slane %v2773_v24, 4 }
 0x4a0   : > { %v2758_v36 = vadd.f32 %v2757_v44, %v2733_v56  ;;  %v2892_v11 = vpop.permute.xlu0 %2891 }
 0x4a1   : > { %v2775_v45 = vpop.permute.xlu1 %2774  ;;  %v2894_v38 = vrot.slane %v2892_v11, 4 }
 0x4a2   : > { %v2777_v47 = vrot.slane %v2775_v45, 4 }
 0x4a4   : > { %v2778_v7 = vsel %vm351_vm0, %v2776_v43, %v2777_v47  ;;  %v2917_v62 = vpop.permute.xlu0 %2916 }
 0x4a5   : > { %v2780_v28 = vsel %vm2779_vm7, %v2773_v24, %v2778_v7  ;;  %v2798_v5 = vpop.permute.xlu1 %2797  ;;  %v2919_v33 = vrot.slane %v2917_v62, 4 }
 0x4a6   : > { %v2782_v35 = vmul.f32 %v2780_v28, %v2771_v50  ;;  %v2801_v61 = vrot.slane %v2798_v5, 4 }
 0x4a8   : > { %v2783_v40 = vadd.f32 %v2782_v35, %v2758_v36  ;;  %v9289_v15 = vpop.permute.xlu0 %3146 }
 0x4a9   : > { %v2800_v31 = vpop.permute.xlu1 %2799 }
 0x4aa   : > { %v2802_v55 = vrot.slane %v2800_v31, 4 }
 0x4ac   : > { %v2803_v52 = vsel %vm351_vm0, %v2801_v61, %v2802_v55  ;;  %v3082_v18 = vpop.permute.xlu0 %3081 }
 0x4ad   : > { %v2804_v4 = vsel %vm2704_vm5, %v2798_v5, %v2803_v52  ;;  %v2880_v3 = vpop.permute.xlu1 %2879  ;;  %v3085_v24 = vrot.slane %v3082_v18, 4 }
 0x4ae   : > { %v2806_v10 = vmul.f32 %v2804_v4, %v2796_v34  ;;  %v2888_v21 = vrot.slane %v2880_v3, %v8328_v0 }
 0x4b0   : > { %v9287_v48 = vadd.f32 %v2806_v10, %v2783_v40  ;;  %v3107_v13 = vpop.permute.xlu0 %3106 }
 0x4b1   : > { %v3110_v7 = vrot.slane %v3107_v13, 4 }
 0x4b2   : > { %v2905_v32 = vpop.permute.xlu1 %2904 }
 0x4b3   : > { %v2913_v39 = vrot.slane %v2905_v32, %v8328_v0 }
 0x4b4   : > { %v9301_v8 = vpop.permute.xlu0 %2835 }
 0x4b7   : > { %v3072_v9 = vpop.permute.xlu1 %3071 }
 0x4b8   : > { %v2965_v56 = vpop.permute.xlu0 %2964  ;;  %v3080_v6 = vrot.slane %v3072_v9, %v8328_v0  ;;  %v2963_v9 = vrot.slane %v9283_v22, %v8328_v0 }
 0x4b9   : > { %v2968_v32 = vrot.slane %v2965_v56, 4 }
 0x4bc   : > { %v3097_v59 = vpop.permute.xlu1 %3096  ;;  %v3132_v45 = vpop.permute.xlu0 %3131 }
 0x4bd   : > { %v3105_v35 = vrot.slane %v3097_v59, %v8328_v0 }
 0x4c0   : > { %v9311_v31 = vpop.permute.xlu0 %3027 }
 0x4c1   : > { %v9291_v26 = vpop.permute.xlu1 %3121 }
 0x4c4   : > { %v2824_v10 = vpop.permute.xlu0 %2823 }
 0x4c5   : > { %v2890_v30 = vpop.permute.xlu1 %2889 }
 0x4c6   : > { %v2893_v17 = vrot.slane %v2890_v30, 4 }
 0x4c8   : > { %v2895_v54 = vsel %vm351_vm0, %v2893_v17, %v2894_v38  ;;  %v2992_v59 = vpop.permute.xlu0 %2991  ;;  %v3135_v17 = vrot.slane %v3132_v45, 4 }
 0x4c9   : > { %v2897_v12 = vsel %vm2896_vm6, %v2890_v30, %v2895_v54  ;;  %v2915_v14 = vpop.permute.xlu1 %2914 }
 0x4ca   : > { %v2899_v25 = vmul.f32 %v2897_v12, %v2888_v21  ;;  %v2918_v1 = vrot.slane %v2915_v14, 4 }
 0x4cc   : > { %v2920_v51 = vsel %vm351_vm0, %v2918_v1, %v2919_v33  ;;  %v3159_v22 = vpop.permute.xlu0 %3158 }
 0x4cd   : > { %v2922_v49 = vsel %vm2921_vm8, %v2915_v14, %v2920_v51  ;;  %v9299_v23 = vpop.permute.xlu1 %2979 }
 0x4ce   : > { %v2924_v2 = vmul.f32 %v2922_v49, %v2913_v39  ;;  %v2826_v39 = vrot.slane %v2824_v10, 4 }
 0x4d0   : > { %v2925_v27 = vadd.f32 %v2924_v2, %v2899_v25 }
 0x4d1   : > { %v2940_v46 = vpop.permute.xlu1 %2939 }
 0x4d2   : > { %v2943_v57 = vrot.slane %v2940_v46, 4 }
 0x4d5   : > { %v2942_v29 = vpop.permute.xlu1 %2941 }
 0x4d6   : > { %v2944_v41 = vrot.slane %v2942_v29, 4 }
 0x4d8   : > { %v2945_v58 = vsel %vm351_vm0, %v2943_v57, %v2944_v41 }
 0x4d9   : > { %v2947_v37 = vsel %vm2946_vm1, %v2940_v46, %v2945_v58  ;;  %v3084_v19 = vpop.permute.xlu1 %3083  ;;  %v2994_v46 = vrot.slane %v2992_v59, 4  ;;  %v2988_v58 = vrot.slane %v9299_v23, %v8328_v0  ;;  %v2844_v23 = vrot.slane %v9301_v8, %v8328_v0 }
 0x4da   : > { %v2949_v44 = vmul.f32 %v2947_v37, %v2938_v53  ;;  %v3086_v36 = vrot.slane %v3084_v19, 4 }
 0x4dc   : > { %v3087_v50 = vsel %vm351_vm0, %v3085_v24, %v3086_v36  ;;  %v2950_v43 = vadd.f32 %v2949_v44, %v2925_v27  ;;  %v2820_v27 = vrot.slane %v9278_v60, %v8328_v0 }
 0x4dd   : > { %v3109_v47 = vpop.permute.xlu1 %3108  ;;  %v3089_v5 = vsel %vm3088_vm4, %v3082_v18, %v3087_v50 }
 0x4de   : > { %v3111_v28 = vrot.slane %v3109_v47, 4  ;;  %v3091_v55 = vmul.f32 %v3089_v5, %v3080_v6 }
 0x4e0   : > { %v3112_v40 = vsel %vm351_vm0, %v3110_v7, %v3111_v28  ;;  %v2857_v28 = vld [vmem:[#allocation7 + $0x13] ss:$8 sm:$0x3] }
 0x4e1   : > { %v3114_v34 = vsel %vm3113_vm10, %v3107_v13, %v3112_v40  ;;  %v9314_v61 = vpop.permute.xlu1 %3003  ;;  %v3130_v13 = vrot.slane %v9291_v26, %v8328_v0  ;;  %v2862_v6 = vrot.slane %v2857_v28, %v11235_v42 }
 0x4e2   : > { %v3116_v52 = vmul.f32 %v3114_v34, %v3105_v35 }
 0x4e4   : > { %v3117_v4 = vadd.f32 %v3116_v52, %v3091_v55 }
 0x4e6   : > { %v9316_v3 = vpop.permute.xlu1 %3171 }
 0x4ea   : > { %v2967_v11 = vpop.permute.xlu1 %2966 }
 0x4eb   : > { %v2969_v62 = vrot.slane %v2967_v11, 4  ;;  %v3161_v11 = vrot.slane %v3159_v22, 4 }
 0x4ed   : > { %v2970_v18 = vsel %vm351_vm0, %v2968_v32, %v2969_v62  ;;  %v2866_v32 = vrot.slane %v2857_v28, %v8363_v16 }
 0x4ee   : > { %v2972_v30 = vsel %vm2971_vm13, %v2965_v56, %v2970_v18  ;;  %v3134_v38 = vpop.permute.xlu1 %3133  ;;  %v2846_v56 = vpop.permute.xlu0 %2845 }
 0x4ef   : > { %v2974_v21 = vmul.f32 %v2972_v30, %v2963_v9  ;;  %v3136_v54 = vrot.slane %v3134_v38, 4  ;;  %v2849_v7 = vrot.slane %v2846_v56, 4 }
 0x4f1   : > { %v3137_v12 = vsel %vm351_vm0, %v3135_v17, %v3136_v54  ;;  %v2975_v14 = vadd.f32 %v2974_v21, %v2950_v43 }
 0x4f2   : > { %v3139_v33 = vsel %vm3138_vm15, %v3132_v45, %v3137_v12  ;;  %v9325_v25 = vpop.permute.xlu1 %3195  ;;  %v3014_v60 = vpop.permute.xlu0 %3013 }
 0x4f3   : > { %v3141_v1 = vmul.f32 %v3139_v33, %v3130_v13  ;;  %v3017_v34 = vrot.slane %v3014_v60, 4  ;;  %v3012_v13 = vrot.slane %v9314_v61, %v8328_v0 }
 0x4f5   : > { %v9327_v51 = vadd.f32 %v3141_v1, %v3117_v4  ;;  %v3049_v1 = vld [vmem:[#allocation7 + $0x14] ss:$8 sm:$0x3] }
 0x4f6   : > { %v2822_v49 = vpop.permute.xlu1 %2821  ;;  %v3182_v43 = vpop.permute.xlu0 %3181  ;;  %v3054_v61 = vrot.slane %v3049_v1, %v11235_v42 }
 0x4f7   : > { %v2825_v2 = vrot.slane %v2822_v49, 4  ;;  %v3185_v21 = vrot.slane %v3182_v43, 4 }
 0x4f9   : > { %v2827_v26 = vsel %vm351_vm0, %v2825_v2, %v2826_v39 }
 0x4fa   : > { %v2828_v29 = vsel %vm2729_vm14, %v2822_v49, %v2827_v26  ;;  %v2990_v57 = vpop.permute.xlu1 %2989  ;;  %v3038_v55 = vpop.permute.xlu0 %3037  ;;  %v3036_v26 = vrot.slane %v9311_v31, %v8328_v0  ;;  %v3058_v31 = vrot.slane %v3049_v1, %v8363_v16 }
 0x4fb   : > { %v2830_v41 = vmul.f32 %v2828_v29, %v2820_v27  ;;  %v2993_v53 = vrot.slane %v2990_v57, 4  ;;  %v3041_v33 = vrot.slane %v3038_v55, 4 }
 0x4fd   : > { %v2831_v37 = vadd.f32 %v2830_v41, %v9287_v48  ;;  %v2995_v19 = vsel %vm351_vm0, %v2993_v53, %v2994_v46 }
 0x4fe   : > { %v2996_v24 = vsel %vm2896_vm6, %v2990_v57, %v2995_v19  ;;  %v3157_v44 = vpop.permute.xlu1 %3156  ;;  %v3206_v54 = vpop.permute.xlu0 %3205 }
 0x4ff   : > { %v2998_v36 = vmul.f32 %v2996_v24, %v2988_v58  ;;  %v3160_v52 = vrot.slane %v3157_v44, 4  ;;  %v3209_v29 = vrot.slane %v3206_v54, 4 }
 0x501   : > { %v2999_v45 = vadd.f32 %v2998_v36, %v2975_v14  ;;  %v3162_v59 = vsel %vm351_vm0, %v3160_v52, %v3161_v11 }
 0x502   : > { %v9338_v50 = vpop.permute.xlu1 %3219  ;;  %v3164_v22 = vsel %vm3163_vm2, %v3157_v44, %v3162_v59  ;;  %v3230_v58 = vpop.permute.xlu0 %3229  ;;  %v3204_v44 = vrot.slane %v9325_v25, %v8328_v0 }
 0x506   : > { %v2848_v47 = vpop.permute.xlu1 %2847 }
 0x507   : > { %v2850_v5 = vrot.slane %v2848_v47, 4 }
 0x509   : > { %v2851_v48 = vsel %vm351_vm0, %v2849_v7, %v2850_v5 }
 0x50a   : > { %v2852_v35 = vsel %vm2754_vm3, %v2846_v56, %v2851_v48  ;;  %v3016_v40 = vpop.permute.xlu1 %3015  ;;  %v3155_v56 = vrot.slane %v9289_v15, %v8328_v0 }
 0x50b   : > { %v2854_v4 = vmul.f32 %v2852_v35, %v2844_v23  ;;  %v3018_v10 = vrot.slane %v3016_v40, 4  ;;  %v3241_v35 = vld [vmem:[#allocation7 + $0x15] ss:$8 sm:$0x3] }
 0x50c   : > { %v3166_v57 = vmul.f32 %v3164_v22, %v3155_v56 }
 0x50d   : > { %v2855_v62 = vadd.f32 %v2854_v4, %v2831_v37  ;;  %v3019_v9 = vsel %vm351_vm0, %v3017_v34, %v3018_v10  ;;  %v3180_v37 = vrot.slane %v9316_v3, %v8328_v0  ;;  %v3246_v10 = vrot.slane %v3241_v35, %v11235_v42 }
 0x50e   : > { %v3184_v8 = vpop.permute.xlu1 %3183  ;;  %v3020_v17 = vsel %vm2921_vm8, %v3014_v60, %v3019_v9  ;;  %v3167_v7 = vadd.f32 %v3166_v57, %v9327_v51 }
 0x50f   : > { %v2870_v18 = vcombine.high %v2855_v62, %v2855_v62  ;;  %v2872_v30 = vmul.f32 %v2862_v6, %v2855_v62  ;;  %v3186_v38 = vrot.slane %v3184_v8, 4  ;;  %v3022_v2 = vmul.f32 %v3020_v17, %v3012_v13 }
 0x510   : > { %v3228_v6 = vrot.slane %v9338_v50, %v8328_v0 }
 0x511   : > { %v2873_v12 = vmul.f32 %v2870_v18, %v2866_v32  ;;  %v2874_v14 = vadd.f32 %v2872_v30, %v9257_v63  ;;  %v3187_v27 = vsel %vm351_vm0, %v3185_v21, %v3186_v38  ;;  %v3023_v19 = vadd.f32 %v3022_v2, %v2999_v45 }
 0x512   : > { %v3040_v39 = vpop.permute.xlu1 %3039  ;;  %v3188_v41 = vsel %vm3088_vm4, %v3182_v43, %v3187_v27  ;;  %v3233_v43 = vrot.slane %v3230_v58, 4  ;;  %v3250_v32 = vrot.slane %v3241_v35, %v8363_v16  ;;  %v3269_v30 = vstv %s6412_s14 }
 0x513   : > { %v2875_v49 = vadd.f32 %v2873_v12, %v9262_v20  ;;  %v3042_v46 = vrot.slane %v3040_v39, 4  ;;  %v3190_v60 = vmul.f32 %v3188_v41, %v3180_v37  ;;  %v11251_v41 = vld [vmem:[#allocation59_spill] sm:$0xff] }
 0x515   : > { %v3043_v63 = vsel %vm351_vm0, %v3041_v33, %v3042_v46  ;;  %v3191_v40 = vadd.f32 %v3190_v60, %v3167_v7 }
 0x516   : > { %v3044_v20 = vsel %vm2946_vm1, %v3038_v55, %v3043_v63  ;;  %v3208_v53 = vpop.permute.xlu1 %3207 }
 0x517   : > { %v3046_v15 = vmul.f32 %v3044_v20, %v3036_v26  ;;  %v3210_v24 = vrot.slane %v3208_v53, 4 }
 0x519   : > { %v3047_v36 = vadd.f32 %v3046_v15, %v3023_v19  ;;  %v3211_v47 = vsel %vm351_vm0, %v3209_v29, %v3210_v24  ;;  %v6986_v29 = vld [vmem:[#allocation10] sm:$0xff] }
 0x51a   : > { %v3212_v28 = vsel %vm3113_vm10, %v3206_v54, %v3211_v47  ;;  %v3232_v5 = vpop.permute.xlu1 %3231 }
 0x51b   : > { %v3062_v23 = vcombine.high %v3047_v36, %v3047_v36  ;;  %v3064_v3 = vmul.f32 %v3054_v61, %v3047_v36  ;;  %v3214_v45 = vmul.f32 %v3212_v28, %v3204_v44  ;;  %v3234_v48 = vrot.slane %v3232_v5, 4 }
 0x51d   : > { %v3065_v25 = vmul.f32 %v3062_v23, %v3058_v31  ;;  %v3066_v34 = vadd.f32 %v3064_v3, %v2874_v14  ;;  %v3235_v55 = vsel %vm351_vm0, %v3233_v43, %v3234_v48  ;;  %v3215_v51 = vadd.f32 %v3214_v45, %v3191_v40 }
 0x51e   : > { %v3236_v52 = vsel %vm3138_vm15, %v3230_v58, %v3235_v55 }
 0x51f   : > { %v3067_v4 = vadd.f32 %v3065_v25, %v2875_v49  ;;  %v3238_v11 = vmul.f32 %v3236_v52, %v3228_v6  ;;  %v3300_v49 = vld [vmem:[#allocation10 + $0x8] sm:$0xff] }
 0x520   : > { %v3310_v27 = vcombine.high %v3300_v49, %v3300_v49 }
 0x521   : > { %v3239_v62 = vadd.f32 %v3238_v11, %v3215_v51 }
 0x523   : > { %v3254_v9 = vcombine.high %v3239_v62, %v3239_v62  ;;  %v3256_v8 = vmul.f32 %v3246_v10, %v3239_v62 }
 0x525   : > { %v3257_v0 = vmul.f32 %v3254_v9, %v3250_v32  ;;  %v3258_v50 = vadd.f32 %v3256_v8, %v3066_v34 }
 0x527   : > { %v3259_v59 = vadd.f32 %v3257_v0, %v3067_v4  ;;  %v3263_v18 = vrot.slane %v3258_v50, 2 }
 0x529   : > { %v3264_v38 = vrot.slane %v3259_v59, 2  ;;  %v3267_v17 = vadd.f32 %v3263_v18, %v3258_v50 }
 0x52b   : > { %v3268_v21 = vadd.f32 %v3264_v38, %v3259_v59  ;;  %v3270_v54 = vadd.f32 %v3269_v30, %v3267_v17 }
 0x52d   : > { %v3271_v13 = vadd.f32 %v3269_v30, %v3268_v21  ;;  %v6413_v12 = vmul.f32 -1.442695, %v3270_v54 }
 0x52f   : > { %6977 = vpow2.f32 %v6413_v12  ;;  %v6414_v14 = vmul.f32 -1.442695, %v3271_v13 }
 0x531   : > { %6979 = vpow2.f32 %v6414_v14 }
 0x539   : > { %v6978_v33 = vpop.eup %6977 }
 0x53a   : > { %v3278_v22 = vadd.f32 1.0, %v6978_v33 }
 0x53b   : > { %v6980_v1 = vpop.eup %6979 }
 0x53c   : > { %v3279_v39 = vadd.f32 1.0, %v6980_v1  ;;  %6981 = vrcp.f32 %v3278_v22 }
 0x53e   : > { %6983 = vrcp.f32 %v3279_v39 }
 0x546   : > { %v6982_v2 = vpop.eup %6981 }
 0x547   : > { %v3287_v46 = vrot.slane %v6982_v2, %v11235_v42  ;;  %v3304_v56 = vrot.slane %v6982_v2, %v8363_v16 }
 0x548   : > { %v6984_v26 = vpop.eup %6983 }
 0x549   : > { %v3291_v61 = vrot.slane %v6984_v26, %v11235_v42  ;;  %v3308_v63 = vrot.slane %v6984_v26, %v8363_v16  ;;  %v3292_v57 = vmul.f32 %v6986_v29, %v3287_v46  ;;  %v3312_v53 = vmul.f32 %v3304_v56, %v3300_v49 }
 0x54b   : > { %v3293_v20 = vmul.f32 %v3291_v61, %v11251_v41  ;;  %v3313_v58 = vmul.f32 %v3310_v27, %v3308_v63 }
 0x54d   : > { %v3296_v37 = vcombine.low %v3292_v57, %v3293_v20  ;;  %v3316_v19 = vcombine.low %v3312_v53, %v3313_v58 }
 0x54f   : > { %6415 = vst [vmem:[%s7920_s29 + $0x10] sm:$0xff] %v3296_v37  ;;  %6416 = vst [vmem:[%s7920_s29 + $0x18] sm:$0xff] %v3316_v19 }
 0x550 PF: > { %p6417_p10 = scmp.ne.s32.totalorder %s7739_s28, 1 }
 0x552   : > { %3323 = sbr.rel (%p6417_p10) target bundleno = 2507 (0x9cb), region = 80 }
 0x559   : > { %v3460_v15 = vld [vmem:[#allocation2] sm:$0xf]  ;;  %v7516_v24 = vmov 112   ;;  %v3324_v16 = vld [vmem:[%s10905_s5] sm:$0xff]  ;;  %vm3328_vm0 = vcmask 1043456   ;;  %v6418_v31 = vld [vmem:[%s10905_s5 + $0x8] sm:$0xff] }
 0x55a   : > { %6989 = vset.pattern.permute.xlu0 %v7516_v24  ;;  %v3416_v42 = vld [vmem:[#allocation2] sm:$0xf]  ;;  %v7517_v44 = vmov 98   ;;  %v3329_v60 = vsel %vm3328_vm0, %v3324_v16, 0.0  ;;  %v3351_v36 = vsel %vm3328_vm0, %v6418_v31, 0.0  ;;  %v3367_v47 = vsel %vm3328_vm0, %v3324_v16, -inf }
 0x55b   : > { %3463 = vperm.xlu0 %6989, %v3460_v15   ;;  %6987 = vset.pattern.permute.xlu1 %v7517_v44  ;;  %v3381_v43 = vsel %vm3328_vm0, %v6418_v31, -inf  ;;  %v3330_v7 = vrot.slane %v3329_v60, 4  ;;  %v3352_v28 = vrot.slane %v3351_v36, 4  ;;  %v3368_v5 = vrot.slane %v3367_v47, 4  ;;  %v3485_v3 = vld [vmem:[#allocation2] sm:$0xf] }
 0x55c   : > { %3419 = vperm.xlu1 %6987, %v3416_v42   ;;  %v3382_v23 = vrot.slane %v3381_v43, 4  ;;  %v9394_v45 = vcombine.high %v3324_v16, %v3324_v16  ;;  %v7518_v25 = vmov 119   ;;  %v3349_v55 = vcombine.high %v6418_v31, %v6418_v31  ;;  %s7520_s23 = smov 25   ;;  %s7523_s2 = smov 96  }
 0x55d   : > { %v3331_v48 = vadd.f32 %v3330_v7, %v3329_v60  ;;  %v3353_v6 = vadd.f32 %v3352_v28, %v3351_v36  ;;  %v3369_v35 = vmax.f32 %v3367_v47, %v3368_v5  ;;  %v7519_v33 = vmov 126   ;;  %v3435_v36 = vld [vmem:[#allocation2] sm:$0xf]  ;;  %s7524_s19 = smov 93   ;;  %s7539_s30 = smov 80  }
 0x55e   : > { %11252 = vst [vmem:[#allocation89_spill] sm:$0xff] %v9394_v45  ;;  %v3383_v40 = vmax.f32 %v3381_v43, %v3382_v23  ;;  %v3336_v34 = vsel %vm3328_vm0, %v9394_v45, 0.0  ;;  %v3374_v52 = vsel %vm3328_vm0, %v9394_v45, -inf  ;;  %v3358_v62 = vsel %vm3328_vm0, %v3349_v55, 0.0  ;;  %s7540_s16 = smov 32   ;;  %s7543_s17 = smov 112  }
 0x55f   : > { %6990 = vset.pattern.permute.xlu0 %v7518_v25  ;;  %v3332_v4 = vrot.slane %v3331_v48, 2  ;;  %v3354_v51 = vrot.slane %v3353_v6, 2  ;;  %v3370_v10 = vrot.slane %v3369_v35, 2  ;;  %v3337_v32 = vrot.slane %v3336_v34, 4  ;;  %v3562_v25 = vld [vmem:[#allocation2 + $0x4] sm:$0xf] }
 0x560   : > { %3488 = vperm.xlu0 %6990, %v3485_v3   ;;  %v3384_v11 = vrot.slane %v3383_v40, 2  ;;  %v3375_v9 = vrot.slane %v3374_v52, 4  ;;  %v3388_v8 = vsel %vm3328_vm0, %v3349_v55, -inf  ;;  %v3359_v38 = vrot.slane %v3358_v62, 4  ;;  %v3608_v55 = vld [vmem:[#allocation2] sm:$0xf] }
 0x561   : > { %v3333_v0 = vadd.f32 %v3332_v4, %v3331_v48  ;;  %v3355_v50 = vadd.f32 %v3354_v51, %v3353_v6  ;;  %v3371_v59 = vmax.f32 %v3369_v35, %v3370_v10  ;;  %v3338_v30 = vadd.f32 %v3337_v32, %v3336_v34  ;;  %v3512_v6 = vld [vmem:[#allocation2] sm:$0xf]  ;;  %v3537_v35 = vld [vmem:[#allocation2 + $0x4] sm:$0xf]  ;;  %s7544_s12 = smov 64   ;;  %s7546_s20 = smov 16  }
 0x562   : > { %v3385_v18 = vmax.f32 %v3383_v40, %v3384_v11  ;;  %v3376_v17 = vmax.f32 %v3374_v52, %v3375_v9  ;;  %v3389_v21 = vrot.slane %v3388_v8, 4  ;;  %v3360_v1 = vadd.f32 %v3359_v38, %v3358_v62  ;;  %v3633_v4 = vld [vmem:[#allocation2] sm:$0xf]  ;;  %s7548_s10 = smov 125   ;;  %s7551_s9 = smov 77  }
 0x563   : > { %v3334_v54 = vrot.slane %v3333_v0, 1  ;;  %v3356_v13 = vrot.slane %v3355_v50, 1  ;;  %v3372_v12 = vrot.slane %v3371_v59, 1  ;;  %v3339_v22 = vrot.slane %v3338_v30, 2  ;;  %v3658_v10 = vld [vmem:[#allocation2] sm:$0xf] }
 0x564   : > { %v3386_v14 = vrot.slane %v3385_v18, 1  ;;  %6991 = vset.pattern.permute.xlu0 %v7519_v33  ;;  %v3377_v39 = vrot.slane %v3376_v17, 2  ;;  %v3390_v49 = vmax.f32 %v3388_v8, %v3389_v21  ;;  %vm3395_vm9 = vcmask 1040384   ;;  %v3683_v32 = vld [vmem:[#allocation2] sm:$0xf]  ;;  %s7553_s15 = smov 29  }
 0x565   : > { %v3335_v2 = vadd.f32 %v3334_v54, %v3333_v0  ;;  %v3357_v27 = vadd.f32 %v3356_v13, %v3355_v50  ;;  %v3373_v46 = vmax.f32 %v3371_v59, %v3372_v12  ;;  %v3340_v56 = vadd.f32 %v3339_v22, %v3338_v30  ;;  %v3708_v9 = vld [vmem:[#allocation2] sm:$0xf]  ;;  %v3733_v0 = vld [vmem:[#allocation2 + $0x4] sm:$0xf]  ;;  %s7556_s26 = smov 109   ;;  %s7558_s14 = smov 61  }
 0x566   : > { %v3361_v26 = vrot.slane %v3360_v1, 2  ;;  %v3378_v61 = vmax.f32 %v3376_v17, %v3377_v39  ;;  %v3391_v63 = vrot.slane %v3390_v49, 2  ;;  %v3387_v41 = vmax.f32 %v3385_v18, %v3386_v14  ;;  %v3758_v59 = vld [vmem:[#allocation2 + $0x4] sm:$0xf]  ;;  %v3803_v30 = vld [vmem:[#allocation2] sm:$0xf] }
 0x567   : > { %v3344_v29 = vmul.f32 0.25, %v3335_v2  ;;  %v3365_v57 = vmul.f32 0.25, %v3357_v27  ;;  %vm3398_vm11 = vcmask 1041408   ;;  %vm3401_vm12 = vcmask 1042432   ;;  %v3828_v17 = vld [vmem:[#allocation2] sm:$0xf] }
 0x568   : > { %v3341_v20 = vrot.slane %v3340_v56, 1  ;;  %v3362_v53 = vadd.f32 %v3361_v26, %v3360_v1  ;;  %v3392_v58 = vmax.f32 %v3390_v49, %v3391_v63  ;;  %v3379_v19 = vrot.slane %v3378_v61, 1  ;;  %v3853_v54 = vld [vmem:[#allocation2] sm:$0xf]  ;;  %v3928_v26 = vld [vmem:[#allocation2 + $0x4] sm:$0xf] }
 0x569   : > { %v3396_v37 = vsel %vm3395_vm9, %v3344_v29, %v3365_v57  ;;  %v7521_v28 = vmov 105   ;;  %v10967_v48 = vmov 0.0   ;;  %v7525_v40 = vmov 5   ;;  %v3878_v12 = vld [vmem:[#allocation2] sm:$0xf]  ;;  %s7559_s21 = smov 13  }
 0x56a   : > { %v3399_v15 = vsel %vm3398_vm11, %v3396_v37, %v3373_v46  ;;  %v3342_v24 = vadd.f32 %v3341_v20, %v3340_v56  ;;  %v3363_v42 = vrot.slane %v3362_v53, 1  ;;  %v3393_v31 = vrot.slane %v3392_v58, 1  ;;  %6988 = vset.pattern.permute.xlu1 %v7521_v28  ;;  %v3903_v56 = vld [vmem:[#allocation2 + $0x4] sm:$0xf]  ;;  %v4048_v37 = vld [vmem:[#allocation2] sm:$0xf] }
 0x56b   : > { %v3402_v16 = vsel %vm3401_vm12, %v3399_v15, %v3387_v41  ;;  %v3380_v47 = vmax.f32 %v3378_v61, %v3379_v19  ;;  %3438 = vperm.xlu1 %6988, %v3435_v36   ;;  %v7526_v34 = vmov 12   ;;  %v7527_v52 = vmov 99   ;;  %v3953_v63 = vld [vmem:[#allocation2 + $0x4] sm:$0xf]  ;;  %v3998_v41 = vld [vmem:[#allocation2] sm:$0xf] }
 0x56c   : > { %3406 = vrot.lane.b32.xlu0 %v3402_v16, %s7520_s23  ;;  %v3345_v44 = vmul.f32 0.25, %v3342_v24  ;;  %v3364_v60 = vadd.f32 %v3363_v42, %v3362_v53  ;;  %v3394_v7 = vmax.f32 %v3392_v58, %v3393_v31  ;;  %v7528_v51 = vmov 106   ;;  %v4023_v53 = vld [vmem:[#allocation2] sm:$0xf]  ;;  %v4098_v42 = vld [vmem:[#allocation2 + $0x4] sm:$0xf] }
 0x56d   : > { %v7529_v11 = vmov 113   ;;  %v7530_v62 = vmov 120   ;;  %v7531_v8 = vmov 127   ;;  %v7532_v50 = vmov 6   ;;  %v4073_v15 = vld [vmem:[#allocation2] sm:$0xf] }
 0x56e   : > { %v3366_v43 = vmul.f32 0.25, %v3364_v60  ;;  %v7533_v18 = vmov 13   ;;  %v7534_v38 = vmov 100   ;;  %v7535_v21 = vmov 107   ;;  %v4123_v31 = vld [vmem:[#allocation2 + $0x4] sm:$0xf] }
 0x56f   : > { %3578 = vrot.lane.b32.xlu1 %v10967_v48, %s7523_s2  ;;  %v7536_v13 = vmov 114   ;;  %v7537_v14 = vmov 121   ;;  %v7538_v33 = vmov 0   ;;  %vm3410_vm5 = vcmask 203776   ;;  %v4148_v60 = vld [vmem:[#allocation2 + $0x4] sm:$0xf] }
 0x570   : > { %v3397_v5 = vsel %vm3395_vm9, %v3345_v44, %v3366_v43  ;;  %v7541_v61 = vmov 7   ;;  %v7542_v57 = vmov 14   ;;  %v7545_v20 = vmov 101   ;;  %s7561_s22 = smov 122   ;;  %s7564_s18 = smov 74  }
 0x571   : > { %v3400_v23 = vsel %vm3398_vm11, %v3397_v5, %v3380_v47  ;;  %v7547_v58 = vmov 108   ;;  %v7549_v19 = vmov 115   ;;  %v7550_v24 = vmov 122   ;;  %v4193_v47 = vld [vmem:[#allocation2] sm:$0xf]  ;;  %s7566_s8 = smov 26  }
 0x572   : > { %v3403_v3 = vsel %vm3401_vm12, %v3400_v23, %v3394_v7  ;;  %v7552_v16 = vmov 1   ;;  %v7554_v44 = vmov 8   ;;  %v7555_v36 = vmov 15   ;;  %v4218_v7 = vld [vmem:[#allocation2] sm:$0xf] }
 0x573   : > { %3408 = vrot.lane.b32.xlu0 %v3403_v3, %s7520_s23  ;;  %3773 = vrot.lane.b32.xlu1 %v10967_v48, %s7524_s19  ;;  %v7557_v43 = vmov 102   ;;  %v7560_v28 = vmov 109   ;;  %v4243_v5 = vld [vmem:[#allocation2] sm:$0xf]  ;;  %v7562_v23 = vmov 116   ;;  %s7569_s23 = smov 106  }
 0x574   : > { %v4268_v3 = vld [vmem:[#allocation2] sm:$0xf]  ;;  %v7598_v45 = vmov 19   ;;  %vm4918_vm14 = vcmask 621568   ;;  %vm3455_vm3 = vcmask 654336   ;;  %vm3480_vm7 = vcmask 261120  }
 0x575   : > { %vm3628_vm6 = vcmask 1022976   ;;  %vm3653_vm8 = vcmask 629760   ;;  %vm3678_vm1 = vcmask 236544   ;;  %vm11036_vm4 = vcmask 916480  }
 0x576   : > { %vm3532_vm10 = vcmask 523264   ;;  %vm3703_vm13 = vcmask 891904   ;;  %vm3557_vm15 = vcmask 130048   ;;  %vm3728_vm2 = vcmask 498688  }
 0x577   : > { %3515 = vperm.xlu0 %6991, %v3512_v6   ;;  %v7563_v6 = vmov 123  }
 0x57b   : > { %6992 = vset.pattern.permute.xlu0 %v7525_v40  ;;  %v7565_v40 = vmov 2  }
 0x57c   : > { %3540 = vperm.xlu0 %6992, %v3537_v35   ;;  %v4293_v35 = vld [vmem:[#allocation2 + $0x4] sm:$0xf] }
 0x580   : > { %6993 = vset.pattern.permute.xlu0 %v7526_v34  ;;  %v7567_v34 = vmov 9  }
 0x581   : > { %3565 = vperm.xlu0 %6993, %v3562_v25   ;;  %v4318_v25 = vld [vmem:[#allocation2 + $0x4] sm:$0xf] }
 0x585   : > { %6994 = vset.pattern.permute.xlu0 %v7527_v52  ;;  %v7568_v52 = vmov 16  }
 0x586   : > { %3611 = vperm.xlu0 %6994, %v3608_v55   ;;  %v4343_v55 = vld [vmem:[#allocation2 + $0x4] sm:$0xf] }
 0x58a   : > { %6995 = vset.pattern.permute.xlu0 %v7528_v51 }
 0x58b   : > { %3636 = vperm.xlu0 %6995, %v3633_v4   ;;  %v4388_v4 = vld [vmem:[#allocation2] sm:$0xf] }
 0x58f   : > { %6996 = vset.pattern.permute.xlu0 %v7529_v11  ;;  %v4413_v11 = vld [vmem:[#allocation2] sm:$0xf] }
 0x590   : > { %3661 = vperm.xlu0 %6996, %v3658_v10   ;;  %v7570_v10 = vmov 103  }
 0x594   : > { %6997 = vset.pattern.permute.xlu0 %v7530_v62 }
 0x595   : > { %3686 = vperm.xlu0 %6997, %v3683_v32   ;;  %v7571_v32 = vmov 110  }
 0x599   : > { %6998 = vset.pattern.permute.xlu0 %v7531_v8 }
 0x59a   : > { %3711 = vperm.xlu0 %6998, %v3708_v9   ;;  %v4438_v9 = vld [vmem:[#allocation2] sm:$0xf] }
 0x59e   : > { %6999 = vset.pattern.permute.xlu0 %v7532_v50 }
 0x59f   : > { %3736 = vperm.xlu0 %6999, %v3733_v0   ;;  %v7572_v0 = vmov 117  }
 0x5a3   : > { %7000 = vset.pattern.permute.xlu0 %v7533_v18 }
 0x5a4   : > { %3761 = vperm.xlu0 %7000, %v3758_v59   ;;  %v4463_v59 = vld [vmem:[#allocation2] sm:$0xf] }
 0x5a8   : > { %7001 = vset.pattern.permute.xlu0 %v7534_v38 }
 0x5a9   : > { %3806 = vperm.xlu0 %7001, %v3803_v30   ;;  %v7573_v30 = vmov 124  }
 0x5ad   : > { %7002 = vset.pattern.permute.xlu0 %v7535_v21 }
 0x5ae   : > { %3831 = vperm.xlu0 %7002, %v3828_v17   ;;  %v4488_v17 = vld [vmem:[#allocation2 + $0x4] sm:$0xf] }
 0x5b2   : > { %7003 = vset.pattern.permute.xlu0 %v7536_v13 }
 0x5b3   : > { %3856 = vperm.xlu0 %7003, %v3853_v54   ;;  %v7574_v54 = vmov 3  }
 0x5b7   : > { %7004 = vset.pattern.permute.xlu0 %v7537_v14  ;;  %v7575_v14 = vmov 10  }
 0x5b8   : > { %3881 = vperm.xlu0 %7004, %v3878_v12   ;;  %v4513_v12 = vld [vmem:[#allocation2 + $0x4] sm:$0xf] }
 0x5bc   : > { %7005 = vset.pattern.permute.xlu0 %v7538_v33 }
 0x5da   : > { %v9412_v22 = vpop.permute.xlu0 %3463 }
 0x5db   : > { %v9465_v62 = vpop.permute.xlu1 %3419 }
 0x5df   : > { %v9414_v1 = vpop.permute.xlu0 %3488 }
 0x5e3   : > { %v3407_v39 = vpop.permute.xlu0 %3406 }
 0x5e4   : > { %v9417_v49 = vsel %vm3410_vm5, 0.0, %v3407_v39 }
 0x5e5   : > { %v9421_v2 = vcombine.low %v10967_v48, %v9417_v49 }
 0x5e7   : > { %3448 = vrot.lane.b32.xlu0 %v9421_v2, %s7539_s30  ;;  %v3409_v27 = vpop.permute.xlu0 %3408 }
 0x5e8   : > { %v9425_v46 = vsel %vm3410_vm5, %v3407_v39, %v3409_v27  ;;  %v9431_v29 = vsel %vm3410_vm5, %v3409_v27, 0.0  ;;  %v9497_v27 = vld [vmem:[#allocation12] sm:$0xff]  ;;  %vm3823_vm5 = vcmask 998400  }
 0x5e9   : > { %3450 = vrot.lane.b32.xlu1 %v9425_v46, %s7539_s30  ;;  %v9461_v51 = vcombine.low %v9417_v49, %v9425_v46  ;;  %v9475_v50 = vcombine.low %v9425_v46, %v9431_v29  ;;  %v4538_v49 = vld [vmem:[#allocation2 + $0x4] sm:$0xf]  ;;  %s7583_s30 = smov 90  }
 0x5ea   : > { %v9471_v8 = vpop.permute.xlu1 %3438 }
 0x5eb   : > { %3906 = vperm.xlu0 %7005, %v3903_v56   ;;  %v9499_v56 = vld [vmem:[#allocation12 + $0x8] sm:$0xff] }
 0x5ed   : > { %3473 = vrot.lane.b32.xlu1 %v9421_v2, %s7540_s16 }
 0x5ee   : > { %v9481_v38 = vpop.permute.xlu1 %3578 }
 0x5ef   : > { %7006 = vset.pattern.permute.xlu0 %v7541_v61  ;;  %v4841_v61 = vsel %vm3328_vm0, %v9497_v27, 0.0 }
 0x5f0   : > { %3931 = vperm.xlu0 %7006, %v3928_v26   ;;  %v7576_v26 = vmov 17  }
 0x5f1   : > { %3475 = vrot.lane.b32.xlu1 %v9425_v46, %s7540_s16  ;;  %s7586_s16 = smov 119  }
 0x5f2   : > { %v9489_v13 = vpop.permute.xlu1 %3773 }
 0x5f4   : > { %7007 = vset.pattern.permute.xlu0 %v7542_v57 }
 0x5f5   : > { %3502 = vrot.lane.b32.xlu1 %v9431_v29, %s7543_s17  ;;  %3956 = vperm.xlu0 %7007, %v3953_v63   ;;  %v4862_v63 = vsel %vm3328_vm0, %v9499_v56, 0.0 }
 0x5f6   : > { %v9477_v18 = vpop.permute.xlu0 %3515 }
 0x5f9   : > { %3527 = vrot.lane.b32.xlu1 %v9431_v29, %s7544_s12  ;;  %7008 = vset.pattern.permute.xlu0 %v7545_v20  ;;  %v4583_v20 = vld [vmem:[#allocation2] sm:$0xf] }
 0x5fa   : > { %4001 = vperm.xlu0 %7008, %v3998_v41  }
 0x5fb   : > { %v9485_v21 = vpop.permute.xlu0 %3540 }
 0x5fd   : > { %3552 = vrot.lane.b32.xlu1 %v9431_v29, %s7546_s20 }
 0x5fe   : > { %7009 = vset.pattern.permute.xlu0 %v7547_v58  ;;  %v4863_v58 = vrot.slane %v4862_v63, 4 }
 0x5ff   : > { %4026 = vperm.xlu0 %7009, %v4023_v53   ;;  %v4842_v53 = vrot.slane %v4841_v61, 4 }
 0x600   : > { %v9491_v33 = vpop.permute.xlu0 %3565 }
 0x601   : > { %3621 = vrot.lane.b32.xlu1 %v9421_v2, %s7548_s10 }
 0x603   : > { %7010 = vset.pattern.permute.xlu0 %v7549_v19 }
 0x604   : > { %4051 = vperm.xlu0 %7010, %v4048_v37   ;;  %v7577_v37 = vmov 104  }
 0x605   : > { %3623 = vrot.lane.b32.xlu1 %v9425_v46, %s7548_s10  ;;  %v9507_v57 = vpop.permute.xlu0 %3611  ;;  %s7589_s10 = smov 76  }
 0x608   : > { %7011 = vset.pattern.permute.xlu0 %v7550_v24  ;;  %v4864_v24 = vadd.f32 %v4863_v58, %v4862_v63  ;;  %v4708_v58 = vld [vmem:[#allocation2 + $0x4] sm:$0xf] }
 0x609   : > { %3646 = vrot.lane.b32.xlu1 %v9421_v2, %s7551_s9  ;;  %4076 = vperm.xlu0 %7011, %v4073_v15   ;;  %v4843_v15 = vadd.f32 %v4842_v53, %v4841_v61 }
 0x60d   : > { %3648 = vrot.lane.b32.xlu1 %v9425_v46, %s7551_s9  ;;  %7012 = vset.pattern.permute.xlu0 %v7552_v16  ;;  %v9517_v16 = vpop.permute.xlu0 %3636  ;;  %s7590_s9 = smov 23  }
 0x60e   : > { %4101 = vperm.xlu0 %7012, %v4098_v42   ;;  %v4878_v42 = vsel %vm3328_vm0, %v9497_v27, -inf }
 0x611   : > { %3671 = vrot.lane.b32.xlu1 %v9421_v2, %s7553_s15 }
 0x612   : > { %7013 = vset.pattern.permute.xlu0 %v7554_v44 }
 0x613   : > { %4126 = vperm.xlu0 %7013, %v4123_v31   ;;  %v4608_v31 = vld [vmem:[#allocation2] sm:$0xf] }
 0x615   : > { %3673 = vrot.lane.b32.xlu1 %v9425_v46, %s7553_s15  ;;  %s7591_s15 = smov 103  }
 0x617   : > { %7014 = vset.pattern.permute.xlu0 %v7555_v36  ;;  %v4879_v36 = vrot.slane %v4878_v42, 4 }
 0x618   : > { %4151 = vperm.xlu0 %7014, %v4148_v60   ;;  %v7579_v60 = vmov 111  }
 0x619   : > { %3698 = vrot.lane.b32.xlu1 %v9431_v29, %s7556_s26 }
 0x61c   : > { %7015 = vset.pattern.permute.xlu0 %v7557_v43  ;;  %v4844_v43 = vrot.slane %v4843_v15, 2 }
 0x61d   : > { %3723 = vrot.lane.b32.xlu1 %v9431_v29, %s7558_s14  ;;  %4196 = vperm.xlu0 %7015, %v4193_v47   ;;  %v4892_v47 = vsel %vm3328_vm0, %v9499_v56, -inf }
 0x621   : > { %3748 = vrot.lane.b32.xlu1 %v9431_v29, %s7559_s21  ;;  %7016 = vset.pattern.permute.xlu0 %v7560_v28  ;;  %v4633_v28 = vld [vmem:[#allocation2] sm:$0xf] }
 0x622   : > { %4221 = vperm.xlu0 %7016, %v4218_v7   ;;  %v4865_v7 = vrot.slane %v4864_v24, 2 }
 0x625   : > { %3816 = vrot.lane.b32.xlu1 %v9421_v2, %s7561_s22 }
 0x626   : > { %7017 = vset.pattern.permute.xlu0 %v7562_v23  ;;  %v9525_v23 = vpop.permute.xlu0 %3661 }
 0x627   : > { %4246 = vperm.xlu0 %7017, %v4243_v5   ;;  %v4893_v5 = vrot.slane %v4892_v47, 4 }
 0x629   : > { %3818 = vrot.lane.b32.xlu1 %v9425_v46, %s7561_s22  ;;  %s7595_s22 = smov 116  }
 0x62b   : > { %7018 = vset.pattern.permute.xlu0 %v7563_v6  ;;  %v4880_v6 = vmax.f32 %v4878_v42, %v4879_v36  ;;  %v4733_v36 = vld [vmem:[#allocation2 + $0x4] sm:$0xf] }
 0x62c   : > { %4271 = vperm.xlu0 %7018, %v4268_v3  }
 0x62d   : > { %3841 = vrot.lane.b32.xlu1 %v9421_v2, %s7564_s18 }
 0x630   : > { %7019 = vset.pattern.permute.xlu0 %v7565_v40  ;;  %v4845_v40 = vadd.f32 %v4844_v43, %v4843_v15 }
 0x631   : > { %3843 = vrot.lane.b32.xlu1 %v9425_v46, %s7564_s18  ;;  %4296 = vperm.xlu0 %7019, %v4293_v35   ;;  %v7580_v35 = vmov 118   ;;  %s7596_s18 = smov 68  }
 0x635   : > { %3866 = vrot.lane.b32.xlu1 %v9421_v2, %s7566_s8  ;;  %7020 = vset.pattern.permute.xlu0 %v7567_v34  ;;  %v4894_v34 = vmax.f32 %v4892_v47, %v4893_v5 }
 0x636   : > { %4321 = vperm.xlu0 %7020, %v4318_v25   ;;  %v4866_v25 = vadd.f32 %v4865_v7, %v4864_v24  ;;  %v7585_v24 = vmov 11  }
 0x639   : > { %3868 = vrot.lane.b32.xlu1 %v9425_v46, %s7566_s8  ;;  %s7597_s8 = smov 20  }
 0x63a   : > { %7021 = vset.pattern.permute.xlu0 %v7568_v52  ;;  %v4658_v52 = vld [vmem:[#allocation2] sm:$0xf] }
 0x63b   : > { %4346 = vperm.xlu0 %7021, %v4343_v55  }
 0x63d   : > { %3893 = vrot.lane.b32.xlu1 %v9431_v29, %s7569_s23 }
 0x63f   : > { %7022 = vset.pattern.permute.xlu0 %v7570_v10  ;;  %v4846_v10 = vrot.slane %v4845_v40, 1 }
 0x640   : > { %4391 = vperm.xlu0 %7022, %v4388_v4   ;;  %v4881_v4 = vrot.slane %v4880_v6, 2 }
 0x641   : > { %3500 = vrot.lane.b32.xlu1 %v9461_v51, %s7543_s17 }
 0x644   : > { %7023 = vset.pattern.permute.xlu0 %v7571_v32  ;;  %v9532_v32 = vpop.permute.xlu0 %3686 }
 0x645   : > { %3525 = vrot.lane.b32.xlu1 %v9461_v51, %s7544_s12  ;;  %4416 = vperm.xlu0 %7023, %v4413_v11   ;;  %v4867_v11 = vrot.slane %v4866_v25, 1 }
 0x649   : > { %3550 = vrot.lane.b32.xlu1 %v9461_v51, %s7546_s20  ;;  %7024 = vset.pattern.permute.xlu0 %v7572_v0  ;;  %v4895_v0 = vrot.slane %v4894_v34, 2  ;;  %s7588_s20 = smov 71  }
 0x64a   : > { %4441 = vperm.xlu0 %7024, %v4438_v9   ;;  %v7582_v9 = vmov 125  }
 0x64d   : > { %3576 = vrot.lane.b32.xlu1 %v9475_v50, %s7523_s2  ;;  %s7578_s2 = smov 58  }
 0x64e   : > { %7025 = vset.pattern.permute.xlu0 %v7573_v30  ;;  %v4882_v30 = vmax.f32 %v4880_v6, %v4881_v4 }
 0x64f   : > { %4466 = vperm.xlu0 %7025, %v4463_v59  }
 0x650   : > { %v4883_v63 = vrot.slane %v4882_v30, 1 }
 0x651   : > { %3696 = vrot.lane.b32.xlu1 %v9461_v51, %s7556_s26  ;;  %s7592_s26 = smov 55  }
 0x652   : > { %v4884_v42 = vmax.f32 %v4882_v30, %v4883_v63 }
 0x653   : > { %7026 = vset.pattern.permute.xlu0 %v7574_v54  ;;  %v4847_v54 = vadd.f32 %v4846_v10, %v4845_v40 }
 0x654   : > { %4491 = vperm.xlu0 %7026, %v4488_v17   ;;  %v4683_v17 = vld [vmem:[#allocation2 + $0x4] sm:$0xf] }
 0x655   : > { %3721 = vrot.lane.b32.xlu1 %v9461_v51, %s7558_s14  ;;  %s7593_s14 = smov 7  }
 0x658   : > { %7027 = vset.pattern.permute.xlu0 %v7575_v14  ;;  %v7584_v14 = vmov 4  }
 0x659   : > { %3746 = vrot.lane.b32.xlu1 %v9461_v51, %s7559_s21  ;;  %4516 = vperm.xlu0 %7027, %v4513_v12   ;;  %v4868_v12 = vadd.f32 %v4867_v11, %v4866_v25  ;;  %s7594_s21 = smov 87  }
 0x65b   : > { %v9495_v39 = vpop.permute.xlu1 %3450  ;;  %v4876_v53 = vmul.f32 0.25, %v4868_v12 }
 0x65d   : > { %3771 = vrot.lane.b32.xlu1 %v9475_v50, %s7524_s19  ;;  %7028 = vset.pattern.permute.xlu0 %v7576_v26  ;;  %s7581_s19 = smov 10   ;;  %v9538_v26 = vpop.permute.xlu0 %3711 }
 0x65e   : > { %4541 = vperm.xlu0 %7028, %v4538_v49   ;;  %v4896_v49 = vmax.f32 %v4894_v34, %v4895_v0 }
 0x65f   : > { %v9509_v41 = vpop.permute.xlu1 %3473 }
 0x661   : > { %3891 = vrot.lane.b32.xlu1 %v9461_v51, %s7569_s23  ;;  %s7599_s23 = smov 100  }
 0x662   : > { %7029 = vset.pattern.permute.xlu0 %v7577_v37  ;;  %v4897_v37 = vrot.slane %v4896_v49, 1 }
 0x663   : > { %v9513_v19 = vpop.permute.xlu1 %3475  ;;  %4586 = vperm.xlu0 %7029, %v4583_v20   ;;  %v4855_v20 = vmul.f32 0.25, %v4847_v54 }
 0x664   : > { %v4898_v47 = vmax.f32 %v4896_v49, %v4897_v37 }
 0x665   : > { %3916 = vrot.lane.b32.xlu1 %v9461_v51, %s7578_s2 }
 0x667   : > { %v9520_v44 = vpop.permute.xlu1 %3502  ;;  %7030 = vset.pattern.permute.xlu0 %v7579_v60  ;;  %v9546_v60 = vpop.permute.xlu0 %3736 }
 0x668   : > { %4611 = vperm.xlu0 %7030, %v4608_v31   ;;  %v4906_v31 = vsel %vm3395_vm9, %v4855_v20, %v4876_v53 }
 0x669   : > { %3918 = vrot.lane.b32.xlu1 %v9431_v29, %s7578_s2  ;;  %v4908_v7 = vsel %vm3398_vm11, %v4906_v31, %v4884_v42  ;;  %s7600_s2 = smov 52  }
 0x66a   : > { %v4910_v5 = vsel %vm3401_vm12, %v4908_v7, %v4898_v47 }
 0x66b   : > { %v9527_v3 = vpop.permute.xlu1 %3527  ;;  %v9554_v6 = vpop.permute.xlu0 %3761 }
 0x66c   : > { %7031 = vset.pattern.permute.xlu0 %v7580_v35 }
 0x66d   : > { %3941 = vrot.lane.b32.xlu1 %v9461_v51, %s7581_s19  ;;  %4636 = vperm.xlu0 %7031, %v4633_v28   ;;  %v7587_v28 = vmov 18  }
 0x66f   : > { %v9530_v55 = vpop.permute.xlu1 %3552  ;;  %v9562_v25 = vpop.permute.xlu0 %3806 }
 0x671   : > { %3943 = vrot.lane.b32.xlu1 %v9431_v29, %s7581_s19  ;;  %7032 = vset.pattern.permute.xlu0 %v7582_v9  ;;  %s7601_s19 = smov 4  }
 0x672   : > { %4661 = vperm.xlu0 %7032, %v4658_v52  }
 0x673   : > { %v9535_v59 = vpop.permute.xlu1 %3621  ;;  %v9568_v52 = vpop.permute.xlu0 %3831 }
 0x675   : > { %3966 = vrot.lane.b32.xlu1 %v9475_v50, %s7583_s30 }
 0x676   : > { %7033 = vset.pattern.permute.xlu0 %v7584_v14 }
 0x677   : > { %v9540_v61 = vpop.permute.xlu1 %3623  ;;  %4686 = vperm.xlu0 %7033, %v4683_v17   ;;  %v9575_v11 = vpop.permute.xlu0 %3856 }
 0x679   : > { %3968 = vrot.lane.b32.xlu1 %v10967_v48, %s7583_s30  ;;  %s7603_s30 = smov 84  }
 0x67b   : > { %v9543_v15 = vpop.permute.xlu1 %3646  ;;  %7034 = vset.pattern.permute.xlu0 %v7585_v24  ;;  %v9581_v0 = vpop.permute.xlu0 %3881 }
 0x67c   : > { %4711 = vperm.xlu0 %7034, %v4708_v58  }
 0x67d   : > { %4011 = vrot.lane.b32.xlu1 %v9421_v2, %s7586_s16 }
 0x67f   : > { %v9549_v43 = vpop.permute.xlu1 %3648  ;;  %v9588_v54 = vpop.permute.xlu0 %3448 }
 0x680   : > { %7035 = vset.pattern.permute.xlu0 %v7587_v28 }
 0x681   : > { %4013 = vrot.lane.b32.xlu1 %v9425_v46, %s7586_s16  ;;  %4736 = vperm.xlu0 %7035, %v4733_v36   ;;  %s7604_s16 = smov 113  }
 0x683   : > { %v9556_v35 = vpop.permute.xlu1 %3671  ;;  %v9594_v14 = vpop.permute.xlu0 %3906 }
 0x685   : > { %4036 = vrot.lane.b32.xlu1 %v9421_v2, %s7588_s20  ;;  %4914 = vrot.lane.b32.xlu0 %v4910_v5, %s7589_s10 }
 0x686   : > { %7036 = vset.pattern.permute.xlu0 %v7598_v45 }
 0x687   : > { %v9560_v40 = vpop.permute.xlu1 %3673  ;;  %v9599_v63 = vpop.permute.xlu0 %3931 }
 0x689   : > { %4038 = vrot.lane.b32.xlu1 %v9425_v46, %s7588_s20  ;;  %s7605_s20 = smov 65  }
 0x68b   : > { %v9565_v34 = vpop.permute.xlu1 %3698  ;;  %v9604_v53 = vpop.permute.xlu0 %3956 }
 0x68c   : > { %11253 = vst [vmem:[#allocation90_spill] sm:$0xff] %v9565_v34 }
 0x68d   : > { %4061 = vrot.lane.b32.xlu1 %v9421_v2, %s7590_s9 }
 0x68f   : > { %v9570_v4 = vpop.permute.xlu1 %3723  ;;  %v9611_v24 = vpop.permute.xlu0 %4001 }
 0x690   : > { %11254 = vst [vmem:[#allocation91_spill] sm:$0xff] %v9570_v4  ;;  %11263 = vst [vmem:[#allocation100_spill] sm:$0xff] %v9611_v24 }
 0x691   : > { %4063 = vrot.lane.b32.xlu1 %v9425_v46, %s7590_s9  ;;  %s7606_s9 = smov 17  }
 0x693   : > { %v9573_v10 = vpop.permute.xlu1 %3748  ;;  %v9619_v31 = vpop.permute.xlu0 %4026 }
 0x694   : > { %11255 = vst [vmem:[#allocation92_spill] sm:$0xff] %v9573_v10  ;;  %11264 = vst [vmem:[#allocation101_spill] sm:$0xff] %v9619_v31 }
 0x695   : > { %4086 = vrot.lane.b32.xlu1 %v9461_v51, %s7591_s15 }
 0x697   : > { %v9578_v9 = vpop.permute.xlu1 %3816  ;;  %v9626_v7 = vpop.permute.xlu0 %4051 }
 0x698   : > { %11256 = vst [vmem:[#allocation93_spill] sm:$0xff] %v9578_v9  ;;  %11267 = vst [vmem:[#allocation104_spill] sm:$0xff] %v9626_v7 }
 0x699   : > { %4088 = vrot.lane.b32.xlu1 %v9431_v29, %s7591_s15  ;;  %s7607_s15 = smov 97  }
 0x69b   : > { %v9583_v30 = vpop.permute.xlu1 %3818  ;;  %v9632_v5 = vpop.permute.xlu0 %4076 }
 0x69c   : > { %11257 = vst [vmem:[#allocation94_spill] sm:$0xff] %v9583_v30  ;;  %11268 = vst [vmem:[#allocation105_spill] sm:$0xff] %v9632_v5 }
 0x69d   : > { %4111 = vrot.lane.b32.xlu1 %v9461_v51, %s7592_s26 }
 0x69f   : > { %v9586_v17 = vpop.permute.xlu1 %3841 }
 0x6a0   : > { %11258 = vst [vmem:[#allocation95_spill] sm:$0xff] %v9586_v17 }
 0x6a1   : > { %4113 = vrot.lane.b32.xlu1 %v9431_v29, %s7592_s26  ;;  %s7608_s26 = smov 49  }
 0x6a3   : > { %v9591_v12 = vpop.permute.xlu1 %3843 }
 0x6a4   : > { %11259 = vst [vmem:[#allocation96_spill] sm:$0xff] %v9591_v12 }
 0x6a5   : > { %4136 = vrot.lane.b32.xlu1 %v9461_v51, %s7593_s14 }
 0x6a7   : > { %v9596_v49 = vpop.permute.xlu1 %3866 }
 0x6a8   : > { %11260 = vst [vmem:[#allocation97_spill] sm:$0xff] %v9596_v49 }
 0x6a9   : > { %4138 = vrot.lane.b32.xlu1 %v9431_v29, %s7593_s14  ;;  %s7609_s14 = smov 1  }
 0x6ab   : > { %v9601_v20 = vpop.permute.xlu1 %3868 }
 0x6ac   : > { %11261 = vst [vmem:[#allocation98_spill] sm:$0xff] %v9601_v20  ;;  %v9639_v20 = vpop.permute.xlu0 %4101 }
 0x6ad   : > { %4161 = vrot.lane.b32.xlu1 %v9475_v50, %s7594_s21  ;;  %11271 = vst [vmem:[#allocation108_spill] sm:$0xff] %v9639_v20 }
 0x6af   : > { %v9606_v58 = vpop.permute.xlu1 %3893 }
 0x6b0   : > { %11262 = vst [vmem:[#allocation99_spill] sm:$0xff] %v9606_v58  ;;  %v4924_v58 = vld [vmem:[#allocation2 + $0x4] sm:$0xf]  ;;  %v9645_v17 = vpop.permute.xlu0 %4126 }
 0x6b1   : > { %4163 = vrot.lane.b32.xlu1 %v10967_v48, %s7594_s21  ;;  %4927 = vperm.xlu0 %7036, %v4924_v58   ;;  %11273 = vst [vmem:[#allocation110_spill] sm:$0xff] %v9645_v17  ;;  %s7610_s21 = smov 81  }
 0x6b3   : > { %v9609_v37 = vpop.permute.xlu1 %3500 }
 0x6b4   : > { %v9653_v58 = vpop.permute.xlu0 %4151 }
 0x6b5   : > { %4206 = vrot.lane.b32.xlu1 %v9421_v2, %s7595_s22  ;;  %11276 = vst [vmem:[#allocation113_spill] sm:$0xff] %v9653_v58 }
 0x6b7   : > { %v9615_v42 = vpop.permute.xlu1 %3525 }
 0x6b9   : > { %4208 = vrot.lane.b32.xlu1 %v9425_v46, %s7595_s22 }
 0x6bb   : > { %v9621_v36 = vpop.permute.xlu1 %3550 }
 0x6bc   : > { %11265 = vst [vmem:[#allocation102_spill] sm:$0xff] %v9621_v36 }
 0x6bd   : > { %4231 = vrot.lane.b32.xlu1 %v9421_v2, %s7596_s18 }
 0x6bf   : > { %v9624_v47 = vpop.permute.xlu1 %3576 }
 0x6c0   : > { %11266 = vst [vmem:[#allocation103_spill] sm:$0xff] %v9624_v47 }
 0x6c1   : > { %4233 = vrot.lane.b32.xlu1 %v9425_v46, %s7596_s18  ;;  %s7611_s18 = smov 110  }
 0x6c3   : > { %v9629_v28 = vpop.permute.xlu1 %3696 }
 0x6c5   : > { %4256 = vrot.lane.b32.xlu1 %v9421_v2, %s7597_s8 }
 0x6c7   : > { %v9634_v48 = vpop.permute.xlu1 %3721 }
 0x6c8   : > { %11269 = vst [vmem:[#allocation106_spill] sm:$0xff] %v9634_v48 }
 0x6c9   : > { %4258 = vrot.lane.b32.xlu1 %v9425_v46, %s7597_s8  ;;  %s7612_s8 = smov 62  }
 0x6cb   : > { %v9637_v49 = vpop.permute.xlu1 %3746 }
 0x6cc   : > { %11270 = vst [vmem:[#allocation107_spill] sm:$0xff] %v9637_v49 }
 0x6cd   : > { %4281 = vrot.lane.b32.xlu1 %v9461_v51, %s7599_s23 }
 0x6cf   : > { %v9642_v9 = vpop.permute.xlu1 %3771 }
 0x6d0   : > { %11272 = vst [vmem:[#allocation109_spill] sm:$0xff] %v9642_v9  ;;  %v9660_v9 = vpop.permute.xlu0 %4196 }
 0x6d1   : > { %4283 = vrot.lane.b32.xlu1 %v9431_v29, %s7599_s23  ;;  %11278 = vst [vmem:[#allocation115_spill] sm:$0xff] %v9660_v9  ;;  %s7613_s23 = smov 14  }
 0x6d3   : > { %v9647_v5 = vpop.permute.xlu1 %3891 }
 0x6d4   : > { %11274 = vst [vmem:[#allocation111_spill] sm:$0xff] %v9647_v5  ;;  %v7602_v5 = vmov 26  }
 0x6d5   : > { %4306 = vrot.lane.b32.xlu1 %v9461_v51, %s7600_s2 }
 0x6d6   : > { %7037 = vset.pattern.permute.xlu1 %v7602_v5 }
 0x6d7   : > { %v9651_v45 = vpop.permute.xlu1 %3916 }
 0x6d8   : > { %11275 = vst [vmem:[#allocation112_spill] sm:$0xff] %v9651_v45  ;;  %v9667_v45 = vpop.permute.xlu0 %4221 }
 0x6d9   : > { %4308 = vrot.lane.b32.xlu1 %v9431_v29, %s7600_s2  ;;  %11281 = vst [vmem:[#allocation118_spill] sm:$0xff] %v9667_v45 }
 0x6db   : > { %v9657_v20 = vpop.permute.xlu1 %3918 }
 0x6dc   : > { %11277 = vst [vmem:[#allocation114_spill] sm:$0xff] %v9657_v20  ;;  %v11283_v20 = vmov 0.0   ;;  %v9673_v30 = vpop.permute.xlu0 %4246 }
 0x6dd   : > { %4331 = vrot.lane.b32.xlu1 %v9461_v51, %s7601_s19  ;;  %11284 = vst [vmem:[#allocation120_spill] sm:$0xff] %v9673_v30 }
 0x6df   : > { %v9662_v17 = vpop.permute.xlu1 %3941 }
 0x6e0   : > { %11279 = vst [vmem:[#allocation116_spill] sm:$0xff] %v9662_v17  ;;  %v9680_v17 = vpop.permute.xlu0 %4271 }
 0x6e1   : > { %4333 = vrot.lane.b32.xlu1 %v9431_v29, %s7601_s19  ;;  %11287 = vst [vmem:[#allocation123_spill] sm:$0xff] %v9680_v17  ;;  %s7614_s19 = smov 94  }
 0x6e3   : > { %v9665_v12 = vpop.permute.xlu1 %3943 }
 0x6e4   : > { %11280 = vst [vmem:[#allocation117_spill] sm:$0xff] %v9665_v12 }
 0x6e5   : > { %4356 = vrot.lane.b32.xlu1 %v9475_v50, %s7603_s30 }
 0x6e7   : > { %v9670_v58 = vpop.permute.xlu1 %3966 }
 0x6e8   : > { %11282 = vst [vmem:[#allocation119_spill] sm:$0xff] %v9670_v58  ;;  %v9686_v58 = vpop.permute.xlu0 %4296 }
 0x6e9   : > { %4358 = vrot.lane.b32.xlu1 %v11283_v20, %s7603_s30  ;;  %11289 = vst [vmem:[#allocation125_spill] sm:$0xff] %v9686_v58  ;;  %s7615_s30 = smov 46  }
 0x6eb   : > { %v9675_v9 = vpop.permute.xlu1 %3968 }
 0x6ec   : > { %11285 = vst [vmem:[#allocation121_spill] sm:$0xff] %v9675_v9  ;;  %v9693_v30 = vpop.permute.xlu0 %4321 }
 0x6ed   : > { %4401 = vrot.lane.b32.xlu1 %v9421_v2, %s7604_s16  ;;  %11292 = vst [vmem:[#allocation128_spill] sm:$0xff] %v9693_v30 }
 0x6ef   : > { %v9678_v5 = vpop.permute.xlu1 %4011 }
 0x6f0   : > { %11286 = vst [vmem:[#allocation122_spill] sm:$0xff] %v9678_v5 }
 0x6f1   : > { %4403 = vrot.lane.b32.xlu1 %v9425_v46, %s7604_s16  ;;  %s7616_s16 = smov 126  }
 0x6f3   : > { %v9683_v12 = vpop.permute.xlu1 %4013 }
 0x6f4   : > { %11288 = vst [vmem:[#allocation124_spill] sm:$0xff] %v9683_v12  ;;  %v9699_v12 = vpop.permute.xlu0 %4346 }
 0x6f5   : > { %4426 = vrot.lane.b32.xlu1 %v9421_v2, %s7605_s20  ;;  %11294 = vst [vmem:[#allocation130_spill] sm:$0xff] %v9699_v12 }
 0x6f7   : > { %v9688_v45 = vpop.permute.xlu1 %4036 }
 0x6f8   : > { %11290 = vst [vmem:[#allocation126_spill] sm:$0xff] %v9688_v45  ;;  %v9706_v58 = vpop.permute.xlu0 %4391 }
 0x6f9   : > { %4428 = vrot.lane.b32.xlu1 %v9425_v46, %s7605_s20  ;;  %11297 = vst [vmem:[#allocation133_spill] sm:$0xff] %v9706_v58  ;;  %s7618_s20 = smov 78  }
 0x6fb   : > { %v9691_v9 = vpop.permute.xlu1 %4038 }
 0x6fc   : > { %11291 = vst [vmem:[#allocation127_spill] sm:$0xff] %v9691_v9 }
 0x6fd   : > { %4451 = vrot.lane.b32.xlu1 %v9421_v2, %s7606_s9 }
 0x6ff   : > { %v9696_v5 = vpop.permute.xlu1 %4061 }
 0x700   : > { %11293 = vst [vmem:[#allocation129_spill] sm:$0xff] %v9696_v5  ;;  %v9712_v5 = vpop.permute.xlu0 %4416 }
 0x701   : > { %4453 = vrot.lane.b32.xlu1 %v9425_v46, %s7606_s9  ;;  %11299 = vst [vmem:[#allocation135_spill] sm:$0xff] %v9712_v5  ;;  %s7626_s9 = smov 124  }
 0x703   : > { %v9701_v17 = vpop.permute.xlu1 %4063 }
 0x704   : > { %11295 = vst [vmem:[#allocation131_spill] sm:$0xff] %v9701_v17  ;;  %v9719_v12 = vpop.permute.xlu0 %4441 }
 0x705   : > { %4476 = vrot.lane.b32.xlu1 %v9461_v51, %s7607_s15  ;;  %11302 = vst [vmem:[#allocation138_spill] sm:$0xff] %v9719_v12 }
 0x707   : > { %v9704_v45 = vpop.permute.xlu1 %4086 }
 0x708   : > { %11296 = vst [vmem:[#allocation132_spill] sm:$0xff] %v9704_v45 }
 0x709   : > { %4478 = vrot.lane.b32.xlu1 %v9431_v29, %s7607_s15 }
 0x70b   : > { %v9709_v9 = vpop.permute.xlu1 %4088 }
 0x70c   : > { %11298 = vst [vmem:[#allocation134_spill] sm:$0xff] %v9709_v9  ;;  %v9725_v9 = vpop.permute.xlu0 %4466 }
 0x70d   : > { %4501 = vrot.lane.b32.xlu1 %v9461_v51, %s7608_s26  ;;  %11304 = vst [vmem:[#allocation140_spill] sm:$0xff] %v9725_v9 }
 0x70f   : > { %v9714_v30 = vpop.permute.xlu1 %4111 }
 0x710   : > { %11300 = vst [vmem:[#allocation136_spill] sm:$0xff] %v9714_v30  ;;  %v9732_v5 = vpop.permute.xlu0 %4491 }
 0x711   : > { %4503 = vrot.lane.b32.xlu1 %v9431_v29, %s7608_s26  ;;  %11307 = vst [vmem:[#allocation143_spill] sm:$0xff] %v9732_v5 }
 0x713   : > { %v9717_v17 = vpop.permute.xlu1 %4113 }
 0x714   : > { %11301 = vst [vmem:[#allocation137_spill] sm:$0xff] %v9717_v17 }
 0x715   : > { %4526 = vrot.lane.b32.xlu1 %v9461_v51, %s7609_s14 }
 0x717   : > { %v9722_v45 = vpop.permute.xlu1 %4136 }
 0x718   : > { %11303 = vst [vmem:[#allocation139_spill] sm:$0xff] %v9722_v45  ;;  %v9738_v45 = vpop.permute.xlu0 %4516 }
 0x719   : > { %4528 = vrot.lane.b32.xlu1 %v9431_v29, %s7609_s14  ;;  %11309 = vst [vmem:[#allocation145_spill] sm:$0xff] %v9738_v45  ;;  %v9755_v45 = vcombine.high %v9497_v27, %v9497_v27 }
 0x71b   : > { %v9727_v58 = vpop.permute.xlu1 %4138  ;;  %11315 = vst [vmem:[#allocation151_spill] sm:$0xff] %v9755_v45  ;;  %v4885_v47 = vsel %vm3328_vm0, %v9755_v45, -inf }
 0x71c   : > { %11305 = vst [vmem:[#allocation141_spill] sm:$0xff] %v9727_v58  ;;  %v9745_v9 = vpop.permute.xlu0 %4541 }
 0x71d   : > { %4551 = vrot.lane.b32.xlu1 %v9475_v50, %s7610_s21  ;;  %11312 = vst [vmem:[#allocation148_spill] sm:$0xff] %v9745_v9 }
 0x71f   : > { %v9730_v30 = vpop.permute.xlu1 %4161 }
 0x720   : > { %11306 = vst [vmem:[#allocation142_spill] sm:$0xff] %v9730_v30 }
 0x721   : > { %4553 = vrot.lane.b32.xlu1 %v11283_v20, %s7610_s21 }
 0x723   : > { %v9735_v17 = vpop.permute.xlu1 %4163 }
 0x724   : > { %11308 = vst [vmem:[#allocation144_spill] sm:$0xff] %v9735_v17  ;;  %v9751_v17 = vpop.permute.xlu0 %4586 }
 0x725   : > { %4596 = vrot.lane.b32.xlu1 %v9421_v2, %s7611_s18  ;;  %11314 = vst [vmem:[#allocation150_spill] sm:$0xff] %v9751_v17 }
 0x727   : > { %v9740_v12 = vpop.permute.xlu1 %4206 }
 0x728   : > { %11310 = vst [vmem:[#allocation146_spill] sm:$0xff] %v9740_v12  ;;  %v4860_v12 = vcombine.high %v9499_v56, %v9499_v56  ;;  %v9767_v17 = vpop.permute.xlu0 %4611 }
 0x729   : > { %4598 = vrot.lane.b32.xlu1 %v9425_v46, %s7611_s18  ;;  %11318 = vst [vmem:[#allocation154_spill] sm:$0xff] %v9767_v17  ;;  %s7634_s18 = smov 120  }
 0x72a   : > { %v4899_v17 = vsel %vm3328_vm0, %v4860_v12, -inf }
 0x72b   : > { %v9743_v58 = vpop.permute.xlu1 %4208 }
 0x72c   : > { %11311 = vst [vmem:[#allocation147_spill] sm:$0xff] %v9743_v58  ;;  %v4848_v58 = vsel %vm3328_vm0, %v9755_v45, 0.0  ;;  %v9775_v4 = vpop.permute.xlu0 %4636 }
 0x72d   : > { %4621 = vrot.lane.b32.xlu1 %v9421_v2, %s7612_s8  ;;  %v4849_v10 = vrot.slane %v4848_v58, 4  ;;  %11320 = vst [vmem:[#allocation156_spill] sm:$0xff] %v9775_v4 }
 0x72f   : > { %v9748_v30 = vpop.permute.xlu1 %4231  ;;  %v4850_v56 = vadd.f32 %v4849_v10, %v4848_v58 }
 0x730   : > { %11313 = vst [vmem:[#allocation149_spill] sm:$0xff] %v9748_v30  ;;  %v4869_v30 = vsel %vm3328_vm0, %v4860_v12, 0.0 }
 0x731   : > { %4623 = vrot.lane.b32.xlu1 %v9425_v46, %s7612_s8  ;;  %v4870_v27 = vrot.slane %v4869_v30, 4  ;;  %v4851_v48 = vrot.slane %v4850_v56, 2  ;;  %s7642_s8 = smov 56  }
 0x733   : > { %v9759_v5 = vpop.permute.xlu1 %4233 }
 0x734   : > { %11316 = vst [vmem:[#allocation152_spill] sm:$0xff] %v9759_v5  ;;  %v4871_v5 = vadd.f32 %v4870_v27, %v4869_v30  ;;  %v9783_v30 = vpop.permute.xlu0 %4661  ;;  %v4852_v27 = vadd.f32 %v4851_v48, %v4850_v56 }
 0x735   : > { %4646 = vrot.lane.b32.xlu1 %v9421_v2, %s7613_s23  ;;  %11323 = vst [vmem:[#allocation159_spill] sm:$0xff] %v9783_v30 }
 0x736   : > { %v4872_v36 = vrot.slane %v4871_v5, 2  ;;  %v4853_v12 = vrot.slane %v4852_v27, 1 }
 0x737   : > { %v9765_v9 = vpop.permute.xlu1 %4256 }
 0x738   : > { %11317 = vst [vmem:[#allocation153_spill] sm:$0xff] %v9765_v9  ;;  %v4886_v9 = vrot.slane %v4885_v47, 4  ;;  %v4873_v45 = vadd.f32 %v4872_v36, %v4871_v5  ;;  %v9789_v31 = vpop.permute.xlu0 %4686 }
 0x739   : > { %4648 = vrot.lane.b32.xlu1 %v9425_v46, %s7613_s23  ;;  %v4900_v46 = vrot.slane %v4899_v17, 4  ;;  %11324 = vst [vmem:[#allocation160_spill] sm:$0xff] %v9789_v31  ;;  %s7656_s23 = smov 108  }
 0x73a   : > { %v4887_v58 = vmax.f32 %v4885_v47, %v4886_v9  ;;  %v4874_v34 = vrot.slane %v4873_v45, 1  ;;  %v4854_v9 = vadd.f32 %v4853_v12, %v4852_v27 }
 0x73b   : > { %v9770_v49 = vpop.permute.xlu1 %4258  ;;  %v4901_v4 = vmax.f32 %v4899_v17, %v4900_v46 }
 0x73c   : > { %11319 = vst [vmem:[#allocation155_spill] sm:$0xff] %v9770_v49  ;;  %v4888_v49 = vrot.slane %v4887_v58, 2  ;;  %v4875_v48 = vadd.f32 %v4874_v34, %v4873_v45  ;;  %v9796_v36 = vpop.permute.xlu0 %4711  ;;  %v4856_v5 = vmul.f32 0.25, %v4854_v9  ;;  %v7617_v34 = vmov 40   ;;  %v4942_v9 = vld [vmem:[#allocation2 + $0x4] sm:$0xf] }
 0x73d   : > { %4671 = vrot.lane.b32.xlu1 %v9461_v51, %s7614_s19  ;;  %v4902_v24 = vrot.slane %v4901_v4, 2  ;;  %11326 = vst [vmem:[#allocation162_spill] sm:$0xff] %v9796_v36  ;;  %7039 = vset.pattern.permute.xlu0 %v7617_v34  ;;  %v11346_v36 = vld [vmem:[#allocation90_spill] sm:$0xff] }
 0x73e   : > { %v4889_v30 = vmax.f32 %v4887_v58, %v4888_v49  ;;  %v4877_v56 = vmul.f32 0.25, %v4875_v48 }
 0x73f   : > { %v9777_v7 = vpop.permute.xlu1 %4281 }
 0x740   : > { %11321 = vst [vmem:[#allocation157_spill] sm:$0xff] %v9777_v7  ;;  %v4890_v47 = vrot.slane %v4889_v30, 1  ;;  %v4907_v49 = vsel %vm3395_vm9, %v4856_v5, %v4877_v56  ;;  %v3425_v56 = vlaneseq  ;;  %vm3583_vm9 = vcmask 785408  }
 0x741   : > { %4673 = vrot.lane.b32.xlu1 %v9431_v29, %s7614_s19  ;;  %s7658_s19 = smov 44  }
 0x742   : > { %v4891_v31 = vmax.f32 %v4889_v30, %v4890_v47  ;;  %v7619_v47 = vmov 839922192  }
 0x743   : > { %v9781_v10 = vpop.permute.xlu1 %4283  ;;  %v3423_v5 = vunpack.c.l.s4 %v7619_v47 }
 0x744   : > { %11322 = vst [vmem:[#allocation158_spill] sm:$0xff] %v9781_v10  ;;  %v4909_v58 = vsel %vm3398_vm11, %v4907_v49, %v4891_v31  ;;  %v4966_v49 = vld [vmem:[#allocation2 + $0x4] sm:$0xf]  ;;  %vm3753_vm11 = vcmask 105472  }
 0x745   : > { %4696 = vrot.lane.b32.xlu1 %v9461_v51, %s7615_s30  ;;  %v4903_v51 = vmax.f32 %v4901_v4, %v4902_v24  ;;  %v9803_v4 = vpop.permute.xlu0 %4736 }
 0x746   : > { %11328 = vst [vmem:[#allocation164_spill] sm:$0xff] %v9803_v4  ;;  %v3626_v4 = vrot.slane %v9540_v61, 4 }
 0x747   : > { %v9786_v7 = vpop.permute.xlu1 %4306 }
 0x749   : > { %4698 = vrot.lane.b32.xlu1 %v9431_v29, %s7615_s30  ;;  %v4904_v29 = vrot.slane %v4903_v51, 1  ;;  %v9812_v30 = vpop.permute.xlu0 %4914  ;;  %s7660_s30 = smov 104  }
 0x74a   : > { %11331 = vst [vmem:[#allocation167_spill] sm:$0xff] %v9812_v30 }
 0x74b   : > { %v9791_v10 = vpop.permute.xlu1 %4308  ;;  %v4905_v24 = vmax.f32 %v4903_v51, %v4904_v29  ;;  %v7620_v29 = vmov 33  }
 0x74d   : > { %4721 = vrot.lane.b32.xlu1 %v9475_v50, %s7616_s16  ;;  %v4911_v27 = vsel %vm3401_vm12, %v4909_v58, %v4905_v24  ;;  %v3424_v24 = vunpack.c.0.s8 %v3423_v5  ;;  %v3426_v58 = vshrl.u32 %v3425_v56, 7  ;;  %v3477_v56 = vrot.slane %v9509_v41, 4 }
 0x74e   : > { %vm3848_vm12 = vcmask 605184  }
 0x74f   : > { %v9794_v17 = vpop.permute.xlu1 %4331 }
 0x750   : > { %11325 = vst [vmem:[#allocation161_spill] sm:$0xff] %v9794_v17 }
 0x751   : > { %4723 = vrot.lane.b32.xlu1 %v11283_v20, %s7616_s16  ;;  %s7661_s16 = smov 40  }
 0x753   : > { %v9799_v46 = vpop.permute.xlu1 %4333 }
 0x754   : > { %11327 = vst [vmem:[#allocation163_spill] sm:$0xff] %v9799_v46  ;;  %v11353_v46 = vld [vmem:[#allocation92_spill] sm:$0xff] }
 0x755   : > { %4746 = vrot.lane.b32.xlu1 %v9475_v50, %s7618_s20  ;;  %v9817_v50 = vsel %vm4918_vm14, 0.0, %v9812_v30  ;;  %v3478_v30 = vrot.slane %v9513_v19, 4  ;;  %v3676_v19 = vrot.slane %v9560_v40, 4  ;;  %v3530_v40 = vrot.slane %v9527_v3, 4 }
 0x756   : > { %11332 = vst [vmem:[#allocation168_spill] sm:$0xff] %v9817_v50  ;;  %v9823_v31 = vcombine.low %v11283_v20, %v9817_v50  ;;  %v3453_v50 = vrot.slane %v9495_v39, 4 }
 0x757   : > { %v9805_v45 = vpop.permute.xlu1 %4356 }
 0x758   : > { %11329 = vst [vmem:[#allocation165_spill] sm:$0xff] %v9805_v45  ;;  %11334 = vst [vmem:[#allocation170_spill] sm:$0xff] %v9823_v31  ;;  %v3701_v45 = vrot.slane %v11346_v36, 4 }
 0x759   : > { %4748 = vrot.lane.b32.xlu1 %v11283_v20, %s7618_s20  ;;  %v9833_v20 = vsub.s32 %v3424_v24, %v3426_v58 }
 0x75b   : > { %v9810_v12 = vpop.permute.xlu1 %4358  ;;  %v3428_v47 = vrot.slane %v9465_v62, %v9833_v20  ;;  %v3472_v24 = vrot.slane %v9412_v22, %v9833_v20  ;;  %v3447_v62 = vrot.slane %v9471_v8, %v9833_v20  ;;  %v3620_v8 = vrot.slane %v9507_v57, %v9833_v20 }
 0x75c   : > { %11330 = vst [vmem:[#allocation166_spill] sm:$0xff] %v9810_v12  ;;  %v3650_v57 = vrot.slane %v9543_v15, 4  ;;  %v3555_v22 = vrot.slane %v9530_v55, 4  ;;  %v3700_v55 = vrot.slane %v9629_v28, 4  ;;  %v11348_v12 = vld [vmem:[#allocation106_spill] sm:$0xff] }
 0x75d   : > { %4916 = vrot.lane.b32.xlu1 %v4911_v27, %s7589_s10  ;;  %s10423_s10 = sld [smem:[#allocation6 + $0x2]] }
 0x75f   : > { %v9819_v48 = vpop.permute.xlu1 %4401 }
 0x760   : > { %11333 = vst [vmem:[#allocation169_spill] sm:$0xff] %v9819_v48 }
 0x761   : > { %4945 = vperm.xlu1 %7037, %v4942_v9   ;;  %v7621_v9 = vmov 54  }
 0x763   : > { %v9825_v51 = vpop.permute.xlu1 %4403 }
 0x764   : > { %11335 = vst [vmem:[#allocation171_spill] sm:$0xff] %v9825_v51 }
 0x765   : > { %4955 = vrot.lane.b32.xlu1 %v9823_v31, %s7544_s12 }
 0x766   : > { %7038 = vset.pattern.permute.xlu1 %v7620_v29  ;;  %v3452_v29 = vrot.slane %v9588_v54, 4 }
 0x767   : > { %v9829_v34 = vpop.permute.xlu1 %4426 }
 0x768   : > { %11336 = vst [vmem:[#allocation172_spill] sm:$0xff] %v9829_v34  ;;  %v3454_v5 = vsel %vm3328_vm0, %v3452_v29, %v3453_v50  ;;  %v3479_v50 = vsel %vm3328_vm0, %v3477_v56, %v3478_v30  ;;  %v3651_v30 = vrot.slane %v9549_v43, 4  ;;  %v3645_v56 = vrot.slane %v9517_v16, %v9833_v20  ;;  %v9894_v43 = vld [vmem:[#allocation7 + $0x17] ss:$8 sm:$0x3] }
 0x769   : > { %4969 = vperm.xlu1 %7038, %v4966_v49   ;;  %v3456_v39 = vsel %vm3455_vm3, %v9588_v54, %v3454_v5  ;;  %v3481_v54 = vsel %vm3480_vm7, %v9509_v41, %v3479_v50  ;;  %v9874_v5 = vsub.s32 0, %v3426_v58  ;;  %v9878_v29 = vsub.s32 1, %v3426_v58 }
 0x76a   : > { %v3483_v58 = vmul.f32 %v3481_v54, %v3472_v24  ;;  %v3652_v50 = vsel %vm3328_vm0, %v3650_v57, %v3651_v30  ;;  %v3504_v57 = vrot.slane %v9609_v37, 4  ;;  %v3675_v30 = vrot.slane %v9556_v35, 4 }
 0x76b   : > { %v9831_v27 = vpop.permute.xlu1 %4428  ;;  %11340 = vst [vmem:[#allocation176_spill] sm:$0xff] %v9878_v29  ;;  %v3654_v61 = vsel %vm3653_vm8, %v9543_v15, %v3652_v50  ;;  %v11344_v15 = vld [vmem:[#allocation101_spill] sm:$0xff]  ;;  %vm3778_vm3 = vcmask 760832   ;;  %vm3873_vm7 = vcmask 211968   ;;  %vm3923_vm8 = vcmask 474112  }
 0x76c   : > { %v3677_v3 = vsel %vm3328_vm0, %v3675_v30, %v3676_v19 }
 0x76d   : > { %7041 = vset.pattern.permute.xlu1 %v7621_v9  ;;  %v3433_v9 = vmul.f32 %v9421_v2, %v3428_v47  ;;  %v3458_v2 = vmul.f32 %v3456_v39, %v3447_v62  ;;  %v9888_v39 = vld [vmem:[#allocation7 + $0x16] ss:$8 sm:$0x3]  ;;  %v3625_v62 = vrot.slane %v9535_v59, 4 }
 0x76f   : > { %v9836_v31 = vpop.permute.xlu1 %4451  ;;  %v3627_v24 = vsel %vm3328_vm0, %v3625_v62, %v3626_v4  ;;  %v3459_v54 = vadd.f32 %v3458_v2, %v3433_v9  ;;  %v9916_v9 = vld [vmem:[#allocation7 + $0x20] ss:$8 sm:$0x3]  ;;  %v3505_v2 = vrot.slane %v9520_v44, 4  ;;  %v3656_v44 = vmul.f32 %v3654_v61, %v3645_v56 }
 0x770   : > { %11337 = vst [vmem:[#allocation173_spill] sm:$0xff] %v9836_v31  ;;  %v3629_v4 = vsel %vm3628_vm6, %v9535_v59, %v3627_v24  ;;  %v11352_v31 = vld [vmem:[#allocation107_spill] sm:$0xff]  ;;  %vm3898_vm6 = vcmask 867328  }
 0x771   : > { %v9919_v62 = vadd.f32 %v3483_v58, %v3459_v54  ;;  %v3529_v58 = vrot.slane %v9615_v42, 4  ;;  %v3631_v61 = vmul.f32 %v3629_v4, %v3620_v8  ;;  %v3506_v24 = vsel %vm3328_vm0, %v3504_v57, %v3505_v2  ;;  %v11343_v54 = vld [vmem:[#allocation100_spill] sm:$0xff]  ;;  %v11350_v2 = vld [vmem:[#allocation91_spill] sm:$0xff] }
 0x772   : > { %v11349_v8 = vld [vmem:[#allocation104_spill] sm:$0xff]  ;;  %v3679_v57 = vsel %vm3678_vm1, %v9556_v35, %v3677_v3  ;;  %v3726_v41 = vrot.slane %v11350_v2, 4  ;;  %v3508_v36 = vsel %vm11036_vm4, %v9609_v37, %v3506_v24  ;;  %v3750_v48 = vrot.slane %v11352_v31, 4  ;;  %v11356_v2 = vld [vmem:[#allocation105_spill] sm:$0xff]  ;;  %v11360_v24 = vld [vmem:[#allocation95_spill] sm:$0xff] }
 0x773   : > { %v9844_v49 = vpop.permute.xlu1 %4453  ;;  %v3531_v19 = vsel %vm3328_vm0, %v3529_v58, %v3530_v40  ;;  %v3657_v56 = vadd.f32 %v3656_v44, %v3631_v61  ;;  %v3751_v4 = vrot.slane %v11353_v46, 4  ;;  %v11355_v35 = vld [vmem:[#allocation96_spill] sm:$0xff]  ;;  %v11359_v46 = vrot.slane %v9525_v23, %v9833_v20 }
 0x774   : > { %11338 = vst [vmem:[#allocation174_spill] sm:$0xff] %v9844_v49  ;;  %v11354_v49 = vld [vmem:[#allocation94_spill] sm:$0xff]  ;;  %v3846_v3 = vrot.slane %v11355_v35, 4  ;;  %v3533_v37 = vsel %vm3532_vm10, %v9615_v42, %v3531_v19  ;;  %v3845_v35 = vrot.slane %v11360_v24, 4  ;;  %v11361_v40 = vrot.slane %v9414_v1, %v9833_v20  ;;  %v11362_v42 = vld [vmem:[#allocation93_spill] sm:$0xff] }
 0x775   : > { %v3821_v34 = vrot.slane %v11354_v49, 4  ;;  %v3681_v49 = vmul.f32 %v3679_v57, %v11359_v46  ;;  %v3820_v19 = vrot.slane %v11362_v42, 4  ;;  %v3752_v23 = vsel %vm3328_vm0, %v3750_v48, %v3751_v4 }
 0x776   : > { %v3510_v51 = vmul.f32 %v3508_v36, %v11361_v40  ;;  %v3847_v57 = vsel %vm3328_vm0, %v3845_v35, %v3846_v3  ;;  %v11365_v46 = vrot.slane %v9477_v18, %v9833_v20  ;;  %v11366_v40 = vld [vmem:[#allocation97_spill] sm:$0xff]  ;;  %v11367_v48 = vrot.slane %v9532_v32, %v9833_v20 }
 0x777   : > { %v9866_v47 = vpop.permute.xlu1 %4476  ;;  %v11368_v3 = vrot.slane %v9489_v13, 4  ;;  %v11369_v13 = vrot.slane %v9485_v21, %v9833_v20  ;;  %v11372_v21 = vrot.slane %v9491_v33, %v9833_v20  ;;  %vm3948_vm1 = vcmask 80896   ;;  %v11377_v33 = vld [vmem:[#allocation113_spill] sm:$0xff] }
 0x778   : > { %11339 = vst [vmem:[#allocation175_spill] sm:$0xff] %v9866_v47  ;;  %v3725_v47 = vrot.slane %v11348_v12, 4  ;;  %v3535_v1 = vmul.f32 %v3533_v37, %v11365_v46  ;;  %v3682_v37 = vadd.f32 %v3681_v49, %v3657_v56  ;;  %v11378_v46 = vld [vmem:[#allocation99_spill] sm:$0xff]  ;;  %vm4653_vm4 = vcmask 113664  }
 0x77b   : > { %v9896_v16 = vpop.permute.xlu1 %4478 }
 0x77c   : > { %11341 = vst [vmem:[#allocation177_spill] sm:$0xff] %v9896_v16  ;;  %v3702_v16 = vsel %vm3328_vm0, %v3700_v55, %v3701_v45  ;;  %v3727_v45 = vsel %vm3328_vm0, %v3725_v47, %v3726_v41  ;;  %v11358_v55 = vld [vmem:[#allocation109_spill] sm:$0xff]  ;;  %v11364_v47 = vrot.slane %v9481_v38, 4  ;;  %v3822_v38 = vsel %vm3328_vm0, %v3820_v19, %v3821_v34 }
 0x77d   : > { %v3775_v61 = vrot.slane %v11358_v55, 4  ;;  %v3754_v34 = vsel %vm3753_vm11, %v11352_v31, %v3752_v23  ;;  %vm4093_vm11 = vcmask 842752   ;;  %v11412_v23 = vld [vmem:[#allocation129_spill] sm:$0xff] }
 0x77f   : > { %v9924_v50 = vpop.permute.xlu1 %4501  ;;  %v3777_v18 = vsel %vm3328_vm0, %v3775_v61, %v11368_v3  ;;  %v11383_v3 = vld [vmem:[#allocation115_spill] sm:$0xff]  ;;  %v11419_v61 = vld [vmem:[#allocation136_spill] sm:$0xff] }
 0x780   : > { %11342 = vst [vmem:[#allocation178_spill] sm:$0xff] %v9924_v50  ;;  %v11347_v50 = vld [vmem:[#allocation102_spill] sm:$0xff]  ;;  %v3779_v31 = vsel %vm3778_vm3, %v11358_v55, %v3777_v18  ;;  %v11375_v55 = vrot.slane %v9568_v52, %v9833_v20  ;;  %v10050_v52 = vld [vmem:[#allocation7 + $0x21] ss:$8 sm:$0x3]  ;;  %vm4143_vm3 = vcmask 56320  }
 0x781   : > { %v3554_v59 = vrot.slane %v11347_v50, 4  ;;  %11380 = vst [vmem:[#allocation90_spill] sm:$0xff] %v10050_v52 }
 0x783   : > { %v9947_v30 = vpop.permute.xlu1 %4503  ;;  %v3556_v58 = vsel %vm3328_vm0, %v3554_v59, %v3555_v22  ;;  %v11363_v22 = vld [vmem:[#allocation98_spill] sm:$0xff] }
 0x784   : > { %11345 = vst [vmem:[#allocation100_spill] sm:$0xff] %v9947_v30  ;;  %v11351_v30 = vld [vmem:[#allocation103_spill] sm:$0xff]  ;;  %v3871_v59 = vrot.slane %v11363_v22, 4  ;;  %v3558_v36 = vsel %vm3557_vm15, %v11347_v50, %v3556_v58  ;;  %v3511_v50 = vadd.f32 %v3510_v51, %v9919_v62  ;;  %v3849_v58 = vsel %vm3848_vm12, %v11360_v24, %v3847_v57 }
 0x785   : > { %v3580_v17 = vrot.slane %v11351_v30, 4  ;;  %v3824_v62 = vsel %vm3823_vm5, %v11362_v42, %v3822_v38  ;;  %v11374_v42 = vld [vmem:[#allocation111_spill] sm:$0xff]  ;;  %vm4018_vm15 = vcmask 973824   ;;  %vm4118_vm12 = vcmask 449536  }
 0x786   : > { %v3536_v56 = vadd.f32 %v3535_v1, %v3511_v50  ;;  %v3895_v22 = vrot.slane %v11374_v42, 4  ;;  %v3896_v1 = vrot.slane %v11378_v46, 4  ;;  %v11384_v50 = vld [vmem:[#allocation118_spill] sm:$0xff]  ;;  %v11391_v46 = vld [vmem:[#allocation121_spill] sm:$0xff]  ;;  %vm4238_vm5 = vcmask 556032  }
 0x787   : > { %v9968_v44 = vpop.permute.xlu1 %4526  ;;  %v3582_v41 = vsel %vm3328_vm0, %v3580_v17, %v11364_v47  ;;  %v3870_v17 = vrot.slane %v11366_v40, 4 }
 0x788   : > { %11357 = vst [vmem:[#allocation101_spill] sm:$0xff] %v9968_v44  ;;  %v3704_v44 = vsel %vm3703_vm13, %v9629_v28, %v3702_v16  ;;  %v3729_v28 = vsel %vm3728_vm2, %v11348_v12, %v3727_v45  ;;  %v3584_v12 = vsel %vm3583_vm9, %v11351_v30, %v3582_v41  ;;  %v11370_v45 = vrot.slane %v9538_v26, %v9833_v20  ;;  %v11371_v30 = vld [vmem:[#allocation108_spill] sm:$0xff]  ;;  %v11376_v41 = vld [vmem:[#allocation110_spill] sm:$0xff] }
 0x789   : > { %v3706_v4 = vmul.f32 %v3704_v44, %v11367_v48  ;;  %v3872_v32 = vsel %vm3328_vm0, %v3870_v17, %v3871_v59  ;;  %v3560_v44 = vmul.f32 %v3558_v36, %v11369_v13  ;;  %v3586_v24 = vmul.f32 %v3584_v12, %v11372_v21  ;;  %v11382_v48 = vld [vmem:[#allocation114_spill] sm:$0xff]  ;;  %v11386_v13 = vld [vmem:[#allocation112_spill] sm:$0xff] }
 0x78a   : > { %v3731_v51 = vmul.f32 %v3729_v28, %v11370_v45  ;;  %v11373_v26 = vrot.slane %v9546_v60, %v9833_v20  ;;  %v3851_v59 = vmul.f32 %v3849_v58, %v11375_v55  ;;  %v3874_v47 = vsel %vm3873_vm7, %v11366_v40, %v3872_v32  ;;  %v11387_v45 = vld [vmem:[#allocation117_spill] sm:$0xff]  ;;  %v11390_v55 = vld [vmem:[#allocation116_spill] sm:$0xff] }
 0x78b   : > { %v9998_v16 = vpop.permute.xlu1 %4528  ;;  %v3707_v35 = vadd.f32 %v3706_v4, %v3682_v37  ;;  %v3561_v60 = vadd.f32 %v3560_v44, %v3536_v56  ;;  %v11379_v28 = vrot.slane %v9554_v6, %v9833_v20  ;;  %v11381_v40 = vrot.slane %v9562_v25, %v9833_v20 }
 0x78c   : > { %v3756_v19 = vmul.f32 %v3754_v34, %v11373_v26  ;;  %v3921_v4 = vrot.slane %v11382_v48, 4  ;;  %vm3973_vm13 = vcmask 736256   ;;  %v11385_v6 = vrot.slane %v9575_v11, %v9833_v20  ;;  %v11394_v48 = vld [vmem:[#allocation119_spill] sm:$0xff] }
 0x78d   : > { %v3732_v36 = vadd.f32 %v3731_v51, %v3707_v35  ;;  %v3781_v38 = vmul.f32 %v3779_v31, %v11379_v28  ;;  %v3826_v17 = vmul.f32 %v3824_v62, %v11381_v40  ;;  %v3587_v58 = vadd.f32 %v3586_v24, %v3561_v60  ;;  %v11388_v35 = vld [vmem:[#allocation120_spill] sm:$0xff]  ;;  %v11389_v24 = vld [vmem:[#allocation123_spill] sm:$0xff]  ;;  %v11392_v28 = vld [vmem:[#allocation125_spill] sm:$0xff] }
 0x78e   : > { %v3876_v34 = vmul.f32 %v3874_v47, %v11385_v6  ;;  %v3897_v25 = vsel %vm3328_vm0, %v3895_v22, %v3896_v1  ;;  %v3920_v44 = vrot.slane %v11386_v13, 4  ;;  %v3946_v51 = vrot.slane %v11387_v45, 4  ;;  %v11393_v40 = vld [vmem:[#allocation128_spill] sm:$0xff]  ;;  %v11395_v6 = vld [vmem:[#allocation130_spill] sm:$0xff] }
 0x78f   : > { %v10028_v49 = vpop.permute.xlu1 %4551  ;;  %v3757_v32 = vadd.f32 %v3756_v19, %v3732_v36  ;;  %v3852_v21 = vadd.f32 %v3851_v59, %v3826_v17  ;;  %v3899_v19 = vsel %vm3898_vm6, %v11374_v42, %v3897_v25  ;;  %v3945_v47 = vrot.slane %v11390_v55, 4  ;;  %v11396_v25 = vld [vmem:[#allocation133_spill] sm:$0xff]  ;;  %v11400_v17 = vld [vmem:[#allocation124_spill] sm:$0xff] }
 0x790   : > { %v3922_v22 = vsel %vm3328_vm0, %v3920_v44, %v3921_v4  ;;  %v3971_v1 = vrot.slane %v11391_v46, 4  ;;  %vm4043_vm2 = vcmask 580608   ;;  %v3602_v59 = vcombine.high %v3587_v58, %v3587_v58 }
 0x791   : > { %v3782_v31 = vadd.f32 %v3781_v38, %v3757_v32  ;;  %v3877_v36 = vadd.f32 %v3876_v34, %v3852_v21  ;;  %v3947_v42 = vsel %vm3328_vm0, %v3945_v47, %v3946_v51  ;;  %v3970_v4 = vrot.slane %v11394_v48, 4  ;;  %v11398_v51 = vld [vmem:[#allocation135_spill] sm:$0xff]  ;;  %v11407_v47 = vld [vmem:[#allocation126_spill] sm:$0xff] }
 0x792   : > { %vm4068_vm9 = vcmask 187392   ;;  %v11397_v34 = vrot.slane %v9581_v0, %v9833_v20  ;;  %v3924_v46 = vsel %vm3923_vm8, %v11386_v13, %v3922_v22  ;;  %v11399_v56 = vrot.slane %v9888_v39, %v9874_v5  ;;  %v11401_v38 = vld [vmem:[#allocation127_spill] sm:$0xff] }
 0x793   : > { %v10060_v37 = vpop.permute.xlu1 %4553  ;;  %v3797_v45 = vcombine.high %v3782_v31, %v3782_v31  ;;  %v3972_v32 = vsel %vm3328_vm0, %v3970_v4, %v3971_v1  ;;  %v4016_v44 = vrot.slane %v11400_v17, 4  ;;  %v4041_v26 = vrot.slane %v11401_v38, 4  ;;  %v11406_v17 = vld [vmem:[#allocation122_spill] sm:$0xff] }
 0x794   : > { %v3901_v21 = vmul.f32 %v3899_v19, %v11397_v34  ;;  %v3604_v62 = vmul.f32 %v11399_v56, %v3587_v58  ;;  %v11402_v0 = vrot.slane %v9888_v39, %v9878_v29  ;;  %v11403_v19 = vrot.slane %v9894_v43, %v9874_v5  ;;  %v11404_v58 = vld [vmem:[#allocation138_spill] sm:$0xff] }
 0x795   : > { %v3949_v34 = vsel %vm3948_vm1, %v11390_v55, %v3947_v42  ;;  %v11405_v1 = vrot.slane %v9594_v14, %v9833_v20  ;;  %v4015_v4 = vrot.slane %v11406_v17, 4  ;;  %v4040_v39 = vrot.slane %v11407_v47, 4  ;;  %v11410_v42 = vld [vmem:[#allocation134_spill] sm:$0xff] }
 0x796   : > { %v3605_v13 = vmul.f32 %v3602_v59, %v11402_v0  ;;  %v3799_v22 = vmul.f32 %v11403_v19, %v3782_v31  ;;  %v11408_v59 = vld [vmem:[#allocation131_spill] sm:$0xff]  ;;  %v11409_v31 = vrot.slane %v9894_v43, %v9878_v29  ;;  %v3902_v18 = vadd.f32 %v3901_v21, %v3877_v36  ;;  %v11413_v43 = vld [vmem:[#allocation132_spill] sm:$0xff]  ;;  %v11414_v36 = vld [vmem:[#allocation137_spill] sm:$0xff] }
 0x797   : > { %v10081_v60 = vpop.permute.xlu1 %4596  ;;  %v3926_v38 = vmul.f32 %v3924_v46, %v11405_v1  ;;  %v4066_v0 = vrot.slane %v11408_v59, 4  ;;  %v3974_v55 = vsel %vm3973_vm13, %v11394_v48, %v3972_v32  ;;  %v4091_v56 = vrot.slane %v11410_v42, 4  ;;  %v11415_v48 = vld [vmem:[#allocation140_spill] sm:$0xff]  ;;  %v11436_v42 = vld [vmem:[#allocation158_spill] sm:$0xff] }
 0x798   : > { %v3800_v19 = vmul.f32 %v3797_v45, %v11409_v31  ;;  %v11411_v14 = vrot.slane %v9599_v63, %v9833_v20  ;;  %v4017_v1 = vsel %vm3328_vm0, %v4015_v4, %v4016_v44  ;;  %v4042_v57 = vsel %vm3328_vm0, %v4040_v39, %v4041_v26  ;;  %v11416_v31 = vld [vmem:[#allocation143_spill] sm:$0xff]  ;;  %v11418_v39 = vld [vmem:[#allocation145_spill] sm:$0xff] }
 0x799   : > { %v4065_v59 = vrot.slane %v11412_v23, 4  ;;  %v4090_v45 = vrot.slane %v11413_v43, 4  ;;  %v4116_v21 = vrot.slane %v11414_v36, 4  ;;  %v11417_v44 = vrot.slane %v9604_v53, %v9833_v20 }
 0x79a   : > { %v3951_v46 = vmul.f32 %v3949_v34, %v11411_v14  ;;  %v3927_v34 = vadd.f32 %v3926_v38, %v3902_v18  ;;  %v4019_v14 = vsel %vm4018_vm15, %v11406_v17, %v4017_v1  ;;  %v4044_v36 = vsel %vm4043_vm2, %v11407_v47, %v4042_v57 }
 0x79b   : > { %v10106_v11 = vpop.permute.xlu1 %4598  ;;  %v3976_v26 = vmul.f32 %v3974_v55, %v11417_v44  ;;  %v4067_v4 = vsel %vm3328_vm0, %v4065_v59, %v4066_v0  ;;  %v4092_v32 = vsel %vm3328_vm0, %v4090_v45, %v4091_v56  ;;  %v4115_v63 = vrot.slane %v11419_v61, 4  ;;  %v11423_v56 = vld [vmem:[#allocation152_spill] sm:$0xff]  ;;  %v11440_v0 = vld [vmem:[#allocation157_spill] sm:$0xff] }
 0x79c   : > { %vm4168_vm7 = vcmask 711680   ;;  %vm4213_vm6 = vcmask 949248   ;;  %v10156_v53 = vadd.f32 %v3799_v22, %v3604_v62  ;;  %v10158_v18 = vadd.f32 %v3800_v19, %v3605_v13  ;;  %v11430_v22 = vld [vmem:[#allocation149_spill] sm:$0xff] }
 0x79d   : > { %v3952_v38 = vadd.f32 %v3951_v46, %v3927_v34  ;;  %vm4263_vm8 = vcmask 162816   ;;  %v4069_v57 = vsel %vm4068_vm9, %v11412_v23, %v4067_v4  ;;  %v4117_v47 = vsel %vm3328_vm0, %v4115_v63, %v4116_v21  ;;  %v11427_v21 = vld [vmem:[#allocation141_spill] sm:$0xff]  ;;  %v11428_v34 = vld [vmem:[#allocation144_spill] sm:$0xff]  ;;  %v11429_v4 = vld [vmem:[#allocation147_spill] sm:$0xff] }
 0x79e   : > { %11420 = vst [vmem:[#allocation102_spill] sm:$0xff] %v10156_v53  ;;  %11421 = vst [vmem:[#allocation106_spill] sm:$0xff] %v10158_v18  ;;  %v4236_v1 = vrot.slane %v11423_v56, 4  ;;  %vm4288_vm1 = vcmask 818176   ;;  %v11425_v19 = vrot.slane %v11343_v54, %v9833_v20  ;;  %v11426_v59 = vrot.slane %v11344_v15, %v9833_v20  ;;  %v11432_v15 = vld [vmem:[#allocation139_spill] sm:$0xff] }
 0x79f   : > { %v10136_v12 = vpop.permute.xlu1 %4621  ;;  %v10170_v13 = vadd.f32 %v3976_v26, %v3952_v38  ;;  %v4094_v23 = vsel %vm4093_vm11, %v11413_v43, %v4092_v32  ;;  %v4141_v63 = vrot.slane %v11427_v21, 4  ;;  %v4166_v44 = vrot.slane %v11428_v34, 4  ;;  %v11434_v32 = vld [vmem:[#allocation142_spill] sm:$0xff] }
 0x7a0   : > { %v4021_v46 = vmul.f32 %v4019_v14, %v11425_v19  ;;  %v4046_v45 = vmul.f32 %v4044_v36, %v11426_v59  ;;  %v4211_v56 = vrot.slane %v11429_v4, 4  ;;  %v4235_v26 = vrot.slane %v11430_v22, 4  ;;  %v11433_v19 = vld [vmem:[#allocation155_spill] sm:$0xff]  ;;  %v11435_v34 = vld [vmem:[#allocation146_spill] sm:$0xff] }
 0x7a1   : > { %v11431_v38 = vrot.slane %v11349_v8, %v9833_v20  ;;  %v4119_v14 = vsel %vm4118_vm12, %v11419_v61, %v4117_v47  ;;  %v4140_v36 = vrot.slane %v11432_v15, 4  ;;  %v4261_v59 = vrot.slane %v11433_v19, 4  ;;  %v11438_v61 = vld [vmem:[#allocation153_spill] sm:$0xff] }
 0x7a2   : > { %v4165_v21 = vrot.slane %v11434_v32, 4  ;;  %v4210_v55 = vrot.slane %v11435_v34, 4  ;;  %v4237_v4 = vsel %vm3328_vm0, %v4235_v26, %v4236_v1  ;;  %v4286_v18 = vrot.slane %v11436_v42, 4 }
 0x7a3   : > { %v10162_v17 = vpop.permute.xlu1 %4623  ;;  %v4071_v54 = vmul.f32 %v4069_v57, %v11431_v38  ;;  %v4047_v52 = vadd.f32 %v4046_v45, %v4021_v46  ;;  %v11437_v8 = vrot.slane %v11356_v2, %v9833_v20  ;;  %v4260_v47 = vrot.slane %v11438_v61, 4  ;;  %v11439_v38 = vld [vmem:[#allocation154_spill] sm:$0xff] }
 0x7a4   : > { %v4620_v19 = vrot.slane %v11439_v38, %v9833_v20  ;;  %v4142_v53 = vsel %vm3328_vm0, %v4140_v36, %v4141_v63  ;;  %v4167_v29 = vsel %vm3328_vm0, %v4165_v21, %v4166_v44  ;;  %v4212_v62 = vsel %vm3328_vm0, %v4210_v55, %v4211_v56 }
 0x7a5   : > { %v4096_v57 = vmul.f32 %v4094_v23, %v11437_v8  ;;  %v4285_v1 = vrot.slane %v11440_v0, 4  ;;  %v4072_v26 = vadd.f32 %v4071_v54, %v4047_v52  ;;  %v11441_v42 = vrot.slane %v11371_v30, %v9833_v20  ;;  %v11442_v52 = vld [vmem:[#allocation156_spill] sm:$0xff]  ;;  %v11443_v30 = vld [vmem:[#allocation159_spill] sm:$0xff] }
 0x7a6   : > { %v4239_v2 = vsel %vm4238_vm5, %v11430_v22, %v4237_v4  ;;  %v4262_v45 = vsel %vm3328_vm0, %v4260_v47, %v4261_v59  ;;  %vm4313_vm13 = vcmask 424960   ;;  %vm4433_vm15 = vcmask 531456  }
 0x7a7   : > { %v10191_v43 = vpop.permute.xlu1 %4646  ;;  %v4121_v46 = vmul.f32 %v4119_v14, %v11441_v42  ;;  %v3992_v63 = vcombine.high %v10170_v13, %v10170_v13  ;;  %v4287_v55 = vsel %vm3328_vm0, %v4285_v1, %v4286_v18  ;;  %v4645_v44 = vrot.slane %v11442_v52, %v9833_v20 }
 0x7a8   : > { %v4670_v56 = vrot.slane %v11443_v30, %v9833_v20  ;;  %v4097_v54 = vadd.f32 %v4096_v57, %v4072_v26  ;;  %v4144_v22 = vsel %vm4143_vm3, %v11432_v15, %v4142_v53  ;;  %v4169_v14 = vsel %vm4168_vm7, %v11434_v32, %v4167_v29  ;;  %v11450_v26 = vld [vmem:[#allocation171_spill] sm:$0xff] }
 0x7a9   : > { %vm4408_vm2 = vcmask 924672   ;;  %vm4458_vm9 = vcmask 138240   ;;  %v4214_v36 = vsel %vm4213_vm6, %v11435_v34, %v4212_v62  ;;  %v11444_v18 = vrot.slane %v9916_v9, %v9874_v5 }
 0x7aa   : > { %v11445_v21 = vrot.slane %v11384_v50, %v9833_v20  ;;  %v4264_v53 = vsel %vm4263_vm8, %v11438_v61, %v4262_v45  ;;  %v4311_v29 = vrot.slane %v9791_v10, 4  ;;  %vm4338_vm11 = vcmask 31744  }
 0x7ab   : > { %v10213_v23 = vpop.permute.xlu1 %4648  ;;  %v10232_v59 = vmul.f32 %v11444_v18, %v10170_v13  ;;  %v4122_v15 = vadd.f32 %v4121_v46, %v4097_v54  ;;  %v4289_v62 = vsel %vm4288_vm1, %v11440_v0, %v4287_v55  ;;  %v4431_v32 = vrot.slane %v9831_v27, 4  ;;  %v11451_v46 = vld [vmem:[#allocation172_spill] sm:$0xff] }
 0x7ac   : > { %v4241_v4 = vmul.f32 %v4239_v2, %v11445_v21  ;;  %vm4483_vm12 = vcmask 793600   ;;  %v11446_v8 = vrot.slane %v11376_v41, %v9833_v20  ;;  %v11447_v57 = vrot.slane %v11377_v33, %v9833_v20  ;;  %v11452_v41 = vld [vmem:[#allocation174_spill] sm:$0xff]  ;;  %v11456_v21 = vld [vmem:[#allocation173_spill] sm:$0xff] }
 0x7ad   : > { %v4310_v10 = vrot.slane %v9786_v7, 4  ;;  %v11448_v47 = vrot.slane %v11383_v3, %v9833_v20  ;;  %v11449_v27 = vrot.slane %v11388_v35, %v9833_v20  ;;  %v4406_v42 = vrot.slane %v11450_v26, 4  ;;  %v11458_v26 = vld [vmem:[#allocation161_spill] sm:$0xff] }
 0x7ae   : > { %v4146_v50 = vmul.f32 %v4144_v22, %v11446_v8  ;;  %v4171_v61 = vmul.f32 %v4169_v14, %v11447_v57  ;;  %v4430_v2 = vrot.slane %v11451_v46, 4  ;;  %v4456_v45 = vrot.slane %v11452_v41, 4  ;;  %v11454_v22 = vld [vmem:[#allocation163_spill] sm:$0xff]  ;;  %v11457_v8 = vld [vmem:[#allocation177_spill] sm:$0xff] }
 0x7af   : > { %v10243_v34 = vpop.permute.xlu1 %4671  ;;  %v4216_v1 = vmul.f32 %v4214_v36, %v11448_v47  ;;  %v4266_v0 = vmul.f32 %v4264_v53, %v11449_v27  ;;  %v11453_v33 = vrot.slane %v11389_v24, %v9833_v20  ;;  %v4312_v54 = vsel %vm3328_vm0, %v4310_v10, %v4311_v29  ;;  %v11455_v36 = vld [vmem:[#allocation169_spill] sm:$0xff]  ;;  %v11459_v29 = vld [vmem:[#allocation175_spill] sm:$0xff] }
 0x7b0   : > { %v4336_v14 = vrot.slane %v11454_v22, 4  ;;  %v4405_v18 = vrot.slane %v11455_v36, 4  ;;  %v4432_v35 = vsel %vm3328_vm0, %v4430_v2, %v4431_v32  ;;  %v4455_v53 = vrot.slane %v11456_v21, 4  ;;  %v11461_v22 = vld [vmem:[#allocation166_spill] sm:$0xff] }
 0x7b1   : > { %v4291_v55 = vmul.f32 %v4289_v62, %v11453_v33  ;;  %v4242_v3 = vadd.f32 %v4241_v4, %v4216_v1  ;;  %v4481_v57 = vrot.slane %v11457_v8, 4  ;;  %v4147_v27 = vadd.f32 %v4146_v50, %v4122_v15  ;;  %v11460_v50 = vld [vmem:[#allocation100_spill] sm:$0xff] }
 0x7b2   : > { %v4335_v41 = vrot.slane %v11458_v26, 4  ;;  %vm4363_vm5 = vcmask 687104   ;;  %vm4508_vm3 = vcmask 400384   ;;  %vm4533_vm7 = vcmask 7168  }
 0x7b3   : > { %v10270_v47 = vpop.permute.xlu1 %4673  ;;  %v4407_v24 = vsel %vm3328_vm0, %v4405_v18, %v4406_v42  ;;  %v4457_v4 = vsel %vm3328_vm0, %v4455_v53, %v4456_v45  ;;  %v4480_v62 = vrot.slane %v11459_v29, 4  ;;  %v4267_v10 = vadd.f32 %v4266_v0, %v4242_v3  ;;  %v11464_v53 = vld [vmem:[#allocation165_spill] sm:$0xff] }
 0x7b4   : > { %v4314_v32 = vsel %vm4313_vm13, %v9786_v7, %v4312_v54  ;;  %v4337_v1 = vsel %vm3328_vm0, %v4335_v41, %v4336_v14  ;;  %v4434_v15 = vsel %vm4433_vm15, %v11451_v46, %v4432_v35  ;;  %v4506_v2 = vrot.slane %v11460_v50, 4  ;;  %v11462_v14 = vld [vmem:[#allocation178_spill] sm:$0xff] }
 0x7b5   : > { %vm4628_vm8 = vcmask 506880   ;;  %v10282_v33 = vadd.f32 %v4171_v61, %v4147_v27  ;;  %v4361_v42 = vrot.slane %v11461_v22, 4  ;;  %v4482_v45 = vsel %vm3328_vm0, %v4480_v62, %v4481_v57  ;;  %v11466_v27 = vld [vmem:[#allocation101_spill] sm:$0xff] }
 0x7b6   : > { %v4292_v0 = vadd.f32 %v4291_v55, %v4267_v10  ;;  %v4409_v7 = vsel %vm4408_vm2, %v11455_v36, %v4407_v24  ;;  %v4459_v54 = vsel %vm4458_vm9, %v11456_v21, %v4457_v4  ;;  %v4505_v46 = vrot.slane %v11462_v14, 4 }
 0x7b7   : > { %v10286_v18 = vpop.permute.xlu1 %4696  ;;  %v4531_v3 = vrot.slane %v9998_v16, 4  ;;  %vm4558_vm1 = vcmask 662528   ;;  %vm4603_vm15 = vcmask 900096   ;;  %v11463_v61 = vrot.slane %v11392_v28, %v9833_v20 }
 0x7b8   : > { %v4339_v55 = vsel %vm4338_vm11, %v11458_v26, %v4337_v1  ;;  %v4360_v8 = vrot.slane %v11464_v53, 4  ;;  %v11465_v36 = vrot.slane %v11398_v51, %v9833_v20  ;;  %v4484_v57 = vsel %vm4483_vm12, %v11459_v29, %v4482_v45 }
 0x7b9   : > { %v4316_v35 = vmul.f32 %v4314_v32, %v11463_v61  ;;  %v4507_v16 = vsel %vm3328_vm0, %v4505_v46, %v4506_v2  ;;  %v4530_v41 = vrot.slane %v11466_v27, 4  ;;  %v4626_v24 = vrot.slane %v10162_v17, 4 }
 0x7ba   : > { %v4436_v21 = vmul.f32 %v4434_v15, %v11465_v36  ;;  %vm4678_vm2 = vcmask 769024   ;;  %v4362_v28 = vsel %vm3328_vm0, %v4360_v8, %v4361_v42  ;;  %v11467_v26 = vrot.slane %v11396_v25, %v9833_v20 }
 0x7bb   : > { %v11468_v51 = vrot.slane %v11404_v58, %v9833_v20  ;;  %v4556_v10 = vrot.slane %v10060_v37, 4  ;;  %v4699_v29 = vpop.permute.xlu1 %4698  ;;  %v4532_v32 = vsel %vm3328_vm0, %v4530_v41, %v4531_v3  ;;  %v4601_v1 = vrot.slane %v10106_v11, 4 }
 0x7bc   : > { %v4411_v4 = vmul.f32 %v4409_v7, %v11467_v26  ;;  %v4625_v17 = vrot.slane %v10136_v12, 4  ;;  %v4651_v15 = vrot.slane %v10213_v23, 4  ;;  %vm4703_vm9 = vcmask 375808  }
 0x7bd   : > { %v4461_v62 = vmul.f32 %v4459_v54, %v11468_v51  ;;  %v11469_v25 = vrot.slane %v11415_v48, %v9833_v20  ;;  %v4509_v58 = vsel %vm4508_vm3, %v11462_v14, %v4507_v16  ;;  %v4555_v37 = vrot.slane %v10028_v49, 4 }
 0x7be   : > { %v4437_v50 = vadd.f32 %v4436_v21, %v4411_v4  ;;  %v4600_v22 = vrot.slane %v10081_v60, 4  ;;  %v4627_v42 = vsel %vm3328_vm0, %v4625_v17, %v4626_v24  ;;  %v4650_v11 = vrot.slane %v10191_v43, 4 }
 0x7bf   : > { %v4486_v2 = vmul.f32 %v4484_v57, %v11469_v25  ;;  %v4676_v45 = vrot.slane %v10270_v47, 4  ;;  %v4364_v23 = vsel %vm4363_vm5, %v11464_v53, %v4362_v28  ;;  %v4534_v48 = vsel %vm4533_vm7, %v11466_v27, %v4532_v32  ;;  %v4722_v14 = vpop.permute.xlu1 %4721 }
 0x7c0   : > { %v4462_v7 = vadd.f32 %v4461_v62, %v4437_v50  ;;  %v4557_v54 = vsel %vm3328_vm0, %v4555_v37, %v4556_v10  ;;  %v4602_v46 = vsel %vm3328_vm0, %v4600_v22, %v4601_v1  ;;  %v4652_v3 = vsel %vm3328_vm0, %v4650_v11, %v4651_v15  ;;  %v11476_v1 = vld [vmem:[#allocation150_spill] sm:$0xff]  ;;  %v11479_v22 = vld [vmem:[#allocation160_spill] sm:$0xff] }
 0x7c1   : > { %v4675_v61 = vrot.slane %v10243_v34, 4  ;;  %v4701_v8 = vrot.slane %v4699_v29, 4  ;;  %v11470_v47 = vrot.slane %v11393_v40, %v9833_v20  ;;  %v11471_v53 = vrot.slane %v11416_v31, %v9833_v20 }
 0x7c2   : > { %v4629_v57 = vsel %vm4628_vm8, %v10136_v12, %v4627_v42  ;;  %v4317_v16 = vadd.f32 %v4316_v35, %v4292_v0  ;;  %v11472_v27 = vrot.slane %v11395_v6, %v9833_v20  ;;  %v4487_v24 = vadd.f32 %v4486_v2, %v4462_v7  ;;  %v11481_v7 = vld [vmem:[#allocation102_spill] sm:$0xff] }
 0x7c3   : > { %v4341_v36 = vmul.f32 %v4339_v55, %v11470_v47  ;;  %v4511_v21 = vmul.f32 %v4509_v58, %v11471_v53  ;;  %v4677_v28 = vsel %vm3328_vm0, %v4675_v61, %v4676_v45  ;;  %v4700_v26 = vrot.slane %v10286_v18, 4  ;;  %v4724_v6 = vpop.permute.xlu1 %4723  ;;  %v11478_v58 = vld [vmem:[#allocation176_spill] sm:$0xff] }
 0x7c4   : > { %v4366_v41 = vmul.f32 %v4364_v23, %v11472_v27  ;;  %v11473_v40 = vrot.slane %v11418_v39, %v9833_v20  ;;  %v4559_v31 = vsel %vm4558_vm1, %v10028_v49, %v4557_v54  ;;  %v4604_v12 = vsel %vm4603_vm15, %v10081_v60, %v4602_v46  ;;  %v4369_v39 = vld [vmem:[#allocation7 + $0x22] ss:$8 sm:$0x3]  ;;  %v4564_v45 = vld [vmem:[#allocation7 + $0x23] ss:$8 sm:$0x3] }
 0x7c5   : > { %v4654_v0 = vsel %vm4653_vm4, %v10191_v43, %v4652_v3  ;;  %v4631_v35 = vmul.f32 %v4629_v57, %v4620_v19  ;;  %v4702_v4 = vsel %vm3328_vm0, %v4700_v26, %v4701_v8  ;;  %v4725_v51 = vrot.slane %v4722_v14, 4  ;;  %v11474_v60 = vld [vmem:[#allocation148_spill] sm:$0xff]  ;;  %v11482_v3 = vld [vmem:[#allocation162_spill] sm:$0xff] }
 0x7c6   : > { %v4536_v55 = vmul.f32 %v4534_v48, %v11473_v40  ;;  %v4726_v62 = vrot.slane %v4724_v6, 4  ;;  %v4512_v10 = vadd.f32 %v4511_v21, %v4487_v24  ;;  %v4679_v49 = vsel %vm4678_vm2, %v10243_v34, %v4677_v28  ;;  %v11485_v27 = vld [vmem:[#allocation106_spill] sm:$0xff]  ;;  %v11487_v26 = vld [vmem:[#allocation164_spill] sm:$0xff] }
 0x7c7   : > { %vm4728_vm11 = vcmask 1031168   ;;  %v4342_v29 = vadd.f32 %v4341_v36, %v4317_v16  ;;  %v11475_v32 = vrot.slane %v11474_v60, %v9833_v20  ;;  %v11477_v17 = vrot.slane %v11476_v1, %v9833_v20  ;;  %v4747_v34 = vpop.permute.xlu1 %4746 }
 0x7c8   : > { %v4656_v19 = vmul.f32 %v4654_v0, %v4645_v44  ;;  %v4727_v15 = vsel %vm3328_vm0, %v4725_v51, %v4726_v62  ;;  %v4704_v50 = vsel %vm4703_vm9, %v10286_v18, %v4702_v4  ;;  %v4374_v2 = vrot.slane %v4369_v39, %v9874_v5 }
 0x7c9   : > { %v4561_v43 = vmul.f32 %v4559_v31, %v11475_v32  ;;  %v4606_v38 = vmul.f32 %v4604_v12, %v11477_v17  ;;  %v4367_v25 = vadd.f32 %v4366_v41, %v4342_v29  ;;  %v4378_v37 = vrot.slane %v4369_v39, %v11478_v58  ;;  %v11488_v29 = vld [vmem:[#allocation167_spill] sm:$0xff] }
 0x7ca   : > { %v4695_v42 = vrot.slane %v11479_v22, %v9833_v20  ;;  %v4537_v11 = vadd.f32 %v4536_v55, %v4512_v10  ;;  %v4681_v52 = vmul.f32 %v4679_v49, %v4670_v56  ;;  %v11480_v44 = vrot.slane %v9916_v9, %v11478_v58  ;;  %v11483_v9 = vld [vmem:[#allocation90_spill] sm:$0xff] }
 0x7cb   : > { %v4632_v23 = vadd.f32 %v4631_v35, %v4606_v38  ;;  %v3996_v48 = vadd.f32 %v10232_v59, %v11481_v7  ;;  %v4187_v54 = vcombine.high %v10282_v33, %v10282_v33  ;;  %v4729_v46 = vsel %vm4728_vm11, %v4722_v14, %v4727_v15  ;;  %v4749_v59 = vpop.permute.xlu1 %4748  ;;  %v4759_v14 = vld [vmem:[#allocation7 + $0x24] ss:$8 sm:$0x3]  ;;  %v4983_v15 = vld [vmem:[#allocation2 + $0x4] sm:$0xf] }
 0x7cc   : > { %v3995_v18 = vmul.f32 %v3992_v63, %v11480_v44  ;;  %v4720_v61 = vrot.slane %v11482_v3, %v9833_v20  ;;  %v4562_v30 = vadd.f32 %v4561_v43, %v4537_v11  ;;  %v4706_v8 = vmul.f32 %v4704_v50, %v4695_v42  ;;  %v11489_v43 = vld [vmem:[#allocation168_spill] sm:$0xff] }
 0x7cd   : > { %v4657_v56 = vadd.f32 %v4656_v19, %v4632_v23  ;;  %v11484_v47 = vrot.slane %v11483_v9, %v9874_v5  ;;  %v4569_v63 = vrot.slane %v4564_v45, %v9874_v5  ;;  %vm4753_vm4 = vcmask 637952   ;;  %v5008_v23 = vld [vmem:[#allocation2 + $0x4] sm:$0xf] }
 0x7ce   : > { %v4382_v36 = vcombine.high %v4367_v25, %v4367_v25  ;;  %v4731_v21 = vmul.f32 %v4729_v46, %v4720_v61  ;;  %v4750_v57 = vrot.slane %v4747_v34, 4  ;;  %v4751_v16 = vrot.slane %v4749_v59, 4  ;;  %v5049_v59 = vld [vmem:[#allocation2 + $0x4] sm:$0xf] }
 0x7cf   : > { %v4189_v13 = vmul.f32 %v11484_v47, %v10282_v33  ;;  %v4682_v53 = vadd.f32 %v4681_v52, %v4657_v56  ;;  %v3997_v41 = vadd.f32 %v3995_v18, %v11485_v27  ;;  %v11486_v24 = vrot.slane %v11483_v9, %v11478_v58  ;;  %v4917_v51 = vpop.permute.xlu1 %4916  ;;  %v5025_v52 = vld [vmem:[#allocation2 + $0x4] sm:$0xf] }
 0x7d0   : > { %v4745_v40 = vrot.slane %v11487_v26, %v9833_v20  ;;  %v4573_v33 = vrot.slane %v4564_v45, %v11478_v58  ;;  %v4577_v55 = vcombine.high %v4562_v30, %v4562_v30  ;;  %v4752_v12 = vsel %vm3328_vm0, %v4750_v57, %v4751_v16  ;;  %v11491_v57 = vld [vmem:[#allocation170_spill] sm:$0xff] }
 0x7d1   : > { %v4190_v28 = vmul.f32 %v4187_v54, %v11486_v24  ;;  %v4707_v31 = vadd.f32 %v4706_v8, %v4682_v53  ;;  %v4384_v0 = vmul.f32 %v4374_v2, %v4367_v25  ;;  %v4191_v6 = vadd.f32 %v4189_v13, %v3996_v48  ;;  %v5086_v13 = vld [vmem:[#allocation2 + $0x4] sm:$0xf] }
 0x7d2   : > { %v4764_v35 = vrot.slane %v4759_v14, %v9874_v5  ;;  %v4754_v4 = vsel %vm4753_vm4, %v4747_v34, %v4752_v12  ;;  %v4385_v62 = vmul.f32 %v4382_v36, %v4378_v37  ;;  %v4579_v39 = vmul.f32 %v4569_v63, %v4562_v30  ;;  %v5111_v53 = vld [vmem:[#allocation2 + $0x4] sm:$0xf]  ;;  %v6422_v12 = vld [vmem:[%s10905_s5 + $0x8] sm:$0xff] }
 0x7d3   : > { %v4732_v10 = vadd.f32 %v4731_v21, %v4707_v31  ;;  %v4756_v49 = vmul.f32 %v4754_v4, %v4745_v40  ;;  %v10415_v60 = vsel %vm4918_vm14, %v11488_v29, %v4917_v51  ;;  %v4192_v32 = vadd.f32 %v4190_v28, %v3997_v41  ;;  %v5136_v16 = vld [vmem:[#allocation2 + $0x4] sm:$0xf]  ;;  %v7107_v29 = vld [vmem:[%s10905_s5] sm:$0xff] }
 0x7d4   : > { %v10419_v1 = vcombine.low %v11489_v43, %v10415_v60  ;;  %4957 = vrot.lane.b32.xlu0 %v10415_v60, %s7544_s12  ;;  %v4580_v17 = vmul.f32 %v4577_v55, %v4573_v33  ;;  %v4768_v38 = vrot.slane %v4759_v14, %v11478_v58  ;;  %v4386_v50 = vadd.f32 %v4384_v0, %v4191_v6  ;;  %v5160_v40 = vld [vmem:[#allocation2 + $0x4] sm:$0xf]  ;;  %v11492_v43 = vld [vmem:[#allocation89_spill] sm:$0xff] }
 0x7d5   : > { %v4757_v19 = vadd.f32 %v4756_v49, %v4732_v10  ;;  %v4387_v2 = vadd.f32 %v4385_v62, %v4192_v32  ;;  %v10429_v42 = vsel %vm4918_vm14, %v4917_v51, 0.0  ;;  %v7622_v7 = vmov 47   ;;  %v5184_v55 = vld [vmem:[#allocation2 + $0x4] sm:$0xf] }
 0x7d6   : > { %4997 = vrot.lane.b32.xlu1 %v10419_v1, %s7544_s12  ;;  %v4581_v37 = vadd.f32 %v4579_v39, %v4386_v50  ;;  %v4787_v48 = vstv %s10423_s10  ;;  %v10436_v30 = vcombine.low %v10415_v60, %v10429_v42  ;;  %v11490_v56 = vmov 0.0   ;;  %v5208_v6 = vld [vmem:[#allocation2 + $0x4] sm:$0xf] }
 0x7d7   : > { %v4772_v34 = vcombine.high %v4757_v19, %v4757_v19  ;;  %v4774_v25 = vmul.f32 %v4764_v35, %v4757_v19  ;;  %v4582_v11 = vadd.f32 %v4580_v17, %v4387_v2  ;;  %v7623_v47 = vmov 20  }
 0x7d8   : > { %4986 = vperm.xlu0 %7039, %v4983_v15   ;;  %v7624_v63 = vmov 61   ;;  %v7625_v21 = vmov 27   ;;  %v7627_v14 = vmov 21   ;;  %v7628_v41 = vmov 34   ;;  %v5232_v15 = vld [vmem:[#allocation2 + $0x4] sm:$0xf] }
 0x7d9   : > { %v4775_v22 = vmul.f32 %v4772_v34, %v4768_v38  ;;  %v4776_v45 = vadd.f32 %v4774_v25, %v4581_v37  ;;  %v7630_v33 = vmov 41   ;;  %v7631_v31 = vmov 48   ;;  %v5298_v37 = vld [vmem:[#allocation2 + $0x4] sm:$0xf] }
 0x7da   : > { %4999 = vrot.lane.b32.xlu1 %v10429_v42, %s7544_s12  ;;  %v4827_v51 = vcombine.high %v6422_v12, %v6422_v12  ;;  %v7632_v39 = vmov 55   ;;  %v7633_v25 = vmov 62   ;;  %v7635_v2 = vmov 28  }
 0x7db   : > { %v4777_v44 = vadd.f32 %v4775_v22, %v4582_v11  ;;  %v4781_v18 = vrot.slane %v4776_v45, 2  ;;  %v5323_v22 = vld [vmem:[#allocation2 + $0x4] sm:$0xf]  ;;  %v7636_v11 = vmov 35   ;;  %vm5106_vm14 = vcmask 1014784  }
 0x7dc   : > { %7040 = vset.pattern.permute.xlu0 %v7622_v7  ;;  %v5273_v7 = vld [vmem:[#allocation2 + $0x4] sm:$0xf]  ;;  %vm5293_vm12 = vcmask 982016   ;;  %vm5318_vm5 = vcmask 457728   ;;  %vm5851_vm7 = vcmask 883712   ;;  %vm5876_vm8 = vcmask 359424  }
 0x7dd   : > { %5011 = vperm.xlu0 %7040, %v5008_v23   ;;  %v4782_v54 = vrot.slane %v4777_v44, 2  ;;  %v4785_v46 = vadd.f32 %v4781_v18, %v4776_v45  ;;  %v5347_v45 = vld [vmem:[#allocation2 + $0x4] sm:$0xf]  ;;  %v7637_v23 = vmov 42   ;;  %v7638_v18 = vmov 49  }
 0x7de   : > { %5028 = vperm.xlu1 %7041, %v5025_v52   ;;  %v5371_v52 = vld [vmem:[#allocation2 + $0x4] sm:$0xf]  ;;  %vm6038_vm1 = vcmask 850944   ;;  %vm6063_vm15 = vcmask 326656  }
 0x7df   : > { %v4786_v3 = vadd.f32 %v4782_v54, %v4777_v44  ;;  %v4788_v61 = vadd.f32 %v4787_v48, %v4785_v46  ;;  %v10483_v44 = vcombine.low %v10429_v42, %v11490_v56  ;;  %v7639_v54 = vmov 56   ;;  %v5419_v46 = vld [vmem:[#allocation2 + $0x4] sm:$0xf] }
 0x7e1   : > { %5040 = vrot.lane.b32.xlu0 %v11490_v56, %s7544_s12  ;;  %v4789_v8 = vadd.f32 %v4787_v48, %v4786_v3  ;;  %v6420_v9 = vmul.f32 -1.442695, %v4788_v61  ;;  %v5395_v48 = vld [vmem:[#allocation2 + $0x4] sm:$0xf]  ;;  %v7640_v3 = vmov 63   ;;  %v7641_v61 = vmov 22  }
 0x7e2   : > { %5038 = vrot.lane.b32.xlu1 %v10436_v30, %s7544_s12  ;;  %7043 = vset.pattern.permute.xlu0 %v7623_v47  ;;  %s7629_s12 = smov 60   ;;  %v5508_v47 = vld [vmem:[#allocation2 + $0x4] sm:$0xf] }
 0x7e3   : > { %7042 = vset.pattern.permute.xlu1 %v7624_v63  ;;  %7091 = vpow2.f32 %v6420_v9  ;;  %v6421_v36 = vmul.f32 -1.442695, %v4789_v8  ;;  %v7643_v8 = vmov 29   ;;  %v5484_v9 = vld [vmem:[#allocation2 + $0x4] sm:$0xf] }
 0x7e4   : > { %v5532_v63 = vld [vmem:[#allocation2 + $0x4] sm:$0xf] }
 0x7e5   : > { %5089 = vperm.xlu0 %7043, %v5086_v13   ;;  %7093 = vpow2.f32 %v6421_v36  ;;  %v7644_v13 = vmov 36   ;;  %v5556_v36 = vld [vmem:[#allocation2 + $0x4] sm:$0xf] }
 0x7e6   : > { %5052 = vperm.xlu1 %7042, %v5049_v59   ;;  %v7645_v59 = vmov 43  }
 0x7e9   : > { %7044 = vset.pattern.permute.xlu0 %v7625_v21  ;;  %v7646_v21 = vmov 50  }
 0x7ea   : > { %5114 = vperm.xlu0 %7044, %v5111_v53   ;;  %5099 = vrot.lane.b32.xlu1 %v11491_v57, %s7626_s9  ;;  %v4946_v53 = vpop.permute.xlu1 %4945 }
 0x7eb   : > { %7050 = vset.pattern.permute.xlu1 %v7627_v14  ;;  %v5580_v14 = vld [vmem:[#allocation2 + $0x4] sm:$0xf] }
 0x7ed   : > { %v7092_v27 = vpop.eup %7091 }
 0x7ee   : > { %7045 = vset.pattern.permute.xlu0 %v7628_v41  ;;  %5101 = vrot.lane.b32.xlu1 %v10415_v60, %s7626_s9  ;;  %v4796_v24 = vadd.f32 1.0, %v7092_v27  ;;  %v4956_v27 = vpop.permute.xlu1 %4955  ;;  %v5604_v41 = vld [vmem:[#allocation2 + $0x4] sm:$0xf] }
 0x7ef   : > { %v7094_v28 = vpop.eup %7093  ;;  %5139 = vperm.xlu0 %7045, %v5136_v16   ;;  %v7647_v16 = vmov 57  }
 0x7f0   : > { %v4797_v26 = vadd.f32 1.0, %v7094_v28  ;;  %7095 = vrcp.f32 %v4796_v24  ;;  %v4928_v24 = vpop.permute.xlu0 %4927  ;;  %v7648_v28 = vmov 64  }
 0x7f2   : > { %5124 = vrot.lane.b32.xlu1 %v11491_v57, %s7629_s12  ;;  %7097 = vrcp.f32 %v4797_v26  ;;  %v4970_v26 = vpop.permute.xlu1 %4969 }
 0x7f3   : > { %7046 = vset.pattern.permute.xlu0 %v7630_v33 }
 0x7f4   : > { %5163 = vperm.xlu0 %7046, %v5160_v40  }
 0x7f6   : > { %5126 = vrot.lane.b32.xlu1 %v10415_v60, %s7629_s12 }
 0x7f8   : > { %7047 = vset.pattern.permute.xlu0 %v7631_v31  ;;  %v5669_v31 = vld [vmem:[#allocation2 + $0x4] sm:$0xf] }
 0x7f9   : > { %5187 = vperm.xlu0 %7047, %v5184_v55   ;;  %v7649_v55 = vmov 30  }
 0x7fa   : > { %v7096_v0 = vpop.eup %7095  ;;  %5149 = vrot.lane.b32.xlu1 %v10419_v1, %s7626_s9 }
 0x7fb   : > { %v4805_v35 = vrot.slane %v7096_v0, %v9874_v5  ;;  %v4821_v4 = vrot.slane %v7096_v0, %v11478_v58  ;;  %v4959_v0 = vrot.slane %v4956_v27, 4 }
 0x7fc   : > { %v7098_v62 = vpop.eup %7097 }
 0x7fd   : > { %7048 = vset.pattern.permute.xlu0 %v7632_v39  ;;  %v4809_v10 = vrot.slane %v7098_v62, %v9874_v5  ;;  %v4825_v49 = vrot.slane %v7098_v62, %v11478_v58  ;;  %v4810_v32 = vmul.f32 %v7107_v29, %v4805_v35  ;;  %v4829_v38 = vmul.f32 %v6422_v12, %v4821_v4  ;;  %v5694_v35 = vld [vmem:[#allocation2 + $0x4] sm:$0xf] }
 0x7fe   : > { %5211 = vperm.xlu0 %7048, %v5208_v6   ;;  %5151 = vrot.lane.b32.xlu1 %v10429_v42, %s7626_s9  ;;  %v5460_v4 = vld [vmem:[#allocation2 + $0x4] sm:$0xf]  ;;  %v4954_v62 = vrot.slane %v4946_v53, %v9833_v20  ;;  %v7650_v39 = vmov 37  }
 0x7ff   : > { %v4811_v17 = vmul.f32 %v4809_v10, %v11492_v43  ;;  %v4830_v19 = vmul.f32 %v4827_v51, %v4825_v49  ;;  %v4936_v49 = vrot.slane %v4928_v24, %v9833_v20 }
 0x801   : > { %v4814_v50 = vcombine.low %v4810_v32, %v4811_v17  ;;  %v4833_v34 = vcombine.low %v4829_v38, %v4830_v19  ;;  %v5718_v32 = vld [vmem:[#allocation2 + $0x4] sm:$0xf]  ;;  %v7651_v38 = vmov 44   ;;  %v4940_v19 = vmul.f32 %v11491_v57, %v4936_v49 }
 0x802   : > { %7049 = vset.pattern.permute.xlu0 %v7633_v25  ;;  %5173 = vrot.lane.b32.xlu1 %v10419_v1, %s7629_s12  ;;  %v7652_v25 = vmov 23   ;;  %v7659_v49 = vmov 59  }
 0x803   : > { %5235 = vperm.xlu0 %7049, %v5232_v15   ;;  %4816 = vst [vmem:[%s7920_s29] sm:$0xff] %v4814_v50  ;;  %6423 = vst [vmem:[%s7920_s29 + $0x8] sm:$0xff] %v4833_v34  ;;  %v4978_v15 = vrot.slane %v4970_v26, %v9833_v20  ;;  %v7657_v26 = vmov 52  }
 0x806   : > { %5175 = vrot.lane.b32.xlu1 %v10429_v42, %s7629_s12 }
 0x807   : > { %5286 = vrot.lane.b32.xlu0 %v11491_v57, %s7634_s18 }
 0x808   : > { %7051 = vset.pattern.permute.xlu0 %v7635_v2 }
 0x80a   : > { %5197 = vrot.lane.b32.xlu1 %v10436_v30, %s7626_s9 }
 0x80b   : > { %5301 = vperm.xlu0 %7051, %v5298_v37  }
 0x80e   : > { %5199 = vrot.lane.b32.xlu1 %v11490_v56, %s7626_s9 }
 0x80f   : > { %7052 = vset.pattern.permute.xlu0 %v7636_v11 }
 0x810   : > { %5326 = vperm.xlu0 %7052, %v5323_v22   ;;  %v5742_v22 = vld [vmem:[#allocation2 + $0x4] sm:$0xf] }
 0x812   : > { %5221 = vrot.lane.b32.xlu1 %v10436_v30, %s7629_s12 }
 0x814   : > { %7053 = vset.pattern.permute.xlu0 %v7637_v23 }
 0x815   : > { %5350 = vperm.xlu0 %7053, %v5347_v45   ;;  %v4981_v45 = vmul.f32 %v10419_v1, %v4978_v15 }
 0x816   : > { %5223 = vrot.lane.b32.xlu1 %v11490_v56, %s7629_s12 }
 0x819   : > { %7054 = vset.pattern.permute.xlu0 %v7638_v18 }
 0x81a   : > { %5374 = vperm.xlu0 %7054, %v5371_v52   ;;  %5245 = vrot.lane.b32.xlu1 %v10483_v44, %s7626_s9  ;;  %v7653_v52 = vmov 51  }
 0x81e   : > { %7055 = vset.pattern.permute.xlu0 %v7639_v54  ;;  %5276 = vperm.xlu1 %7050, %v5273_v7  }
 0x81f   : > { %5398 = vperm.xlu0 %7055, %v5395_v48  }
 0x822   : > { %5288 = vrot.lane.b32.xlu1 %v10415_v60, %s7634_s18 }
 0x823   : > { %7056 = vset.pattern.permute.xlu0 %v7640_v3  ;;  %7057 = vset.pattern.permute.xlu1 %v7641_v61 }
 0x824   : > { %5422 = vperm.xlu0 %7056, %v5419_v46   ;;  %v5881_v46 = vld [vmem:[#allocation2 + $0x4] sm:$0xf] }
 0x826   : > { %5311 = vrot.lane.b32.xlu1 %v11491_v57, %s7642_s8 }
 0x828   : > { %5473 = vrot.lane.b32.xlu0 %v11491_v57, %s7595_s22 }
 0x829   : > { %7058 = vset.pattern.permute.xlu0 %v7643_v8  ;;  %v7654_v8 = vmov 38  }
 0x82a   : > { %5313 = vrot.lane.b32.xlu1 %v10415_v60, %s7642_s8 }
 0x82c   : > { %5487 = vperm.xlu0 %7058, %v5484_v9  }
 0x82e   : > { %5336 = vrot.lane.b32.xlu1 %v10419_v1, %s7634_s18 }
 0x830   : > { %7059 = vset.pattern.permute.xlu0 %v7644_v13 }
 0x831   : > { %5511 = vperm.xlu0 %7059, %v5508_v47  }
 0x832   : > { %5338 = vrot.lane.b32.xlu1 %v10429_v42, %s7634_s18 }
 0x835   : > { %7060 = vset.pattern.permute.xlu0 %v7645_v59 }
 0x836   : > { %5535 = vperm.xlu0 %7060, %v5532_v63   ;;  %5360 = vrot.lane.b32.xlu1 %v10419_v1, %s7642_s8 }
 0x83a   : > { %7061 = vset.pattern.permute.xlu0 %v7646_v21  ;;  %5362 = vrot.lane.b32.xlu1 %v10429_v42, %s7642_s8 }
 0x83b   : > { %5559 = vperm.xlu0 %7061, %v5556_v36   ;;  %v5905_v36 = vld [vmem:[#allocation2 + $0x4] sm:$0xf] }
 0x83e   : > { %5384 = vrot.lane.b32.xlu1 %v10436_v30, %s7634_s18 }
 0x83f   : > { %7062 = vset.pattern.permute.xlu0 %v7647_v16  ;;  %v7655_v16 = vmov 45  }
 0x840   : > { %5583 = vperm.xlu0 %7062, %v5580_v14  }
 0x842   : > { %5386 = vrot.lane.b32.xlu1 %v11490_v56, %s7634_s18 }
 0x844   : > { %7063 = vset.pattern.permute.xlu0 %v7648_v28 }
 0x845   : > { %5607 = vperm.xlu0 %7063, %v5604_v41  }
 0x846   : > { %5408 = vrot.lane.b32.xlu1 %v10436_v30, %s7642_s8  ;;  %v4958_v40 = vpop.permute.xlu0 %4957 }
 0x847   : > { %v4960_v12 = vrot.slane %v4958_v40, 4 }
 0x848   : > { %v4998_v33 = vpop.permute.xlu1 %4997 }
 0x849   : > { %5658 = vrot.lane.b32.xlu0 %v11491_v57, %s7543_s17  ;;  %v4961_v6 = vsel %vm3328_vm0, %v4959_v0, %v4960_v12  ;;  %v5001_v17 = vrot.slane %v4998_v33, 4 }
 0x84a   : > { %5410 = vrot.lane.b32.xlu1 %v11490_v56, %s7642_s8  ;;  %7065 = vset.pattern.permute.xlu0 %v7649_v55  ;;  %v4962_v10 = vsel %vm3532_vm10, %v4956_v27, %v4961_v6  ;;  %v5929_v55 = vld [vmem:[#allocation2 + $0x4] sm:$0xf] }
 0x84b   : > { %v4964_v43 = vmul.f32 %v4962_v10, %v4954_v62 }
 0x84c   : > { %v5000_v51 = vpop.permute.xlu1 %4999 }
 0x84d   : > { %5672 = vperm.xlu0 %7065, %v5669_v31   ;;  %v5002_v29 = vrot.slane %v5000_v51, 4  ;;  %v4965_v37 = vadd.f32 %v4964_v43, %v4940_v19 }
 0x84e   : > { %5432 = vrot.lane.b32.xlu1 %v10483_v44, %s7634_s18 }
 0x84f   : > { %v5003_v50 = vsel %vm3328_vm0, %v5001_v17, %v5002_v29  ;;  %v4982_v7 = vadd.f32 %v4981_v45, %v4965_v37 }
 0x850   : > { %v5004_v11 = vsel %vm3532_vm10, %v4998_v33, %v5003_v50 }
 0x851   : > { %7066 = vset.pattern.permute.xlu0 %v7650_v39 }
 0x852   : > { %5697 = vperm.xlu0 %7066, %v5694_v35   ;;  %5463 = vperm.xlu1 %7057, %v5460_v4  }
 0x856   : > { %7067 = vset.pattern.permute.xlu0 %v7651_v38  ;;  %5475 = vrot.lane.b32.xlu1 %v10415_v60, %s7595_s22 }
 0x857   : > { %5721 = vperm.xlu0 %7067, %v5718_v32   ;;  %v4987_v34 = vpop.permute.xlu0 %4986  ;;  %7064 = vset.pattern.permute.xlu1 %v7652_v25 }
 0x858   : > { %v4995_v2 = vrot.slane %v4987_v34, %v9833_v20 }
 0x85a   : > { %5497 = vrot.lane.b32.xlu1 %v11491_v57, %s7600_s2  ;;  %v5006_v23 = vmul.f32 %v5004_v11, %v4995_v2 }
 0x85b   : > { %7068 = vset.pattern.permute.xlu0 %v7653_v52 }
 0x85c   : > { %5745 = vperm.xlu0 %7068, %v5742_v22   ;;  %v5012_v18 = vpop.permute.xlu0 %5011  ;;  %v5007_v3 = vadd.f32 %v5006_v23, %v4982_v7  ;;  %v5953_v22 = vld [vmem:[#allocation2 + $0x4] sm:$0xf] }
 0x85d   : > { %v5020_v48 = vrot.slane %v5012_v18, %v9833_v20  ;;  %v5029_v54 = vpop.permute.xlu1 %5028  ;;  %v5645_v18 = vld [vmem:[#allocation2 + $0x4] sm:$0xf] }
 0x85e   : > { %5499 = vrot.lane.b32.xlu1 %v10415_v60, %s7600_s2  ;;  %v5037_v53 = vrot.slane %v5029_v54, %v9833_v20 }
 0x85f   : > { %v5023_v61 = vmul.f32 %v10436_v30, %v5020_v48 }
 0x860   : > { %7071 = vset.pattern.permute.xlu0 %v7654_v8  ;;  %v5041_v9 = vpop.permute.xlu0 %5040  ;;  %v7662_v8 = vmov 60  }
 0x861   : > { %v5024_v47 = vadd.f32 %v5023_v61, %v5007_v3  ;;  %5884 = vperm.xlu0 %7071, %v5881_v46   ;;  %v5039_v13 = vpop.permute.xlu1 %5038  ;;  %v5043_v63 = vrot.slane %v5041_v9, 4 }
 0x862   : > { %v5042_v59 = vrot.slane %v5039_v13, 4  ;;  %5521 = vrot.lane.b32.xlu1 %v10419_v1, %s7595_s22 }
 0x864   : > { %v5044_v21 = vsel %vm3328_vm0, %v5042_v59, %v5043_v63  ;;  %v5090_v33 = vpop.permute.xlu0 %5089  ;;  %v7663_v59 = vmov 24  }
 0x865   : > { %v5045_v14 = vsel %vm3532_vm10, %v5039_v13, %v5044_v21  ;;  %7074 = vset.pattern.permute.xlu0 %v7655_v16  ;;  %v10538_v27 = vpop.permute.xlu1 %5052  ;;  %vm5131_vm10 = vcmask 490496   ;;  %v5098_v51 = vrot.slane %v5090_v33, %v9833_v20 }
 0x866   : > { %v5047_v41 = vmul.f32 %v5045_v14, %v5037_v53  ;;  %5908 = vperm.xlu0 %7074, %v5905_v36   ;;  %5523 = vrot.lane.b32.xlu1 %v10429_v42, %s7595_s22 }
 0x868   : > { %v10542_v24 = vadd.f32 %v5047_v41, %v5024_v47 }
 0x869   : > { %v5100_v28 = vpop.permute.xlu1 %5099  ;;  %v5115_v35 = vpop.permute.xlu0 %5114 }
 0x86a   : > { %5846 = vrot.lane.b32.xlu0 %v10415_v60, %s7656_s23  ;;  %5545 = vrot.lane.b32.xlu1 %v10419_v1, %s7600_s2  ;;  %v5103_v0 = vrot.slane %v5100_v28, 4  ;;  %v5123_v62 = vrot.slane %v5115_v35, %v9833_v20 }
 0x86b   : > { %7077 = vset.pattern.permute.xlu0 %v7657_v26 }
 0x86d   : > { %v5102_v40 = vpop.permute.xlu1 %5101 }
 0x86e   : > { %5871 = vrot.lane.b32.xlu0 %v10415_v60, %s7658_s19  ;;  %5547 = vrot.lane.b32.xlu1 %v10429_v42, %s7600_s2  ;;  %v5104_v31 = vrot.slane %v5102_v40, 4  ;;  %v5140_v50 = vpop.permute.xlu0 %5139 }
 0x86f   : > { %v5148_v25 = vrot.slane %v5140_v50, %v9833_v20 }
 0x870   : > { %v5105_v6 = vsel %vm3328_vm0, %v5103_v0, %v5104_v31 }
 0x871   : > { %v5125_v12 = vpop.permute.xlu1 %5124  ;;  %v5107_v29 = vsel %vm5106_vm14, %v5100_v28, %v5105_v6  ;;  %v6140_v28 = vld [vmem:[#allocation2 + $0x4] sm:$0xf] }
 0x872   : > { %5932 = vperm.xlu0 %7077, %v5929_v55   ;;  %5569 = vrot.lane.b32.xlu1 %v10436_v30, %s7595_s22  ;;  %v5128_v39 = vrot.slane %v5125_v12, 4  ;;  %v5109_v19 = vmul.f32 %v5107_v29, %v5098_v51  ;;  %v5067_v29 = vld [vmem:[#allocation7 + $0x25] ss:$8 sm:$0x3] }
 0x873   : > { %v5164_v48 = vpop.permute.xlu0 %5163 }
 0x874   : > { %v5172_v46 = vrot.slane %v5164_v48, %v9833_v20 }
 0x875   : > { %v5127_v4 = vpop.permute.xlu1 %5126 }
 0x876   : > { %v5129_v10 = vrot.slane %v5127_v4, 4  ;;  %5896 = vrot.lane.b32.xlu0 %v10429_v42, %s7656_s23  ;;  %5571 = vrot.lane.b32.xlu1 %v11490_v56, %s7595_s22 }
 0x877   : > { %7080 = vset.pattern.permute.xlu0 %v7659_v49 }
 0x878   : > { %v5130_v32 = vsel %vm3328_vm0, %v5128_v39, %v5129_v10  ;;  %v5188_v53 = vpop.permute.xlu0 %5187 }
 0x879   : > { %v5132_v43 = vsel %vm5131_vm10, %v5125_v12, %v5130_v32  ;;  %v5150_v17 = vpop.permute.xlu1 %5149  ;;  %v5196_v14 = vrot.slane %v5188_v53, %v9833_v20  ;;  %v5061_v12 = vrot.slane %v10538_v27, %v9833_v20  ;;  %v5856_v53 = vld [vmem:[#allocation2 + $0x4] sm:$0xf] }
 0x87a   : > { %v5134_v38 = vmul.f32 %v5132_v43, %v5123_v62  ;;  %6033 = vrot.lane.b32.xlu0 %v10415_v60, %s7660_s30  ;;  %5593 = vrot.lane.b32.xlu1 %v10436_v30, %s7600_s2  ;;  %v5153_v2 = vrot.slane %v5150_v17, 4  ;;  %v7665_v62 = vmov 67  }
 0x87c   : > { %v5135_v15 = vadd.f32 %v5134_v38, %v5109_v19  ;;  %v5254_v38 = vld [vmem:[#allocation7 + $0x26] ss:$8 sm:$0x3]  ;;  %v6164_v19 = vld [vmem:[#allocation2 + $0x4] sm:$0xf] }
 0x87d   : > { %v5152_v34 = vpop.permute.xlu1 %5151  ;;  %v5212_v31 = vpop.permute.xlu0 %5211 }
 0x87e   : > { %v5154_v37 = vrot.slane %v5152_v34, 4  ;;  %6058 = vrot.lane.b32.xlu0 %v10415_v60, %s7661_s16  ;;  %5595 = vrot.lane.b32.xlu1 %v11490_v56, %s7600_s2  ;;  %v5220_v35 = vrot.slane %v5212_v31, %v9833_v20 }
 0x880   : > { %v5155_v11 = vsel %vm3328_vm0, %v5153_v2, %v5154_v37  ;;  %v5072_v37 = vrot.slane %v5067_v29, %v9874_v5 }
 0x881   : > { %v5174_v45 = vpop.permute.xlu1 %5173  ;;  %v5156_v23 = vsel %vm5106_vm14, %v5150_v17, %v5155_v11 }
 0x882   : > { %5956 = vperm.xlu0 %7080, %v5953_v22   ;;  %5617 = vrot.lane.b32.xlu1 %v10483_v44, %s7595_s22  ;;  %v5158_v52 = vmul.f32 %v5156_v23, %v5148_v25  ;;  %v5177_v3 = vrot.slane %v5174_v45, 4  ;;  %s7664_s22 = smov 48   ;;  %v5236_v10 = vpop.permute.xlu0 %5235  ;;  %v5259_v22 = vrot.slane %v5254_v38, %v9874_v5 }
 0x883   : > { %v5244_v32 = vrot.slane %v5236_v10, %v9833_v20 }
 0x884   : > { %v5159_v7 = vadd.f32 %v5158_v52, %v5135_v15 }
 0x885   : > { %v5176_v54 = vpop.permute.xlu1 %5175 }
 0x886   : > { %v5178_v61 = vrot.slane %v5176_v54, 4  ;;  %5757 = vrot.lane.b32.xlu0 %v11490_v56, %s7543_s17  ;;  %5648 = vperm.xlu1 %7064, %v5645_v18  }
 0x887   : > { %7083 = vset.pattern.permute.xlu0 %v7662_v8 }
 0x888   : > { %v5179_v9 = vsel %vm3328_vm0, %v5177_v3, %v5178_v61  ;;  %v5831_v3 = vld [vmem:[#allocation2 + $0x4] sm:$0xf] }
 0x889   : > { %v5180_v47 = vsel %vm5131_vm10, %v5174_v45, %v5179_v9  ;;  %v5198_v13 = vpop.permute.xlu1 %5197  ;;  %v5076_v45 = vrot.slane %v5067_v29, %v11478_v58 }
 0x88a   : > { %v5182_v63 = vmul.f32 %v5180_v47, %v5172_v46  ;;  %5920 = vrot.lane.b32.xlu0 %v10429_v42, %s7658_s19  ;;  %5660 = vrot.lane.b32.xlu1 %v10415_v60, %s7543_s17  ;;  %v5201_v16 = vrot.slane %v5198_v13, 4  ;;  %v5287_v46 = vpop.permute.xlu0 %5286 }
 0x88b   : > { %7069 = vset.pattern.permute.xlu1 %v7663_v59 }
 0x88c   : > { %v5183_v36 = vadd.f32 %v5182_v63, %v5159_v7  ;;  %v5290_v63 = vrot.slane %v5287_v46, 4 }
 0x88d   : > { %v5200_v21 = vpop.permute.xlu1 %5199 }
 0x88e   : > { %v5202_v41 = vrot.slane %v5200_v21, 4  ;;  %6083 = vrot.lane.b32.xlu0 %v10429_v42, %s7660_s30  ;;  %5682 = vrot.lane.b32.xlu1 %v11491_v57, %s7664_s22  ;;  %v5302_v21 = vpop.permute.xlu0 %5301 }
 0x890   : > { %v5203_v26 = vsel %vm3328_vm0, %v5201_v16, %v5202_v41  ;;  %v5310_v16 = vrot.slane %v5302_v21, %v9833_v20 }
 0x891   : > { %v5222_v40 = vpop.permute.xlu1 %5221  ;;  %v5204_v33 = vsel %vm5106_vm14, %v5198_v13, %v5203_v26  ;;  %v7666_v26 = vmov 31  }
 0x892   : > { %6143 = vperm.xlu0 %7083, %v6140_v28   ;;  %5684 = vrot.lane.b32.xlu1 %v10415_v60, %s7664_s22  ;;  %v5206_v55 = vmul.f32 %v5204_v33, %v5196_v14  ;;  %v5225_v4 = vrot.slane %v5222_v40, 4  ;;  %v5064_v60 = vmul.f32 %v10483_v44, %v5061_v12 }
 0x894   : > { %v5207_v0 = vadd.f32 %v5206_v55, %v5183_v36  ;;  %v5065_v15 = vadd.f32 %v5064_v60, %v10542_v24  ;;  %v5263_v24 = vrot.slane %v5254_v38, %v11478_v58 }
 0x895   : > { %v5224_v6 = vpop.permute.xlu1 %5223 }
 0x896   : > { %v5226_v51 = vrot.slane %v5224_v6, 4  ;;  %5942 = vrot.lane.b32.xlu0 %v10436_v30, %s7656_s23  ;;  %5707 = vrot.lane.b32.xlu1 %v10419_v1, %s7543_s17  ;;  %v5080_v23 = vcombine.high %v5065_v15, %v5065_v15  ;;  %v5082_v7 = vmul.f32 %v5072_v37, %v5065_v15 }
 0x897   : > { %7084 = vset.pattern.permute.xlu0 %v7665_v62  ;;  %v5327_v62 = vpop.permute.xlu0 %5326 }
 0x898   : > { %v5227_v39 = vsel %vm3328_vm0, %v5225_v4, %v5226_v51  ;;  %v5083_v61 = vmul.f32 %v5080_v23, %v5076_v45  ;;  %v7667_v4 = vmov 25  }
 0x899   : > { %v5228_v27 = vsel %vm5131_vm10, %v5222_v40, %v5227_v39  ;;  %v5246_v49 = vpop.permute.xlu1 %5245  ;;  %v5335_v39 = vrot.slane %v5327_v62, %v9833_v20  ;;  %v7672_v62 = vmov 65  }
 0x89a   : > { %v5230_v43 = vmul.f32 %v5228_v27, %v5220_v35  ;;  %v5247_v17 = vrot.slane %v5246_v49, 4  ;;  %6105 = vrot.lane.b32.xlu0 %v10419_v1, %s7661_s16  ;;  %5709 = vrot.lane.b32.xlu1 %v10429_v42, %s7543_s17 }
 0x89c   : > { %v5231_v50 = vadd.f32 %v5230_v43, %v5207_v0  ;;  %v5248_v34 = vsel %vm3328_vm0, %v5247_v17, %v5202_v41  ;;  %v6018_v0 = vld [vmem:[#allocation2 + $0x4] sm:$0xf] }
 0x89d   : > { %v5249_v25 = vsel %vm5106_vm14, %v5246_v49, %v5248_v34  ;;  %v5277_v2 = vpop.permute.xlu1 %5276  ;;  %v6043_v49 = vld [vmem:[#allocation2 + $0x4] sm:$0xf]  ;;  %v7669_v34 = vmov 39  }
 0x89e   : > { %v5251_v11 = vmul.f32 %v5249_v25, %v5244_v32  ;;  %6167 = vperm.xlu0 %7084, %v6164_v19   ;;  %5731 = vrot.lane.b32.xlu1 %v10419_v1, %s7664_s22  ;;  %v5285_v33 = vrot.slane %v5277_v2, %v9833_v20  ;;  %v7668_v32 = vmov 32   ;;  %v6068_v19 = vld [vmem:[#allocation2 + $0x4] sm:$0xf] }
 0x8a0   : > { %v5252_v52 = vadd.f32 %v5251_v11, %v5231_v50  ;;  %v5351_v50 = vpop.permute.xlu0 %5350 }
 0x8a1   : > { %v5289_v18 = vpop.permute.xlu1 %5288  ;;  %v5359_v2 = vrot.slane %v5351_v50, %v9833_v20 }
 0x8a2   : > { %v5267_v48 = vcombine.high %v5252_v52, %v5252_v52  ;;  %v5269_v54 = vmul.f32 %v5259_v22, %v5252_v52  ;;  %5968 = vrot.lane.b32.xlu0 %v11490_v56, %s7658_s19  ;;  %5733 = vrot.lane.b32.xlu1 %v10429_v42, %s7664_s22  ;;  %v5291_v47 = vrot.slane %v5289_v18, 4  ;;  %v7670_v52 = vmov 58  }
 0x8a4   : > { %v5270_v8 = vmul.f32 %v5267_v48, %v5263_v24  ;;  %v10623_v9 = vadd.f32 %v5269_v54, %v5082_v7  ;;  %v5292_v36 = vsel %vm3328_vm0, %v5290_v63, %v5291_v47  ;;  %v5375_v7 = vpop.permute.xlu0 %5374 }
 0x8a5   : > { %v5312_v13 = vpop.permute.xlu1 %5311  ;;  %v5294_v40 = vsel %vm5293_vm12, %v5287_v46, %v5292_v36  ;;  %v5383_v54 = vrot.slane %v5375_v7, %v9833_v20 }
 0x8a6   : > { %v10625_v59 = vadd.f32 %v5270_v8, %v5083_v61  ;;  %6131 = vrot.lane.b32.xlu0 %v11490_v56, %s7660_s30  ;;  %5834 = vperm.xlu1 %7069, %v5831_v3   ;;  %v5315_v41 = vrot.slane %v5312_v13, 4  ;;  %v5296_v35 = vmul.f32 %v5294_v40, %v5285_v33  ;;  %v5766_v61 = vld [vmem:[#allocation2 + $0x4] sm:$0xf] }
 0x8a8   : > { %v5399_v36 = vpop.permute.xlu0 %5398 }
 0x8a9   : > { %v5314_v14 = vpop.permute.xlu1 %5313 }
 0x8aa   : > { %v5316_v28 = vrot.slane %v5314_v14, 4  ;;  %7070 = vset.pattern.permute.xlu1 %v7666_v26  ;;  %6153 = vrot.lane.b32.xlu0 %v10436_v30, %s7661_s16  ;;  %v7671_v26 = vmov 46  }
 0x8ab   : > { %5859 = vperm.xlu1 %7070, %v5856_v53   ;;  %v6092_v53 = vld [vmem:[#allocation2 + $0x4] sm:$0xf] }
 0x8ac   : > { %v5317_v55 = vsel %vm3328_vm0, %v5315_v41, %v5316_v28  ;;  %v5423_v33 = vpop.permute.xlu0 %5422 }
 0x8ad   : > { %v5319_v31 = vsel %vm5318_vm5, %v5312_v13, %v5317_v55  ;;  %v5337_v12 = vpop.permute.xlu1 %5336 }
 0x8ae   : > { %v5321_v6 = vmul.f32 %v5319_v31, %v5310_v16  ;;  %6177 = vrot.lane.b32.xlu0 %v10483_v44, %s7660_s30  ;;  %v5340_v10 = vrot.slane %v5337_v12, 4  ;;  %v5407_v16 = vrot.slane %v5399_v36, %v9833_v20 }
 0x8af   : > { %7072 = vset.pattern.permute.xlu1 %v7667_v4 }
 0x8b0   : > { %6021 = vperm.xlu1 %7072, %v6018_v0   ;;  %v5322_v51 = vadd.f32 %v5321_v6, %v5296_v35  ;;  %v5441_v35 = vld [vmem:[#allocation7 + $0x27] ss:$8 sm:$0x3] }
 0x8b1   : > { %v5339_v60 = vpop.permute.xlu1 %5338 }
 0x8b2   : > { %v5341_v27 = vrot.slane %v5339_v60, 4 }
 0x8b4   : > { %v5342_v29 = vsel %vm3328_vm0, %v5340_v10, %v5341_v27  ;;  %7073 = vset.pattern.permute.xlu1 %v7668_v32  ;;  %v5446_v10 = vrot.slane %v5441_v35, %v9874_v5 }
 0x8b5   : > { %6046 = vperm.xlu1 %7073, %v6043_v49   ;;  %v5361_v43 = vpop.permute.xlu1 %5360  ;;  %v5343_v17 = vsel %vm5293_vm12, %v5337_v12, %v5342_v29  ;;  %v5431_v12 = vrot.slane %v5423_v33, %v9833_v20  ;;  %v5474_v49 = vpop.permute.xlu0 %5473  ;;  %v5450_v29 = vrot.slane %v5441_v35, %v11478_v58 }
 0x8b6   : > { %v5345_v38 = vmul.f32 %v5343_v17, %v5335_v39  ;;  %v5364_v37 = vrot.slane %v5361_v43, 4  ;;  %v5477_v17 = vrot.slane %v5474_v49, 4 }
 0x8b8   : > { %v5346_v15 = vadd.f32 %v5345_v38, %v5322_v51 }
 0x8b9   : > { %7075 = vset.pattern.permute.xlu1 %v7669_v34  ;;  %v5363_v25 = vpop.permute.xlu1 %5362 }
 0x8ba   : > { %v5365_v22 = vrot.slane %v5363_v25, 4  ;;  %6071 = vperm.xlu1 %7075, %v6068_v19  }
 0x8bc   : > { %v5366_v11 = vsel %vm3328_vm0, %v5364_v37, %v5365_v22  ;;  %v5790_v37 = vld [vmem:[#allocation2 + $0x4] sm:$0xf] }
 0x8bd   : > { %v5367_v45 = vsel %vm5318_vm5, %v5361_v43, %v5366_v11  ;;  %v5385_v23 = vpop.permute.xlu1 %5384 }
 0x8be   : > { %v5369_v24 = vmul.f32 %v5367_v45, %v5359_v2  ;;  %5844 = vrot.lane.b32.xlu1 %v11491_v57, %s7656_s23  ;;  %v5388_v46 = vrot.slane %v5385_v23, 4  ;;  %v5488_v45 = vpop.permute.xlu0 %5487 }
 0x8bf   : > { %7076 = vset.pattern.permute.xlu1 %v7670_v52 }
 0x8c0   : > { %v5370_v18 = vadd.f32 %v5369_v24, %v5346_v15 }
 0x8c1   : > { %v5387_v48 = vpop.permute.xlu1 %5386 }
 0x8c2   : > { %v5389_v3 = vrot.slane %v5387_v48, 4  ;;  %5869 = vrot.lane.b32.xlu1 %v11491_v57, %s7658_s19  ;;  %v7673_v48 = vmov 53  }
 0x8c4   : > { %v5390_v8 = vsel %vm3328_vm0, %v5388_v46, %v5389_v3 }
 0x8c5   : > { %v5409_v47 = vpop.permute.xlu1 %5408  ;;  %v5391_v13 = vsel %vm5293_vm12, %v5385_v23, %v5390_v8 }
 0x8c6   : > { %5769 = vperm.xlu1 %7076, %v5766_v61   ;;  %v5393_v63 = vmul.f32 %v5391_v13, %v5383_v54  ;;  %v5412_v41 = vrot.slane %v5409_v47, 4  ;;  %v5512_v54 = vpop.permute.xlu0 %5511  ;;  %v7674_v13 = vmov 66  }
 0x8c8   : > { %v5394_v21 = vadd.f32 %v5393_v63, %v5370_v18  ;;  %v5496_v18 = vrot.slane %v5488_v45, %v9833_v20  ;;  %v5520_v63 = vrot.slane %v5512_v54, %v9833_v20 }
 0x8c9   : > { %v5411_v14 = vpop.permute.xlu1 %5410 }
 0x8ca   : > { %v5413_v28 = vrot.slane %v5411_v14, 4  ;;  %7078 = vset.pattern.permute.xlu1 %v7671_v26  ;;  %v5536_v36 = vpop.permute.xlu0 %5535 }
 0x8cb   : > { %6095 = vperm.xlu1 %7078, %v6092_v53  }
 0x8cc   : > { %v5414_v40 = vsel %vm3328_vm0, %v5412_v41, %v5413_v28 }
 0x8cd   : > { %v5415_v55 = vsel %vm5318_vm5, %v5409_v47, %v5414_v40  ;;  %v5433_v31 = vpop.permute.xlu1 %5432 }
 0x8ce   : > { %v5417_v0 = vmul.f32 %v5415_v55, %v5407_v16  ;;  %v5434_v6 = vrot.slane %v5433_v31, 4  ;;  %v5560_v26 = vpop.permute.xlu0 %5559  ;;  %v5977_v55 = vld [vmem:[#allocation2 + $0x4] sm:$0xf] }
 0x8cf   : > { %5894 = vrot.lane.b32.xlu1 %v10419_v1, %s7656_s23 }
 0x8d0   : > { %v5418_v4 = vadd.f32 %v5417_v0, %v5394_v21  ;;  %v5435_v51 = vsel %vm3328_vm0, %v5434_v6, %v5389_v3  ;;  %7079 = vset.pattern.permute.xlu1 %v7672_v62 }
 0x8d1   : > { %v5436_v60 = vsel %vm5293_vm12, %v5433_v31, %v5435_v51  ;;  %v5464_v39 = vpop.permute.xlu1 %5463  ;;  %v5544_v31 = vrot.slane %v5536_v36, %v9833_v20 }
 0x8d2   : > { %v5438_v27 = vmul.f32 %v5436_v60, %v5431_v12  ;;  %v5472_v25 = vrot.slane %v5464_v39, %v9833_v20  ;;  %v5584_v51 = vpop.permute.xlu0 %5583 }
 0x8d3   : > { %6031 = vrot.lane.b32.xlu1 %v11491_v57, %s7660_s30 }
 0x8d4   : > { %v5439_v32 = vadd.f32 %v5438_v27, %v5418_v4 }
 0x8d5   : > { %v5476_v43 = vpop.permute.xlu1 %5475 }
 0x8d6   : > { %v5454_v38 = vcombine.high %v5439_v32, %v5439_v32  ;;  %v5456_v19 = vmul.f32 %v5446_v10, %v5439_v32  ;;  %v5478_v15 = vrot.slane %v5476_v43, 4 }
 0x8d7   : > { %6056 = vrot.lane.b32.xlu1 %v11491_v57, %s7661_s16  ;;  %v6116_v57 = vld [vmem:[#allocation2 + $0x4] sm:$0xf] }
 0x8d8   : > { %v5457_v50 = vmul.f32 %v5454_v38, %v5450_v29  ;;  %v10667_v34 = vadd.f32 %v5456_v19, %v10623_v9  ;;  %v5479_v2 = vsel %vm3328_vm0, %v5477_v17, %v5478_v15  ;;  %v5592_v15 = vrot.slane %v5584_v51, %v9833_v20 }
 0x8d9   : > { %v5480_v22 = vsel %vm4213_vm6, %v5474_v49, %v5479_v2  ;;  %v5498_v11 = vpop.permute.xlu1 %5497  ;;  %v5608_v49 = vpop.permute.xlu0 %5607 }
 0x8da   : > { %v10673_v23 = vadd.f32 %v5457_v50, %v10625_v59  ;;  %v5482_v24 = vmul.f32 %v5480_v22, %v5472_v25  ;;  %v5501_v9 = vrot.slane %v5498_v11, 4  ;;  %v5616_v45 = vrot.slane %v5608_v49, %v9833_v20 }
 0x8db   : > { %5793 = vperm.xlu1 %7079, %v5790_v37  }
 0x8dd   : > { %v5500_v52 = vpop.permute.xlu1 %5499  ;;  %v5659_v50 = vpop.permute.xlu0 %5658 }
 0x8de   : > { %v5502_v7 = vrot.slane %v5500_v52, 4 }
 0x8df   : > { %7081 = vset.pattern.permute.xlu1 %v7673_v48 }
 0x8e0   : > { %v5503_v46 = vsel %vm3328_vm0, %v5501_v9, %v5502_v7  ;;  %6119 = vperm.xlu1 %7081, %v6116_v57  }
 0x8e1   : > { %v5504_v3 = vsel %vm4313_vm13, %v5498_v11, %v5503_v46  ;;  %v5522_v61 = vpop.permute.xlu1 %5521 }
 0x8e2   : > { %v5506_v8 = vmul.f32 %v5504_v3, %v5496_v18  ;;  %v5525_v53 = vrot.slane %v5522_v61, 4  ;;  %v5626_v18 = vld [vmem:[#allocation7 + $0x30] ss:$8 sm:$0x3] }
 0x8e4   : > { %v5507_v59 = vadd.f32 %v5506_v8, %v5482_v24  ;;  %5755 = vrot.lane.b32.xlu1 %v10436_v30, %s7543_s17  ;;  %v5673_v24 = vpop.permute.xlu0 %5672 }
 0x8e5   : > { %v5524_v47 = vpop.permute.xlu1 %5523  ;;  %7082 = vset.pattern.permute.xlu1 %v7674_v13 }
 0x8e6   : > { %v5526_v21 = vrot.slane %v5524_v47, 4  ;;  %v5662_v47 = vrot.slane %v5659_v50, 4 }
 0x8e8   : > { %v5527_v14 = vsel %vm3328_vm0, %v5525_v53, %v5526_v21  ;;  %5918 = vrot.lane.b32.xlu1 %v10419_v1, %s7658_s19  ;;  %v5698_v3 = vpop.permute.xlu0 %5697 }
 0x8e9   : > { %v5528_v16 = vsel %vm4213_vm6, %v5522_v61, %v5527_v14  ;;  %v5546_v41 = vpop.permute.xlu1 %5545  ;;  %v5635_v61 = vrot.slane %v5626_v18, %v11478_v58 }
 0x8ea   : > { %v5530_v28 = vmul.f32 %v5528_v16, %v5520_v63  ;;  %v5549_v12 = vrot.slane %v5546_v41, 4 }
 0x8ec   : > { %v5531_v40 = vadd.f32 %v5530_v28, %v5507_v59  ;;  %6081 = vrot.lane.b32.xlu1 %v10419_v1, %s7660_s30  ;;  %v5568_v1 = vrot.slane %v5560_v26, %v9833_v20  ;;  %v5722_v26 = vpop.permute.xlu0 %5721 }
 0x8ed   : > { %v5548_v33 = vpop.permute.xlu1 %5547 }
 0x8ee   : > { %v5550_v0 = vrot.slane %v5548_v33, 4 }
 0x8f0   : > { %v5551_v6 = vsel %vm3328_vm0, %v5549_v12, %v5550_v0  ;;  %5980 = vperm.xlu1 %7082, %v5977_v55   ;;  %v5681_v55 = vrot.slane %v5673_v24, %v9833_v20  ;;  %v10727_v0 = vpop.permute.xlu0 %5745 }
 0x8f1   : > { %v5552_v35 = vsel %vm4313_vm13, %v5546_v41, %v5551_v6  ;;  %v5570_v4 = vpop.permute.xlu1 %5569 }
 0x8f2   : > { %v5554_v62 = vmul.f32 %v5552_v35, %v5544_v31  ;;  %v5573_v10 = vrot.slane %v5570_v4, 4 }
 0x8f4   : > { %v5555_v60 = vadd.f32 %v5554_v62, %v5531_v40  ;;  %5779 = vrot.lane.b32.xlu1 %v10436_v30, %s7664_s22  ;;  %v5885_v62 = vpop.permute.xlu0 %5884 }
 0x8f5   : > { %v5572_v39 = vpop.permute.xlu1 %5571 }
 0x8f6   : > { %v5574_v27 = vrot.slane %v5572_v39, 4 }
 0x8f8   : > { %v5575_v29 = vsel %vm3328_vm0, %v5573_v10, %v5574_v27  ;;  %5781 = vrot.lane.b32.xlu1 %v11490_v56, %s7664_s22 }
 0x8f9   : > { %v5576_v32 = vsel %vm4213_vm6, %v5570_v4, %v5575_v29  ;;  %v5594_v43 = vpop.permute.xlu1 %5593  ;;  %v10736_v29 = vpop.permute.xlu0 %5908 }
 0x8fa   : > { %v5578_v17 = vmul.f32 %v5576_v32, %v5568_v1  ;;  %v5597_v25 = vrot.slane %v5594_v43, 4 }
 0x8fc   : > { %5944 = vrot.lane.b32.xlu1 %v11490_v56, %s7656_s23  ;;  %v5579_v38 = vadd.f32 %v5578_v17, %v5555_v60 }
 0x8fd   : > { %v5596_v19 = vpop.permute.xlu1 %5595 }
 0x8fe   : > { %v5598_v2 = vrot.slane %v5596_v19, 4 }
 0x900   : > { %v5599_v37 = vsel %vm3328_vm0, %v5597_v25, %v5598_v2  ;;  %6107 = vrot.lane.b32.xlu1 %v10429_v42, %s7661_s16  ;;  %v5631_v42 = vrot.slane %v5626_v18, %v9874_v5  ;;  %v5847_v25 = vpop.permute.xlu0 %5846 }
 0x901   : > { %v5600_v22 = vsel %vm4313_vm13, %v5594_v43, %v5599_v37  ;;  %v5618_v11 = vpop.permute.xlu1 %5617  ;;  %vm5689_vm13 = vcmask 392192   ;;  %v5730_v43 = vrot.slane %v5722_v26, %v9833_v20 }
 0x902   : > { %v5602_v52 = vmul.f32 %v5600_v22, %v5592_v15  ;;  %v5619_v57 = vrot.slane %v5618_v11, 4 }
 0x904   : > { %v5603_v9 = vadd.f32 %v5602_v52, %v5579_v38  ;;  %v5620_v7 = vsel %vm3328_vm0, %v5619_v57, %v5574_v27  ;;  %5803 = vrot.lane.b32.xlu1 %v10483_v44, %s7543_s17  ;;  %s6424_s17 = sld [smem:[#allocation6 + $0x3]] }
 0x905   : > { %v5621_v48 = vsel %vm4213_vm6, %v5618_v11, %v5620_v7  ;;  %v5649_v54 = vpop.permute.xlu1 %5648  ;;  %vm11493_vm6 = vcmask 916480   ;;  %v5872_v11 = vpop.permute.xlu0 %5871  ;;  %v5849_v7 = vrot.slane %v5847_v25, 4 }
 0x906   : > { %v5623_v46 = vmul.f32 %v5621_v48, %v5616_v45  ;;  %v5657_v14 = vrot.slane %v5649_v54, %v9833_v20  ;;  %vm11494_vm3 = vmmov %vm11493_vm6 }
 0x907   : > { %vm11495_vm2 = vmmov %vm11494_vm3 }
 0x908   : > { %v5624_v8 = vadd.f32 %v5623_v46, %v5603_v9  ;;  %5966 = vrot.lane.b32.xlu1 %v10436_v30, %s7658_s19  ;;  %vm11496_vm9 = vmmov %vm11495_vm2 }
 0x909   : > { %v5661_v59 = vpop.permute.xlu1 %5660  ;;  %v10743_v24 = vpop.permute.xlu0 %5932 }
 0x90a   : > { %v5639_v13 = vcombine.high %v5624_v8, %v5624_v8  ;;  %v5641_v63 = vmul.f32 %v5631_v42, %v5624_v8  ;;  %v5663_v36 = vrot.slane %v5661_v59, 4  ;;  %v5874_v8 = vrot.slane %v5872_v11, 4 }
 0x90c   : > { %v5642_v53 = vmul.f32 %v5639_v13, %v5635_v61  ;;  %v10714_v21 = vadd.f32 %v5641_v63, %v10667_v34  ;;  %v5664_v16 = vsel %vm3328_vm0, %v5662_v47, %v5663_v36  ;;  %6129 = vrot.lane.b32.xlu1 %v10436_v30, %s7660_s30 }
 0x90d   : > { %v5665_v41 = vsel %vm11493_vm6, %v5659_v50, %v5664_v16  ;;  %v5683_v28 = vpop.permute.xlu1 %5682  ;;  %v5897_v57 = vpop.permute.xlu0 %5896 }
 0x90e   : > { %v10722_v40 = vadd.f32 %v5642_v53, %v10673_v23  ;;  %v5667_v33 = vmul.f32 %v5665_v41, %v5657_v14  ;;  %v5686_v31 = vrot.slane %v5683_v28, 4 }
 0x910   : > { %5990 = vrot.lane.b32.xlu1 %v10483_v44, %s7656_s23  ;;  %v5706_v44 = vrot.slane %v5698_v3, %v9833_v20 }
 0x911   : > { %v5685_v34 = vpop.permute.xlu1 %5684  ;;  %v6034_v48 = vpop.permute.xlu0 %6033 }
 0x912   : > { %v5687_v12 = vrot.slane %v5685_v34, 4  ;;  %v5899_v34 = vrot.slane %v5897_v57, 4 }
 0x914   : > { %v5688_v30 = vsel %vm3328_vm0, %v5686_v31, %v5687_v12  ;;  %6155 = vrot.lane.b32.xlu1 %v11490_v56, %s7661_s16  ;;  %v5893_v12 = vrot.slane %v5885_v62, %v9833_v20 }
 0x915   : > { %v5690_v23 = vsel %vm5689_vm13, %v5683_v28, %v5688_v30  ;;  %v5708_v6 = vpop.permute.xlu1 %5707  ;;  %v6059_v13 = vpop.permute.xlu0 %6058 }
 0x916   : > { %v5692_v35 = vmul.f32 %v5690_v23, %v5681_v55  ;;  %v5711_v60 = vrot.slane %v5708_v6, 4 }
 0x918   : > { %v5693_v4 = vadd.f32 %v5692_v35, %v5667_v33  ;;  %v6036_v35 = vrot.slane %v6034_v48, 4 }
 0x919   : > { %v5710_v51 = vpop.permute.xlu1 %5709  ;;  %v10755_v28 = vpop.permute.xlu0 %5956 }
 0x91a   : > { %v5712_v39 = vrot.slane %v5710_v51, 4 }
 0x91c   : > { %v5713_v1 = vsel %vm3328_vm0, %v5711_v60, %v5712_v39 }
 0x91d   : > { %v5714_v10 = vsel %vm11494_vm3, %v5708_v6, %v5713_v1  ;;  %v5732_v27 = vpop.permute.xlu1 %5731  ;;  %v10759_v31 = vpop.permute.xlu0 %5757 }
 0x91e   : > { %v5716_v49 = vmul.f32 %v5714_v10, %v5706_v44  ;;  %v5735_v17 = vrot.slane %v5732_v27, 4  ;;  %v6061_v10 = vrot.slane %v6059_v13, 4  ;;  %v5760_v11 = vrot.slane %v10759_v31, 4 }
 0x920   : > { %v5717_v56 = vadd.f32 %v5716_v49, %v5693_v4 }
 0x921   : > { %v5734_v32 = vpop.permute.xlu1 %5733  ;;  %v5921_v39 = vpop.permute.xlu0 %5920 }
 0x922   : > { %v5736_v38 = vrot.slane %v5734_v32, 4  ;;  %v5923_v48 = vrot.slane %v5921_v39, 4 }
 0x924   : > { %v5737_v19 = vsel %vm3328_vm0, %v5735_v17, %v5736_v38 }
 0x925   : > { %v5738_v15 = vsel %vm5689_vm13, %v5732_v27, %v5737_v19  ;;  %v5835_v50 = vpop.permute.xlu1 %5834 }
 0x926   : > { %v5740_v2 = vmul.f32 %v5738_v15, %v5730_v43  ;;  %v5843_v42 = vrot.slane %v5835_v50, %v9833_v20  ;;  %v6084_v15 = vpop.permute.xlu0 %6083 }
 0x928   : > { %v10741_v37 = vadd.f32 %v5740_v2, %v5717_v56 }
 0x92a   : > { %v5860_v22 = vpop.permute.xlu1 %5859  ;;  %v10774_v2 = vpop.permute.xlu0 %6143 }
 0x92b   : > { %v5868_v63 = vrot.slane %v5860_v22, %v9833_v20 }
 0x92f   : > { %v6022_v45 = vpop.permute.xlu1 %6021 }
 0x930   : > { %v6030_v62 = vrot.slane %v6022_v45, %v9833_v20 }
 0x934   : > { %v6047_v52 = vpop.permute.xlu1 %6046 }
 0x935   : > { %v6055_v56 = vrot.slane %v6047_v52, %v9833_v20  ;;  %v5754_v52 = vrot.slane %v10727_v0, %v9833_v20  ;;  %v6086_v0 = vrot.slane %v6084_v15, 4  ;;  %v5812_v15 = vld [vmem:[#allocation7 + $0x31] ss:$8 sm:$0x3] }
 0x939   : > { %v10745_v18 = vpop.permute.xlu1 %6071 }
 0x93d   : > { %v5845_v9 = vpop.permute.xlu1 %5844 }
 0x93e   : > { %v5848_v54 = vrot.slane %v5845_v9, 4 }
 0x940   : > { %v5850_v46 = vsel %vm3328_vm0, %v5848_v54, %v5849_v7  ;;  %v5943_v54 = vpop.permute.xlu0 %5942 }
 0x941   : > { %v5852_v3 = vsel %vm5851_vm7, %v5845_v9, %v5850_v46  ;;  %v5870_v61 = vpop.permute.xlu1 %5869 }
 0x942   : > { %v5854_v59 = vmul.f32 %v5852_v3, %v5843_v42  ;;  %v5873_v47 = vrot.slane %v5870_v61, 4  ;;  %v5917_v3 = vrot.slane %v10736_v29, %v9833_v20 }
 0x944   : > { %v5875_v36 = vsel %vm3328_vm0, %v5873_v47, %v5874_v8 }
 0x945   : > { %v5877_v53 = vsel %vm5876_vm8, %v5870_v61, %v5875_v36  ;;  %v10753_v14 = vpop.permute.xlu1 %5769  ;;  %v6106_v36 = vpop.permute.xlu0 %6105 }
 0x946   : > { %v5879_v16 = vmul.f32 %v5877_v53, %v5868_v63  ;;  %v6080_v53 = vrot.slane %v10745_v18, %v9833_v20  ;;  %v5778_v18 = vrot.slane %v10753_v14, %v9833_v20 }
 0x948   : > { %v5880_v41 = vadd.f32 %v5879_v16, %v5854_v59 }
 0x949   : > { %v10794_v31 = vpop.permute.xlu0 %6167 }
 0x94a   : > { %v10757_v26 = vpop.permute.xlu1 %6095 }
 0x94e   : > { %v5895_v33 = vpop.permute.xlu1 %5894 }
 0x94f   : > { %v5898_v55 = vrot.slane %v5895_v33, 4 }
 0x951   : > { %v5900_v30 = vsel %vm3328_vm0, %v5898_v55, %v5899_v34 }
 0x952   : > { %v5901_v23 = vsel %vm5851_vm7, %v5895_v33, %v5900_v30  ;;  %v6032_v6 = vpop.permute.xlu1 %6031 }
 0x953   : > { %v5903_v4 = vmul.f32 %v5901_v23, %v5893_v12  ;;  %v6035_v51 = vrot.slane %v6032_v6, 4 }
 0x955   : > { %v5904_v44 = vadd.f32 %v5903_v4, %v5880_v41  ;;  %v6037_v60 = vsel %vm3328_vm0, %v6035_v51, %v6036_v35 }
 0x956   : > { %v6057_v1 = vpop.permute.xlu1 %6056  ;;  %v6039_v49 = vsel %vm6038_vm1, %v6032_v6, %v6037_v60  ;;  %v5969_v6 = vpop.permute.xlu0 %5968 }
 0x957   : > { %v6060_v27 = vrot.slane %v6057_v1, 4  ;;  %v6041_v38 = vmul.f32 %v6039_v49, %v6030_v62  ;;  %v6104_v49 = vrot.slane %v10757_v26, %v9833_v20 }
 0x959   : > { %v6062_v32 = vsel %vm3328_vm0, %v6060_v27, %v6061_v10 }
 0x95a   : > { %v6064_v43 = vsel %vm6063_vm15, %v6057_v1, %v6062_v32  ;;  %v10770_v17 = vpop.permute.xlu1 %5793  ;;  %v6109_v1 = vrot.slane %v6106_v36, 4  ;;  %v6132_v10 = vpop.permute.xlu0 %6131 }
 0x95b   : > { %v6066_v19 = vmul.f32 %v6064_v43, %v6055_v56 }
 0x95d   : > { %v6067_v50 = vadd.f32 %v6066_v19, %v6041_v38  ;;  %v5946_v19 = vrot.slane %v5943_v54, 4 }
 0x95f   : > { %v10772_v25 = vpop.permute.xlu1 %6119 }
 0x963   : > { %v5756_v22 = vpop.permute.xlu1 %5755 }
 0x964   : > { %v5759_v45 = vrot.slane %v5756_v22, 4 }
 0x966   : > { %v5761_v57 = vsel %vm3328_vm0, %v5759_v45, %v5760_v11  ;;  %v5802_v45 = vrot.slane %v10770_v17, %v9833_v20  ;;  %v5941_v17 = vrot.slane %v10743_v24, %v9833_v20 }
 0x967   : > { %v5762_v9 = vsel %vm11495_vm2, %v5756_v22, %v5761_v57  ;;  %v5919_v7 = vpop.permute.xlu1 %5918  ;;  %v6154_v22 = vpop.permute.xlu0 %6153 }
 0x968   : > { %v5764_v42 = vmul.f32 %v5762_v9, %v5754_v52  ;;  %v5922_v46 = vrot.slane %v5919_v7, 4 }
 0x96a   : > { %v5765_v61 = vadd.f32 %v5764_v42, %v10741_v37  ;;  %v5924_v8 = vsel %vm3328_vm0, %v5922_v46, %v5923_v48  ;;  %v5817_v48 = vrot.slane %v5812_v15, %v9874_v5 }
 0x96b   : > { %v5925_v59 = vsel %vm5876_vm8, %v5919_v7, %v5924_v8  ;;  %v6082_v47 = vpop.permute.xlu1 %6081 }
 0x96c   : > { %v5927_v13 = vmul.f32 %v5925_v59, %v5917_v3  ;;  %v6085_v63 = vrot.slane %v6082_v47, 4  ;;  %v5821_v3 = vrot.slane %v5812_v15, %v11478_v58 }
 0x96e   : > { %v10788_v16 = vadd.f32 %v5927_v13, %v5904_v44  ;;  %v6087_v41 = vsel %vm3328_vm0, %v6085_v63, %v6086_v0  ;;  %v6178_v0 = vpop.permute.xlu0 %6177 }
 0x96f   : > { %v6088_v29 = vsel %vm6038_vm1, %v6082_v47, %v6087_v41  ;;  %v10792_v33 = vpop.permute.xlu1 %5980  ;;  %v6134_v47 = vrot.slane %v6132_v10, 4  ;;  %v6179_v24 = vrot.slane %v6178_v0, 4 }
 0x970   : > { %v6090_v37 = vmul.f32 %v6088_v29, %v6080_v53  ;;  %v5965_v53 = vrot.slane %v10755_v28, %v9833_v20  ;;  %v6128_v28 = vrot.slane %v10772_v25, %v9833_v20  ;;  %v6152_v25 = vrot.slane %v10774_v2, %v9833_v20 }
 0x972   : > { %v6091_v34 = vadd.f32 %v6090_v37, %v6067_v50  ;;  %v5971_v50 = vrot.slane %v5969_v6, 4 }
 0x973   : > { %v5780_v55 = vpop.permute.xlu1 %5779 }
 0x974   : > { %v5783_v30 = vrot.slane %v5780_v55, 4 }
 0x977   : > { %v5782_v12 = vpop.permute.xlu1 %5781 }
 0x978   : > { %v5784_v23 = vrot.slane %v5782_v12, 4 }
 0x97a   : > { %v5785_v35 = vsel %vm3328_vm0, %v5783_v30, %v5784_v23  ;;  %v5999_v23 = vld [vmem:[#allocation7 + $0x32] ss:$8 sm:$0x3] }
 0x97b   : > { %v5786_v4 = vsel %vm5689_vm13, %v5780_v55, %v5785_v35  ;;  %v5945_v51 = vpop.permute.xlu1 %5944  ;;  %v5989_v35 = vrot.slane %v10792_v33, %v9833_v20  ;;  %v6008_v33 = vrot.slane %v5999_v23, %v11478_v58 }
 0x97c   : > { %v5788_v44 = vmul.f32 %v5786_v4, %v5778_v18  ;;  %v5947_v14 = vrot.slane %v5945_v51, 4  ;;  %v6157_v51 = vrot.slane %v6154_v22, 4 }
 0x97e   : > { %v5789_v60 = vadd.f32 %v5788_v44, %v5765_v61  ;;  %v5948_v7 = vsel %vm3328_vm0, %v5946_v19, %v5947_v14  ;;  %v6180_v44 = vsel %vm3328_vm0, %v6179_v24, %v6134_v47 }
 0x97f   : > { %v6108_v39 = vpop.permute.xlu1 %6107 }
 0x980   : > { %v6110_v27 = vrot.slane %v6108_v39, 4 }
 0x982   : > { %v6111_v62 = vsel %vm3328_vm0, %v6109_v1, %v6110_v27 }
 0x983   : > { %v6112_v56 = vsel %vm6063_vm15, %v6106_v36, %v6111_v62  ;;  %v5804_v32 = vpop.permute.xlu1 %5803 }
 0x984   : > { %v6114_v43 = vmul.f32 %v6112_v56, %v6104_v49  ;;  %v5805_v38 = vrot.slane %v5804_v32, 4  ;;  %v6186_v56 = vld [vmem:[#allocation7 + $0x33] ss:$8 sm:$0x3] }
 0x986   : > { %v5806_v52 = vsel %vm3328_vm0, %v5805_v38, %v5760_v11  ;;  %v6115_v57 = vadd.f32 %v6114_v43, %v6091_v34  ;;  %v5949_v11 = vsel %vm5851_vm7, %v5943_v54, %v5948_v7 }
 0x987   : > { %v5807_v26 = vsel %vm11496_vm9, %v5804_v32, %v5806_v52  ;;  %v5967_v9 = vpop.permute.xlu1 %5966  ;;  %v5951_v29 = vmul.f32 %v5949_v11, %v5941_v17 }
 0x988   : > { %v5809_v42 = vmul.f32 %v5807_v26, %v5802_v45  ;;  %v5970_v46 = vrot.slane %v5967_v9, 4  ;;  %v6191_v45 = vrot.slane %v6186_v56, %v9874_v5 }
 0x989   : > { %v5952_v4 = vadd.f32 %v5951_v29, %v10788_v16  ;;  %v6176_v16 = vrot.slane %v10794_v31, %v9833_v20  ;;  %v6245_v29 = vld [vmem:[#allocation12 + $0x8] sm:$0xff] }
 0x98a   : > { %v5810_v61 = vadd.f32 %v5809_v42, %v5789_v60  ;;  %v5972_v8 = vsel %vm3328_vm0, %v5970_v46, %v5971_v50 }
 0x98b   : > { %v6130_v59 = vpop.permute.xlu1 %6129  ;;  %v5973_v41 = vsel %vm5876_vm8, %v5967_v9, %v5972_v8  ;;  %v6195_v9 = vrot.slane %v6186_v56, %v11478_v58 }
 0x98c   : > { %v5825_v13 = vcombine.high %v5810_v61, %v5810_v61  ;;  %v5827_v63 = vmul.f32 %v5817_v48, %v5810_v61  ;;  %v6133_v36 = vrot.slane %v6130_v59, 4  ;;  %v5975_v30 = vmul.f32 %v5973_v41, %v5965_v53 }
 0x98d   : > { %v6214_v61 = vstv %s6424_s17 }
 0x98e   : > { %v5828_v37 = vmul.f32 %v5825_v13, %v5821_v3  ;;  %v5829_v34 = vadd.f32 %v5827_v63, %v10714_v21  ;;  %v6135_v55 = vsel %vm3328_vm0, %v6133_v36, %v6134_v47  ;;  %v5976_v1 = vadd.f32 %v5975_v30, %v5952_v4 }
 0x98f   : > { %v5991_v12 = vpop.permute.xlu1 %5990  ;;  %v6136_v18 = vsel %vm6038_vm1, %v6130_v59, %v6135_v55 }
 0x990   : > { %v5830_v54 = vadd.f32 %v5828_v37, %v10722_v40  ;;  %v5992_v6 = vrot.slane %v5991_v12, 4  ;;  %v6004_v40 = vrot.slane %v5999_v23, %v9874_v5  ;;  %v6138_v10 = vmul.f32 %v6136_v18, %v6128_v28  ;;  %v7108_v23 = vld [vmem:[#allocation12] sm:$0xff] }
 0x991   : > { %v11497_v18 = vld [vmem:[#allocation151_spill] sm:$0xff] }
 0x992   : > { %v5993_v21 = vsel %vm3328_vm0, %v5992_v6, %v5947_v14  ;;  %v6181_v14 = vsel %vm6038_vm1, %v6178_v0, %v6180_v44  ;;  %v6139_v38 = vadd.f32 %v6138_v10, %v6115_v57 }
 0x993   : > { %v5994_v60 = vsel %vm5851_vm7, %v5991_v12, %v5993_v21  ;;  %v6156_v39 = vpop.permute.xlu1 %6155  ;;  %v6183_v2 = vmul.f32 %v6181_v14, %v6176_v16 }
 0x994   : > { %v5996_v27 = vmul.f32 %v5994_v60, %v5989_v35  ;;  %v6158_v49 = vrot.slane %v6156_v39, 4 }
 0x996   : > { %v5997_v62 = vadd.f32 %v5996_v27, %v5976_v1  ;;  %v6159_v32 = vsel %vm3328_vm0, %v6157_v51, %v6158_v49 }
 0x997   : > { %v6160_v43 = vsel %vm6063_vm15, %v6154_v22, %v6159_v32 }
 0x998   : > { %v6012_v19 = vcombine.high %v5997_v62, %v5997_v62  ;;  %v6014_v15 = vmul.f32 %v6004_v40, %v5997_v62  ;;  %v6162_v50 = vmul.f32 %v6160_v43, %v6152_v25 }
 0x99a   : > { %v6015_v52 = vmul.f32 %v6012_v19, %v6008_v33  ;;  %v6016_v26 = vadd.f32 %v6014_v15, %v5829_v34  ;;  %v6163_v20 = vadd.f32 %v6162_v50, %v6139_v38  ;;  %v6255_v34 = vcombine.high %v6245_v29, %v6245_v29 }
 0x99c   : > { %v6017_v31 = vadd.f32 %v6015_v52, %v5830_v54  ;;  %v6184_v7 = vadd.f32 %v6183_v2, %v6163_v20 }
 0x99e   : > { %v6199_v48 = vcombine.high %v6184_v7, %v6184_v7  ;;  %v6201_v42 = vmul.f32 %v6191_v45, %v6184_v7 }
 0x9a0   : > { %v6202_v46 = vmul.f32 %v6199_v48, %v6195_v9  ;;  %v6203_v3 = vadd.f32 %v6201_v42, %v6016_v26 }
 0x9a2   : > { %v6204_v22 = vadd.f32 %v6202_v46, %v6017_v31  ;;  %v6208_v57 = vrot.slane %v6203_v3, 2 }
 0x9a4   : > { %v6209_v8 = vrot.slane %v6204_v22, 2  ;;  %v6212_v17 = vadd.f32 %v6208_v57, %v6203_v3 }
 0x9a6   : > { %v6213_v11 = vadd.f32 %v6209_v8, %v6204_v22  ;;  %v6215_v59 = vadd.f32 %v6214_v61, %v6212_v17 }
 0x9a8   : > { %v6216_v47 = vadd.f32 %v6214_v61, %v6213_v11  ;;  %v6425_v0 = vmul.f32 -1.442695, %v6215_v59 }
 0x9aa   : > { %7099 = vpow2.f32 %v6425_v0  ;;  %v6426_v13 = vmul.f32 -1.442695, %v6216_v47 }
 0x9ac   : > { %7101 = vpow2.f32 %v6426_v13 }
 0x9b4   : > { %v7100_v63 = vpop.eup %7099 }
 0x9b5   : > { %v6223_v36 = vadd.f32 1.0, %v7100_v63 }
 0x9b6   : > { %v7102_v53 = vpop.eup %7101 }
 0x9b7   : > { %v6224_v41 = vadd.f32 1.0, %v7102_v53  ;;  %7103 = vrcp.f32 %v6223_v36 }
 0x9b9   : > { %7105 = vrcp.f32 %v6224_v41 }
 0x9c1   : > { %v7104_v37 = vpop.eup %7103 }
 0x9c2   : > { %v6232_v55 = vrot.slane %v7104_v37, %v9874_v5  ;;  %v6249_v24 = vrot.slane %v7104_v37, %v11478_v58 }
 0x9c3   : > { %v7106_v12 = vpop.eup %7105 }
 0x9c4   : > { %v6236_v54 = vrot.slane %v7106_v12, %v9874_v5  ;;  %v6253_v30 = vrot.slane %v7106_v12, %v11478_v58  ;;  %v6237_v6 = vmul.f32 %v7108_v23, %v6232_v55  ;;  %v6257_v35 = vmul.f32 %v6249_v24, %v6245_v29 }
 0x9c6   : > { %v6238_v28 = vmul.f32 %v6236_v54, %v11497_v18  ;;  %v6258_v4 = vmul.f32 %v6255_v34, %v6253_v30 }
 0x9c8   : > { %v6241_v21 = vcombine.low %v6237_v6, %v6238_v28  ;;  %v6261_v51 = vcombine.low %v6257_v35, %v6258_v4 }
 0x9ca   : > { %6427 = vst [vmem:[%s7920_s29 + $0x10] sm:$0xff] %v6241_v21  ;;  %6428 = vst [vmem:[%s7920_s29 + $0x18] sm:$0xff] %v6261_v51 }
 0x9cb PF: > { %s6436_s2 = sshll.u32 %s7739_s28, 9  ;;  %s6280_s12 = sshll.u32 %s7920_s29, 4  ;;  %s10855_s12 = int_to_ptr.vmem [resolvable:$true] %s6280_s12 }
 0x9cc   : > { %s10852_s9 = scalar_lea.hbm %s10907_s7, %s6436_s2  ;;  %s10859_s15 = scalar_lea.sflag [#allocation4], %s339_s13 }
 0x9cd   : > { %s7264_s26 = scalar_lea.vmem %s10855_s12, 512  ;;  %p11498_p0 = scmp.ne.s32.totalorder %s11041_s11, 0 }
 0x9ce   : > { %p7265_p11 = scmp.ne.s32.totalorder %s10855_s12, %s7264_s26  ;;  %s7675_s28 = smov [#allocation13]  }
 0x9cf   : > { %s7268_s14 = sshll.u32 %s7675_s28, 4  ;;  %s7269_s14 = int_to_ptr.vmem [resolvable:$false] %s7268_s14 }
 0x9d0   : > { %p7266_p2 = pnand %p7265_p11, %p11498_p0  ;;  %s7270_s21 = scalar_lea.vmem %s7269_s14, 1024 }
 0x9d1   : > { %p7271_p1 = scmp.lt.s32.totalorder %s10855_s12, %s7269_s14  ;;  %p7272_p4 = scmp.lt.s32.totalorder %s7270_s21, %s7264_s26 }
 0x9d2   : > { %p7267_p3 = pneg %p7266_p2 }
 0x9d3   : > { %p7273_p7 = por %p7272_p4, %p7271_p1 }
 0x9d5   : > { %p7274_p8 = pnand %p7273_p7, %p7267_p3 }
 0x9d7   : > { %7277 = shalt.err (!%p7274_p8)
}
 0x9d8   : > { %s7278_s13 = scalar_lea.hbm %s10852_s9, 512  ;;  %s7282_s8 = scalar_lea.hbm %s10907_s7, 1024 }
 0x9d9   : > { %p7279_p12 = scmp.ne.s32.totalorder %s10852_s9, %s7278_s13  ;;  %p7283_p6 = scmp.lt.u32.totalorder %s10852_s9, %s10907_s7 }
 0x9da   : > { %p7284_p9 = scmp.lt.u32.totalorder %s7282_s8, %s7278_s13  ;;  %p7286_p11 = scmp.lt.u32.totalorder %s7278_s13, %s10852_s9 }
 0x9db   : > { %p7280_p13 = pnand %p7279_p12, %p11498_p0 }
 0x9dc   : > { %p7285_p10 = por %p7284_p9, %p7283_p6 }
 0x9dd   : > { %p7281_p5 = pneg %p7280_p13 }
 0x9de   : > { %p7287_p2 = por %p7286_p11, %p7285_p10 }
 0x9e0   : > { %p7288_p3 = pnand %p7287_p2, %p7281_p5 }
 0x9e2   : > { %7291 = shalt.err (!%p7288_p3)
}
 0x9e3   : > { %s7676_s30 = smov 128   ;;  %s7677_s16 = smov 8  }
 0x9e4   : > { %6461 = dma.vmem_to_hbm [thread:$0]  (%p11498_p0), %s10855_s12, 512, %s10852_s9, %s10859_s15, %s7676_s30, %s7676_s30, %s7677_s16  }
 0x9e5 PF: > { %s11499_s22 = sld [smem:[#allocation22_spill]]  ;;  %p6498_p1 = scmp.ge.s32.totalorder %s7342_s27, 2 }
 0x9e6   : > { %s6295_s17 = sand.u32 1, %s7330_s24  }
 0x9e7   : > { %s6296_s2 = scalar_lea.sflag [#allocation4], %s6295_s17 }
 0x9eb   : > { %p11500_p4 = scmp.ne.s32.totalorder %s11499_s22, 0 }
 0x9ed   : > { %p6483_p7 = pnand %p6498_p1, %p11500_p4 }
 0x9ef   : > { %7325 = dma.done.wait (!%p6483_p7), %s6296_s2, 512  }
 0x9f0   : > { %7327 = vsyncadd (!%p6483_p7), %s6296_s2, 4294966784  ;;  %s11501_s27 = sld [smem:[#allocation20_spill]]  ;;  %s11502_s20 = sld [smem:[#allocation19_spill]] }
 0x9f1   : > { %s11503_s26 = sld [smem:[#allocation21_spill]]  ;;  %s11504_s24 = smov %s7334_s25 }
 0x9f6   : > { %p21_p8 = scmp.ge.s32.totalorder %s11501_s27, 4   ;;  %s11505_s25 = smov %s11502_s20 }
 0x9f8   :  { %23 = sbr.rel (!%p21_p8) target bundleno = 9 (0x9), region = 151 }
 0x9ff   :  { %6301 = vsyncpa [#allocation3], 1 }
 0xa00   :  { %6303 = vsyncpa [#allocation3 + $0x1], 1 }
 0xa01   :  { %6304 = vsyncpa [#allocation8], 1 }
 0xa02   :  { %6305 = vsyncpa [#allocation11], 1 }
 0xa03   :  { %6306 = vsyncpa [#allocation4], 1 }
 0xa04   :  { %6308 = vsyncpa [#allocation4 + $0x1], 1 }
 0xa05   :  { %6309 = vsyncpa [#allocation5], 1 }
 0xa06   :  { %6311 = vsyncpa [#allocation5 + $0x1], 1 }

</bundles_post_ra>
